<compile_context>
chip_gen: v7x
topology: tpu7x:2x2x1
jax: 0.10.0
libtpu: 0.0.40
codegen_flags: <defaults>
</compile_context>

<pallas_src>
import functools

import jax
import jax.numpy as jnp
from jax import lax
from jax.experimental import pallas as pl
from jax.experimental.pallas import tpu as pltpu


LANE = 128  # internal channel padding -> lane-dense vregs / stores


# ----------------------------------------------------------------------------
# Fused Pallas kernel: conv1(im2col dot)+ReLU -> conv2(9 tap dots)+ReLU -> pool
# ----------------------------------------------------------------------------
def _fused_backbone_kernel(p_ref, w1_ref, b1_ref, w2_ref, b2_ref, o_ref,
                           pad2_ref, *, H, W):
    """Processes Bt images per grid step.

    p_ref   : (Bt, H*W, 9*Cin)    bf16  conv1 im2col patches
    w1_ref  : (9*Cin, Fp)         bf16  conv1 im2col weight
    b1_ref  : (1, Fp)             f32
    w2_ref  : (9, Fp, Fp)         bf16  conv2 taps (tap index = kh*3 + kw)
    b2_ref  : (1, Fp)             f32
    o_ref   : (Bt, Fp)            f32   pooled features (lane-dense store)
    pad2_ref: (Bt, H+2, W+2, Fp)  bf16  zero-halo conv1 activation scratch
    """
    Bt, HW, K1 = p_ref.shape
    Fp = o_ref.shape[-1]

    # ---- refresh only the 1-pixel halo ring (interior is overwritten below) --
    pad2_ref[:, 0:1, :, :] = jnp.zeros((Bt, 1, W + 2, Fp), jnp.bfloat16)
    pad2_ref[:, H + 1:H + 2, :, :] = jnp.zeros((Bt, 1, W + 2, Fp), jnp.bfloat16)
    pad2_ref[:, :, 0:1, :] = jnp.zeros((Bt, H + 2, 1, Fp), jnp.bfloat16)
    pad2_ref[:, :, W + 1:W + 2, :] = jnp.zeros((Bt, H + 2, 1, Fp), jnp.bfloat16)

    # ---- conv1: single im2col matmul, bias + ReLU in f32, store bf16 ---------
    acc1 = jnp.dot(p_ref[...].reshape(Bt * HW, K1), w1_ref[...],
                   preferred_element_type=jnp.float32)          # (Bt*HW, Fp)
    h1 = jnp.maximum(acc1 + b1_ref[...], 0.0).astype(jnp.bfloat16)
    pad2_ref[:, 1:H + 1, 1:W + 1, :] = h1.reshape(Bt, H, W, Fp)

    # ---- conv2: 9 accumulating K=Fp bf16 MXU dots on the tap slices ----------
    acc2 = jnp.zeros((Bt * HW, Fp), jnp.float32)
    for kh in range(3):                       # static unroll: 9 MXU pushes
        for kw in range(3):
            tap = pad2_ref[:, kh:kh + H, kw:kw + W, :].reshape(Bt * HW, Fp)
            acc2 = acc2 + jnp.dot(tap, w2_ref[kh * 3 + kw],
                                  preferred_element_type=jnp.float32)
    h2 = jnp.maximum(acc2 + b2_ref[...], 0.0)                   # (Bt*HW, Fp)

    # ---- global average pool over spatial positions --------------------------
    pooled = jnp.sum(h2.reshape(Bt, HW, Fp), axis=1) * (1.0 / HW)   # (Bt, Fp)
    o_ref[...] = pooled.astype(o_ref.dtype)


# ----------------------------------------------------------------------------
# pallas_call wrapper
# ----------------------------------------------------------------------------
def fused_backbone(patches, w1, b1, w2, b2, *, H, W, Bt):
    """patches: (B, H*W, 9*Cin) bf16 (B must be a multiple of Bt)."""
    B, HW, K1 = patches.shape
    Fp = w1.shape[-1]
    assert B % Bt == 0

    kernel = functools.partial(_fused_backbone_kernel, H=H, W=W)
    out = pl.pallas_call(
        kernel,
        out_shape=jax.ShapeDtypeStruct((B, Fp), jnp.float32),
        grid_spec=pltpu.PrefetchScalarGridSpec(
            num_scalar_prefetch=0,
            grid=(B // Bt,),
            in_specs=[
                pl.BlockSpec((Bt, HW, K1), lambda b: (b, 0, 0)),
                pl.BlockSpec((K1, Fp), lambda b: (0, 0)),
                pl.BlockSpec((1, Fp), lambda b: (0, 0)),
                pl.BlockSpec((9, Fp, Fp), lambda b: (0, 0, 0)),
                pl.BlockSpec((1, Fp), lambda b: (0, 0)),
            ],
            out_specs=pl.BlockSpec((Bt, Fp), lambda b: (b, 0)),
            scratch_shapes=[
                pltpu.VMEM((Bt, H + 2, W + 2, Fp), jnp.bfloat16),  # conv1 act
            ],
        ),
        compiler_params=pltpu.CompilerParams(
            dimension_semantics=("parallel",)),
    )(patches, w1, b1, w2, b2)
    return out                                                   # (B, Fp)


def _im2col_3x3(x_nhwc):
    """(B,H,W,C) -> (B, H*W, 9*C) 'same'-padded 3x3 patches (tap = kh*3+kw)."""
    B, H, W, C = x_nhwc.shape
    xp = jnp.pad(x_nhwc, ((0, 0), (1, 1), (1, 1), (0, 0)))
    taps = [xp[:, kh:kh + H, kw:kw + W, :] for kh in range(3) for kw in range(3)]
    return jnp.concatenate(taps, axis=-1).reshape(B, H * W, 9 * C)


# ----------------------------------------------------------------------------
# BackboneAdapter
# ----------------------------------------------------------------------------
class BackboneAdapterPallas:
    """Deterministic synthetic backbone; fc / classifier head == Identity."""

    def __init__(self, input_dim, input_ch, feat_ch=32, seed=0):
        del input_dim                          # fully convolutional
        assert feat_ch <= LANE
        self.input_ch = input_ch
        self.feat_ch = feat_ch
        k1, k2, k3, k4 = jax.random.split(jax.random.PRNGKey(seed), 4)
        # f32 master weights (Kaiming-style scale) -- also used by the reference.
        self.w1 = jax.random.normal(k1, (9, input_ch, feat_ch), jnp.float32) \
            * (2.0 / (9 * input_ch)) ** 0.5
        self.b1 = 0.1 * jax.random.normal(k2, (feat_ch,), jnp.float32)
        self.w2 = jax.random.normal(k3, (9, feat_ch, feat_ch), jnp.float32) \
            * (2.0 / (9 * feat_ch)) ** 0.5
        self.b2 = 0.1 * jax.random.normal(k4, (feat_ch,), jnp.float32)
        # self.model.fc / self.model.classifier == nn.Identity() -> no params.

        # Kernel-side params: bf16 MXU operands, channels zero-padded to 128
        # lanes.  conv1 weight is in im2col layout (9*Cin, Fp); conv2 weight
        # stays per-tap (9, Fp, Fp).  Zero bias padding keeps padded output
        # lanes exactly 0 (ReLU(0+0)=0) -- required invariant.
        Fp = LANE
        w1_pad = jnp.zeros((9, input_ch, Fp), jnp.bfloat16) \
            .at[:, :, :feat_ch].set(self.w1.astype(jnp.bfloat16))
        self.w1_k = w1_pad.reshape(9 * input_ch, Fp)
        self.b1_k = jnp.zeros((1, Fp), jnp.float32).at[0, :feat_ch].set(self.b1)
        self.w2_k = jnp.zeros((9, Fp, Fp), jnp.bfloat16) \
            .at[:, :feat_ch, :feat_ch].set(self.w2.astype(jnp.bfloat16))
        self.b2_k = jnp.zeros((1, Fp), jnp.float32).at[0, :feat_ch].set(self.b2)

    def __call__(self, x_nchw):
        # NCHW -> NHWC + bf16 cast + conv1 im2col (tiny XLA ops; ~18 KB/image
        # of extra HBM, pipelined by the input BlockSpec).
        x = jnp.transpose(x_nchw, (0, 2, 3, 1)).astype(jnp.bfloat16)
        B, H, W, _ = x.shape
        patches = _im2col_3x3(x)                                 # (B, H*W, 9*Cin)

        Bt = min(B, 8)                         # images per grid step
        B_pad = -(-B // Bt) * Bt
        if B_pad != B:
            patches = jnp.pad(patches, ((0, B_pad - B), (0, 0), (0, 0)))

        feats_padded = fused_backbone(patches, self.w1_k, self.b1_k,
                                      self.w2_k, self.b2_k,
                                      H=H, W=W, Bt=Bt)           # (B_pad, 128)
        return feats_padded[:B, :self.feat_ch]                   # fc = Identity


# ----------------------------------------------------------------------------
# Pure-JAX reference (mirrors the kernel's bf16 rounding points)
# ----------------------------------------------------------------------------
def _reference_forward(x_nchw, adapter):
    x = jnp.transpose(x_nchw, (0, 2, 3, 1)).astype(jnp.bfloat16)

    def conv(h, w9, b):
        cin, cout = w9.shape[1], w9.shape[2]
        w = w9.astype(jnp.bfloat16).reshape(3, 3, cin, cout)     # HWIO
        y = lax.conv_general_dilated(
            h, w, window_strides=(1, 1), padding="SAME",
            dimension_numbers=("NHWC", "HWIO", "NHWC"),
            preferred_element_type=jnp.float32)
        return jnp.maximum(y + b.reshape(1, 1, 1, cout), 0.0)

    h1 = conv(x, adapter.w1, adapter.b1)
    h2 = conv(h1.astype(jnp.bfloat16), adapter.w2, adapter.b2)
    return jnp.mean(h2, axis=(1, 2))


if __name__ == "__main__":
    B, Cin, H, W = 2, 4, 16, 16
    x = jax.random.normal(jax.random.PRNGKey(0), (B, Cin, H, W), jnp.float32)

    adapter = BackboneAdapterPallas(input_dim=H, input_ch=Cin, feat_ch=32)

    feats = jax.block_until_ready(adapter(x))
    ref = _reference_forward(x, adapter)

    assert feats.shape == (B, 32), feats.shape
    err = jnp.max(jnp.abs(feats - ref))
    assert jnp.allclose(feats, ref, atol=2e-2, rtol=2e-2), f"max abs err = {err}"

    print("KERNEL_OK")
</pallas_src>

<mosaic_0001>
module attributes {stable_mosaic.version = 11 : i64} {
  func.func @_fused_backbone_kernel(%arg0: i32, %arg1: memref<2x256x36xbf16, #tpu.memory_space<vmem>>, %arg2: memref<36x128xbf16, #tpu.memory_space<vmem>>, %arg3: memref<1x128xf32, #tpu.memory_space<vmem>>, %arg4: memref<9x128x128xbf16, #tpu.memory_space<vmem>>, %arg5: memref<1x128xf32, #tpu.memory_space<vmem>>, %arg6: memref<2x128xf32, #tpu.memory_space<vmem>>, %arg7: memref<2x18x18x128xbf16, #tpu.memory_space<vmem>>) attributes {dimension_semantics = [#tpu.dimension_semantics<parallel>], iteration_bounds = array<i64: 1>, scalar_prefetch = 0 : i64, scratch_operands = 1 : i64, tpu.core_type = #tpu.core_type<tc>, window_params = [{transform_indices = @transform_0, window_bounds = array<i64: 2, 256, 36>}, {pipeline_mode = #tpu.pipeline_mode<synchronous>, transform_indices = @transform_1, window_bounds = array<i64: 36, 128>}, {pipeline_mode = #tpu.pipeline_mode<synchronous>, transform_indices = @transform_2, window_bounds = array<i64: 1, 128>}, {pipeline_mode = #tpu.pipeline_mode<synchronous>, transform_indices = @transform_3, window_bounds = array<i64: 9, 128, 128>}, {pipeline_mode = #tpu.pipeline_mode<synchronous>, transform_indices = @transform_4, window_bounds = array<i64: 1, 128>}, {transform_indices = @transform_5, window_bounds = array<i64: 2, 128>}]} {
    %cst = arith.constant 0.000000e+00 : bf16
    %0 = vector.broadcast %cst : bf16 to vector<2x1x18x128xbf16>
    %c0 = arith.constant 0 : index
    %c0_0 = arith.constant 0 : index
    %c0_1 = arith.constant 0 : index
    %c0_2 = arith.constant 0 : index
    %1 = vector.load %arg7[%c0, %c0_0, %c0_1, %c0_2] : memref<2x18x18x128xbf16, #tpu.memory_space<vmem>>, vector<2x1x18x128xbf16>
    tpu.vector_store %arg7[%c0, %c0_0, %c0_1, %c0_2], %0 {strides = array<i32>} : memref<2x18x18x128xbf16, #tpu.memory_space<vmem>>, vector<2x1x18x128xbf16>,
    %cst_3 = arith.constant 0.000000e+00 : bf16
    %2 = vector.broadcast %cst_3 : bf16 to vector<2x1x18x128xbf16>
    %c0_4 = arith.constant 0 : index
    %c17 = arith.constant 17 : index
    %c0_5 = arith.constant 0 : index
    %c0_6 = arith.constant 0 : index
    %3 = vector.load %arg7[%c0_4, %c17, %c0_5, %c0_6] : memref<2x18x18x128xbf16, #tpu.memory_space<vmem>>, vector<2x1x18x128xbf16>
    tpu.vector_store %arg7[%c0_4, %c17, %c0_5, %c0_6], %2 {strides = array<i32>} : memref<2x18x18x128xbf16, #tpu.memory_space<vmem>>, vector<2x1x18x128xbf16>,
    %cst_7 = arith.constant 0.000000e+00 : bf16
    %4 = vector.broadcast %cst_7 : bf16 to vector<2x18x1x128xbf16>
    %c0_8 = arith.constant 0 : index
    %c0_9 = arith.constant 0 : index
    %c0_10 = arith.constant 0 : index
    %c0_11 = arith.constant 0 : index
    %5 = vector.load %arg7[%c0_8, %c0_9, %c0_10, %c0_11] : memref<2x18x18x128xbf16, #tpu.memory_space<vmem>>, vector<2x18x1x128xbf16>
    tpu.vector_store %arg7[%c0_8, %c0_9, %c0_10, %c0_11], %4 {strides = array<i32>} : memref<2x18x18x128xbf16, #tpu.memory_space<vmem>>, vector<2x18x1x128xbf16>,
    %cst_12 = arith.constant 0.000000e+00 : bf16
    %6 = vector.broadcast %cst_12 : bf16 to vector<2x18x1x128xbf16>
    %c0_13 = arith.constant 0 : index
    %c0_14 = arith.constant 0 : index
    %c17_15 = arith.constant 17 : index
    %c0_16 = arith.constant 0 : index
    %7 = vector.load %arg7[%c0_13, %c0_14, %c17_15, %c0_16] : memref<2x18x18x128xbf16, #tpu.memory_space<vmem>>, vector<2x18x1x128xbf16>
    tpu.vector_store %arg7[%c0_13, %c0_14, %c17_15, %c0_16], %6 {strides = array<i32>} : memref<2x18x18x128xbf16, #tpu.memory_space<vmem>>, vector<2x18x1x128xbf16>,
    %c0_17 = arith.constant 0 : index
    %c0_18 = arith.constant 0 : index
    %c0_19 = arith.constant 0 : index
    %8 = vector.load %arg1[%c0_17, %c0_18, %c0_19] : memref<2x256x36xbf16, #tpu.memory_space<vmem>>, vector<2x256x36xbf16>
    %9 = vector.shape_cast %8 : vector<2x256x36xbf16> to vector<512x36xbf16>
    %c0_20 = arith.constant 0 : index
    %c0_21 = arith.constant 0 : index
    %10 = vector.load %arg2[%c0_20, %c0_21] : memref<36x128xbf16, #tpu.memory_space<vmem>>, vector<36x128xbf16>
    %cst_22 = arith.constant dense<0.000000e+00> : vector<512x128xf32>
    %11 = tpu.matmul %9, %10, %cst_22 {dimension_numbers = #tpu.dot_dimension_numbers<[1], [0], [0], [1], [0, 0, 1, 1], [], []>} : vector<512x36xbf16>, vector<36x128xbf16>, vector<512x128xf32> -> vector<512x128xf32>
    %c0_23 = arith.constant 0 : index
    %c0_24 = arith.constant 0 : index
    %12 = vector.load %arg3[%c0_23, %c0_24] : memref<1x128xf32, #tpu.memory_space<vmem>>, vector<1x128xf32>
    %13 = vector.broadcast %12 : vector<1x128xf32> to vector<512x128xf32>
    %14 = arith.addf %11, %13 : vector<512x128xf32>
    %cst_25 = arith.constant 0.000000e+00 : f32
    %15 = vector.broadcast %cst_25 : f32 to vector<512x128xf32>
    %16 = arith.maximumf %14, %15 : vector<512x128xf32>
    %17 = arith.truncf %16 : vector<512x128xf32> to vector<512x128xbf16>
    %18 = vector.shape_cast %17 : vector<512x128xbf16> to vector<2x16x16x128xbf16>
    %c0_26 = arith.constant 0 : index
    %c1 = arith.constant 1 : index
    %c1_27 = arith.constant 1 : index
    %c0_28 = arith.constant 0 : index
    %19 = vector.load %arg7[%c0_26, %c1, %c1_27, %c0_28] : memref<2x18x18x128xbf16, #tpu.memory_space<vmem>>, vector<2x16x16x128xbf16>
    tpu.vector_store %arg7[%c0_26, %c1, %c1_27, %c0_28], %18 {strides = array<i32>} : memref<2x18x18x128xbf16, #tpu.memory_space<vmem>>, vector<2x16x16x128xbf16>,
    %cst_29 = arith.constant 0.000000e+00 : f32
    %20 = vector.broadcast %cst_29 : f32 to vector<512x128xf32>
    %c0_30 = arith.constant 0 : index
    %c0_31 = arith.constant 0 : index
    %c0_32 = arith.constant 0 : index
    %c0_33 = arith.constant 0 : index
    %21 = vector.load %arg7[%c0_30, %c0_31, %c0_32, %c0_33] : memref<2x18x18x128xbf16, #tpu.memory_space<vmem>>, vector<2x16x16x128xbf16>
    %22 = vector.shape_cast %21 : vector<2x16x16x128xbf16> to vector<512x128xbf16>
    %c0_34 = arith.constant 0 : index
    %c0_35 = arith.constant 0 : index
    %c0_36 = arith.constant 0 : index
    %23 = vector.load %arg4[%c0_34, %c0_35, %c0_36] : memref<9x128x128xbf16, #tpu.memory_space<vmem>>, vector<1x128x128xbf16>
    %24 = vector.shape_cast %23 : vector<1x128x128xbf16> to vector<128x128xbf16>
    %cst_37 = arith.constant dense<0.000000e+00> : vector<512x128xf32>
    %25 = tpu.matmul %22, %24, %cst_37 {dimension_numbers = #tpu.dot_dimension_numbers<[1], [0], [0], [1], [0, 0, 1, 1], [], []>} : vector<512x128xbf16>, vector<128x128xbf16>, vector<512x128xf32> -> vector<512x128xf32>
    %26 = arith.addf %20, %25 : vector<512x128xf32>
    %c0_38 = arith.constant 0 : index
    %c0_39 = arith.constant 0 : index
    %c1_40 = arith.constant 1 : index
    %c0_41 = arith.constant 0 : index
    %27 = vector.load %arg7[%c0_38, %c0_39, %c1_40, %c0_41] : memref<2x18x18x128xbf16, #tpu.memory_space<vmem>>, vector<2x16x16x128xbf16>
    %28 = vector.shape_cast %27 : vector<2x16x16x128xbf16> to vector<512x128xbf16>
    %c1_42 = arith.constant 1 : index
    %c0_43 = arith.constant 0 : index
    %c0_44 = arith.constant 0 : index
    %29 = vector.load %arg4[%c1_42, %c0_43, %c0_44] : memref<9x128x128xbf16, #tpu.memory_space<vmem>>, vector<1x128x128xbf16>
    %30 = vector.shape_cast %29 : vector<1x128x128xbf16> to vector<128x128xbf16>
    %cst_45 = arith.constant dense<0.000000e+00> : vector<512x128xf32>
    %31 = tpu.matmul %28, %30, %cst_45 {dimension_numbers = #tpu.dot_dimension_numbers<[1], [0], [0], [1], [0, 0, 1, 1], [], []>} : vector<512x128xbf16>, vector<128x128xbf16>, vector<512x128xf32> -> vector<512x128xf32>
    %32 = arith.addf %26, %31 : vector<512x128xf32>
    %c0_46 = arith.constant 0 : index
    %c0_47 = arith.constant 0 : index
    %c2 = arith.constant 2 : index
    %c0_48 = arith.constant 0 : index
    %33 = vector.load %arg7[%c0_46, %c0_47, %c2, %c0_48] : memref<2x18x18x128xbf16, #tpu.memory_space<vmem>>, vector<2x16x16x128xbf16>
    %34 = vector.shape_cast %33 : vector<2x16x16x128xbf16> to vector<512x128xbf16>
    %c2_49 = arith.constant 2 : index
    %c0_50 = arith.constant 0 : index
    %c0_51 = arith.constant 0 : index
    %35 = vector.load %arg4[%c2_49, %c0_50, %c0_51] : memref<9x128x128xbf16, #tpu.memory_space<vmem>>, vector<1x128x128xbf16>
    %36 = vector.shape_cast %35 : vector<1x128x128xbf16> to vector<128x128xbf16>
    %cst_52 = arith.constant dense<0.000000e+00> : vector<512x128xf32>
    %37 = tpu.matmul %34, %36, %cst_52 {dimension_numbers = #tpu.dot_dimension_numbers<[1], [0], [0], [1], [0, 0, 1, 1], [], []>} : vector<512x128xbf16>, vector<128x128xbf16>, vector<512x128xf32> -> vector<512x128xf32>
    %38 = arith.addf %32, %37 : vector<512x128xf32>
    %c0_53 = arith.constant 0 : index
    %c1_54 = arith.constant 1 : index
    %c0_55 = arith.constant 0 : index
    %c0_56 = arith.constant 0 : index
    %39 = vector.load %arg7[%c0_53, %c1_54, %c0_55, %c0_56] : memref<2x18x18x128xbf16, #tpu.memory_space<vmem>>, vector<2x16x16x128xbf16>
    %40 = vector.shape_cast %39 : vector<2x16x16x128xbf16> to vector<512x128xbf16>
    %c3 = arith.constant 3 : index
    %c0_57 = arith.constant 0 : index
    %c0_58 = arith.constant 0 : index
    %41 = vector.load %arg4[%c3, %c0_57, %c0_58] : memref<9x128x128xbf16, #tpu.memory_space<vmem>>, vector<1x128x128xbf16>
    %42 = vector.shape_cast %41 : vector<1x128x128xbf16> to vector<128x128xbf16>
    %cst_59 = arith.constant dense<0.000000e+00> : vector<512x128xf32>
    %43 = tpu.matmul %40, %42, %cst_59 {dimension_numbers = #tpu.dot_dimension_numbers<[1], [0], [0], [1], [0, 0, 1, 1], [], []>} : vector<512x128xbf16>, vector<128x128xbf16>, vector<512x128xf32> -> vector<512x128xf32>
    %44 = arith.addf %38, %43 : vector<512x128xf32>
    %c0_60 = arith.constant 0 : index
    %c1_61 = arith.constant 1 : index
    %c1_62 = arith.constant 1 : index
    %c0_63 = arith.constant 0 : index
    %45 = vector.load %arg7[%c0_60, %c1_61, %c1_62, %c0_63] : memref<2x18x18x128xbf16, #tpu.memory_space<vmem>>, vector<2x16x16x128xbf16>
    %46 = vector.shape_cast %45 : vector<2x16x16x128xbf16> to vector<512x128xbf16>
    %c4 = arith.constant 4 : index
    %c0_64 = arith.constant 0 : index
    %c0_65 = arith.constant 0 : index
    %47 = vector.load %arg4[%c4, %c0_64, %c0_65] : memref<9x128x128xbf16, #tpu.memory_space<vmem>>, vector<1x128x128xbf16>
    %48 = vector.shape_cast %47 : vector<1x128x128xbf16> to vector<128x128xbf16>
    %cst_66 = arith.constant dense<0.000000e+00> : vector<512x128xf32>
    %49 = tpu.matmul %46, %48, %cst_66 {dimension_numbers = #tpu.dot_dimension_numbers<[1], [0], [0], [1], [0, 0, 1, 1], [], []>} : vector<512x128xbf16>, vector<128x128xbf16>, vector<512x128xf32> -> vector<512x128xf32>
    %50 = arith.addf %44, %49 : vector<512x128xf32>
    %c0_67 = arith.constant 0 : index
    %c1_68 = arith.constant 1 : index
    %c2_69 = arith.constant 2 : index
    %c0_70 = arith.constant 0 : index
    %51 = vector.load %arg7[%c0_67, %c1_68, %c2_69, %c0_70] : memref<2x18x18x128xbf16, #tpu.memory_space<vmem>>, vector<2x16x16x128xbf16>
    %52 = vector.shape_cast %51 : vector<2x16x16x128xbf16> to vector<512x128xbf16>
    %c5 = arith.constant 5 : index
    %c0_71 = arith.constant 0 : index
    %c0_72 = arith.constant 0 : index
    %53 = vector.load %arg4[%c5, %c0_71, %c0_72] : memref<9x128x128xbf16, #tpu.memory_space<vmem>>, vector<1x128x128xbf16>
    %54 = vector.shape_cast %53 : vector<1x128x128xbf16> to vector<128x128xbf16>
    %cst_73 = arith.constant dense<0.000000e+00> : vector<512x128xf32>
    %55 = tpu.matmul %52, %54, %cst_73 {dimension_numbers = #tpu.dot_dimension_numbers<[1], [0], [0], [1], [0, 0, 1, 1], [], []>} : vector<512x128xbf16>, vector<128x128xbf16>, vector<512x128xf32> -> vector<512x128xf32>
    %56 = arith.addf %50, %55 : vector<512x128xf32>
    %c0_74 = arith.constant 0 : index
    %c2_75 = arith.constant 2 : index
    %c0_76 = arith.constant 0 : index
    %c0_77 = arith.constant 0 : index
    %57 = vector.load %arg7[%c0_74, %c2_75, %c0_76, %c0_77] : memref<2x18x18x128xbf16, #tpu.memory_space<vmem>>, vector<2x16x16x128xbf16>
    %58 = vector.shape_cast %57 : vector<2x16x16x128xbf16> to vector<512x128xbf16>
    %c6 = arith.constant 6 : index
    %c0_78 = arith.constant 0 : index
    %c0_79 = arith.constant 0 : index
    %59 = vector.load %arg4[%c6, %c0_78, %c0_79] : memref<9x128x128xbf16, #tpu.memory_space<vmem>>, vector<1x128x128xbf16>
    %60 = vector.shape_cast %59 : vector<1x128x128xbf16> to vector<128x128xbf16>
    %cst_80 = arith.constant dense<0.000000e+00> : vector<512x128xf32>
    %61 = tpu.matmul %58, %60, %cst_80 {dimension_numbers = #tpu.dot_dimension_numbers<[1], [0], [0], [1], [0, 0, 1, 1], [], []>} : vector<512x128xbf16>, vector<128x128xbf16>, vector<512x128xf32> -> vector<512x128xf32>
    %62 = arith.addf %56, %61 : vector<512x128xf32>
    %c0_81 = arith.constant 0 : index
    %c2_82 = arith.constant 2 : index
    %c1_83 = arith.constant 1 : index
    %c0_84 = arith.constant 0 : index
    %63 = vector.load %arg7[%c0_81, %c2_82, %c1_83, %c0_84] : memref<2x18x18x128xbf16, #tpu.memory_space<vmem>>, vector<2x16x16x128xbf16>
    %64 = vector.shape_cast %63 : vector<2x16x16x128xbf16> to vector<512x128xbf16>
    %c7 = arith.constant 7 : index
    %c0_85 = arith.constant 0 : index
    %c0_86 = arith.constant 0 : index
    %65 = vector.load %arg4[%c7, %c0_85, %c0_86] : memref<9x128x128xbf16, #tpu.memory_space<vmem>>, vector<1x128x128xbf16>
    %66 = vector.shape_cast %65 : vector<1x128x128xbf16> to vector<128x128xbf16>
    %cst_87 = arith.constant dense<0.000000e+00> : vector<512x128xf32>
    %67 = tpu.matmul %64, %66, %cst_87 {dimension_numbers = #tpu.dot_dimension_numbers<[1], [0], [0], [1], [0, 0, 1, 1], [], []>} : vector<512x128xbf16>, vector<128x128xbf16>, vector<512x128xf32> -> vector<512x128xf32>
    %68 = arith.addf %62, %67 : vector<512x128xf32>
    %c0_88 = arith.constant 0 : index
    %c2_89 = arith.constant 2 : index
    %c2_90 = arith.constant 2 : index
    %c0_91 = arith.constant 0 : index
    %69 = vector.load %arg7[%c0_88, %c2_89, %c2_90, %c0_91] : memref<2x18x18x128xbf16, #tpu.memory_space<vmem>>, vector<2x16x16x128xbf16>
    %70 = vector.shape_cast %69 : vector<2x16x16x128xbf16> to vector<512x128xbf16>
    %c8 = arith.constant 8 : index
    %c0_92 = arith.constant 0 : index
    %c0_93 = arith.constant 0 : index
    %71 = vector.load %arg4[%c8, %c0_92, %c0_93] : memref<9x128x128xbf16, #tpu.memory_space<vmem>>, vector<1x128x128xbf16>
    %72 = vector.shape_cast %71 : vector<1x128x128xbf16> to vector<128x128xbf16>
    %cst_94 = arith.constant dense<0.000000e+00> : vector<512x128xf32>
    %73 = tpu.matmul %70, %72, %cst_94 {dimension_numbers = #tpu.dot_dimension_numbers<[1], [0], [0], [1], [0, 0, 1, 1], [], []>} : vector<512x128xbf16>, vector<128x128xbf16>, vector<512x128xf32> -> vector<512x128xf32>
    %74 = arith.addf %68, %73 : vector<512x128xf32>
    %c0_95 = arith.constant 0 : index
    %c0_96 = arith.constant 0 : index
    %75 = vector.load %arg5[%c0_95, %c0_96] : memref<1x128xf32, #tpu.memory_space<vmem>>, vector<1x128xf32>
    %76 = vector.broadcast %75 : vector<1x128xf32> to vector<512x128xf32>
    %77 = arith.addf %74, %76 : vector<512x128xf32>
    %cst_97 = arith.constant 0.000000e+00 : f32
    %78 = vector.broadcast %cst_97 : f32 to vector<512x128xf32>
    %79 = arith.maximumf %77, %78 : vector<512x128xf32>
    %80 = vector.shape_cast %79 : vector<512x128xf32> to vector<2x256x128xf32>
    %cst_98 = arith.constant dense<0.000000e+00> : vector<2x128xf32>
    %81 = vector.multi_reduction <add>, %80, %cst_98 [1] : vector<2x256x128xf32> to vector<2x128xf32>
    %cst_99 = arith.constant 3.906250e-03 : f32
    %82 = vector.broadcast %cst_99 : f32 to vector<2x128xf32>
    %83 = arith.mulf %81, %82 : vector<2x128xf32>
    %c0_100 = arith.constant 0 : index
    %c0_101 = arith.constant 0 : index
    %84 = vector.load %arg6[%c0_100, %c0_101] : memref<2x128xf32, #tpu.memory_space<vmem>>, vector<2x128xf32>
    tpu.vector_store %arg6[%c0_100, %c0_101], %83 {strides = array<i32>} : memref<2x128xf32, #tpu.memory_space<vmem>>, vector<2x128xf32>,
    return
  }
  func.func @transform_0(%arg0: i32) -> (i32, i32, i32) {
    %c0_i32 = arith.constant 0 : i32
    %c0_i32_0 = arith.constant 0 : i32
    %c0_i32_1 = arith.constant 0 : i32
    return %arg0, %c0_i32, %c0_i32_0 : i32, i32, i32
  }
  func.func @transform_1(%arg0: i32) -> (i32, i32) {
    %c0_i32 = arith.constant 0 : i32
    %c0_i32_0 = arith.constant 0 : i32
    %c0_i32_1 = arith.constant 0 : i32
    return %c0_i32, %c0_i32_0 : i32, i32
  }
  func.func @transform_2(%arg0: i32) -> (i32, i32) {
    %c0_i32 = arith.constant 0 : i32
    %c0_i32_0 = arith.constant 0 : i32
    %c0_i32_1 = arith.constant 0 : i32
    return %c0_i32, %c0_i32_0 : i32, i32
  }
  func.func @transform_3(%arg0: i32) -> (i32, i32, i32) {
    %c0_i32 = arith.constant 0 : i32
    %c0_i32_0 = arith.constant 0 : i32
    %c0_i32_1 = arith.constant 0 : i32
    %c0_i32_2 = arith.constant 0 : i32
    return %c0_i32, %c0_i32_0, %c0_i32_1 : i32, i32, i32
  }
  func.func @transform_4(%arg0: i32) -> (i32, i32) {
    %c0_i32 = arith.constant 0 : i32
    %c0_i32_0 = arith.constant 0 : i32
    %c0_i32_1 = arith.constant 0 : i32
    return %c0_i32, %c0_i32_0 : i32, i32
  }
  func.func @transform_5(%arg0: i32) -> (i32, i32) {
    %c0_i32 = arith.constant 0 : i32
    %c0_i32_0 = arith.constant 0 : i32
    return %arg0, %c0_i32 : i32, i32
  }
}

</mosaic_0001>

<bundles_post_ra>
// kernel: tpu_custom_call.1
= control target key start
LH: loop header
LB: loop body
LE: loop exit
PB: predicated region body
PF: predicated region fallthrough
CT: control target
= control target key end

     0   :  { %10 = vsyncpa [#allocation4], 0  ;;  %s16168_s0 = inlined_call_operand.vmem [shape: bf16[2,256,36], index: 0, kind: input, shape index: {}]   ;;  %s16169_s1 = inlined_call_operand.vmem [shape: bf16[36,128], index: 1, kind: input, shape index: {}]   ;;  %s16170_s2 = inlined_call_operand.vmem [shape: f32[1,128], index: 2, kind: input, shape index: {}]   ;;  %s16171_s3 = inlined_call_operand.hbm [shape: bf16[9,128,128], index: 3, kind: input, shape index: {}]   ;;  %s16172_s4 = inlined_call_operand.vmem [shape: f32[1,128], index: 4, kind: input, shape index: {}]   ;;  %s16173_s5 = inlined_call_operand.hbm [shape: f32[2,128], index: 5, kind: output, shape index: {}]  }
   0x1   :  { %11 = vsyncpa [#allocation5], 0  ;;  %s13824_s18 = smov [#allocation3]   ;;  %s13776_s22 = scalar_lea.hbm %s16171_s3, 9216 }
   0x2   :  { %s23_s19 = sshll.u32 %s13824_s18, 4  ;;  %p13777_p0 = scmp.ne.s32.totalorder %s16171_s3, %s13776_s22  ;;  %s24_s19 = int_to_ptr.vmem [resolvable:$true] %s23_s19 }
   0x3   :  { %p13780_p1 = scmp.lt.u32.totalorder %s13776_s22, %s16171_s3 }
   0x5   :  { %p13782_p2 = pnand %p13780_p1, %p13777_p0 }
   0x7   :  { %13785 = shalt.err (!%p13782_p2)
}
   0x8   :  { %s13786_s27 = scalar_lea.vmem %s24_s19, 9216  ;;  %p13791_p4 = scmp.lt.s32.totalorder %s24_s19, %s24_s19 }
   0x9   :  { %p13787_p3 = scmp.ne.s32.totalorder %s24_s19, %s13786_s27  ;;  %p13792_p5 = scmp.lt.s32.totalorder %s13786_s27, %s13786_s27 }
   0xb   :  { %p13793_p6 = por %p13792_p5, %p13791_p4 }
   0xd   :  { %p13794_p7 = pnand %p13793_p6, %p13787_p3 }
   0xf   :  { %13797 = shalt.err (!%p13794_p7)
}
  0x10   :  { %s13825_s28 = smov 64   ;;  %s13826_s29 = smov 4  }
  0x11   :  { %29 = dma.hbm_to_vmem [thread:$0]  %s16171_s3, 9216, %s24_s19, [#allocation4], %s13825_s28, %s13825_s28, %s13826_s29  }
  0x12   :  { %13820 = dma.done.wait [#allocation4], 9216  }
  0x13   :  { %13821 = vsyncadd [#allocation4], 4294958080  ;;  %v13368_v0 = vld [vmem:[%s16169_s1] sm:$0xff]   ;;  %v13369_v1 = vld [vmem:[%s16169_s1 + $0x8] sm:$0xff]   ;;  %vm521_vm0 = vcmask 293888   ;;  %vm618_vm1 = vcmask 1041408  }
  0x14   :  { %12044 = vmatprep.subr.bf16.mxu0 %v13368_v0  ;;  %v13370_v2 = vld [vmem:[%s16169_s1 + $0x10] ss:$0 sps:$4 sm:$0x33]   ;;  %v13371_v3 = vld [vmem:[%s16168_s0] sm:$0xff]   ;;  %v13372_v5 = vld [vmem:[%s16168_s0 + $0x8] sm:$0xff]   ;;  %vm49_vm2 = vcmask 1040384  }
  0x15   :  { %12045 = vmatpush3.bf16.msra.mxu0 %v13368_v0  ;;  %12050 = vmatprep.mubr.msk.bf16.mxu0 %vm521_vm0, %v13371_v3  ;;  %v620_v4 = vsel %vm618_vm1, %v13370_v2, 0  ;;  %v13373_v6 = vld [vmem:[%s16168_s0 + $0x10] sm:$0xff]   ;;  %v13374_v7 = vld [vmem:[%s16168_s0 + $0x18] sm:$0xff]   ;;  %v13375_v8 = vld [vmem:[%s16168_s0 + $0x20] sm:$0xff]   ;;  %vm50_vm3 = vsmask.f32 256 }
  0x16   :  { %12046 = vmatprep.subr.bf16.mxu0 %v13369_v1  ;;  %v13376_v9 = vld [vmem:[%s16168_s0 + $0x28] sm:$0xff]   ;;  %v13377_v10 = vld [vmem:[%s16168_s0 + $0x30] sm:$0xff]   ;;  %v13378_v11 = vld [vmem:[%s16168_s0 + $0x38] sm:$0xff]   ;;  %vm160_vm5 = vsmask.f32 7938  ;;  %v13827_v53 = vmov 0  }
  0x17   :  { %v13379_v12 = vld [vmem:[%s16168_s0 + $0x40] sm:$0xff]   ;;  %v13403_v13 = vld [vmem:[#allocation3 + $0x40] sm:$0xff]   ;;  %v13404_v14 = vld [vmem:[#allocation3 + $0x48] sm:$0xff]   ;;  %36 = vst [vmem:[#allocation2] sm:$0xf] %v13827_v53  ;;  %vm1810_vm10 = vcmask 1043456  }
  0x18   :  { %vm13916_vm4 = vmand %vm49_vm2, %vm50_vm3  ;;  %v58_v16 = vld [vmem:[#allocation2 + $0x18] sm:$0x1]  ;;  %v13380_v18 = vld [vmem:[%s16168_s0 + $0x48] sm:$0xff]   ;;  %37 = vst [vmem:[#allocation2 + $0x4] sm:$0xf] %v13827_v53  ;;  %vm4026_vm14 = vcmask 1042432  }
  0x19   :  { %12047 = vmatpush3.bf16.msra.mxu0 %v13369_v1  ;;  %v59_v17 = vsel %vm13916_vm4, 0, %v58_v16  ;;  %v13381_v19 = vld [vmem:[%s16168_s0 + $0x50] sm:$0xff]   ;;  %v13382_v20 = vld [vmem:[%s16168_s0 + $0x58] sm:$0xff]   ;;  %v13383_v21 = vld [vmem:[%s16168_s0 + $0x60] sm:$0xff]   ;;  %38 = vst [vmem:[#allocation2 + $0x8] sm:$0x1] %v13827_v53 }
  0x1a   :  { %13362 = vmatprep.subr.msk.bf16.mxu0 %vm618_vm1, %v13370_v2  ;;  %60 = vst [vmem:[#allocation2 + $0x18] sm:$0x1] %v59_v17  ;;  %v13384_v22 = vld [vmem:[%s16168_s0 + $0x68] sm:$0xff]   ;;  %v13385_v23 = vld [vmem:[%s16168_s0 + $0x70] sm:$0xff]   ;;  %v13386_v24 = vld [vmem:[%s16168_s0 + $0x78] sm:$0xff]   ;;  %vm4027_vm15 = vcmask 1046532  }
  0x1b   :  { %v13387_v25 = vld [vmem:[%s16168_s0 + $0x80] sm:$0xff]   ;;  %v13388_v26 = vld [vmem:[%s16168_s0 + $0x88] sm:$0xff]   ;;  %v13389_v27 = vld [vmem:[%s16168_s0 + $0x90] sm:$0xff]   ;;  %39 = vst [vmem:[#allocation2 + $0xd8] sm:$0xf] %v13827_v53  ;;  %vm10977_vm1 = vcmask 1041409  }
  0x1c   :  { %v13390_v28 = vld [vmem:[%s16168_s0 + $0x98] sm:$0xff]   ;;  %v13391_v29 = vld [vmem:[%s16168_s0 + $0xa0] sm:$0xff]   ;;  %v13392_v30 = vld [vmem:[%s16168_s0 + $0xa8] sm:$0xff]   ;;  %40 = vst [vmem:[#allocation2 + $0xdc] sm:$0xf] %v13827_v53 }
  0x1d   :  { %12049 = vmatpush3.bf16.msra.mxu0 %v620_v4  ;;  %v13393_v31 = vld [vmem:[%s16168_s0 + $0xb0] sm:$0xff]   ;;  %v13394_v32 = vld [vmem:[%s16168_s0 + $0xb8] sm:$0xff]   ;;  %v13395_v33 = vld [vmem:[%s16168_s0 + $0xc0] sm:$0xff]   ;;  %41 = vst [vmem:[#allocation2 + $0xe0] sm:$0x1] %v13827_v53 }
  0x1e   :  { %12114 = vmatprep.subr.bf16.mxu0 %v13403_v13  ;;  %v55_v34 = vld [vmem:[#allocation2 + $0xc] sm:$0x1]  ;;  %vm13991_vm6 = vmand %vm49_vm2, %vm160_vm5  ;;  %v168_v37 = vld [vmem:[#allocation2 + $0x20] sm:$0x1]  ;;  %43 = vst [vmem:[#allocation2 + $0xcc] sm:$0xf] %v13827_v53 }
  0x1f   :  { %v56_v35 = vsel %vm13916_vm4, 0, %v55_v34  ;;  %v169_v38 = vsel %vm13991_vm6, 0, %v168_v37  ;;  %v165_v39 = vld [vmem:[#allocation2 + $0x14] sm:$0x1]  ;;  %v13396_v41 = vld [vmem:[%s16168_s0 + $0xc8] sm:$0xff]   ;;  %v13405_v43 = vld [vmem:[#allocation3 + $0x50] sm:$0xff]  }
  0x20   :  { %12051 = vmatmul.mubr.msk.bf16.vlgmr.msra.gmra.mrb[0].mxu0 %vm521_vm0, %v13372_v5  ;;  %57 = vst [vmem:[#allocation2 + $0xc] sm:$0x1] %v56_v35  ;;  %170 = vst [vmem:[#allocation2 + $0x20] sm:$0x1] %v169_v38  ;;  %v166_v40 = vsel %vm13991_vm6, 0, %v165_v39  ;;  %v13397_v42 = vld [vmem:[%s16168_s0 + $0xd0] sm:$0xff]  }
  0x21   :  { %12054 = vmatprep.mubr.msk.bf16.mxu0 %vm521_vm0, %v13373_v6  ;;  %12115 = vmatpush3.bf16.msra.mxu0 %v13403_v13  ;;  %167 = vst [vmem:[#allocation2 + $0x14] sm:$0x1] %v166_v40  ;;  %v64_v44 = vld [vmem:[#allocation2 + $0x30] sm:$0x1]  ;;  %v61_v46 = vld [vmem:[#allocation2 + $0x24] sm:$0x1]  ;;  %vm14108_vm12 = vmand %vm1810_vm10, %vm160_vm5 }
  0x22   :  { %12116 = vmatprep.subr.bf16.mxu0 %v13404_v14  ;;  %v65_v45 = vsel %vm13916_vm4, 0, %v64_v44  ;;  %v62_v47 = vsel %vm13916_vm4, 0, %v61_v46  ;;  %v174_v48 = vld [vmem:[#allocation2 + $0x38] sm:$0x1]  ;;  %v13406_v51 = vld [vmem:[#allocation3 + $0x100] sm:$0xff]   ;;  %v13399_v52 = vld [vmem:[%s16168_s0 + $0xe0] sm:$0xff]  }
  0x23   :  { %66 = vst [vmem:[#allocation2 + $0x30] sm:$0x1] %v65_v45  ;;  %63 = vst [vmem:[#allocation2 + $0x24] sm:$0x1] %v62_v47  ;;  %v175_v49 = vsel %vm13991_vm6, 0, %v174_v48  ;;  %v13398_v50 = vld [vmem:[%s16168_s0 + $0xd8] sm:$0xff]   ;;  %12834 = vmatprep.subr.bf16.mxu1 %v13406_v51 }
  0x24   :  { %176 = vst [vmem:[#allocation2 + $0x38] sm:$0x1] %v175_v49  ;;  %44 = vst [vmem:[#allocation2 + $0xd0] sm:$0xf] %v13827_v53  ;;  %v171_v54 = vld [vmem:[#allocation2 + $0x2c] sm:$0x1]  ;;  %12842 = vmatpush3.bf16.msra.mxu1 %v13406_v51 }
  0x25   :  { %12117 = vmatpush3.bf16.msra.mxu0 %v13404_v14  ;;  %45 = vst [vmem:[#allocation2 + $0xd4] sm:$0x1] %v13827_v53  ;;  %46 = vst [vmem:[#allocation2 + $0x1a4] sm:$0xf] %v13827_v53  ;;  %v13407_v55 = vld [vmem:[#allocation3 + $0x58] sm:$0xff]   ;;  %v172_v56 = vsel %vm13991_vm6, 0, %v171_v54 }
  0x26   :  { %12118 = vmatprep.subr.bf16.mxu0 %v13405_v43  ;;  %47 = vst [vmem:[#allocation2 + $0x1a8] sm:$0xf] %v13827_v53  ;;  %48 = vst [vmem:[#allocation2 + $0x1ac] sm:$0x1] %v13827_v53  ;;  %v13408_v57 = vld [vmem:[#allocation3 + $0x108] sm:$0xff]   ;;  %v13400_v58 = vld [vmem:[%s16168_s0 + $0xe8] sm:$0xff]  }
  0x27   :  { %173 = vst [vmem:[#allocation2 + $0x2c] sm:$0x1] %v172_v56  ;;  %12835 = vmatprep.subr.bf16.mxu1 %v13408_v57  ;;  %v70_v59 = vld [vmem:[#allocation2 + $0x48] sm:$0x1]  ;;  %v13409_v60 = vld [vmem:[#allocation3 + $0x60] sm:$0xff]   ;;  %v13410_v1 = vld [vmem:[#allocation3 + $0x110] sm:$0xff]  }
  0x28   :  { %12055 = vmatmul.mubr.msk.bf16.gmra.mrb[4].mxu0 %vm521_vm0, %v13374_v7  ;;  %12843 = vmatpush3.bf16.msra.mxu1 %v13408_v57  ;;  %v52_v61 = vld [vmem:[#allocation2] sm:$0x1]  ;;  %v13401_v62 = vld [vmem:[%s16168_s0 + $0xf0] sm:$0xff]   ;;  %v71_v63 = vsel %vm13916_vm4, 0, %v70_v59  ;;  %v67_v0 = vld [vmem:[#allocation2 + $0x3c] sm:$0x1] }
  0x29   :  { %12058 = vmatprep.mubr.msk.bf16.mxu0 %vm521_vm0, %v13375_v8  ;;  %12119 = vmatpush3.bf16.msra.mxu0 %v13405_v43  ;;  %v53_v2 = vsel %vm13916_vm4, 0, %v52_v61  ;;  %72 = vst [vmem:[#allocation2 + $0x48] sm:$0x1] %v71_v63  ;;  %v68_v3 = vsel %vm13916_vm4, 0, %v67_v0  ;;  %v180_v4 = vld [vmem:[#allocation2 + $0x50] sm:$0x1] }
  0x2a   :  { %12120 = vmatprep.subr.bf16.mxu0 %v13407_v55  ;;  %54 = vst [vmem:[#allocation2] sm:$0x1] %v53_v2  ;;  %69 = vst [vmem:[#allocation2 + $0x3c] sm:$0x1] %v68_v3  ;;  %v181_v5 = vsel %vm13991_vm6, 0, %v180_v4  ;;  %12836 = vmatprep.subr.bf16.mxu1 %v13410_v1  ;;  %v13411_v7 = vld [vmem:[#allocation3 + $0x68] sm:$0xff]  }
  0x2b   :  { %182 = vst [vmem:[#allocation2 + $0x50] sm:$0x1] %v181_v5  ;;  %v177_v6 = vld [vmem:[#allocation2 + $0x44] sm:$0x1]  ;;  %v76_v14 = vld [vmem:[#allocation2 + $0x60] sm:$0x1] }
  0x2c   :  { %12844 = vmatpush3.bf16.msra.mxu1 %v13410_v1  ;;  %v178_v8 = vsel %vm13991_vm6, 0, %v177_v6  ;;  %v13413_v13 = vld [vmem:[#allocation3 + $0x70] sm:$0xff]   ;;  %v13414_v16 = vld [vmem:[#allocation3 + $0x120] sm:$0xff]   ;;  %v77_v17 = vsel %vm13916_vm4, 0, %v76_v14  ;;  %vm2148_vm7 = vsmask.f32 3328 }
  0x2d   :  { %12121 = vmatpush3.bf16.msra.mxu0 %v13407_v55  ;;  %179 = vst [vmem:[#allocation2 + $0x44] sm:$0x1] %v178_v8  ;;  %78 = vst [vmem:[#allocation2 + $0x60] sm:$0x1] %v77_v17  ;;  %v82_v34 = vld [vmem:[#allocation2 + $0x78] sm:$0x1] }
  0x2e   :  { %12122 = vmatprep.subr.bf16.mxu0 %v13409_v60  ;;  %v83_v40 = vsel %vm13916_vm4, 0, %v82_v34  ;;  %vm2149_vm8 = vsmask.f32 7440  ;;  %v192_v43 = vld [vmem:[#allocation2 + $0x80] sm:$0x1]  ;;  %v13418_v59 = vld [vmem:[#allocation3 + $0x138] sm:$0xff]  }
  0x2f   :  { %84 = vst [vmem:[#allocation2 + $0x78] sm:$0x1] %v83_v40  ;;  %v193_v47 = vsel %vm13991_vm6, 0, %v192_v43  ;;  %vm14063_vm9 = vmor %vm2148_vm7, %vm2149_vm8  ;;  %v189_v53 = vld [vmem:[#allocation2 + $0x74] sm:$0x1]  ;;  %v13417_v56 = vld [vmem:[#allocation3 + $0x130] sm:$0xff]  }
  0x30   :  { %12059 = vmatmul.mubr.msk.bf16.gmra.mrb[8].mxu0 %vm521_vm0, %v13376_v9  ;;  %v13412_v9 = vld [vmem:[#allocation3 + $0x118] sm:$0xff]   ;;  %194 = vst [vmem:[#allocation2 + $0x80] sm:$0x1] %v193_v47  ;;  %v190_v55 = vsel %vm13991_vm6, 0, %v189_v53  ;;  %v88_v57 = vld [vmem:[#allocation2 + $0x90] sm:$0x1] }
  0x31   :  { %12062 = vmatprep.mubr.msk.bf16.mxu0 %vm521_vm0, %v13377_v10  ;;  %12123 = vmatpush3.bf16.msra.mxu0 %v13409_v60  ;;  %v162_v10 = vld [vmem:[#allocation2 + $0x8] sm:$0x1]  ;;  %191 = vst [vmem:[#allocation2 + $0x74] sm:$0x1] %v190_v55  ;;  %v85_v60 = vld [vmem:[#allocation2 + $0x84] sm:$0x1] }
  0x32   :  { %12124 = vmatprep.subr.bf16.mxu0 %v13411_v7  ;;  %12837 = vmatprep.subr.bf16.mxu1 %v13412_v9  ;;  %v198_v61 = vld [vmem:[#allocation2 + $0x98] sm:$0x1]  ;;  %v195_v0 = vld [vmem:[#allocation2 + $0x8c] sm:$0x1]  ;;  %v13419_v2 = vld [vmem:[#allocation3 + $0x140] sm:$0xff]  }
  0x33   :  { %12845 = vmatpush3.bf16.msra.mxu1 %v13412_v9  ;;  %v199_v63 = vsel %vm13991_vm6, 0, %v198_v61  ;;  %v196_v1 = vsel %vm13991_vm6, 0, %v195_v0  ;;  %v94_v3 = vld [vmem:[#allocation2 + $0xa8] sm:$0x1]  ;;  %v91_v5 = vld [vmem:[#allocation2 + $0x9c] sm:$0x1] }
  0x34   :  { %12838 = vmatprep.subr.bf16.mxu1 %v13414_v16  ;;  %200 = vst [vmem:[#allocation2 + $0x98] sm:$0x1] %v199_v63  ;;  %197 = vst [vmem:[#allocation2 + $0x8c] sm:$0x1] %v196_v1  ;;  %v95_v4 = vsel %vm13916_vm4, 0, %v94_v3  ;;  %v92_v6 = vsel %vm13916_vm4, 0, %v91_v5 }
  0x35   :  { %12125 = vmatpush3.bf16.msra.mxu0 %v13411_v7  ;;  %96 = vst [vmem:[#allocation2 + $0xa8] sm:$0x1] %v95_v4  ;;  %v204_v7 = vld [vmem:[#allocation2 + $0xb0] sm:$0x1]  ;;  %v201_v8 = vld [vmem:[#allocation2 + $0xa4] sm:$0x1] }
  0x36   :  { %12126 = vmatprep.subr.bf16.mxu0 %v13413_v13  ;;  %93 = vst [vmem:[#allocation2 + $0x9c] sm:$0x1] %v92_v6  ;;  %v205_v9 = vsel %vm13991_vm6, 0, %v204_v7  ;;  %v97_v14 = vld [vmem:[#allocation2 + $0xb4] sm:$0x1] }
  0x37   :  { %12846 = vmatpush3.bf16.msra.mxu1 %v13414_v16  ;;  %206 = vst [vmem:[#allocation2 + $0xb0] sm:$0x1] %v205_v9  ;;  %v98_v16 = vsel %vm13916_vm4, 0, %v97_v14  ;;  %v210_v17 = vld [vmem:[#allocation2 + $0xc8] sm:$0x1] }
  0x38   :  { %12063 = vmatmul.mubr.msk.bf16.gmra.mrb[12].mxu0 %vm521_vm0, %v13378_v11  ;;  %v163_v11 = vsel %vm13991_vm6, 0, %v162_v10  ;;  %v202_v10 = vsel %vm13991_vm6, 0, %v201_v8  ;;  %99 = vst [vmem:[#allocation2 + $0xb4] sm:$0x1] %v98_v16  ;;  %vm1167_vm11 = vsmask.f32 4368 }
  0x39   :  { %12066 = vmatprep.mubr.msk.bf16.mxu0 %vm521_vm0, %v13379_v12  ;;  %164 = vst [vmem:[#allocation2 + $0x8] sm:$0x1] %v163_v11  ;;  %v13402_v12 = vld [vmem:[%s16168_s0 + $0xf8] sm:$0xff]   ;;  %12127 = vmatpush3.bf16.msra.mxu0 %v13413_v13  ;;  %203 = vst [vmem:[#allocation2 + $0xa4] sm:$0x1] %v202_v10 }
  0x3a   :  { %v100_v11 = vld [vmem:[#allocation2 + $0xc0] sm:$0x1]  ;;  %vm14115_vm13 = vmor %vm50_vm3, %vm1167_vm11  ;;  %v1816_v7 = vld [vmem:[#allocation2 + $0x14] sm:$0x1] }
  0x3b   :  { %v14094_v13 = vld [vmem:[%s16170_s2] ss:$0 sm:$0xff] }
  0x3c   :  { %v1823_v1 = vld [vmem:[#allocation2 + $0x20] sm:$0x1] }
  0x40   :  { %12067 = vmatmul.mubr.msk.bf16.gmra.mrb[16].mxu0 %vm521_vm0, %v13380_v18  ;;  %v73_v18 = vld [vmem:[#allocation2 + $0x54] sm:$0x1] }
  0x41   :  { %12070 = vmatprep.mubr.msk.bf16.mxu0 %vm521_vm0, %v13381_v19  ;;  %v74_v19 = vsel %vm13916_vm4, 0, %v73_v18  ;;  %v207_v18 = vld [vmem:[#allocation2 + $0xbc] sm:$0x1] }
  0x42   :  { %75 = vst [vmem:[#allocation2 + $0x54] sm:$0x1] %v74_v19  ;;  %v211_v19 = vsel %vm13991_vm6, 0, %v210_v17 }
  0x43   :  { %212 = vst [vmem:[#allocation2 + $0xc8] sm:$0x1] %v211_v19 }
  0x48   :  { %12071 = vmatmul.mubr.msk.bf16.gmra.mrb[20].mxu0 %vm521_vm0, %v13382_v20  ;;  %v186_v20 = vld [vmem:[#allocation2 + $0x68] sm:$0x1] }
  0x49   :  { %12074 = vmatprep.mubr.msk.bf16.mxu0 %vm521_vm0, %v13383_v21  ;;  %v187_v21 = vsel %vm13991_vm6, 0, %v186_v20  ;;  %v208_v20 = vsel %vm13991_vm6, 0, %v207_v18 }
  0x4a   :  { %188 = vst [vmem:[#allocation2 + $0x68] sm:$0x1] %v187_v21  ;;  %209 = vst [vmem:[#allocation2 + $0xbc] sm:$0x1] %v208_v20 }
  0x50   :  { %12075 = vmatmul.mubr.msk.bf16.gmra.mrb[24].mxu0 %vm521_vm0, %v13384_v22  ;;  %v183_v22 = vld [vmem:[#allocation2 + $0x5c] sm:$0x1] }
  0x51   :  { %12078 = vmatprep.mubr.msk.bf16.mxu0 %vm521_vm0, %v13385_v23  ;;  %v13415_v23 = vld [vmem:[#allocation3 + $0x78] sm:$0xff]  }
  0x52   :  { %12128 = vmatprep.subr.bf16.mxu0 %v13415_v23 }
  0x53   :  { %12129 = vmatpush3.bf16.msra.mxu0 %v13415_v23 }
  0x58   :  { %12079 = vmatmul.mubr.msk.bf16.gmra.mrb[28].mxu0 %vm521_vm0, %v13386_v24  ;;  %v2036_v24 = vld [vmem:[#allocation2] sm:$0xf] }
  0x59   :  { %12082 = vmatprep.mubr.msk.bf16.mxu0 %vm521_vm0, %v13387_v25  ;;  %v184_v25 = vsel %vm13991_vm6, 0, %v183_v22 }
  0x5a   :  { %185 = vst [vmem:[#allocation2 + $0x5c] sm:$0x1] %v184_v25 }
  0x60   :  { %12083 = vmatmul.mubr.msk.bf16.gmra.mrb[32].mxu0 %vm521_vm0, %v13388_v26  ;;  %v13416_v26 = vld [vmem:[#allocation3 + $0x128] sm:$0xff]  }
  0x61   :  { %12086 = vmatprep.mubr.msk.bf16.mxu0 %vm521_vm0, %v13389_v27  ;;  %v2037_v27 = vld [vmem:[#allocation2 + $0x4] sm:$0xf]  ;;  %12839 = vmatprep.subr.bf16.mxu1 %v13416_v26 }
  0x62   :  { %12847 = vmatpush3.bf16.msra.mxu1 %v13416_v26 }
  0x63   :  { %12840 = vmatprep.subr.bf16.mxu1 %v13417_v56 }
  0x66   :  { %12848 = vmatpush3.bf16.msra.mxu1 %v13417_v56 }
  0x67   :  { %12841 = vmatprep.subr.bf16.mxu1 %v13418_v59 }
  0x68   :  { %12087 = vmatmul.mubr.msk.bf16.gmra.mrb[36].mxu0 %vm521_vm0, %v13390_v28  ;;  %v2116_v28 = vld [vmem:[#allocation2 + $0x8] sm:$0x1] }
  0x69   :  { %12090 = vmatprep.mubr.msk.bf16.mxu0 %vm521_vm0, %v13391_v29  ;;  %v2152_v29 = vshrl.u32 %v2036_v24, 16 }
  0x6a   :  { %12849 = vmatpush3.bf16.msra.mxu1 %v13418_v59 }
  0x6b   :  { %v2154_v35 = vrot.slane %v2152_v29, 4  ;;  %12514 = vmatprep.subr.bf16.mxu1 %v13419_v2 }
  0x70   :  { %12091 = vmatmul.mubr.msk.bf16.gmra.mrb[40].mxu0 %vm521_vm0, %v13392_v30  ;;  %v2155_v30 = vshll.u32 %v2036_v24, 16 }
  0x71   :  { %12094 = vmatprep.mubr.msk.bf16.mxu0 %vm521_vm0, %v13393_v31  ;;  %v2161_v31 = vshll.u32 %v2037_v27, 16 }
  0x72   :  { %v2157_v37 = vrot.slane %v2155_v30, 5 }
  0x73   :  { %v2163_v38 = vrot.slane %v2161_v31, 5 }
  0x74   :  { %v2158_v44 = vor.u32 %v2157_v37, %v2154_v35 }
  0x76   :  { %v2159_v48 = vrot.slane %v2158_v44, 4 }
  0x78   :  { %12095 = vmatmul.mubr.msk.bf16.gmra.mrb[44].mxu0 %vm521_vm0, %v13394_v32  ;;  %v2165_v32 = vshrl.u32 %v2037_v27, 16  ;;  %v2164_v51 = vsel %vm14063_vm9, %v2159_v48, %v2163_v38 }
  0x79   :  { %12098 = vmatprep.mubr.msk.bf16.mxu0 %vm521_vm0, %v13395_v33  ;;  %v2171_v33 = vshll.u32 %v2116_v28, 16 }
  0x7a   :  { %v2167_v39 = vrot.slane %v2165_v32, 4 }
  0x7b   :  { %v2173_v46 = vrot.slane %v2171_v33, 5 }
  0x7c   :  { %v2168_v45 = vor.u32 %v2167_v39, %v2163_v38 }
  0x7e   :  { %v2169_v49 = vrot.slane %v2168_v45, 4 }
  0x80   :  { %12099 = vmatmul.mubr.msk.bf16.gmra.mrb[48].mxu0 %vm521_vm0, %v13396_v41  ;;  %v79_v41 = vld [vmem:[#allocation2 + $0x6c] sm:$0x1] }
  0x81   :  { %12102 = vmatprep.mubr.msk.bf16.mxu0 %vm521_vm0, %v13397_v42  ;;  %v80_v42 = vsel %vm13916_vm4, 0, %v79_v41 }
  0x82   :  { %81 = vst [vmem:[#allocation2 + $0x6c] sm:$0x1] %v80_v42 }
  0x88   :  { %12103 = vmatmul.mubr.msk.bf16.gmra.mrb[52].mxu0 %vm521_vm0, %v13398_v50  ;;  %v16182_v50 = vmov 0 }
  0x89   :  { %12106 = vmatprep.mubr.msk.bf16.mxu0 %vm521_vm0, %v13399_v52  ;;  %v16183_v50 = vsel %vm14063_vm9, 4294967295, %v16182_v50  ;;  %v2174_v52 = vsel %vm14063_vm9, %v2169_v49, %v2173_v46  ;;  %v1819_v49 = vld [vmem:[#allocation2 + $0x18] sm:$0xf] }
  0x8a   :  { %16184 = vst [vmem:[#allocation9_spill] sm:$0xff] %v16183_v50  ;;  %v11128_v54 = vcombine.low %v2164_v51, %v2174_v52 }
  0x90   :  { %12107 = vmatmul.mubr.msk.bf16.gmra.mrb[56].mxu0 %vm521_vm0, %v13400_v58  ;;  %v89_v58 = vsel %vm13916_vm4, 0, %v88_v57 }
  0x91   :  { %12110 = vmatprep.mubr.msk.bf16.mxu0 %vm521_vm0, %v13401_v62  ;;  %90 = vst [vmem:[#allocation2 + $0x90] sm:$0x1] %v89_v58  ;;  %v86_v62 = vsel %vm13916_vm4, 0, %v85_v60  ;;  %v1812_v58 = vld [vmem:[#allocation2 + $0xc] sm:$0xf] }
  0x92   :  { %87 = vst [vmem:[#allocation2 + $0x84] sm:$0x1] %v86_v62 }
  0x98   :  { %12111 = vmatmul.mubr.msk.bf16.gmra.mrb[60].mxu0 %vm521_vm0, %v13402_v12  ;;  %v101_v12 = vsel %vm13916_vm4, 0, %v100_v11  ;;  %vm14900_vm0 = vmor %vm4026_vm14, %vm4027_vm15 }
  0x99   :  { %12130 = vmatprep.mubr.bf16.mxu0 %v11128_v54  ;;  %102 = vst [vmem:[#allocation2 + $0xc0] sm:$0x1] %v101_v12 }
  0xf3   :  { %v12052_v21 = vpop.f32.mrb[0].mxu0 }
  0xf4   :  { %v665_v22 = vadd.f32 %v12052_v21, %v14094_v13  ;;  %v656_v23 = vpop.f32.mrb[1].mxu0 }
  0xf5   :  { %v657_v24 = vadd.f32 %v14094_v13, %v656_v23  ;;  %v12053_v25 = vpop.f32.mrb[2].mxu0 }
  0xf6   :  { %v913_v26 = vmax.f32 %v665_v22, 0.0  ;;  %v668_v27 = vadd.f32 %v12053_v25, %v14094_v13  ;;  %v659_v28 = vpop.f32.mrb[3].mxu0 }
  0xf7   :  { %v911_v29 = vmax.f32 %v657_v24, 0.0  ;;  %v660_v30 = vadd.f32 %v14094_v13, %v659_v28  ;;  %v1833_v28 = vld [vmem:[#allocation2 + $0x30] sm:$0xf] }
  0xf8   :  { %v11587_v31 = vpack.c.bf16 %v913_v26, %v913_v26  ;;  %v914_v32 = vmax.f32 %v668_v27, 0.0 }
  0xf9   :  { %v11585_v33 = vpack.c.bf16 %v911_v29, %v911_v29  ;;  %v912_v34 = vmax.f32 %v660_v30, 0.0 }
  0xfa   :  { %v1187_v35 = vshrl.u32 %v11587_v31, 16  ;;  %v11588_v37 = vpack.c.bf16 %v914_v32, %v914_v32  ;;  %v1190_v38 = vshll.u32 %v11587_v31, 16 }
  0xfb   :  { %v1170_v39 = vshrl.u32 %v11585_v33, 16  ;;  %v1173_v40 = vshll.u32 %v11585_v33, 16  ;;  %v11586_v41 = vpack.c.bf16 %v912_v34, %v912_v34  ;;  %v12056_v42 = vpop.f32.mrb[4].mxu0 }
  0xfc   :  { %v1189_v43 = vrot.slane %v1187_v35, 7  ;;  %v1195_v44 = vshrl.u32 %v11588_v37, 16  ;;  %v1198_v45 = vshll.u32 %v11588_v37, 16  ;;  %v681_v46 = vadd.f32 %v12056_v42, %v14094_v13  ;;  %v672_v47 = vpop.f32.mrb[5].mxu0  ;;  %v1826_v35 = vld [vmem:[#allocation2 + $0x24] sm:$0xf] }
  0xfd   :  { %v1172_v51 = vrot.slane %v1170_v39, 7  ;;  %v1178_v52 = vshrl.u32 %v11586_v41, 16  ;;  %v1181_v53 = vshll.u32 %v11586_v41, 16  ;;  %v673_v54 = vadd.f32 %v14094_v13, %v672_v47  ;;  %v12057_v55 = vpop.f32.mrb[6].mxu0 }
  0xfe   :  { %v1192_v56 = vor.u32 %v1190_v38, %v1189_v43  ;;  %v1193_v57 = vrot.slane %v1189_v43, 4  ;;  %v1197_v59 = vrot.slane %v1195_v44, 7  ;;  %v917_v60 = vmax.f32 %v681_v46, 0.0  ;;  %v675_v61 = vpop.f32.mrb[7].mxu0 }
  0xff   :  { %v1175_v62 = vor.u32 %v1173_v40, %v1172_v51  ;;  %v1176_v63 = vrot.slane %v1172_v51, 4  ;;  %v1180_v2 = vrot.slane %v1178_v52, 7  ;;  %v915_v3 = vmax.f32 %v673_v54, 0.0 }
 0x100   :  { %v1820_v4 = vsel %vm14108_vm12, %v1192_v56, %v1819_v49  ;;  %v1200_v5 = vor.u32 %v1198_v45, %v1197_v59  ;;  %v1202_v6 = vrot.slane %v1197_v59, 4  ;;  %v11591_v8 = vpack.c.bf16 %v917_v60, %v917_v60  ;;  %v1830_v59 = vld [vmem:[#allocation2 + $0x2c] sm:$0x1] }
 0x101   :  { %1821 = vst [vmem:[#allocation2 + $0x18] sm:$0xf] %v1820_v4  ;;  %v1813_v9 = vsel %vm14108_vm12, %v1175_v62, %v1812_v58  ;;  %v1183_v10 = vor.u32 %v1181_v53, %v1180_v2  ;;  %v1185_v11 = vrot.slane %v1180_v2, 4  ;;  %v11589_v12 = vpack.c.bf16 %v915_v3, %v915_v3  ;;  %v1837_v58 = vld [vmem:[#allocation2 + $0x38] sm:$0x1] }
 0x102   :  { %1814 = vst [vmem:[#allocation2 + $0xc] sm:$0xf] %v1813_v9  ;;  %v1201_v14 = vsel %vm14115_vm13, %v1193_v57, %v1200_v5  ;;  %v1824_v16 = vsel %vm13916_vm4, %v1202_v6, %v1823_v1  ;;  %v1221_v17 = vshrl.u32 %v11591_v8, 16  ;;  %v1224_v20 = vshll.u32 %v11591_v8, 16  ;;  %v1847_v8 = vld [vmem:[#allocation2 + $0x48] sm:$0xf] }
 0x103   :  { %1822 = vst [vmem:[#allocation2 + $0x1c] sm:$0xf] %v1201_v14  ;;  %1825 = vst [vmem:[#allocation2 + $0x20] sm:$0x1] %v1824_v16  ;;  %v1184_v18 = vsel %vm14115_vm13, %v1176_v63, %v1183_v10  ;;  %v1817_v19 = vsel %vm13916_vm4, %v1185_v11, %v1816_v7  ;;  %v1204_v21 = vshrl.u32 %v11589_v12, 16  ;;  %v12060_v22 = vpop.f32.mrb[8].mxu0  ;;  %v684_v24 = vadd.f32 %v12057_v55, %v14094_v13 }
 0x104   :  { %1815 = vst [vmem:[#allocation2 + $0x10] sm:$0xf] %v1184_v18  ;;  %1818 = vst [vmem:[#allocation2 + $0x14] sm:$0x1] %v1817_v19  ;;  %v14131_v23 = vrot.slane %v1221_v17, 7  ;;  %v676_v25 = vadd.f32 %v14094_v13, %v675_v61  ;;  %v697_v26 = vadd.f32 %v12060_v22, %v14094_v13  ;;  %v688_v27 = vpop.f32.mrb[9].mxu0 }
 0x105   :  { %v1206_v29 = vrot.slane %v1204_v21, 7  ;;  %v1207_v30 = vshll.u32 %v11589_v12, 16  ;;  %v689_v31 = vadd.f32 %v14094_v13, %v688_v27  ;;  %v12061_v32 = vpop.f32.mrb[10].mxu0  ;;  %v918_v37 = vmax.f32 %v684_v24, 0.0  ;;  %v1840_v19 = vld [vmem:[#allocation2 + $0x3c] sm:$0xf] }
 0x106   :  { %v1226_v33 = vor.u32 %v1224_v20, %v14131_v23  ;;  %v1227_v34 = vrot.slane %v14131_v23, 4  ;;  %v916_v38 = vmax.f32 %v676_v25, 0.0  ;;  %v691_v39 = vpop.f32.mrb[11].mxu0  ;;  %v921_v42 = vmax.f32 %v697_v26, 0.0 }
 0x107   :  { %v1209_v40 = vor.u32 %v1207_v30, %v1206_v29  ;;  %v1210_v41 = vrot.slane %v1206_v29, 4  ;;  %v919_v43 = vmax.f32 %v689_v31, 0.0  ;;  %v11592_v45 = vpack.c.bf16 %v918_v37, %v918_v37 }
 0x108   :  { %v1834_v44 = vsel %vm14108_vm12, %v1226_v33, %v1833_v28  ;;  %v11590_v46 = vpack.c.bf16 %v916_v38, %v916_v38  ;;  %v700_v47 = vadd.f32 %v12061_v32, %v14094_v13  ;;  %v11595_v51 = vpack.c.bf16 %v921_v42, %v921_v42 }
 0x109   :  { %1835 = vst [vmem:[#allocation2 + $0x30] sm:$0xf] %v1834_v44  ;;  %v1827_v49 = vsel %vm14108_vm12, %v1209_v40, %v1826_v35  ;;  %v11593_v52 = vpack.c.bf16 %v919_v43, %v919_v43  ;;  %v692_v53 = vadd.f32 %v14094_v13, %v691_v39  ;;  %v1229_v54 = vshrl.u32 %v11592_v45, 16  ;;  %v1851_v43 = vld [vmem:[#allocation2 + $0x50] sm:$0x1] }
 0x10a   :  { %1828 = vst [vmem:[#allocation2 + $0x24] sm:$0xf] %v1827_v49  ;;  %v1232_v55 = vshll.u32 %v11592_v45, 16  ;;  %v1212_v56 = vshrl.u32 %v11590_v46, 16  ;;  %v1215_v57 = vshll.u32 %v11590_v46, 16  ;;  %v1255_v60 = vshrl.u32 %v11595_v51, 16 }
 0x10b   :  { %v1258_v61 = vshll.u32 %v11595_v51, 16  ;;  %v1238_v62 = vshrl.u32 %v11593_v52, 16  ;;  %v1241_v63 = vshll.u32 %v11593_v52, 16  ;;  %v12064_v1 = vpop.f32.mrb[12].mxu0  ;;  %v1231_v2 = vrot.slane %v1229_v54, 7 }
 0x10c   :  { %v1214_v3 = vrot.slane %v1212_v56, 7  ;;  %v922_v4 = vmax.f32 %v700_v47, 0.0  ;;  %v920_v5 = vmax.f32 %v692_v53, 0.0  ;;  %v704_v6 = vpop.f32.mrb[13].mxu0  ;;  %v14145_v7 = vrot.slane %v1255_v60, 7 }
 0x10d   :  { %v14147_v9 = vrot.slane %v1238_v62, 7  ;;  %v713_v10 = vadd.f32 %v12064_v1, %v14094_v13  ;;  %v705_v11 = vadd.f32 %v14094_v13, %v704_v6  ;;  %v12065_v12 = vpop.f32.mrb[14].mxu0  ;;  %v1234_v14 = vor.u32 %v1232_v55, %v1231_v2  ;;  %v1844_v44 = vld [vmem:[#allocation2 + $0x44] sm:$0x1] }
 0x10e   :  { %v1236_v16 = vrot.slane %v1231_v2, 4  ;;  %v1217_v17 = vor.u32 %v1215_v57, %v1214_v3  ;;  %v1219_v18 = vrot.slane %v1214_v3, 4  ;;  %v707_v20 = vpop.f32.mrb[15].mxu0  ;;  %v1260_v21 = vor.u32 %v1258_v61, %v14145_v7 }
 0x10f   :  { %v1261_v22 = vrot.slane %v14145_v7, 4  ;;  %v1243_v23 = vor.u32 %v1241_v63, %v14147_v9  ;;  %v1244_v24 = vrot.slane %v14147_v9, 4  ;;  %v1235_v25 = vsel %vm14115_vm13, %v1227_v34, %v1234_v14 }
 0x110   :  { %v1838_v26 = vsel %vm13916_vm4, %v1236_v16, %v1837_v58  ;;  %v1218_v27 = vsel %vm14115_vm13, %v1210_v41, %v1217_v17  ;;  %v1831_v28 = vsel %vm13916_vm4, %v1219_v18, %v1830_v59  ;;  %1836 = vst [vmem:[#allocation2 + $0x34] sm:$0xf] %v1235_v25  ;;  %v1848_v29 = vsel %vm14108_vm12, %v1260_v21, %v1847_v8 }
 0x111   :  { %1839 = vst [vmem:[#allocation2 + $0x38] sm:$0x1] %v1838_v26  ;;  %1829 = vst [vmem:[#allocation2 + $0x28] sm:$0xf] %v1218_v27  ;;  %v1841_v30 = vsel %vm14108_vm12, %v1243_v23, %v1840_v19  ;;  %v11596_v31 = vpack.c.bf16 %v922_v4, %v922_v4  ;;  %v11594_v32 = vpack.c.bf16 %v920_v5, %v920_v5  ;;  %v925_v33 = vmax.f32 %v713_v10, 0.0 }
 0x112   :  { %1832 = vst [vmem:[#allocation2 + $0x2c] sm:$0x1] %v1831_v28  ;;  %1849 = vst [vmem:[#allocation2 + $0x48] sm:$0xf] %v1848_v29  ;;  %v923_v34 = vmax.f32 %v705_v11, 0.0  ;;  %v716_v35 = vadd.f32 %v12065_v12, %v14094_v13  ;;  %v708_v37 = vadd.f32 %v14094_v13, %v707_v20 }
 0x113   :  { %1842 = vst [vmem:[#allocation2 + $0x3c] sm:$0xf] %v1841_v30  ;;  %v1263_v38 = vshrl.u32 %v11596_v31, 16  ;;  %v1266_v39 = vshll.u32 %v11596_v31, 16  ;;  %v1246_v40 = vshrl.u32 %v11594_v32, 16  ;;  %v1249_v41 = vshll.u32 %v11594_v32, 16 }
 0x114   :  { %v12068_v42 = vpop.f32.mrb[16].mxu0  ;;  %v11599_v45 = vpack.c.bf16 %v925_v33, %v925_v33  ;;  %v11597_v46 = vpack.c.bf16 %v923_v34, %v923_v34  ;;  %v926_v47 = vmax.f32 %v716_v35, 0.0  ;;  %v924_v49 = vmax.f32 %v708_v37, 0.0  ;;  %v1861_v11 = vld [vmem:[#allocation2 + $0x60] sm:$0xf] }
 0x115   :  { %v720_v51 = vpop.f32.mrb[17].mxu0  ;;  %v1265_v52 = vrot.slane %v1263_v38, 7  ;;  %v1248_v53 = vrot.slane %v1246_v40, 7  ;;  %v729_v54 = vadd.f32 %v12068_v42, %v14094_v13  ;;  %v1854_v12 = vld [vmem:[#allocation2 + $0x54] sm:$0xf] }
 0x116   :  { %v721_v55 = vadd.f32 %v14094_v13, %v720_v51  ;;  %v12069_v56 = vpop.f32.mrb[18].mxu0  ;;  %v1289_v57 = vshrl.u32 %v11599_v45, 16  ;;  %v1292_v58 = vshll.u32 %v11599_v45, 16  ;;  %v1272_v59 = vshrl.u32 %v11597_v46, 16  ;;  %v2038_v19 = vld [vmem:[#allocation2 + $0xc] sm:$0xf] }
 0x117   :  { %v1275_v60 = vshll.u32 %v11597_v46, 16  ;;  %v723_v61 = vpop.f32.mrb[19].mxu0  ;;  %v1268_v62 = vor.u32 %v1266_v39, %v1265_v52  ;;  %v1270_v63 = vrot.slane %v1265_v52, 4  ;;  %v1251_v1 = vor.u32 %v1249_v41, %v1248_v53  ;;  %v1865_v31 = vld [vmem:[#allocation2 + $0x68] sm:$0x1] }
 0x118   :  { %v1253_v2 = vrot.slane %v1248_v53, 4  ;;  %v1291_v3 = vrot.slane %v1289_v57, 7  ;;  %v1274_v4 = vrot.slane %v1272_v59, 7  ;;  %v11600_v5 = vpack.c.bf16 %v926_v47, %v926_v47  ;;  %v1858_v37 = vld [vmem:[#allocation2 + $0x5c] sm:$0x1] }
 0x119   :  { %v11598_v6 = vpack.c.bf16 %v924_v49, %v924_v49  ;;  %v1269_v7 = vsel %vm14115_vm13, %v1261_v22, %v1268_v62  ;;  %v1852_v8 = vsel %vm13916_vm4, %v1270_v63, %v1851_v43  ;;  %v1252_v9 = vsel %vm14115_vm13, %v1244_v24, %v1251_v1  ;;  %v2039_v47 = vld [vmem:[#allocation2 + $0x10] sm:$0xf]  ;;  %v1868_v59 = vld [vmem:[#allocation2 + $0x6c] sm:$0xf]  ;;  %v2117_v1 = vld [vmem:[#allocation2 + $0x14] sm:$0x1] }
 0x11a   :  { %v1845_v10 = vsel %vm13916_vm4, %v1253_v2, %v1844_v44  ;;  %1850 = vst [vmem:[#allocation2 + $0x4c] sm:$0xf] %v1269_v7  ;;  %1853 = vst [vmem:[#allocation2 + $0x50] sm:$0x1] %v1852_v8  ;;  %v1294_v14 = vor.u32 %v1292_v58, %v1291_v3  ;;  %v1295_v16 = vrot.slane %v1291_v3, 4  ;;  %v1277_v17 = vor.u32 %v1275_v60, %v1274_v4 }
 0x11b   :  { %1843 = vst [vmem:[#allocation2 + $0x40] sm:$0xf] %v1252_v9  ;;  %1846 = vst [vmem:[#allocation2 + $0x44] sm:$0x1] %v1845_v10  ;;  %v1278_v18 = vrot.slane %v1274_v4, 4  ;;  %v1297_v20 = vshrl.u32 %v11600_v5, 16  ;;  %v732_v33 = vadd.f32 %v12069_v56, %v14094_v13  ;;  %v724_v34 = vadd.f32 %v14094_v13, %v723_v61 }
 0x11c   :  { %v1300_v21 = vshll.u32 %v11600_v5, 16  ;;  %v1280_v22 = vshrl.u32 %v11598_v6, 16  ;;  %v1283_v23 = vshll.u32 %v11598_v6, 16  ;;  %v14179_v25 = vpop.f32.mrb[20].mxu0  ;;  %v1862_v24 = vsel %vm14108_vm12, %v1294_v14, %v1861_v11  ;;  %v1875_v58 = vld [vmem:[#allocation2 + $0x78] sm:$0xf] }
 0x11d   :  { %v1855_v26 = vsel %vm14108_vm12, %v1277_v17, %v1854_v12  ;;  %v929_v27 = vmax.f32 %v729_v54, 0.0  ;;  %v927_v28 = vmax.f32 %v721_v55, 0.0  ;;  %v14185_v29 = vpop.f32.mrb[21].mxu0  ;;  %1863 = vst [vmem:[#allocation2 + $0x60] sm:$0xf] %v1862_v24  ;;  %v1299_v30 = vrot.slane %v1297_v20, 7 }
 0x11e   :  { %1856 = vst [vmem:[#allocation2 + $0x54] sm:$0xf] %v1855_v26  ;;  %v1282_v32 = vrot.slane %v1280_v22, 7  ;;  %v14189_v35 = vpop.f32.mrb[22].mxu0  ;;  %v2176_v40 = vshrl.u32 %v2038_v19, 16  ;;  %v2179_v41 = vshll.u32 %v2038_v19, 16 }
 0x11f   :  { %v11603_v38 = vpack.c.bf16 %v929_v27, %v929_v27  ;;  %v11601_v39 = vpack.c.bf16 %v927_v28, %v927_v28  ;;  %v14191_v42 = vpop.f32.mrb[23].mxu0  ;;  %v1302_v43 = vor.u32 %v1300_v21, %v1299_v30  ;;  %v1304_v44 = vrot.slane %v1299_v30, 4  ;;  %v2041_v24 = vld [vmem:[#allocation2 + $0x1c] sm:$0xf] }
 0x120   :  { %v1285_v45 = vor.u32 %v1283_v23, %v1282_v32  ;;  %v1287_v46 = vrot.slane %v1282_v32, 4  ;;  %v930_v62 = vmax.f32 %v732_v33, 0.0  ;;  %v928_v63 = vmax.f32 %v724_v34, 0.0 }
 0x121   :  { %v1323_v49 = vshrl.u32 %v11603_v38, 16  ;;  %v1326_v51 = vshll.u32 %v11603_v38, 16  ;;  %v1306_v52 = vshrl.u32 %v11601_v39, 16  ;;  %v1309_v53 = vshll.u32 %v11601_v39, 16  ;;  %v1879_v39 = vld [vmem:[#allocation2 + $0x80] sm:$0x1] }
 0x122   :  { %v1303_v54 = vsel %vm14115_vm13, %v1295_v16, %v1302_v43  ;;  %v1866_v55 = vsel %vm13916_vm4, %v1304_v44, %v1865_v31  ;;  %v1286_v56 = vsel %vm14115_vm13, %v1278_v18, %v1285_v45  ;;  %v1859_v57 = vsel %vm13916_vm4, %v1287_v46, %v1858_v37  ;;  %v2040_v18 = vld [vmem:[#allocation2 + $0x18] sm:$0xf]  ;;  %v1872_v44 = vld [vmem:[#allocation2 + $0x74] sm:$0x1] }
 0x123   :  { %1864 = vst [vmem:[#allocation2 + $0x64] sm:$0xf] %v1303_v54  ;;  %1867 = vst [vmem:[#allocation2 + $0x68] sm:$0x1] %v1866_v55  ;;  %v1325_v60 = vrot.slane %v1323_v49, 7  ;;  %v1308_v61 = vrot.slane %v1306_v52, 7  ;;  %v11604_v12 = vpack.c.bf16 %v930_v62, %v930_v62  ;;  %v11602_v14 = vpack.c.bf16 %v928_v63, %v928_v63 }
 0x124   :  { %1857 = vst [vmem:[#allocation2 + $0x58] sm:$0xf] %v1286_v56  ;;  %1860 = vst [vmem:[#allocation2 + $0x5c] sm:$0x1] %v1859_v57  ;;  %v2178_v2 = vrot.slane %v2176_v40, 4  ;;  %v2181_v3 = vrot.slane %v2179_v41, 5 }
 0x125   :  { %v2185_v4 = vshll.u32 %v2039_v47, 16  ;;  %v2189_v5 = vshrl.u32 %v2039_v47, 16  ;;  %v14201_v6 = vpop.f32.mrb[24].mxu0  ;;  %v1328_v7 = vor.u32 %v1326_v51, %v1325_v60  ;;  %v1329_v8 = vrot.slane %v1325_v60, 4  ;;  %v2118_v55 = vld [vmem:[#allocation2 + $0x20] sm:$0x1] }
 0x126   :  { %v1311_v9 = vor.u32 %v1309_v53, %v1308_v61  ;;  %v1312_v10 = vrot.slane %v1308_v61, 4  ;;  %v14203_v11 = vpop.f32.mrb[25].mxu0  ;;  %v2182_v16 = vor.u32 %v2181_v3, %v2178_v2  ;;  %v2195_v23 = vshll.u32 %v2117_v1, 16  ;;  %v2042_v3 = vld [vmem:[#allocation2 + $0x24] sm:$0xf] }
 0x127   :  { %v2187_v17 = vrot.slane %v2185_v4, 5  ;;  %v14205_v19 = vpop.f32.mrb[26].mxu0  ;;  %v1876_v20 = vsel %vm14108_vm12, %v1328_v7, %v1875_v58  ;;  %v2191_v22 = vrot.slane %v2189_v5, 4  ;;  %v1331_v27 = vshrl.u32 %v11604_v12, 16 }
 0x128   :  { %v1869_v21 = vsel %vm14108_vm12, %v1311_v9, %v1868_v59  ;;  %v14211_v26 = vpop.f32.mrb[27].mxu0  ;;  %1877 = vst [vmem:[#allocation2 + $0x78] sm:$0xf] %v1876_v20  ;;  %v1334_v28 = vshll.u32 %v11604_v12, 16  ;;  %v1314_v30 = vshrl.u32 %v11602_v14, 16  ;;  %v1317_v31 = vshll.u32 %v11602_v14, 16 }
 0x129   :  { %1870 = vst [vmem:[#allocation2 + $0x6c] sm:$0xf] %v1869_v21  ;;  %v2183_v32 = vrot.slane %v2182_v16, 4  ;;  %v2192_v33 = vor.u32 %v2191_v22, %v2187_v17  ;;  %v2197_v34 = vrot.slane %v2195_v23, 5  ;;  %v2200_v37 = vshrl.u32 %v2040_v18, 16 }
 0x12a   :  { %v1333_v38 = vrot.slane %v1331_v27, 7  ;;  %v1316_v40 = vrot.slane %v1314_v30, 7  ;;  %v2203_v41 = vshll.u32 %v2040_v18, 16  ;;  %v2209_v43 = vshll.u32 %v2041_v24, 16  ;;  %v2043_v30 = vld [vmem:[#allocation2 + $0x28] sm:$0xf] }
 0x12b   :  { %v2188_v45 = vsel %vm14063_vm9, %v2183_v32, %v2187_v17  ;;  %v2193_v46 = vrot.slane %v2192_v33, 4  ;;  %v2202_v47 = vrot.slane %v2200_v37, 4  ;;  %v2213_v49 = vshrl.u32 %v2041_v24, 16  ;;  %v14215_v56 = vpop.f32.mrb[28].mxu0 }
 0x12c   :  { %v1336_v51 = vor.u32 %v1334_v28, %v1333_v38  ;;  %v1338_v52 = vrot.slane %v1333_v38, 4  ;;  %v1319_v53 = vor.u32 %v1317_v31, %v1316_v40  ;;  %v1321_v54 = vrot.slane %v1316_v40, 4  ;;  %v14219_v61 = vpop.f32.mrb[29].mxu0 }
 0x12d   :  { %v2198_v57 = vsel %vm14063_vm9, %v2193_v46, %v2197_v34  ;;  %v2205_v58 = vrot.slane %v2203_v41, 5  ;;  %v2211_v59 = vrot.slane %v2209_v43, 5  ;;  %v2215_v60 = vrot.slane %v2213_v49, 4  ;;  %v14229_v4 = vpop.f32.mrb[30].mxu0 }
 0x12e   :  { %v1337_v62 = vsel %vm14115_vm13, %v1329_v8, %v1336_v51  ;;  %v1880_v63 = vsel %vm13916_vm4, %v1338_v52, %v1879_v39  ;;  %v1320_v1 = vsel %vm14115_vm13, %v1312_v10, %v1319_v53  ;;  %v1873_v2 = vsel %vm13916_vm4, %v1321_v54, %v1872_v44  ;;  %v14231_v12 = vpop.f32.mrb[31].mxu0  ;;  %v2119_v39 = vld [vmem:[#allocation2 + $0x2c] sm:$0x1] }
 0x12f   :  { %1878 = vst [vmem:[#allocation2 + $0x7c] sm:$0xf] %v1337_v62  ;;  %1881 = vst [vmem:[#allocation2 + $0x80] sm:$0x1] %v1880_v63  ;;  %v11129_v5 = vcombine.low %v2188_v45, %v2198_v57  ;;  %v2206_v7 = vor.u32 %v2205_v58, %v2202_v47  ;;  %v2216_v9 = vor.u32 %v2215_v60, %v2211_v59  ;;  %v2219_v8 = vshll.u32 %v2118_v55, 16 }
 0x130   :  { %1871 = vst [vmem:[#allocation2 + $0x70] sm:$0xf] %v1320_v1  ;;  %1874 = vst [vmem:[#allocation2 + $0x74] sm:$0x1] %v1873_v2  ;;  %v745_v14 = vadd.f32 %v14179_v25, %v14094_v13  ;;  %v737_v10 = vadd.f32 %v14094_v13, %v14185_v29  ;;  %v748_v16 = vadd.f32 %v14189_v35, %v14094_v13  ;;  %v2224_v22 = vshrl.u32 %v2042_v3, 16 }
 0x131   :  { %v740_v17 = vadd.f32 %v14094_v13, %v14191_v42  ;;  %12131 = vmatmul.mubr.bf16.vlgmr.msra.gmra.mrb[64].mxu0 %v11129_v5  ;;  %v2207_v18 = vrot.slane %v2206_v7, 4  ;;  %v2217_v20 = vrot.slane %v2216_v9, 4  ;;  %v2221_v21 = vrot.slane %v2219_v8, 5  ;;  %v1882_v1 = vld [vmem:[#allocation2 + $0x84] sm:$0xf] }
 0x132   :  { %v933_v23 = vmax.f32 %v745_v14, 0.0  ;;  %v931_v24 = vmax.f32 %v737_v10, 0.0  ;;  %v934_v27 = vmax.f32 %v748_v16, 0.0  ;;  %v2226_v35 = vrot.slane %v2224_v22, 4  ;;  %v1893_v16 = vld [vmem:[#allocation2 + $0x98] sm:$0x1] }
 0x133   :  { %v932_v28 = vmax.f32 %v740_v17, 0.0  ;;  %v2212_v25 = vsel %vm14063_vm9, %v2207_v18, %v2211_v59  ;;  %v2222_v29 = vsel %vm14063_vm9, %v2217_v20, %v2221_v21  ;;  %v2227_v31 = vshll.u32 %v2042_v3, 16  ;;  %v14245_v37 = vpop.f32.mrb[32].mxu0  ;;  %v1889_v59 = vld [vmem:[#allocation2 + $0x90] sm:$0xf] }
 0x134   :  { %v11130_v32 = vcombine.low %v2212_v25, %v2222_v29  ;;  %v11607_v42 = vpack.c.bf16 %v933_v23, %v933_v23  ;;  %v11605_v33 = vpack.c.bf16 %v931_v24, %v931_v24  ;;  %v11608_v34 = vpack.c.bf16 %v934_v27, %v934_v27  ;;  %v14247_v44 = vpop.f32.mrb[33].mxu0  ;;  %v1886_v17 = vld [vmem:[#allocation2 + $0x8c] sm:$0x1]  ;;  %v5479_v23 = vld [vmem:[#allocation2 + $0x24] sm:$0xf] }
 0x135   :  { %v11606_v38 = vpack.c.bf16 %v932_v28, %v932_v28  ;;  %v2229_v40 = vrot.slane %v2227_v31, 5  ;;  %v2233_v41 = vshll.u32 %v2043_v30, 16  ;;  %v2237_v43 = vshrl.u32 %v2043_v30, 16  ;;  %v14249_v51 = vpop.f32.mrb[34].mxu0  ;;  %v2044_v24 = vld [vmem:[#allocation2 + $0x30] sm:$0xf] }
 0x136   :  { %12134 = vmatprep.mubr.bf16.mxu0 %v11130_v32  ;;  %v1357_v45 = vshrl.u32 %v11607_v42, 16  ;;  %v1360_v46 = vshll.u32 %v11607_v42, 16  ;;  %v1340_v47 = vshrl.u32 %v11605_v33, 16  ;;  %v1343_v49 = vshll.u32 %v11605_v33, 16  ;;  %v14251_v57 = vpop.f32.mrb[35].mxu0 }
 0x137   :  { %v1365_v52 = vshrl.u32 %v11608_v34, 16  ;;  %v1368_v53 = vshll.u32 %v11608_v34, 16  ;;  %v1348_v54 = vshrl.u32 %v11606_v38, 16  ;;  %v1351_v55 = vshll.u32 %v11606_v38, 16  ;;  %v5480_v29 = vld [vmem:[#allocation2 + $0x28] sm:$0xf] }
 0x138   :  { %v1359_v58 = vrot.slane %v1357_v45, 7  ;;  %v1342_v60 = vrot.slane %v1340_v47, 7  ;;  %v2230_v62 = vor.u32 %v2229_v40, %v2226_v35  ;;  %v2235_v63 = vrot.slane %v2233_v41, 5  ;;  %v5481_v35 = vld [vmem:[#allocation2 + $0x2c] sm:$0x1] }
 0x139   :  { %v1367_v2 = vrot.slane %v1365_v52, 7  ;;  %v1350_v3 = vrot.slane %v1348_v54, 7  ;;  %v2239_v5 = vrot.slane %v2237_v43, 4  ;;  %v2243_v7 = vshll.u32 %v2119_v39, 16  ;;  %v2045_v38 = vld [vmem:[#allocation2 + $0x34] sm:$0xf] }
 0x13a   :  { %v1362_v9 = vor.u32 %v1360_v46, %v1359_v58  ;;  %v1363_v8 = vrot.slane %v1359_v58, 4  ;;  %v1345_v14 = vor.u32 %v1343_v49, %v1342_v60  ;;  %v1346_v10 = vrot.slane %v1342_v60, 4 }
 0x13b   :  { %v1370_v18 = vor.u32 %v1368_v53, %v1367_v2  ;;  %v1372_v20 = vrot.slane %v1367_v2, 4  ;;  %v1353_v21 = vor.u32 %v1351_v55, %v1350_v3  ;;  %v1355_v22 = vrot.slane %v1350_v3, 4  ;;  %v14257_v31 = vpop.f32.mrb[36].mxu0 }
 0x13c   :  { %v1890_v27 = vsel %vm14108_vm12, %v1362_v9, %v1889_v59  ;;  %v1883_v28 = vsel %vm14108_vm12, %v1345_v14, %v1882_v1  ;;  %v2231_v30 = vrot.slane %v2230_v62, 4  ;;  %v2240_v25 = vor.u32 %v2239_v5, %v2235_v63  ;;  %v14267_v39 = vpop.f32.mrb[37].mxu0  ;;  %v2120_v59 = vld [vmem:[#allocation2 + $0x38] sm:$0x1]  ;;  %v5482_v62 = vld [vmem:[#allocation2 + $0x30] sm:$0xf] }
 0x13d   :  { %1891 = vst [vmem:[#allocation2 + $0x90] sm:$0xf] %v1890_v27  ;;  %1884 = vst [vmem:[#allocation2 + $0x84] sm:$0xf] %v1883_v28  ;;  %v1371_v32 = vsel %vm14115_vm13, %v1363_v8, %v1370_v18  ;;  %v1894_v42 = vsel %vm13916_vm4, %v1372_v20, %v1893_v16  ;;  %v1354_v33 = vsel %vm14115_vm13, %v1346_v10, %v1353_v21  ;;  %v2245_v41 = vrot.slane %v2243_v7, 5  ;;  %v14269_v45 = vpop.f32.mrb[38].mxu0 }
 0x13e   :  { %v1887_v34 = vsel %vm13916_vm4, %v1355_v22, %v1886_v17  ;;  %1892 = vst [vmem:[#allocation2 + $0x94] sm:$0xf] %v1371_v32  ;;  %1895 = vst [vmem:[#allocation2 + $0x98] sm:$0x1] %v1894_v42  ;;  %v2241_v40 = vrot.slane %v2240_v25, 4  ;;  %v5618_v43 = vshrl.u32 %v5479_v23, 16  ;;  %v2236_v54 = vsel %vm14063_vm9, %v2231_v30, %v2235_v63 }
 0x13f   :  { %1885 = vst [vmem:[#allocation2 + $0x88] sm:$0xf] %v1354_v33  ;;  %1888 = vst [vmem:[#allocation2 + $0x8c] sm:$0x1] %v1887_v34  ;;  %v5621_v46 = vshll.u32 %v5479_v23, 16  ;;  %v5627_v47 = vshll.u32 %v5480_v29, 16 }
 0x140   :  { %v5631_v49 = vshrl.u32 %v5480_v29, 16  ;;  %v5637_v52 = vshll.u32 %v5481_v35, 16  ;;  %v14271_v53 = vpop.f32.mrb[39].mxu0  ;;  %v2246_v55 = vsel %vm14063_vm9, %v2241_v40, %v2245_v41  ;;  %v5620_v58 = vrot.slane %v5618_v43, 4  ;;  %v5483_v18 = vld [vmem:[#allocation2 + $0x34] sm:$0xf] }
 0x141   :  { %v2248_v60 = vshrl.u32 %v2044_v24, 16  ;;  %v11131_v1 = vcombine.low %v2236_v54, %v2246_v55  ;;  %v5623_v2 = vrot.slane %v5621_v46, 5  ;;  %v5629_v3 = vrot.slane %v5627_v47, 5  ;;  %v5484_v35 = vld [vmem:[#allocation2 + $0x38] sm:$0x1] }
 0x142   :  { %v5633_v5 = vrot.slane %v5631_v49, 4  ;;  %v5639_v7 = vrot.slane %v5637_v52, 5  ;;  %v2251_v8 = vshll.u32 %v2044_v24, 16  ;;  %v2257_v14 = vshll.u32 %v2045_v38, 16 }
 0x143   :  { %v2250_v9 = vrot.slane %v2248_v60, 4  ;;  %12135 = vmatmul.mubr.bf16.gmra.mrb[68].mxu0 %v11131_v1  ;;  %v5624_v10 = vor.u32 %v5623_v2, %v5620_v58  ;;  %v2261_v17 = vshrl.u32 %v2045_v38, 16  ;;  %v2267_v63 = vshll.u32 %v2120_v59, 16  ;;  %v14277_v33 = vpop.f32.mrb[40].mxu0 }
 0x144   :  { %v5634_v16 = vor.u32 %v5633_v5, %v5629_v3  ;;  %v2253_v20 = vrot.slane %v2251_v8, 5  ;;  %v2259_v21 = vrot.slane %v2257_v14, 5  ;;  %v5642_v22 = vshrl.u32 %v5482_v62, 16  ;;  %v14283_v43 = vpop.f32.mrb[41].mxu0  ;;  %v2046_v5 = vld [vmem:[#allocation2 + $0x3c] sm:$0xf] }
 0x145   :  { %v5645_v23 = vshll.u32 %v5482_v62, 16  ;;  %v5625_v27 = vrot.slane %v5624_v10, 4  ;;  %v2263_v30 = vrot.slane %v2261_v17, 4  ;;  %v2269_v25 = vrot.slane %v2267_v63, 5  ;;  %v14287_v60 = vpop.f32.mrb[42].mxu0 }
 0x146   :  { %v5635_v28 = vrot.slane %v5634_v16, 4  ;;  %v2254_v29 = vor.u32 %v2253_v20, %v2250_v9  ;;  %v5644_v32 = vrot.slane %v5642_v22, 4  ;;  %v5651_v24 = vshll.u32 %v5483_v18, 16  ;;  %v14299_v10 = vld [vmem:[#allocation2 + $0x40] sm:$0xf] }
 0x147   :  { %v5647_v42 = vrot.slane %v5645_v23, 5  ;;  %v5630_v34 = vsel %vm14063_vm9, %v5625_v27, %v5629_v3  ;;  %v2264_v40 = vor.u32 %v2263_v30, %v2259_v21  ;;  %v5655_v41 = vshrl.u32 %v5483_v18, 16 }
 0x148   :  { %v5640_v38 = vsel %vm14063_vm9, %v5635_v28, %v5639_v7  ;;  %v2255_v47 = vrot.slane %v2254_v29, 4  ;;  %v5653_v52 = vrot.slane %v5651_v24, 5  ;;  %v5661_v58 = vshll.u32 %v5484_v35, 16  ;;  %v14295_v7 = vpop.f32.mrb[43].mxu0 }
 0x149   :  { %v11322_v46 = vcombine.low %v5630_v34, %v5640_v38  ;;  %v5648_v49 = vor.u32 %v5647_v42, %v5644_v32  ;;  %v2265_v54 = vrot.slane %v2264_v40, 4  ;;  %v5657_v55 = vrot.slane %v5655_v41, 4  ;;  %v1903_v42 = vld [vmem:[#allocation2 + $0xa8] sm:$0xf]  ;;  %v13420_v40 = vld [vmem:[#allocation3 + $0x148] sm:$0xff]  }
 0x14a   :  { %v761_v59 = vadd.f32 %v14201_v6, %v14094_v13  ;;  %v2260_v62 = vsel %vm14063_vm9, %v2255_v47, %v2259_v21  ;;  %v753_v2 = vadd.f32 %v14094_v13, %v14203_v11  ;;  %v764_v3 = vadd.f32 %v14205_v19, %v14094_v13 }
 0x14b   :  { %12454 = vmatprep.mubr.bf16.mxu1 %v11322_v46  ;;  %v5649_v1 = vrot.slane %v5648_v49, 4  ;;  %v2270_v9 = vsel %vm14063_vm9, %v2265_v54, %v2269_v25  ;;  %v5658_v6 = vor.u32 %v5657_v55, %v5653_v52  ;;  %v5663_v8 = vrot.slane %v5661_v58, 5  ;;  %v1907_v46 = vld [vmem:[#allocation2 + $0xb0] sm:$0x1]  ;;  %v2121_v49 = vld [vmem:[#allocation2 + $0x44] sm:$0x1] }
 0x14c   :  { %v937_v14 = vmax.f32 %v761_v59, 0.0  ;;  %v11132_v16 = vcombine.low %v2260_v62, %v2270_v9  ;;  %v935_v63 = vmax.f32 %v753_v2, 0.0  ;;  %v938_v11 = vmax.f32 %v764_v3, 0.0  ;;  %v13571_v62 = vld [vmem:[#allocation3 + $0x140] sm:$0xff]   ;;  %v5485_v9 = vld [vmem:[#allocation2 + $0x3c] sm:$0xf] }
 0x14d   :  { %v5654_v17 = vsel %vm14063_vm9, %v5649_v1, %v5653_v52  ;;  %v5659_v18 = vrot.slane %v5658_v6, 4  ;;  %v756_v19 = vadd.f32 %v14094_v13, %v14211_v26  ;;  %v2272_v21 = vshrl.u32 %v2046_v5, 16  ;;  %v1896_v26 = vld [vmem:[#allocation2 + $0x9c] sm:$0xf]  ;;  %v5486_v6 = vld [vmem:[#allocation2 + $0x40] sm:$0xf] }
 0x14e   :  { %v11611_v20 = vpack.c.bf16 %v937_v14, %v937_v14  ;;  %12138 = vmatprep.mubr.bf16.mxu0 %v11132_v16  ;;  %v11609_v22 = vpack.c.bf16 %v935_v63, %v935_v63  ;;  %v11612_v23 = vpack.c.bf16 %v938_v11, %v938_v11  ;;  %v2275_v27 = vshll.u32 %v2046_v5, 16  ;;  %v1900_v11 = vld [vmem:[#allocation2 + $0xa4] sm:$0x1] }
 0x14f   :  { %v2281_v28 = vshll.u32 %v14299_v10, 16  ;;  %v5664_v30 = vsel %vm14063_vm9, %v5659_v18, %v5663_v8  ;;  %v936_v35 = vmax.f32 %v756_v19, 0.0  ;;  %v2274_v52 = vrot.slane %v2272_v21, 4  ;;  %v13421_v8 = vld [vmem:[#allocation3 + $0x150] sm:$0xff]  }
 0x150   :  { %v1391_v25 = vshrl.u32 %v11611_v20, 16  ;;  %v1394_v29 = vshll.u32 %v11611_v20, 16  ;;  %v11323_v32 = vcombine.low %v5654_v17, %v5664_v30  ;;  %v1374_v24 = vshrl.u32 %v11609_v22, 16  ;;  %v5487_v30 = vld [vmem:[#allocation2 + $0x44] sm:$0x1] }
 0x151   :  { %v1377_v34 = vshll.u32 %v11609_v22, 16  ;;  %v1399_v38 = vshrl.u32 %v11612_v23, 16  ;;  %v1402_v41 = vshll.u32 %v11612_v23, 16  ;;  %v11610_v47 = vpack.c.bf16 %v936_v35, %v936_v35 }
 0x152   :  { %v1393_v13 = vrot.slane %v1391_v25, 7  ;;  %12455 = vmatmul.mubr.bf16.vlgmr.msra.gmra.mrb[0].mxu1 %v11323_v32  ;;  %v1376_v54 = vrot.slane %v1374_v24, 7  ;;  %v2277_v58 = vrot.slane %v2275_v27, 5  ;;  %v14308_v59 = vrot.slane %v2281_v28, 5  ;;  %v2048_v25 = vld [vmem:[#allocation2 + $0x48] sm:$0xf] }
 0x153   :  { %v1401_v55 = vrot.slane %v1399_v38, 7  ;;  %12515 = vmatpush3.bf16.msra.mxu1 %v13571_v62  ;;  %v1382_v3 = vshrl.u32 %v11610_v47, 16  ;;  %v1385_v5 = vshll.u32 %v11610_v47, 16  ;;  %v2285_v21 = vshrl.u32 %v14299_v10, 16  ;;  %v2049_v47 = vld [vmem:[#allocation2 + $0x4c] sm:$0xf] }
 0x154   :  { %v1396_v1 = vor.u32 %v1394_v29, %v1393_v13  ;;  %v1397_v2 = vrot.slane %v1393_v13, 4  ;;  %v1379_v14 = vor.u32 %v1377_v34, %v1376_v54  ;;  %v1380_v16 = vrot.slane %v1376_v54, 4  ;;  %12516 = vmatprep.subr.bf16.mxu1 %v13420_v40  ;;  %v5488_v62 = vld [vmem:[#allocation2 + $0x48] sm:$0xf] }
 0x155   :  { %v1404_v17 = vor.u32 %v1402_v41, %v1401_v55  ;;  %v1406_v63 = vrot.slane %v1401_v55, 4  ;;  %v1384_v20 = vrot.slane %v1382_v3, 7  ;;  %v2278_v19 = vor.u32 %v2277_v58, %v2274_v52  ;;  %v2122_v58 = vld [vmem:[#allocation2 + $0x50] sm:$0x1] }
 0x156   :  { %v1904_v18 = vsel %vm14108_vm12, %v1396_v1, %v1903_v42  ;;  %v1897_v22 = vsel %vm14108_vm12, %v1379_v14, %v1896_v26  ;;  %v2291_v28 = vshll.u32 %v2121_v49, 16  ;;  %v2287_v10 = vrot.slane %v2285_v21, 4  ;;  %v14327_v49 = vpop.f32.mrb[44].mxu0 }
 0x157   :  { %1905 = vst [vmem:[#allocation2 + $0xa8] sm:$0xf] %v1904_v18  ;;  %v1405_v23 = vsel %vm14115_vm13, %v1397_v2, %v1404_v17  ;;  %v1908_v27 = vsel %vm13916_vm4, %v1406_v63, %v1907_v46  ;;  %1898 = vst [vmem:[#allocation2 + $0x9c] sm:$0xf] %v1897_v22  ;;  %v1387_v29 = vor.u32 %v1385_v5, %v1384_v20  ;;  %v1389_v35 = vrot.slane %v1384_v20, 4 }
 0x158   :  { %1906 = vst [vmem:[#allocation2 + $0xac] sm:$0xf] %v1405_v23  ;;  %1909 = vst [vmem:[#allocation2 + $0xb0] sm:$0x1] %v1908_v27  ;;  %v2279_v32 = vrot.slane %v2278_v19, 4  ;;  %12517 = vmatpush3.bf16.msra.mxu1 %v13420_v40  ;;  %v2293_v42 = vrot.slane %v2291_v28, 5  ;;  %v2288_v46 = vor.u32 %v2287_v10, %v14308_v59 }
 0x159   :  { %v5666_v24 = vshrl.u32 %v5485_v9, 16  ;;  %v5669_v34 = vshll.u32 %v5485_v9, 16  ;;  %v5675_v38 = vshll.u32 %v5486_v6, 16  ;;  %12518 = vmatprep.subr.bf16.mxu1 %v13421_v8  ;;  %v1388_v13 = vsel %vm14115_vm13, %v1380_v16, %v1387_v29  ;;  %v5489_v20 = vld [vmem:[#allocation2 + $0x4c] sm:$0xf] }
 0x15a   :  { %v1901_v26 = vsel %vm13916_vm4, %v1389_v35, %v1900_v11  ;;  %v2284_v41 = vsel %vm14063_vm9, %v2279_v32, %v14308_v59  ;;  %1899 = vst [vmem:[#allocation2 + $0xa0] sm:$0xf] %v1388_v13  ;;  %v5679_v55 = vshrl.u32 %v5486_v6, 16  ;;  %v2289_v1 = vrot.slane %v2288_v46, 4  ;;  %v5490_v35 = vld [vmem:[#allocation2 + $0x50] sm:$0x1] }
 0x15b   :  { %1902 = vst [vmem:[#allocation2 + $0xa4] sm:$0x1] %v1901_v26  ;;  %v5668_v40 = vrot.slane %v5666_v24, 4  ;;  %v5671_v52 = vrot.slane %v5669_v34, 5  ;;  %v5677_v54 = vrot.slane %v5675_v38, 5  ;;  %v5685_v2 = vshll.u32 %v5487_v30, 16 }
 0x15c   :  { %v2296_v3 = vshrl.u32 %v2048_v25, 16  ;;  %v2299_v5 = vshll.u32 %v2048_v25, 16  ;;  %12519 = vmatpush3.bf16.msra.mxu1 %v13421_v8  ;;  %v5681_v14 = vrot.slane %v5679_v55, 4  ;;  %v2305_v16 = vshll.u32 %v2049_v47, 16  ;;  %v14331_v8 = vpop.f32.mrb[45].mxu0 }
 0x15d   :  { %v5672_v9 = vor.u32 %v5671_v52, %v5668_v40  ;;  %v2309_v59 = vshrl.u32 %v2049_v47, 16  ;;  %v2294_v17 = vsel %vm14063_vm9, %v2289_v1, %v2293_v42  ;;  %v5687_v63 = vrot.slane %v5685_v2, 5  ;;  %v13422_v42 = vld [vmem:[#allocation3 + $0x158] sm:$0xff]   ;;  %v14335_v26 = vpop.f32.mrb[46].mxu0 }
 0x15e   :  { %v2298_v11 = vrot.slane %v2296_v3, 4  ;;  %v2301_v18 = vrot.slane %v2299_v5, 5  ;;  %v11133_v19 = vcombine.low %v2284_v41, %v2294_v17  ;;  %v5682_v21 = vor.u32 %v5681_v14, %v5677_v54  ;;  %12520 = vmatprep.subr.bf16.mxu1 %v13422_v42  ;;  %v14339_v52 = vpop.f32.mrb[47].mxu0  ;;  %v14346_v3 = vld [vmem:[%s16170_s2] ss:$0 sm:$0xff] }
 0x15f   :  { %v5673_v6 = vrot.slane %v5672_v9, 4  ;;  %v2307_v22 = vrot.slane %v2305_v16, 5  ;;  %v2311_v27 = vrot.slane %v2309_v59, 4  ;;  %v2315_v28 = vshll.u32 %v2122_v58, 16  ;;  %v2050_v14 = vld [vmem:[#allocation2 + $0x54] sm:$0xf] }
 0x160   :  { %v2302_v23 = vor.u32 %v2301_v18, %v2298_v11  ;;  %v5690_v30 = vshrl.u32 %v5488_v62, 16  ;;  %12139 = vmatmul.mubr.bf16.gmra.mrb[72].mxu0 %v11133_v19  ;;  %v5683_v29 = vrot.slane %v5682_v21, 4  ;;  %v5693_v32 = vshll.u32 %v5488_v62, 16  ;;  %12521 = vmatpush3.bf16.msra.mxu1 %v13422_v42 }
 0x161   :  { %v5678_v25 = vsel %vm14063_vm9, %v5673_v6, %v5677_v54  ;;  %v5699_v10 = vshll.u32 %v5489_v20, 16  ;;  %v2312_v34 = vor.u32 %v2311_v27, %v2307_v22  ;;  %v2317_v38 = vrot.slane %v2315_v28, 5  ;;  %v2051_v28 = vld [vmem:[#allocation2 + $0x58] sm:$0xf] }
 0x162   :  { %v2303_v24 = vrot.slane %v2302_v23, 4  ;;  %v5692_v13 = vrot.slane %v5690_v30, 4  ;;  %v5688_v41 = vsel %vm14063_vm9, %v5683_v29, %v5687_v63  ;;  %v5695_v46 = vrot.slane %v5693_v32, 5 }
 0x163   :  { %v5701_v47 = vrot.slane %v5699_v10, 5  ;;  %v5703_v40 = vshrl.u32 %v5489_v20, 16  ;;  %v11324_v54 = vcombine.low %v5678_v25, %v5688_v41  ;;  %v2313_v58 = vrot.slane %v2312_v34, 4  ;;  %v1917_v34 = vld [vmem:[#allocation2 + $0xc0] sm:$0xf] }
 0x164   :  { %v2308_v55 = vsel %vm14063_vm9, %v2303_v24, %v2307_v22  ;;  %v5709_v62 = vshll.u32 %v5490_v35, 16  ;;  %v5696_v1 = vor.u32 %v5695_v46, %v5692_v13  ;;  %v777_v5 = vadd.f32 %v14346_v3, %v14215_v56 }
 0x165   :  { %v5705_v2 = vrot.slane %v5703_v40, 4  ;;  %v769_v9 = vadd.f32 %v14346_v3, %v14219_v61  ;;  %12458 = vmatprep.mubr.bf16.mxu1 %v11324_v54  ;;  %v2318_v16 = vsel %vm14063_vm9, %v2313_v58, %v2317_v38  ;;  %v780_v17 = vadd.f32 %v14346_v3, %v14229_v4  ;;  %v1921_v54 = vld [vmem:[#allocation2 + $0xc8] sm:$0x1] }
 0x166   :  { %v5711_v59 = vrot.slane %v5709_v62, 5  ;;  %v772_v63 = vadd.f32 %v14346_v3, %v14231_v12  ;;  %v11134_v11 = vcombine.low %v2308_v55, %v2318_v16  ;;  %v5697_v18 = vrot.slane %v5696_v1, 4 }
 0x167   :  { %v5706_v20 = vor.u32 %v5705_v2, %v5701_v47  ;;  %v941_v19 = vmax.f32 %v777_v5, 0.0  ;;  %v939_v56 = vmax.f32 %v769_v9, 0.0  ;;  %v942_v6 = vmax.f32 %v780_v17, 0.0  ;;  %v1914_v2 = vld [vmem:[#allocation2 + $0xbc] sm:$0x1] }
 0x168   :  { %v940_v21 = vmax.f32 %v772_v63, 0.0  ;;  %v2320_v61 = vshrl.u32 %v2050_v14, 16  ;;  %12142 = vmatprep.mubr.bf16.mxu0 %v11134_v11  ;;  %v5702_v22 = vsel %vm14063_vm9, %v5697_v18, %v5701_v47  ;;  %v2323_v30 = vshll.u32 %v2050_v14, 16  ;;  %v1910_v47 = vld [vmem:[#allocation2 + $0xb4] sm:$0xf] }
 0x169   :  { %v5707_v23 = vrot.slane %v5706_v20, 4  ;;  %v11615_v27 = vpack.c.bf16 %v941_v19, %v941_v19  ;;  %v11613_v4 = vpack.c.bf16 %v939_v56, %v939_v56  ;;  %v11616_v25 = vpack.c.bf16 %v942_v6, %v942_v6  ;;  %v2123_v5 = vld [vmem:[#allocation2 + $0x5c] sm:$0x1]  ;;  %v5491_v11 = vld [vmem:[#allocation2 + $0x54] sm:$0xf] }
 0x16a   :  { %v11614_v29 = vpack.c.bf16 %v940_v21, %v940_v21  ;;  %v2322_v12 = vrot.slane %v2320_v61, 4  ;;  %v2325_v42 = vrot.slane %v2323_v30, 5  ;;  %v2329_v14 = vshll.u32 %v2051_v28, 16  ;;  %v5492_v18 = vld [vmem:[#allocation2 + $0x58] sm:$0xf] }
 0x16b   :  { %v5712_v35 = vsel %vm14063_vm9, %v5707_v23, %v5711_v59  ;;  %v1425_v32 = vshrl.u32 %v11615_v27, 16  ;;  %v1428_v10 = vshll.u32 %v11615_v27, 16  ;;  %v1408_v38 = vshrl.u32 %v11613_v4, 16  ;;  %v5493_v21 = vld [vmem:[#allocation2 + $0x5c] sm:$0x1] }
 0x16c   :  { %v11325_v24 = vcombine.low %v5702_v22, %v5712_v35  ;;  %v1411_v13 = vshll.u32 %v11613_v4, 16  ;;  %v1433_v41 = vshrl.u32 %v11616_v25, 16  ;;  %v1436_v40 = vshll.u32 %v11616_v25, 16  ;;  %v2052_v30 = vld [vmem:[#allocation2 + $0x60] sm:$0xf] }
 0x16d   :  { %v1427_v46 = vrot.slane %v1425_v32, 7  ;;  %v1416_v55 = vshrl.u32 %v11614_v29, 16  ;;  %v1419_v58 = vshll.u32 %v11614_v29, 16  ;;  %v1410_v62 = vrot.slane %v1408_v38, 7 }
 0x16e   :  { %12459 = vmatmul.mubr.bf16.gmra.mrb[4].mxu1 %v11325_v24  ;;  %v1435_v1 = vrot.slane %v1433_v41, 7  ;;  %v2326_v9 = vor.u32 %v2325_v42, %v2322_v12  ;;  %v2333_v63 = vshrl.u32 %v2051_v28, 16  ;;  %v2331_v29 = vrot.slane %v2329_v14, 5  ;;  %v2053_v42 = vld [vmem:[#allocation2 + $0x64] sm:$0xf]  ;;  %v14374_v24 = vpop.f32.mrb[48].mxu0 }
 0x16f   :  { %v1430_v16 = vor.u32 %v1428_v10, %v1427_v46  ;;  %v1431_v59 = vrot.slane %v1427_v46, 4  ;;  %v1418_v17 = vrot.slane %v1416_v55, 7  ;;  %v1413_v20 = vor.u32 %v1411_v13, %v1410_v62 }
 0x170   :  { %v1414_v19 = vrot.slane %v1410_v62, 4  ;;  %v1438_v56 = vor.u32 %v1436_v40, %v1435_v1  ;;  %v1440_v6 = vrot.slane %v1435_v1, 4  ;;  %v2327_v27 = vrot.slane %v2326_v9, 4  ;;  %v2124_v1 = vld [vmem:[#allocation2 + $0x68] sm:$0x1] }
 0x171   :  { %v1918_v61 = vsel %vm14108_vm12, %v1430_v16, %v1917_v34  ;;  %v1421_v22 = vor.u32 %v1419_v58, %v1418_v17  ;;  %v1423_v23 = vrot.slane %v1418_v17, 4  ;;  %v1911_v4 = vsel %vm14108_vm12, %v1413_v20, %v1910_v47 }
 0x172   :  { %1919 = vst [vmem:[#allocation2 + $0xc0] sm:$0xf] %v1918_v61  ;;  %v1439_v28 = vsel %vm14115_vm13, %v1431_v59, %v1438_v56  ;;  %v1922_v25 = vsel %vm13916_vm4, %v1440_v6, %v1921_v54  ;;  %1912 = vst [vmem:[#allocation2 + $0xb4] sm:$0xf] %v1911_v4  ;;  %v2335_v32 = vrot.slane %v2333_v63, 4  ;;  %v2339_v10 = vshll.u32 %v2123_v5, 16 }
 0x173   :  { %1920 = vst [vmem:[#allocation2 + $0xc4] sm:$0xf] %v1439_v28  ;;  %1923 = vst [vmem:[#allocation2 + $0xc8] sm:$0x1] %v1922_v25  ;;  %v1422_v12 = vsel %vm14115_vm13, %v1414_v19, %v1421_v22  ;;  %v1915_v35 = vsel %vm13916_vm4, %v1423_v23, %v1914_v2  ;;  %v2332_v34 = vsel %vm14063_vm9, %v2327_v27, %v2331_v29  ;;  %v5714_v38 = vshrl.u32 %v5491_v11, 16  ;;  %v14378_v59 = vpop.f32.mrb[49].mxu0 }
 0x174   :  { %1913 = vst [vmem:[#allocation2 + $0xb8] sm:$0xf] %v1422_v12  ;;  %1916 = vst [vmem:[#allocation2 + $0xbc] sm:$0x1] %v1915_v35  ;;  %v5717_v13 = vshll.u32 %v5491_v11, 16  ;;  %v5723_v41 = vshll.u32 %v5492_v18, 16  ;;  %v2336_v46 = vor.u32 %v2335_v32, %v2331_v29 }
 0x175   :  { %v2341_v47 = vrot.slane %v2339_v10, 5  ;;  %v5727_v40 = vshrl.u32 %v5492_v18, 16  ;;  %v5733_v54 = vshll.u32 %v5493_v21, 16  ;;  %v5716_v55 = vrot.slane %v5714_v38, 4  ;;  %v5494_v19 = vld [vmem:[#allocation2 + $0x60] sm:$0xf] }
 0x176   :  { %v5719_v58 = vrot.slane %v5717_v13, 5  ;;  %v5725_v62 = vrot.slane %v5723_v41, 5  ;;  %v2344_v2 = vshrl.u32 %v2052_v30, 16  ;;  %v2337_v5 = vrot.slane %v2336_v46, 4  ;;  %v14380_v56 = vpop.f32.mrb[50].mxu0 }
 0x177   :  { %v5729_v9 = vrot.slane %v5727_v40, 4  ;;  %v5735_v14 = vrot.slane %v5733_v54, 5  ;;  %v2347_v16 = vshll.u32 %v2052_v30, 16  ;;  %v2353_v20 = vshll.u32 %v2053_v42, 16  ;;  %v5495_v22 = vld [vmem:[#allocation2 + $0x64] sm:$0xf] }
 0x178   :  { %v5720_v17 = vor.u32 %v5719_v58, %v5716_v55  ;;  %v2346_v63 = vrot.slane %v2344_v2, 4  ;;  %v2357_v11 = vshrl.u32 %v2053_v42, 16  ;;  %v2342_v18 = vsel %vm14063_vm9, %v2337_v5, %v2341_v47  ;;  %v14384_v28 = vpop.f32.mrb[51].mxu0  ;;  %v5496_v42 = vld [vmem:[#allocation2 + $0x68] sm:$0x1] }
 0x179   :  { %v5730_v6 = vor.u32 %v5729_v9, %v5725_v62  ;;  %v2349_v21 = vrot.slane %v2347_v16, 5  ;;  %v2363_v61 = vshll.u32 %v2124_v1, 16  ;;  %v11135_v23 = vcombine.low %v2332_v34, %v2342_v18  ;;  %v112_v41 = vld [vmem:[#allocation2 + $0xf0] sm:$0x1]  ;;  %v109_v54 = vld [vmem:[#allocation2 + $0xe4] sm:$0x1] }
 0x17a   :  { %v5721_v27 = vrot.slane %v5720_v17, 4  ;;  %v2355_v4 = vrot.slane %v2353_v20, 5  ;;  %v2359_v30 = vrot.slane %v2357_v11, 4  ;;  %v5738_v35 = vshrl.u32 %v5494_v19, 16  ;;  %v222_v17 = vld [vmem:[#allocation2 + $0xf8] sm:$0x1] }
 0x17b   :  { %v5731_v25 = vrot.slane %v5730_v6, 4  ;;  %v2350_v29 = vor.u32 %v2349_v21, %v2346_v63  ;;  %v2365_v12 = vrot.slane %v2363_v61, 5  ;;  %12143 = vmatmul.mubr.bf16.gmra.mrb[76].mxu0 %v11135_v23  ;;  %v5741_v38 = vshll.u32 %v5494_v19, 16  ;;  %v219_v19 = vld [vmem:[#allocation2 + $0xec] sm:$0x1] }
 0x17c   :  { %v5726_v32 = vsel %vm14063_vm9, %v5721_v27, %v5725_v62  ;;  %v2360_v10 = vor.u32 %v2359_v30, %v2355_v4  ;;  %v5747_v13 = vshll.u32 %v5495_v22, 16  ;;  %v5740_v47 = vrot.slane %v5738_v35, 4  ;;  %v2054_v18 = vld [vmem:[#allocation2 + $0x6c] sm:$0xf] }
 0x17d   :  { %v5736_v34 = vsel %vm14063_vm9, %v5731_v25, %v5735_v14  ;;  %v2351_v46 = vrot.slane %v2350_v29, 4  ;;  %v5751_v40 = vshrl.u32 %v5495_v22, 16  ;;  %v5743_v1 = vrot.slane %v5741_v38, 5 }
 0x17e   :  { %v11326_v55 = vcombine.low %v5726_v32, %v5736_v34  ;;  %v2361_v58 = vrot.slane %v2360_v10, 4  ;;  %v5749_v2 = vrot.slane %v5747_v13, 5  ;;  %v5757_v9 = vshll.u32 %v5496_v42, 16  ;;  %v2055_v10 = vld [vmem:[#allocation2 + $0x70] sm:$0xf] }
 0x17f   :  { %v2356_v5 = vsel %vm14063_vm9, %v2351_v46, %v2355_v4  ;;  %v5753_v62 = vrot.slane %v5751_v40, 4  ;;  %v113_v16 = vsel %vm13916_vm4, 0, %v112_v41  ;;  %v5744_v63 = vor.u32 %v5743_v1, %v5740_v47 }
 0x180   :  { %12462 = vmatprep.mubr.bf16.mxu1 %v11326_v55  ;;  %v2366_v14 = vsel %vm14063_vm9, %v2361_v58, %v2365_v12  ;;  %114 = vst [vmem:[#allocation2 + $0xf0] sm:$0x1] %v113_v16  ;;  %v793_v20 = vadd.f32 %v14346_v3, %v14245_v37  ;;  %v110_v11 = vsel %vm13916_vm4, 0, %v109_v54  ;;  %v5759_v61 = vrot.slane %v5757_v9, 5  ;;  %v13423_v54 = vld [vmem:[#allocation3] sm:$0xff]  }
 0x181   :  { %v11136_v6 = vcombine.low %v2356_v5, %v2366_v14  ;;  %v5754_v21 = vor.u32 %v5753_v62, %v5749_v2  ;;  %111 = vst [vmem:[#allocation2 + $0xe4] sm:$0x1] %v110_v11  ;;  %v785_v22 = vadd.f32 %v14346_v3, %v14247_v44  ;;  %v5745_v23 = vrot.slane %v5744_v63, 4  ;;  %12194 = vmatprep.subr.bf16.mxu0 %v13423_v54 }
 0x182   :  { %v945_v27 = vmax.f32 %v793_v20, 0.0  ;;  %v223_v4 = vsel %vm13991_vm6, 0, %v222_v17  ;;  %v796_v37 = vadd.f32 %v14346_v3, %v14249_v51  ;;  %v220_v29 = vsel %vm13991_vm6, 0, %v219_v19  ;;  %12195 = vmatpush3.bf16.msra.mxu0 %v13423_v54  ;;  %v2056_v54 = vld [vmem:[#allocation2 + $0x78] sm:$0xf] }
 0x183   :  { %12146 = vmatprep.mubr.bf16.mxu0 %v11136_v6  ;;  %v5755_v30 = vrot.slane %v5754_v21, 4  ;;  %v943_v25 = vmax.f32 %v785_v22, 0.0  ;;  %224 = vst [vmem:[#allocation2 + $0xf8] sm:$0x1] %v223_v4  ;;  %v788_v12 = vadd.f32 %v14346_v3, %v14251_v57  ;;  %v5750_v44 = vsel %vm14063_vm9, %v5745_v23, %v5749_v2  ;;  %221 = vst [vmem:[#allocation2 + $0xec] sm:$0x1] %v220_v29 }
 0x184   :  { %v11619_v35 = vpack.c.bf16 %v945_v27, %v945_v27  ;;  %v946_v32 = vmax.f32 %v796_v37, 0.0  ;;  %v2368_v42 = vshrl.u32 %v2054_v18, 16  ;;  %v2371_v41 = vshll.u32 %v2054_v18, 16  ;;  %v2125_v21 = vld [vmem:[#allocation2 + $0x74] sm:$0x1] }
 0x185   :  { %v5760_v51 = vsel %vm14063_vm9, %v5755_v30, %v5759_v61  ;;  %v11617_v38 = vpack.c.bf16 %v943_v25, %v943_v25  ;;  %v944_v13 = vmax.f32 %v788_v12, 0.0  ;;  %v2377_v20 = vshll.u32 %v2055_v10, 16 }
 0x186   :  { %v11327_v34 = vcombine.low %v5750_v44, %v5760_v51  ;;  %v1459_v46 = vshrl.u32 %v11619_v35, 16  ;;  %v1462_v47 = vshll.u32 %v11619_v35, 16  ;;  %v11620_v40 = vpack.c.bf16 %v946_v32, %v946_v32  ;;  %v5497_v35 = vld [vmem:[#allocation2 + $0x6c] sm:$0xf] }
 0x187   :  { %v1442_v57 = vshrl.u32 %v11617_v38, 16  ;;  %v1445_v55 = vshll.u32 %v11617_v38, 16  ;;  %v11618_v58 = vpack.c.bf16 %v944_v13, %v944_v13  ;;  %v2370_v1 = vrot.slane %v2368_v42, 4  ;;  %v1931_v16 = vld [vmem:[#allocation2 + $0xf0] sm:$0xf] }
 0x188   :  { %12463 = vmatmul.mubr.bf16.gmra.mrb[8].mxu1 %v11327_v34  ;;  %v1461_v2 = vrot.slane %v1459_v46, 7  ;;  %v1467_v5 = vshrl.u32 %v11620_v40, 16  ;;  %v1470_v62 = vshll.u32 %v11620_v40, 16  ;;  %v2373_v9 = vrot.slane %v2371_v41, 5  ;;  %v1924_v18 = vld [vmem:[#allocation2 + $0xe4] sm:$0xf] }
 0x189   :  { %v1444_v17 = vrot.slane %v1442_v57, 7  ;;  %v1450_v14 = vshrl.u32 %v11618_v58, 16  ;;  %v1453_v63 = vshll.u32 %v11618_v58, 16  ;;  %v2379_v37 = vrot.slane %v2377_v20, 5  ;;  %v5498_v13 = vld [vmem:[#allocation2 + $0x70] sm:$0xf] }
 0x18a   :  { %v1464_v11 = vor.u32 %v1462_v47, %v1461_v2  ;;  %v1465_v19 = vrot.slane %v1461_v2, 4  ;;  %v1469_v6 = vrot.slane %v1467_v5, 7  ;;  %v2374_v61 = vor.u32 %v2373_v9, %v2370_v1  ;;  %v1935_v27 = vld [vmem:[#allocation2 + $0xf8] sm:$0x1]  ;;  %v1928_v12 = vld [vmem:[#allocation2 + $0xec] sm:$0x1] }
 0x18b   :  { %v1447_v22 = vor.u32 %v1445_v55, %v1444_v17  ;;  %v1448_v23 = vrot.slane %v1444_v17, 4  ;;  %v1452_v4 = vrot.slane %v1450_v14, 7  ;;  %v2381_v38 = vshrl.u32 %v2055_v10, 16  ;;  %v5499_v40 = vld [vmem:[#allocation2 + $0x74] sm:$0x1] }
 0x18c   :  { %v1932_v30 = vsel %vm14108_vm12, %v1464_v11, %v1931_v16  ;;  %v1472_v25 = vor.u32 %v1470_v62, %v1469_v6  ;;  %v1474_v29 = vrot.slane %v1469_v6, 4  ;;  %v2375_v44 = vrot.slane %v2374_v61, 4  ;;  %v2057_v9 = vld [vmem:[#allocation2 + $0x7c] sm:$0xf]  ;;  %v5500_v20 = vld [vmem:[#allocation2 + $0x78] sm:$0xf] }
 0x18d   :  { %1933 = vst [vmem:[#allocation2 + $0xf0] sm:$0xf] %v1932_v30  ;;  %v1925_v32 = vsel %vm14108_vm12, %v1447_v22, %v1924_v18  ;;  %v1455_v42 = vor.u32 %v1453_v63, %v1452_v4  ;;  %v1457_v51 = vrot.slane %v1452_v4, 4  ;;  %v2387_v47 = vshll.u32 %v2125_v21, 16  ;;  %v2126_v6 = vld [vmem:[#allocation2 + $0x80] sm:$0x1] }
 0x18e   :  { %1926 = vst [vmem:[#allocation2 + $0xe4] sm:$0xf] %v1925_v32  ;;  %v1473_v41 = vsel %vm14115_vm13, %v1465_v19, %v1472_v25  ;;  %v1936_v34 = vsel %vm13916_vm4, %v1474_v29, %v1935_v27  ;;  %v2380_v46 = vsel %vm14063_vm9, %v2375_v44, %v2379_v37  ;;  %v2383_v55 = vrot.slane %v2381_v38, 4  ;;  %v14428_v4 = vpop.f32.mrb[52].mxu0  ;;  %v5501_v32 = vld [vmem:[#allocation2 + $0x7c] sm:$0xf] }
 0x18f   :  { %1934 = vst [vmem:[#allocation2 + $0xf4] sm:$0xf] %v1473_v41  ;;  %1937 = vst [vmem:[#allocation2 + $0xf8] sm:$0x1] %v1936_v34  ;;  %v1456_v57 = vsel %vm14115_vm13, %v1448_v23, %v1455_v42  ;;  %v1929_v10 = vsel %vm13916_vm4, %v1457_v51, %v1928_v12  ;;  %v5762_v58 = vshrl.u32 %v5497_v35, 16  ;;  %v2389_v1 = vrot.slane %v2387_v47, 5 }
 0x190   :  { %1927 = vst [vmem:[#allocation2 + $0xe8] sm:$0xf] %v1456_v57  ;;  %1930 = vst [vmem:[#allocation2 + $0xec] sm:$0x1] %v1929_v10  ;;  %v5765_v2 = vshll.u32 %v5497_v35, 16  ;;  %v5771_v5 = vshll.u32 %v5498_v13, 16  ;;  %v2384_v16 = vor.u32 %v2383_v55, %v2379_v37 }
 0x191   :  { %v5775_v62 = vshrl.u32 %v5498_v13, 16  ;;  %v5764_v17 = vrot.slane %v5762_v58, 4  ;;  %v5781_v14 = vshll.u32 %v5499_v40, 16  ;;  %v2392_v63 = vshrl.u32 %v2056_v54, 16  ;;  %v118_v34 = vld [vmem:[#allocation2 + $0x108] sm:$0x1] }
 0x192   :  { %v5767_v11 = vrot.slane %v5765_v2, 5  ;;  %v5773_v19 = vrot.slane %v5771_v5, 5  ;;  %v2395_v21 = vshll.u32 %v2056_v54, 16  ;;  %v2385_v61 = vrot.slane %v2384_v16, 4  ;;  %v5502_v54 = vld [vmem:[#allocation2 + $0x80] sm:$0x1] }
 0x193   :  { %v5777_v18 = vrot.slane %v5775_v62, 4  ;;  %v5783_v22 = vrot.slane %v5781_v14, 5  ;;  %v2394_v23 = vrot.slane %v2392_v63, 4  ;;  %v2401_v27 = vshll.u32 %v2057_v9, 16  ;;  %v115_v16 = vld [vmem:[#allocation2 + $0xfc] sm:$0x1] }
 0x194   :  { %v5768_v30 = vor.u32 %v5767_v11, %v5764_v17  ;;  %v2397_v29 = vrot.slane %v2395_v21, 5  ;;  %v2405_v12 = vshrl.u32 %v2057_v9, 16  ;;  %v2390_v37 = vsel %vm14063_vm9, %v2385_v61, %v2389_v1  ;;  %v228_v17 = vld [vmem:[#allocation2 + $0x110] sm:$0x1] }
 0x195   :  { %v5778_v25 = vor.u32 %v5777_v18, %v5773_v19  ;;  %v2403_v44 = vrot.slane %v2401_v27, 5  ;;  %v2411_v35 = vshll.u32 %v2126_v6, 16  ;;  %v5786_v42 = vshrl.u32 %v5500_v20, 16 }
 0x196   :  { %v11137_v51 = vcombine.low %v2380_v46, %v2390_v37  ;;  %v5769_v38 = vrot.slane %v5768_v30, 4  ;;  %v2398_v41 = vor.u32 %v2397_v29, %v2394_v23  ;;  %v2407_v47 = vrot.slane %v2405_v12, 4  ;;  %v14448_v29 = vpop.f32.mrb[53].mxu0 }
 0x197   :  { %v5779_v13 = vrot.slane %v5778_v25, 4  ;;  %v2413_v40 = vrot.slane %v2411_v35, 5  ;;  %v5788_v57 = vrot.slane %v5786_v42, 4  ;;  %v5789_v10 = vshll.u32 %v5500_v20, 16  ;;  %v2058_v35 = vld [vmem:[#allocation2 + $0x84] sm:$0xf] }
 0x198   :  { %12147 = vmatmul.mubr.bf16.gmra.mrb[80].mxu0 %v11137_v51  ;;  %v5774_v55 = vsel %vm14063_vm9, %v5769_v38, %v5773_v19  ;;  %v2399_v1 = vrot.slane %v2398_v41, 4  ;;  %v5795_v2 = vshll.u32 %v5501_v32, 16  ;;  %v2408_v46 = vor.u32 %v2407_v47, %v2403_v44  ;;  %v13424_v19 = vld [vmem:[#allocation3 + $0x160] sm:$0xff]  }
 0x199   :  { %v5784_v58 = vsel %vm14063_vm9, %v5779_v13, %v5783_v22  ;;  %v5791_v62 = vrot.slane %v5789_v10, 5  ;;  %v5799_v9 = vshrl.u32 %v5501_v32, 16  ;;  %v5805_v20 = vshll.u32 %v5502_v54, 16  ;;  %v225_v22 = vld [vmem:[#allocation2 + $0x104] sm:$0x1]  ;;  %12522 = vmatprep.subr.bf16.mxu1 %v13424_v19  ;;  %v14452_v32 = vpop.f32.mrb[54].mxu0 }
 0x19a   :  { %v11328_v5 = vcombine.low %v5774_v55, %v5784_v58  ;;  %v2404_v14 = vsel %vm14063_vm9, %v2399_v1, %v2403_v44  ;;  %v5797_v63 = vrot.slane %v5795_v2, 5  ;;  %v119_v11 = vsel %vm13916_vm4, 0, %v118_v34  ;;  %12523 = vmatpush3.bf16.msra.mxu1 %v13424_v19  ;;  %v14458_v13 = vpop.f32.mrb[55].mxu0  ;;  %v2059_v54 = vld [vmem:[#allocation2 + $0x88] sm:$0xf] }
 0x19b   :  { %v2409_v18 = vrot.slane %v2408_v46, 4  ;;  %v5792_v6 = vor.u32 %v5791_v62, %v5788_v57  ;;  %v5801_v21 = vrot.slane %v5799_v9, 4  ;;  %120 = vst [vmem:[#allocation2 + $0x108] sm:$0x1] %v119_v11  ;;  %v809_v61 = vadd.f32 %v14346_v3, %v14257_v31 }
 0x19c   :  { %12466 = vmatprep.mubr.bf16.mxu1 %v11328_v5  ;;  %v5807_v23 = vrot.slane %v5805_v20, 5  ;;  %v116_v27 = vsel %vm13916_vm4, 0, %v115_v16  ;;  %v801_v30 = vadd.f32 %v14346_v3, %v14267_v39  ;;  %v229_v25 = vsel %vm13991_vm6, 0, %v228_v17 }
 0x19d   :  { %v2414_v12 = vsel %vm14063_vm9, %v2409_v18, %v2413_v40  ;;  %v5793_v37 = vrot.slane %v5792_v6, 4  ;;  %v5802_v44 = vor.u32 %v5801_v21, %v5797_v63  ;;  %v949_v31 = vmax.f32 %v809_v61, 0.0  ;;  %117 = vst [vmem:[#allocation2 + $0xfc] sm:$0x1] %v116_v27  ;;  %230 = vst [vmem:[#allocation2 + $0x110] sm:$0x1] %v229_v25 }
 0x19e   :  { %v11138_v42 = vcombine.low %v2404_v14, %v2414_v12  ;;  %v947_v39 = vmax.f32 %v801_v30, 0.0  ;;  %v812_v51 = vadd.f32 %v14346_v3, %v14269_v45  ;;  %v226_v38 = vsel %vm13991_vm6, 0, %v225_v22 }
 0x19f   :  { %v5798_v41 = vsel %vm14063_vm9, %v5793_v37, %v5797_v63  ;;  %v5803_v34 = vrot.slane %v5802_v44, 4  ;;  %v11623_v47 = vpack.c.bf16 %v949_v31, %v949_v31  ;;  %227 = vst [vmem:[#allocation2 + $0x104] sm:$0x1] %v226_v38  ;;  %v804_v40 = vadd.f32 %v14346_v3, %v14271_v53  ;;  %v2127_v37 = vld [vmem:[#allocation2 + $0x8c] sm:$0x1] }
 0x1a0   :  { %12150 = vmatprep.mubr.bf16.mxu0 %v11138_v42  ;;  %v11621_v57 = vpack.c.bf16 %v947_v39, %v947_v39  ;;  %v950_v10 = vmax.f32 %v812_v51, 0.0  ;;  %v2416_v55 = vshrl.u32 %v2058_v35, 16  ;;  %v2419_v45 = vshll.u32 %v2058_v35, 16  ;;  %v5503_v31 = vld [vmem:[#allocation2 + $0x84] sm:$0xf] }
 0x1a1   :  { %v5808_v58 = vsel %vm14063_vm9, %v5803_v34, %v5807_v23  ;;  %v1493_v1 = vshrl.u32 %v11623_v47, 16  ;;  %v1496_v2 = vshll.u32 %v11623_v47, 16  ;;  %v948_v5 = vmax.f32 %v804_v40, 0.0 }
 0x1a2   :  { %v11329_v46 = vcombine.low %v5798_v41, %v5808_v58  ;;  %v1476_v62 = vshrl.u32 %v11621_v57, 16  ;;  %v1479_v9 = vshll.u32 %v11621_v57, 16  ;;  %v11624_v16 = vpack.c.bf16 %v950_v10, %v950_v10  ;;  %v1945_v20 = vld [vmem:[#allocation2 + $0x108] sm:$0xf] }
 0x1a3   :  { %v1495_v17 = vrot.slane %v1493_v1, 7  ;;  %v11622_v14 = vpack.c.bf16 %v948_v5, %v948_v5  ;;  %v2418_v63 = vrot.slane %v2416_v55, 4  ;;  %v2421_v53 = vrot.slane %v2419_v45, 5  ;;  %v5504_v1 = vld [vmem:[#allocation2 + $0x88] sm:$0xf] }
 0x1a4   :  { %12467 = vmatmul.mubr.bf16.gmra.mrb[12].mxu1 %v11329_v46  ;;  %v1478_v11 = vrot.slane %v1476_v62, 7  ;;  %v1501_v19 = vshrl.u32 %v11624_v16, 16  ;;  %v1504_v18 = vshll.u32 %v11624_v16, 16  ;;  %v2425_v6 = vshll.u32 %v2059_v54, 16  ;;  %v1938_v22 = vld [vmem:[#allocation2 + $0xfc] sm:$0xf] }
 0x1a5   :  { %v1498_v21 = vor.u32 %v1496_v2, %v1495_v17  ;;  %v1499_v61 = vrot.slane %v1495_v17, 4  ;;  %v1484_v23 = vshrl.u32 %v11622_v14, 16  ;;  %v1487_v27 = vshll.u32 %v11622_v14, 16  ;;  %v1949_v42 = vld [vmem:[#allocation2 + $0x110] sm:$0x1] }
 0x1a6   :  { %v1481_v30 = vor.u32 %v1479_v9, %v1478_v11  ;;  %v1482_v25 = vrot.slane %v1478_v11, 4  ;;  %v1503_v12 = vrot.slane %v1501_v19, 7  ;;  %v2422_v44 = vor.u32 %v2421_v53, %v2418_v63  ;;  %v1942_v40 = vld [vmem:[#allocation2 + $0x104] sm:$0x1]  ;;  %v5505_v46 = vld [vmem:[#allocation2 + $0x8c] sm:$0x1] }
 0x1a7   :  { %v1946_v35 = vsel %vm14108_vm12, %v1498_v21, %v1945_v20  ;;  %v1486_v39 = vrot.slane %v1484_v23, 7  ;;  %v2427_v51 = vrot.slane %v2425_v6, 5  ;;  %v2429_v38 = vshrl.u32 %v2059_v54, 16  ;;  %v2060_v9 = vld [vmem:[#allocation2 + $0x90] sm:$0xf] }
 0x1a8   :  { %1947 = vst [vmem:[#allocation2 + $0x108] sm:$0xf] %v1946_v35  ;;  %v1939_v41 = vsel %vm14108_vm12, %v1481_v30, %v1938_v22  ;;  %v1506_v34 = vor.u32 %v1504_v18, %v1503_v12  ;;  %v1508_v47 = vrot.slane %v1503_v12, 4  ;;  %v2423_v57 = vrot.slane %v2422_v44, 4  ;;  %v2061_v53 = vld [vmem:[#allocation2 + $0x94] sm:$0xf] }
 0x1a9   :  { %1940 = vst [vmem:[#allocation2 + $0xfc] sm:$0xf] %v1939_v41  ;;  %v1489_v10 = vor.u32 %v1487_v27, %v1486_v39  ;;  %v1491_v55 = vrot.slane %v1486_v39, 4  ;;  %v2431_v45 = vrot.slane %v2429_v38, 4  ;;  %v2435_v58 = vshll.u32 %v2127_v37, 16 }
 0x1aa   :  { %v1507_v2 = vsel %vm14115_vm13, %v1499_v61, %v1506_v34  ;;  %v1950_v54 = vsel %vm13916_vm4, %v1508_v47, %v1949_v42  ;;  %v2428_v5 = vsel %vm14063_vm9, %v2423_v57, %v2427_v51  ;;  %v5810_v62 = vshrl.u32 %v5503_v31, 16  ;;  %v2128_v61 = vld [vmem:[#allocation2 + $0x98] sm:$0x1]  ;;  %v5506_v37 = vld [vmem:[#allocation2 + $0x90] sm:$0xf] }
 0x1ab   :  { %1948 = vst [vmem:[#allocation2 + $0x10c] sm:$0xf] %v1507_v2  ;;  %1951 = vst [vmem:[#allocation2 + $0x110] sm:$0x1] %v1950_v54  ;;  %v1490_v16 = vsel %vm14115_vm13, %v1482_v25, %v1489_v10  ;;  %v1943_v17 = vsel %vm13916_vm4, %v1491_v55, %v1942_v40  ;;  %v2432_v14 = vor.u32 %v2431_v45, %v2427_v51  ;;  %v2437_v63 = vrot.slane %v2435_v58, 5 }
 0x1ac   :  { %1941 = vst [vmem:[#allocation2 + $0x100] sm:$0xf] %v1490_v16  ;;  %1944 = vst [vmem:[#allocation2 + $0x104] sm:$0x1] %v1943_v17  ;;  %v5812_v20 = vrot.slane %v5810_v62, 4  ;;  %v5813_v11 = vshll.u32 %v5503_v31, 16 }
 0x1ad   :  { %v5819_v19 = vshll.u32 %v5504_v1, 16  ;;  %v5823_v18 = vshrl.u32 %v5504_v1, 16  ;;  %v2433_v6 = vrot.slane %v2432_v14, 4  ;;  %v5829_v21 = vshll.u32 %v5505_v46, 16  ;;  %v5507_v51 = vld [vmem:[#allocation2 + $0x94] sm:$0xf] }
 0x1ae   :  { %v2440_v22 = vshrl.u32 %v2060_v9, 16  ;;  %v2443_v23 = vshll.u32 %v2060_v9, 16  ;;  %v5815_v27 = vrot.slane %v5813_v11, 5  ;;  %v2449_v12 = vshll.u32 %v2061_v53, 16  ;;  %v14482_v31 = vpop.f32.mrb[56].mxu0 }
 0x1af   :  { %v5821_v30 = vrot.slane %v5819_v19, 5  ;;  %v5825_v25 = vrot.slane %v5823_v18, 4  ;;  %v2438_v44 = vsel %vm14063_vm9, %v2433_v6, %v2437_v63  ;;  %v5831_v35 = vrot.slane %v5829_v21, 5  ;;  %v124_v54 = vld [vmem:[#allocation2 + $0x120] sm:$0x1] }
 0x1b0   :  { %v2442_v42 = vrot.slane %v2440_v22, 4  ;;  %v2445_v39 = vrot.slane %v2443_v23, 5  ;;  %v11139_v38 = vcombine.low %v2428_v5, %v2438_v44  ;;  %v5816_v41 = vor.u32 %v5815_v27, %v5812_v20  ;;  %v5508_v16 = vld [vmem:[#allocation2 + $0x98] sm:$0x1]  ;;  %v121_v20 = vld [vmem:[#allocation2 + $0x114] sm:$0x1] }
 0x1b1   :  { %v5826_v34 = vor.u32 %v5825_v25, %v5821_v30  ;;  %v2451_v47 = vrot.slane %v2449_v12, 5  ;;  %v2453_v57 = vshrl.u32 %v2061_v53, 16  ;;  %v2459_v10 = vshll.u32 %v2128_v61, 16  ;;  %v234_v21 = vld [vmem:[#allocation2 + $0x128] sm:$0x1]  ;;  %v14490_v61 = vpop.f32.mrb[57].mxu0 }
 0x1b2   :  { %v2446_v40 = vor.u32 %v2445_v39, %v2442_v42  ;;  %v5834_v55 = vshrl.u32 %v5506_v37, 16  ;;  %12151 = vmatmul.mubr.bf16.gmra.mrb[84].mxu0 %v11139_v38  ;;  %v5817_v45 = vrot.slane %v5816_v41, 4  ;;  %v5837_v1 = vshll.u32 %v5506_v37, 16  ;;  %v14500_v42 = vpop.f32.mrb[58].mxu0 }
 0x1b3   :  { %v5827_v58 = vrot.slane %v5826_v34, 4  ;;  %v5843_v2 = vshll.u32 %v5507_v51, 16  ;;  %v2455_v62 = vrot.slane %v2453_v57, 4  ;;  %v2461_v9 = vrot.slane %v2459_v10, 5  ;;  %v14508_v57 = vpop.f32.mrb[59].mxu0 }
 0x1b4   :  { %v2447_v46 = vrot.slane %v2446_v40, 4  ;;  %v5836_v17 = vrot.slane %v5834_v55, 4  ;;  %v5822_v5 = vsel %vm14063_vm9, %v5817_v45, %v5821_v30  ;;  %v5839_v63 = vrot.slane %v5837_v1, 5 }
 0x1b5   :  { %v5832_v14 = vsel %vm14063_vm9, %v5827_v58, %v5831_v35  ;;  %v5845_v53 = vrot.slane %v5843_v2, 5  ;;  %v2456_v18 = vor.u32 %v2455_v62, %v2451_v47  ;;  %v5847_v6 = vshrl.u32 %v5507_v51, 16  ;;  %v231_v35 = vld [vmem:[#allocation2 + $0x11c] sm:$0x1]  ;;  %v2063_v62 = vld [vmem:[#allocation2 + $0xa0] sm:$0xf] }
 0x1b6   :  { %v11330_v11 = vcombine.low %v5822_v5, %v5832_v14  ;;  %v2452_v19 = vsel %vm14063_vm9, %v2447_v46, %v2451_v47  ;;  %v5840_v22 = vor.u32 %v5839_v63, %v5836_v17  ;;  %v5853_v23 = vshll.u32 %v5508_v16, 16  ;;  %v13425_v5 = vld [vmem:[#allocation3 + $0x8] sm:$0xff]  }
 0x1b7   :  { %v125_v27 = vsel %vm13916_vm4, 0, %v124_v54  ;;  %v825_v30 = vadd.f32 %v14346_v3, %v14277_v33  ;;  %v2457_v25 = vrot.slane %v2456_v18, 4  ;;  %v5849_v12 = vrot.slane %v5847_v6, 4  ;;  %12196 = vmatprep.subr.bf16.mxu0 %v13425_v5 }
 0x1b8   :  { %12470 = vmatprep.mubr.bf16.mxu1 %v11330_v11  ;;  %126 = vst [vmem:[#allocation2 + $0x120] sm:$0x1] %v125_v27  ;;  %v122_v37 = vsel %vm13916_vm4, 0, %v121_v20  ;;  %v817_v44 = vadd.f32 %v14346_v3, %v14283_v43  ;;  %v5841_v39 = vrot.slane %v5840_v22, 4  ;;  %v5855_v51 = vrot.slane %v5853_v23, 5  ;;  %12197 = vmatpush3.bf16.msra.mxu0 %v13425_v5 }
 0x1b9   :  { %v953_v38 = vmax.f32 %v825_v30, 0.0  ;;  %123 = vst [vmem:[#allocation2 + $0x114] sm:$0x1] %v122_v37  ;;  %v235_v33 = vsel %vm13991_vm6, 0, %v234_v21  ;;  %v2462_v41 = vsel %vm14063_vm9, %v2457_v25, %v2461_v9  ;;  %v5850_v34 = vor.u32 %v5849_v12, %v5845_v53  ;;  %v2062_v43 = vld [vmem:[#allocation2 + $0x9c] sm:$0xf] }
 0x1ba   :  { %v951_v47 = vmax.f32 %v817_v44, 0.0  ;;  %236 = vst [vmem:[#allocation2 + $0x128] sm:$0x1] %v235_v33  ;;  %v828_v40 = vadd.f32 %v14346_v3, %v14287_v60  ;;  %v11140_v10 = vcombine.low %v2452_v19, %v2462_v41  ;;  %v5846_v55 = vsel %vm14063_vm9, %v5841_v39, %v5845_v53  ;;  %v5509_v33 = vld [vmem:[#allocation2 + $0x9c] sm:$0xf] }
 0x1bb   :  { %v11627_v45 = vpack.c.bf16 %v953_v38, %v953_v38  ;;  %v232_v58 = vsel %vm13991_vm6, 0, %v231_v35  ;;  %v5851_v1 = vrot.slane %v5850_v34, 4  ;;  %v820_v46 = vadd.f32 %v14346_v3, %v14295_v7 }
 0x1bc   :  { %v11625_v2 = vpack.c.bf16 %v951_v47, %v951_v47  ;;  %v954_v54 = vmax.f32 %v828_v40, 0.0  ;;  %233 = vst [vmem:[#allocation2 + $0x11c] sm:$0x1] %v232_v58  ;;  %12154 = vmatprep.mubr.bf16.mxu0 %v11140_v10  ;;  %v2464_v16 = vshrl.u32 %v2062_v43, 16  ;;  %v2467_v17 = vshll.u32 %v2062_v43, 16 }
 0x1bd   :  { %v1527_v60 = vshrl.u32 %v11627_v45, 16  ;;  %v1530_v9 = vshll.u32 %v11627_v45, 16  ;;  %v5856_v14 = vsel %vm14063_vm9, %v5851_v1, %v5855_v51  ;;  %v952_v18 = vmax.f32 %v820_v46, 0.0  ;;  %v2129_v51 = vld [vmem:[#allocation2 + $0xa4] sm:$0x1] }
 0x1be   :  { %v1510_v63 = vshrl.u32 %v11625_v2, 16  ;;  %v1513_v53 = vshll.u32 %v11625_v2, 16  ;;  %v11628_v20 = vpack.c.bf16 %v954_v54, %v954_v54  ;;  %v11331_v11 = vcombine.low %v5846_v55, %v5856_v14  ;;  %v5510_v46 = vld [vmem:[#allocation2 + $0xa0] sm:$0xf]  ;;  %v5511_v14 = vld [vmem:[#allocation2 + $0xa4] sm:$0x1] }
 0x1bf   :  { %v1529_v19 = vrot.slane %v1527_v60, 7  ;;  %v2466_v6 = vrot.slane %v2464_v16, 4  ;;  %v1959_v21 = vld [vmem:[#allocation2 + $0x120] sm:$0xf]  ;;  %v2469_v23 = vrot.slane %v2467_v17, 5  ;;  %v11626_v12 = vpack.c.bf16 %v952_v18, %v952_v18 }
 0x1c0   :  { %v1512_v7 = vrot.slane %v1510_v63, 7  ;;  %v1535_v3 = vshrl.u32 %v11628_v20, 16  ;;  %v1538_v22 = vshll.u32 %v11628_v20, 16  ;;  %12471 = vmatmul.mubr.bf16.gmra.mrb[16].mxu1 %v11331_v11  ;;  %v1952_v25 = vld [vmem:[#allocation2 + $0x114] sm:$0xf]  ;;  %v2473_v37 = vshll.u32 %v2063_v62, 16 }
 0x1c1   :  { %v1532_v27 = vor.u32 %v1530_v9, %v1529_v19  ;;  %v1533_v30 = vrot.slane %v1529_v19, 4  ;;  %v2470_v38 = vor.u32 %v2469_v23, %v2466_v6  ;;  %v1963_v34 = vld [vmem:[#allocation2 + $0x128] sm:$0x1]  ;;  %v1518_v47 = vshrl.u32 %v11626_v12, 16 }
 0x1c2   :  { %v1515_v44 = vor.u32 %v1513_v53, %v1512_v7  ;;  %v1516_v35 = vrot.slane %v1512_v7, 4  ;;  %v1537_v39 = vrot.slane %v1535_v3, 7  ;;  %v1521_v40 = vshll.u32 %v11626_v12, 16  ;;  %v2064_v19 = vld [vmem:[#allocation2 + $0xa8] sm:$0xf] }
 0x1c3   :  { %v1960_v41 = vsel %vm14108_vm12, %v1532_v27, %v1959_v21  ;;  %v2475_v43 = vrot.slane %v2473_v37, 5  ;;  %v2471_v58 = vrot.slane %v2470_v38, 4  ;;  %v1520_v1 = vrot.slane %v1518_v47, 7  ;;  %v1956_v17 = vld [vmem:[#allocation2 + $0x11c] sm:$0x1] }
 0x1c4   :  { %1961 = vst [vmem:[#allocation2 + $0x120] sm:$0xf] %v1960_v41  ;;  %v1953_v10 = vsel %vm14108_vm12, %v1515_v44, %v1952_v25  ;;  %v1540_v55 = vor.u32 %v1538_v22, %v1537_v39  ;;  %v1542_v45 = vrot.slane %v1537_v39, 4  ;;  %v2477_v2 = vshrl.u32 %v2063_v62, 16  ;;  %v2065_v3 = vld [vmem:[#allocation2 + $0xac] sm:$0xf] }
 0x1c5   :  { %1954 = vst [vmem:[#allocation2 + $0x114] sm:$0xf] %v1953_v10  ;;  %v2483_v54 = vshll.u32 %v2129_v51, 16  ;;  %v5858_v60 = vshrl.u32 %v5509_v33, 16  ;;  %v2476_v5 = vsel %vm14063_vm9, %v2471_v58, %v2475_v43  ;;  %v5861_v63 = vshll.u32 %v5509_v33, 16 }
 0x1c6   :  { %v1541_v9 = vsel %vm14115_vm13, %v1533_v30, %v1540_v55  ;;  %v1964_v16 = vsel %vm13916_vm4, %v1542_v45, %v1963_v34  ;;  %v1523_v53 = vor.u32 %v1521_v40, %v1520_v1  ;;  %v1525_v20 = vrot.slane %v1520_v1, 4  ;;  %v2130_v44 = vld [vmem:[#allocation2 + $0xb0] sm:$0x1]  ;;  %v5512_v10 = vld [vmem:[#allocation2 + $0xa8] sm:$0xf]  ;;  %v13426_v55 = vld [vmem:[#allocation3 + $0x168] sm:$0xff]  }
 0x1c7   :  { %1962 = vst [vmem:[#allocation2 + $0x124] sm:$0xf] %v1541_v9  ;;  %1965 = vst [vmem:[#allocation2 + $0x128] sm:$0x1] %v1964_v16  ;;  %v2479_v62 = vrot.slane %v2477_v2, 4  ;;  %v2485_v11 = vrot.slane %v2483_v54, 5  ;;  %12524 = vmatprep.subr.bf16.mxu1 %v13426_v55 }
 0x1c8   :  { %v5860_v18 = vrot.slane %v5858_v60, 4  ;;  %v5863_v6 = vrot.slane %v5861_v63, 5  ;;  %v5867_v21 = vshll.u32 %v5510_v46, 16  ;;  %v5871_v7 = vshrl.u32 %v5510_v46, 16  ;;  %v5513_v2 = vld [vmem:[#allocation2 + $0xac] sm:$0xf]  ;;  %12525 = vmatpush3.bf16.msra.mxu1 %v13426_v55 }
 0x1c9   :  { %v1524_v22 = vsel %vm14115_vm13, %v1516_v35, %v1523_v53  ;;  %v1957_v23 = vsel %vm13916_vm4, %v1525_v20, %v1956_v17  ;;  %v2480_v27 = vor.u32 %v2479_v62, %v2475_v43  ;;  %v5877_v30 = vshll.u32 %v5511_v14, 16  ;;  %v14534_v54 = vpop.f32.mrb[60].mxu0  ;;  %v5514_v63 = vld [vmem:[#allocation2 + $0xb0] sm:$0x1] }
 0x1ca   :  { %1955 = vst [vmem:[#allocation2 + $0x118] sm:$0xf] %v1524_v22  ;;  %1958 = vst [vmem:[#allocation2 + $0x11c] sm:$0x1] %v1957_v23  ;;  %v5864_v25 = vor.u32 %v5863_v6, %v5860_v18  ;;  %v5869_v12 = vrot.slane %v5867_v21, 5  ;;  %v5873_v37 = vrot.slane %v5871_v7, 4 }
 0x1cb   :  { %v2488_v39 = vshrl.u32 %v2064_v19, 16  ;;  %v2481_v51 = vrot.slane %v2480_v27, 4  ;;  %v5879_v38 = vrot.slane %v5877_v30, 5  ;;  %v2491_v33 = vshll.u32 %v2064_v19, 16  ;;  %v14538_v62 = vpop.f32.mrb[61].mxu0 }
 0x1cc   :  { %v2497_v41 = vshll.u32 %v2065_v3, 16  ;;  %v5865_v34 = vrot.slane %v5864_v25, 4  ;;  %v5874_v47 = vor.u32 %v5873_v37, %v5869_v12  ;;  %v2501_v35 = vshrl.u32 %v2065_v3, 16  ;;  %v130_v6 = vld [vmem:[#allocation2 + $0x138] sm:$0x1]  ;;  %v14542_v27 = vpop.f32.mrb[62].mxu0 }
 0x1cd   :  { %v2490_v40 = vrot.slane %v2488_v39, 4  ;;  %v2486_v43 = vsel %vm14063_vm9, %v2481_v51, %v2485_v11  ;;  %v2493_v45 = vrot.slane %v2491_v33, 5  ;;  %v2507_v1 = vshll.u32 %v2130_v44, 16  ;;  %v127_v23 = vld [vmem:[#allocation2 + $0x12c] sm:$0x1] }
 0x1ce   :  { %v2499_v58 = vrot.slane %v2497_v41, 5  ;;  %v11141_v46 = vcombine.low %v2476_v5, %v2486_v43  ;;  %v5870_v60 = vsel %vm14063_vm9, %v5865_v34, %v5869_v12  ;;  %v5875_v9 = vrot.slane %v5874_v47, 4  ;;  %v240_v41 = vld [vmem:[#allocation2 + $0x140] sm:$0x1]  ;;  %v237_v34 = vld [vmem:[#allocation2 + $0x134] sm:$0x1] }
 0x1cf   :  { %v2503_v16 = vrot.slane %v2501_v35, 4  ;;  %v2494_v17 = vor.u32 %v2493_v45, %v2490_v40  ;;  %v2509_v14 = vrot.slane %v2507_v1, 5  ;;  %v5882_v53 = vshrl.u32 %v5512_v10, 16  ;;  %v14555_v47 = vpop.f32.mrb[63].mxu0  ;;  %v2066_v1 = vld [vmem:[#allocation2 + $0xb4] sm:$0xf] }
 0x1d0   :  { %v5885_v20 = vshll.u32 %v5512_v10, 16  ;;  %12155 = vmatmul.mubr.bf16.gmra.mrb[88].mxu0 %v11141_v46  ;;  %v5880_v11 = vsel %vm14063_vm9, %v5875_v9, %v5879_v38  ;;  %v5891_v5 = vshll.u32 %v5513_v2, 16  ;;  %v5895_v18 = vshrl.u32 %v5513_v2, 16  ;;  %v14551_v38 = vld [vmem:[%s16170_s2] ss:$0 sm:$0xff] }
 0x1d1   :  { %v2504_v19 = vor.u32 %v2503_v16, %v2499_v58  ;;  %v11332_v21 = vcombine.low %v5870_v60, %v5880_v11  ;;  %v2495_v7 = vrot.slane %v2494_v17, 4  ;;  %v5884_v3 = vrot.slane %v5882_v53, 4  ;;  %v2067_v16 = vld [vmem:[#allocation2 + $0xb8] sm:$0xf] }
 0x1d2   :  { %v5887_v22 = vrot.slane %v5885_v20, 5  ;;  %v5893_v25 = vrot.slane %v5891_v5, 5  ;;  %v5897_v12 = vrot.slane %v5895_v18, 4  ;;  %v5901_v37 = vshll.u32 %v5514_v63, 16 }
 0x1d3   :  { %v2505_v30 = vrot.slane %v2504_v19, 4  ;;  %12474 = vmatprep.mubr.bf16.mxu1 %v11332_v21  ;;  %v2500_v44 = vsel %vm14063_vm9, %v2495_v7, %v2499_v58  ;;  %v131_v51 = vsel %vm13916_vm4, 0, %v130_v6  ;;  %v841_v33 = vadd.f32 %v14551_v38, %v14327_v49 }
 0x1d4   :  { %v5888_v39 = vor.u32 %v5887_v22, %v5884_v3  ;;  %v5898_v35 = vor.u32 %v5897_v12, %v5893_v25  ;;  %v5903_v10 = vrot.slane %v5901_v37, 5  ;;  %132 = vst [vmem:[#allocation2 + $0x138] sm:$0x1] %v131_v51  ;;  %v128_v55 = vsel %vm13916_vm4, 0, %v127_v23  ;;  %v2131_v51 = vld [vmem:[#allocation2 + $0xbc] sm:$0x1] }
 0x1d5   :  { %v2510_v40 = vsel %vm14063_vm9, %v2505_v30, %v2509_v14  ;;  %v957_v58 = vmax.f32 %v841_v33, 0.0  ;;  %129 = vst [vmem:[#allocation2 + $0x12c] sm:$0x1] %v128_v55  ;;  %v833_v49 = vadd.f32 %v14551_v38, %v14331_v8  ;;  %v241_v46 = vsel %vm13991_vm6, 0, %v240_v41 }
 0x1d6   :  { %v11142_v43 = vcombine.low %v2500_v44, %v2510_v40  ;;  %v5889_v45 = vrot.slane %v5888_v39, 4  ;;  %v5899_v2 = vrot.slane %v5898_v35, 4  ;;  %v844_v60 = vadd.f32 %v14551_v38, %v14335_v26  ;;  %242 = vst [vmem:[#allocation2 + $0x140] sm:$0x1] %v241_v46 }
 0x1d7   :  { %v238_v9 = vsel %vm13991_vm6, 0, %v237_v34  ;;  %v11631_v14 = vpack.c.bf16 %v957_v58, %v957_v58  ;;  %v955_v63 = vmax.f32 %v833_v49, 0.0  ;;  %v836_v8 = vadd.f32 %v14551_v38, %v14339_v52 }
 0x1d8   :  { %12158 = vmatprep.mubr.bf16.mxu0 %v11142_v43  ;;  %v5894_v17 = vsel %vm14063_vm9, %v5889_v45, %v5893_v25  ;;  %239 = vst [vmem:[#allocation2 + $0x134] sm:$0x1] %v238_v9  ;;  %v5904_v53 = vsel %vm14063_vm9, %v5899_v2, %v5903_v10  ;;  %v958_v20 = vmax.f32 %v844_v60, 0.0  ;;  %v2512_v26 = vshrl.u32 %v2066_v1, 16  ;;  %v5515_v10 = vld [vmem:[#allocation2 + $0xb4] sm:$0xf] }
 0x1d9   :  { %v2515_v11 = vshll.u32 %v2066_v1, 16  ;;  %v11333_v19 = vcombine.low %v5894_v17, %v5904_v53  ;;  %v1561_v5 = vshrl.u32 %v11631_v14, 16  ;;  %v1564_v18 = vshll.u32 %v11631_v14, 16  ;;  %v5516_v53 = vld [vmem:[#allocation2 + $0xb8] sm:$0xf] }
 0x1da   :  { %v11629_v6 = vpack.c.bf16 %v955_v63, %v955_v63  ;;  %v11632_v21 = vpack.c.bf16 %v958_v20, %v958_v20  ;;  %v956_v7 = vmax.f32 %v836_v8, 0.0  ;;  %v2514_v3 = vrot.slane %v2512_v26, 4 }
 0x1db   :  { %v2517_v22 = vrot.slane %v2515_v11, 5  ;;  %12475 = vmatmul.mubr.bf16.gmra.mrb[20].mxu1 %v11333_v19  ;;  %v1563_v23 = vrot.slane %v1561_v5, 7  ;;  %v2521_v12 = vshll.u32 %v2067_v16, 16  ;;  %v1973_v52 = vld [vmem:[#allocation2 + $0x138] sm:$0xf]  ;;  %v2525_v9 = vshrl.u32 %v2067_v16, 16 }
 0x1dc   :  { %v1544_v30 = vshrl.u32 %v11629_v6, 16  ;;  %v1547_v25 = vshll.u32 %v11629_v6, 16  ;;  %v1569_v37 = vshrl.u32 %v11632_v21, 16  ;;  %v1572_v44 = vshll.u32 %v11632_v21, 16  ;;  %v1966_v55 = vld [vmem:[#allocation2 + $0x12c] sm:$0xf] }
 0x1dd   :  { %v11630_v39 = vpack.c.bf16 %v956_v7, %v956_v7  ;;  %v2518_v33 = vor.u32 %v2517_v22, %v2514_v3  ;;  %v1566_v41 = vor.u32 %v1564_v18, %v1563_v23  ;;  %v1567_v34 = vrot.slane %v1563_v23, 4  ;;  %v1977_v60 = vld [vmem:[#allocation2 + $0x140] sm:$0x1]  ;;  %v5517_v7 = vld [vmem:[#allocation2 + $0xbc] sm:$0x1] }
 0x1de   :  { %v1546_v40 = vrot.slane %v1544_v30, 7  ;;  %v2523_v35 = vrot.slane %v2521_v12, 5  ;;  %v1571_v43 = vrot.slane %v1569_v37, 7  ;;  %v2527_v11 = vrot.slane %v2525_v9, 4  ;;  %v5518_v3 = vld [vmem:[#allocation2 + $0xc0] sm:$0xf] }
 0x1df   :  { %v1552_v45 = vshrl.u32 %v11630_v39, 16  ;;  %v1555_v58 = vshll.u32 %v11630_v39, 16  ;;  %v2519_v49 = vrot.slane %v2518_v33, 4  ;;  %v1974_v1 = vsel %vm14108_vm12, %v1566_v41, %v1973_v52  ;;  %v1970_v26 = vld [vmem:[#allocation2 + $0x134] sm:$0x1] }
 0x1e0   :  { %v1549_v2 = vor.u32 %v1547_v25, %v1546_v40  ;;  %v1550_v46 = vrot.slane %v1546_v40, 4  ;;  %1975 = vst [vmem:[#allocation2 + $0x138] sm:$0xf] %v1974_v1  ;;  %v1574_v17 = vor.u32 %v1572_v44, %v1571_v43  ;;  %v1576_v14 = vrot.slane %v1571_v43, 4  ;;  %v5519_v12 = vld [vmem:[#allocation2 + $0xc4] sm:$0xf] }
 0x1e1   :  { %v1554_v63 = vrot.slane %v1552_v45, 7  ;;  %v2524_v8 = vsel %vm14063_vm9, %v2519_v49, %v2523_v35  ;;  %v2531_v19 = vshll.u32 %v2131_v51, 16  ;;  %v5906_v5 = vshrl.u32 %v5515_v10, 16  ;;  %v136_v40 = vld [vmem:[#allocation2 + $0x150] sm:$0x1] }
 0x1e2   :  { %v1967_v20 = vsel %vm14108_vm12, %v1549_v2, %v1966_v55  ;;  %v1575_v18 = vsel %vm14115_vm13, %v1567_v34, %v1574_v17  ;;  %v1978_v16 = vsel %vm13916_vm4, %v1576_v14, %v1977_v60  ;;  %v2528_v22 = vor.u32 %v2527_v11, %v2523_v35  ;;  %v5520_v43 = vld [vmem:[#allocation2 + $0xc8] sm:$0x1]  ;;  %v246_v11 = vld [vmem:[#allocation2 + $0x158] sm:$0x1] }
 0x1e3   :  { %1968 = vst [vmem:[#allocation2 + $0x12c] sm:$0xf] %v1967_v20  ;;  %v1557_v6 = vor.u32 %v1555_v58, %v1554_v63  ;;  %v1559_v21 = vrot.slane %v1554_v63, 4  ;;  %1976 = vst [vmem:[#allocation2 + $0x13c] sm:$0xf] %v1575_v18  ;;  %v2533_v23 = vrot.slane %v2531_v19, 5  ;;  %v857_v18 = vadd.f32 %v14551_v38, %v14374_v24 }
 0x1e4   :  { %1979 = vst [vmem:[#allocation2 + $0x140] sm:$0x1] %v1978_v16  ;;  %v5908_v30 = vrot.slane %v5906_v5, 4  ;;  %v5909_v25 = vshll.u32 %v5515_v10, 16  ;;  %v5915_v44 = vshll.u32 %v5516_v53, 16  ;;  %v5919_v39 = vshrl.u32 %v5516_v53, 16 }
 0x1e5   :  { %v1558_v52 = vsel %vm14115_vm13, %v1550_v46, %v1557_v6  ;;  %v1971_v37 = vsel %vm13916_vm4, %v1559_v21, %v1970_v26  ;;  %v2529_v51 = vrot.slane %v2528_v22, 4  ;;  %v5925_v41 = vshll.u32 %v5517_v7, 16  ;;  %v133_v46 = vld [vmem:[#allocation2 + $0x144] sm:$0x1] }
 0x1e6   :  { %1969 = vst [vmem:[#allocation2 + $0x130] sm:$0xf] %v1558_v52  ;;  %1972 = vst [vmem:[#allocation2 + $0x134] sm:$0x1] %v1971_v37  ;;  %v5911_v33 = vrot.slane %v5909_v25, 5  ;;  %v5930_v34 = vshrl.u32 %v5518_v3, 16  ;;  %v849_v7 = vadd.f32 %v14551_v38, %v14378_v59 }
 0x1e7   :  { %v5917_v35 = vrot.slane %v5915_v44, 5  ;;  %v5921_v55 = vrot.slane %v5919_v39, 4  ;;  %v5933_v10 = vshll.u32 %v5518_v3, 16  ;;  %v5939_v45 = vshll.u32 %v5519_v12, 16  ;;  %v243_v3 = vld [vmem:[#allocation2 + $0x14c] sm:$0x1] }
 0x1e8   :  { %v2534_v58 = vsel %vm14063_vm9, %v2529_v51, %v2533_v23  ;;  %v5912_v49 = vor.u32 %v5911_v33, %v5908_v30  ;;  %v5927_v1 = vrot.slane %v5925_v41, 5  ;;  %v5932_v2 = vrot.slane %v5930_v34, 4  ;;  %v106_v25 = vld [vmem:[#allocation2 + $0xd8] sm:$0x1]  ;;  %v216_v51 = vld [vmem:[#allocation2 + $0xe0] sm:$0x1] }
 0x1e9   :  { %v11143_v60 = vcombine.low %v2524_v8, %v2534_v58  ;;  %v5922_v9 = vor.u32 %v5921_v55, %v5917_v35  ;;  %v5935_v17 = vrot.slane %v5933_v10, 5  ;;  %v5941_v14 = vrot.slane %v5939_v45, 5 }
 0x1ea   :  { %v5913_v63 = vrot.slane %v5912_v49, 4  ;;  %v5943_v53 = vshrl.u32 %v5519_v12, 16  ;;  %v5949_v20 = vshll.u32 %v5520_v43, 16  ;;  %v137_v26 = vsel %vm13916_vm4, 0, %v136_v40  ;;  %v13427_v12 = vld [vmem:[#allocation3 + $0x10] sm:$0xff]  }
 0x1eb   :  { %12159 = vmatmul.mubr.bf16.gmra.mrb[92].mxu0 %v11143_v60  ;;  %v5923_v19 = vrot.slane %v5922_v9, 4  ;;  %v5936_v5 = vor.u32 %v5935_v17, %v5932_v2  ;;  %138 = vst [vmem:[#allocation2 + $0x150] sm:$0x1] %v137_v26  ;;  %v134_v8 = vsel %vm13916_vm4, 0, %v133_v46  ;;  %v961_v30 = vmax.f32 %v857_v18, 0.0  ;;  %12198 = vmatprep.subr.bf16.mxu0 %v13427_v12 }
 0x1ec   :  { %v5918_v16 = vsel %vm14063_vm9, %v5913_v63, %v5917_v35  ;;  %v5945_v6 = vrot.slane %v5943_v53, 4  ;;  %v5951_v21 = vrot.slane %v5949_v20, 5  ;;  %135 = vst [vmem:[#allocation2 + $0x144] sm:$0x1] %v134_v8  ;;  %v247_v24 = vsel %vm13991_vm6, 0, %v246_v11  ;;  %12199 = vmatpush3.bf16.msra.mxu0 %v13427_v12 }
 0x1ed   :  { %v5928_v22 = vsel %vm14063_vm9, %v5923_v19, %v5927_v1  ;;  %v5937_v23 = vrot.slane %v5936_v5, 4  ;;  %v959_v44 = vmax.f32 %v849_v7, 0.0  ;;  %248 = vst [vmem:[#allocation2 + $0x158] sm:$0x1] %v247_v24  ;;  %v860_v39 = vadd.f32 %v14551_v38, %v14380_v56  ;;  %v2069_v40 = vld [vmem:[#allocation2 + $0xdc] sm:$0xf] }
 0x1ee   :  { %v11334_v52 = vcombine.low %v5918_v16, %v5928_v22  ;;  %v5946_v37 = vor.u32 %v5945_v6, %v5941_v14  ;;  %v11635_v33 = vpack.c.bf16 %v961_v30, %v961_v30  ;;  %v244_v41 = vsel %vm13991_vm6, 0, %v243_v3  ;;  %v2070_v9 = vld [vmem:[#allocation2 + $0xe4] sm:$0xf] }
 0x1ef   :  { %v5942_v59 = vsel %vm14063_vm9, %v5937_v23, %v5941_v14  ;;  %v852_v34 = vadd.f32 %v14551_v38, %v14384_v28  ;;  %v11633_v55 = vpack.c.bf16 %v959_v44, %v959_v44  ;;  %v962_v43 = vmax.f32 %v860_v39, 0.0  ;;  %245 = vst [vmem:[#allocation2 + $0x14c] sm:$0x1] %v244_v41 }
 0x1f0   :  { %12478 = vmatprep.mubr.bf16.mxu1 %v11334_v52  ;;  %v5947_v35 = vrot.slane %v5946_v37, 4  ;;  %v107_v56 = vsel %vm13916_vm4, 0, %v106_v25  ;;  %v1595_v10 = vshrl.u32 %v11635_v33, 16  ;;  %v1598_v45 = vshll.u32 %v11635_v33, 16  ;;  %v13428_v33 = vld [vmem:[#allocation3 + $0x170] sm:$0xff]  }
 0x1f1   :  { %v960_v58 = vmax.f32 %v852_v34, 0.0  ;;  %108 = vst [vmem:[#allocation2 + $0xd8] sm:$0x1] %v107_v56  ;;  %v217_v49 = vsel %vm13991_vm6, 0, %v216_v51  ;;  %v1578_v2 = vshrl.u32 %v11633_v55, 16  ;;  %v1581_v46 = vshll.u32 %v11633_v55, 16  ;;  %12526 = vmatprep.subr.bf16.mxu1 %v13428_v33 }
 0x1f2   :  { %v5952_v28 = vsel %vm14063_vm9, %v5947_v35, %v5951_v21  ;;  %v1987_v1 = vld [vmem:[#allocation2 + $0x150] sm:$0xf]  ;;  %v11636_v60 = vpack.c.bf16 %v962_v43, %v962_v43  ;;  %218 = vst [vmem:[#allocation2 + $0xe0] sm:$0x1] %v217_v49  ;;  %v1597_v14 = vrot.slane %v1595_v10, 7  ;;  %v2545_v20 = vshll.u32 %v2069_v40, 16  ;;  %12527 = vmatpush3.bf16.msra.mxu1 %v13428_v33 }
 0x1f3   :  { %v11335_v17 = vcombine.low %v5942_v59, %v5952_v28  ;;  %v1980_v63 = vld [vmem:[#allocation2 + $0x144] sm:$0xf]  ;;  %v11634_v53 = vpack.c.bf16 %v960_v58, %v960_v58  ;;  %v1580_v26 = vrot.slane %v1578_v2, 7  ;;  %v2549_v5 = vshrl.u32 %v2069_v40, 16  ;;  %v2071_v58 = vld [vmem:[#allocation2 + $0xe8] sm:$0xf] }
 0x1f4   :  { %v1603_v11 = vshrl.u32 %v11636_v60, 16  ;;  %v1606_v19 = vshll.u32 %v11636_v60, 16  ;;  %v1600_v18 = vor.u32 %v1598_v45, %v1597_v14  ;;  %v1601_v8 = vrot.slane %v1597_v14, 4  ;;  %v1991_v16 = vld [vmem:[#allocation2 + $0x158] sm:$0x1] }
 0x1f5   :  { %12479 = vmatmul.mubr.bf16.gmra.mrb[24].mxu1 %v11335_v17  ;;  %v1586_v6 = vshrl.u32 %v11634_v53, 16  ;;  %v1589_v21 = vshll.u32 %v11634_v53, 16  ;;  %v1583_v7 = vor.u32 %v1581_v46, %v1580_v26  ;;  %v1584_v3 = vrot.slane %v1580_v26, 4  ;;  %v2133_v49 = vld [vmem:[#allocation2 + $0xec] sm:$0x1] }
 0x1f6   :  { %v1605_v22 = vrot.slane %v1603_v11, 7  ;;  %v14619_v23 = vrot.slane %v2545_v20, 5  ;;  %v1988_v30 = vsel %vm14108_vm12, %v1600_v18, %v1987_v1  ;;  %v1984_v25 = vld [vmem:[#allocation2 + $0x14c] sm:$0x1]  ;;  %v2551_v12 = vrot.slane %v2549_v5, 4 }
 0x1f7   :  { %v1588_v24 = vrot.slane %v1586_v6, 7  ;;  %v2560_v52 = vshrl.u32 %v2070_v9, 16  ;;  %1989 = vst [vmem:[#allocation2 + $0x150] sm:$0xf] %v1988_v30  ;;  %v1981_v37 = vsel %vm14108_vm12, %v1583_v7, %v1980_v63  ;;  %v2563_v59 = vshll.u32 %v2070_v9, 16 }
 0x1f8   :  { %v1608_v44 = vor.u32 %v1606_v19, %v1605_v22  ;;  %v1610_v39 = vrot.slane %v1605_v22, 4  ;;  %v2068_v51 = vld [vmem:[#allocation2 + $0xd8] sm:$0xf]  ;;  %1982 = vst [vmem:[#allocation2 + $0x144] sm:$0xf] %v1981_v37  ;;  %v2552_v10 = vor.u32 %v2551_v12, %v14619_v23  ;;  %v2569_v20 = vshll.u32 %v2071_v58, 16 }
 0x1f9   :  { %v1591_v41 = vor.u32 %v1589_v21, %v1588_v24  ;;  %v1593_v34 = vrot.slane %v1588_v24, 4  ;;  %v2132_v40 = vld [vmem:[#allocation2 + $0xe0] sm:$0x1]  ;;  %v2536_v35 = vshrl.u32 %v2068_v51, 16  ;;  %v2539_v55 = vshll.u32 %v2068_v51, 16 }
 0x1fa   :  { %v1609_v43 = vsel %vm14115_vm13, %v1601_v8, %v1608_v44  ;;  %v1992_v56 = vsel %vm13916_vm4, %v1610_v39, %v1991_v16  ;;  %v2555_v45 = vshll.u32 %v2132_v40, 16  ;;  %v5521_v60 = vld [vmem:[#allocation2 + $0xe4] sm:$0xf]  ;;  %v2553_v9 = vrot.slane %v2552_v10, 4  ;;  %v5522_v19 = vld [vmem:[#allocation2 + $0xe8] sm:$0xf] }
 0x1fb   :  { %1990 = vst [vmem:[#allocation2 + $0x154] sm:$0xf] %v1609_v43  ;;  %1993 = vst [vmem:[#allocation2 + $0x158] sm:$0x1] %v1992_v56  ;;  %v1592_v28 = vsel %vm14115_vm13, %v1584_v3, %v1591_v41  ;;  %v1985_v1 = vsel %vm13916_vm4, %v1593_v34, %v1984_v25  ;;  %v2538_v2 = vrot.slane %v2536_v35, 4  ;;  %v2541_v46 = vrot.slane %v2539_v55, 5 }
 0x1fc   :  { %1983 = vst [vmem:[#allocation2 + $0x148] sm:$0xf] %v1592_v28  ;;  %1986 = vst [vmem:[#allocation2 + $0x14c] sm:$0x1] %v1985_v1  ;;  %v2557_v17 = vrot.slane %v2555_v45, 5  ;;  %v2562_v14 = vrot.slane %v2560_v52, 4 }
 0x1fd   :  { %v2565_v63 = vrot.slane %v2563_v59, 5  ;;  %v2542_v53 = vor.u32 %v2541_v46, %v2538_v2  ;;  %v2573_v26 = vshrl.u32 %v2071_v58, 16  ;;  %v2579_v11 = vshll.u32 %v2133_v49, 16  ;;  %v5523_v8 = vld [vmem:[#allocation2 + $0xec] sm:$0x1] }
 0x1fe   :  { %v2558_v5 = vsel %vm14063_vm9, %v2553_v9, %v2557_v17  ;;  %v5954_v16 = vshrl.u32 %v5521_v60, 16  ;;  %v5957_v6 = vshll.u32 %v5521_v60, 16  ;;  %v2571_v7 = vrot.slane %v2569_v20, 5  ;;  %v2072_v52 = vld [vmem:[#allocation2 + $0xf0] sm:$0xf] }
 0x1ff   :  { %v2566_v18 = vor.u32 %v2565_v63, %v2562_v14  ;;  %v2543_v21 = vrot.slane %v2542_v53, 4  ;;  %v2575_v3 = vrot.slane %v2573_v26, 4  ;;  %v2581_v22 = vrot.slane %v2579_v11, 5  ;;  %v2073_v59 = vld [vmem:[#allocation2 + $0xf4] sm:$0xf] }
 0x200   :  { %v5956_v24 = vrot.slane %v5954_v16, 4  ;;  %v5959_v25 = vrot.slane %v5957_v6, 5  ;;  %v5963_v12 = vshll.u32 %v5522_v19, 16  ;;  %v5967_v39 = vshrl.u32 %v5522_v19, 16  ;;  %v2134_v35 = vld [vmem:[#allocation2 + $0xf8] sm:$0x1] }
 0x201   :  { %v2567_v30 = vrot.slane %v2566_v18, 4  ;;  %v2548_v37 = vsel %vm14063_vm9, %v2543_v21, %v14619_v23  ;;  %v2576_v44 = vor.u32 %v2575_v3, %v2571_v7  ;;  %v5973_v51 = vshll.u32 %v5523_v8, 16  ;;  %v5524_v28 = vld [vmem:[#allocation2 + $0xf0] sm:$0xf]  ;;  %v5525_v9 = vld [vmem:[#allocation2 + $0xf4] sm:$0xf] }
 0x202   :  { %v11144_v33 = vcombine.low %v2548_v37, %v2558_v5  ;;  %v5960_v34 = vor.u32 %v5959_v25, %v5956_v24  ;;  %v5965_v40 = vrot.slane %v5963_v12, 5  ;;  %v5969_v43 = vrot.slane %v5967_v39, 4  ;;  %v5526_v20 = vld [vmem:[#allocation2 + $0xf8] sm:$0x1]  ;;  %v142_v26 = vld [vmem:[#allocation2 + $0x168] sm:$0x1] }
 0x203   :  { %v2572_v41 = vsel %vm14063_vm9, %v2567_v30, %v2571_v7  ;;  %v2577_v55 = vrot.slane %v2576_v44, 4  ;;  %v5975_v56 = vrot.slane %v5973_v51, 5  ;;  %v2584_v10 = vshrl.u32 %v2072_v52, 16  ;;  %v139_v8 = vld [vmem:[#allocation2 + $0x15c] sm:$0x1] }
 0x204   :  { %12162 = vmatprep.mubr.bf16.mxu0 %v11144_v33  ;;  %v5961_v45 = vrot.slane %v5960_v34, 4  ;;  %v2587_v58 = vshll.u32 %v2072_v52, 16  ;;  %v2593_v49 = vshll.u32 %v2073_v59, 16  ;;  %v2597_v23 = vshrl.u32 %v2073_v59, 16  ;;  %v252_v3 = vld [vmem:[#allocation2 + $0x170] sm:$0x1] }
 0x205   :  { %v2582_v1 = vsel %vm14063_vm9, %v2577_v55, %v2581_v22  ;;  %v5970_v2 = vor.u32 %v5969_v43, %v5965_v40  ;;  %v2586_v46 = vrot.slane %v2584_v10, 4  ;;  %v2603_v60 = vshll.u32 %v2134_v35, 16  ;;  %v13429_v22 = vld [vmem:[#allocation3 + $0x18] sm:$0xff]   ;;  %v249_v51 = vld [vmem:[#allocation2 + $0x164] sm:$0x1] }
 0x206   :  { %v11145_v17 = vcombine.low %v2572_v41, %v2582_v1  ;;  %v5966_v14 = vsel %vm14063_vm9, %v5961_v45, %v5965_v40  ;;  %v2589_v63 = vrot.slane %v2587_v58, 5  ;;  %v2595_v53 = vrot.slane %v2593_v49, 5  ;;  %12200 = vmatprep.subr.bf16.mxu0 %v13429_v22  ;;  %v2074_v49 = vld [vmem:[#allocation2 + $0xfc] sm:$0xf] }
 0x207   :  { %v5971_v11 = vrot.slane %v5970_v2, 4  ;;  %v2599_v19 = vrot.slane %v2597_v23, 4  ;;  %v2605_v5 = vrot.slane %v2603_v60, 5  ;;  %v5978_v18 = vshrl.u32 %v5524_v28, 16  ;;  %12201 = vmatpush3.bf16.msra.mxu0 %v13429_v22  ;;  %v13430_v23 = vld [vmem:[#allocation3 + $0x20] sm:$0xff]  }
 0x208   :  { %12163 = vmatmul.mubr.bf16.gmra.mrb[96].mxu0 %v11145_v17  ;;  %v2590_v16 = vor.u32 %v2589_v63, %v2586_v46  ;;  %v5981_v6 = vshll.u32 %v5524_v28, 16  ;;  %v5987_v21 = vshll.u32 %v5525_v9, 16  ;;  %v5991_v7 = vshrl.u32 %v5525_v9, 16  ;;  %12202 = vmatprep.subr.bf16.mxu0 %v13430_v23 }
 0x209   :  { %v5976_v30 = vsel %vm14063_vm9, %v5971_v11, %v5975_v56  ;;  %v2600_v24 = vor.u32 %v2599_v19, %v2595_v53  ;;  %v5980_v25 = vrot.slane %v5978_v18, 4  ;;  %v5997_v12 = vshll.u32 %v5526_v20, 16 }
 0x20a   :  { %v11336_v52 = vcombine.low %v5966_v14, %v5976_v30  ;;  %v2591_v37 = vrot.slane %v2590_v16, 4  ;;  %v5983_v44 = vrot.slane %v5981_v6, 5  ;;  %v5989_v39 = vrot.slane %v5987_v21, 5 }
 0x20b   :  { %v2601_v59 = vrot.slane %v2600_v24, 4  ;;  %v5993_v33 = vrot.slane %v5991_v7, 4  ;;  %v5999_v41 = vrot.slane %v5997_v12, 5  ;;  %v143_v34 = vsel %vm13916_vm4, 0, %v142_v26  ;;  %12203 = vmatpush3.bf16.msra.mxu0 %v13430_v23 }
 0x20c   :  { %12482 = vmatprep.mubr.bf16.mxu1 %v11336_v52  ;;  %v2596_v40 = vsel %vm14063_vm9, %v2591_v37, %v2595_v53  ;;  %v5984_v35 = vor.u32 %v5983_v44, %v5980_v25  ;;  %144 = vst [vmem:[#allocation2 + $0x168] sm:$0x1] %v143_v34  ;;  %v873_v55 = vadd.f32 %v14551_v38, %v14428_v4  ;;  %v140_v43 = vsel %vm13916_vm4, 0, %v139_v8  ;;  %v2075_v8 = vld [vmem:[#allocation2 + $0x100] sm:$0xf] }
 0x20d   :  { %v2606_v56 = vsel %vm14063_vm9, %v2601_v59, %v2605_v5  ;;  %v5994_v10 = vor.u32 %v5993_v33, %v5989_v39  ;;  %141 = vst [vmem:[#allocation2 + $0x15c] sm:$0x1] %v140_v43  ;;  %v865_v45 = vadd.f32 %v14551_v38, %v14448_v29  ;;  %v253_v58 = vsel %vm13991_vm6, 0, %v252_v3 }
 0x20e   :  { %v11146_v28 = vcombine.low %v2596_v40, %v2606_v56  ;;  %v5985_v1 = vrot.slane %v5984_v35, 4  ;;  %v965_v2 = vmax.f32 %v873_v55, 0.0  ;;  %254 = vst [vmem:[#allocation2 + $0x170] sm:$0x1] %v253_v58  ;;  %v876_v4 = vadd.f32 %v14551_v38, %v14452_v32 }
 0x20f   :  { %v5995_v46 = vrot.slane %v5994_v10, 4  ;;  %v963_v60 = vmax.f32 %v865_v45, 0.0  ;;  %v250_v9 = vsel %vm13991_vm6, 0, %v249_v51  ;;  %v868_v29 = vadd.f32 %v14551_v38, %v14458_v13 }
 0x210   :  { %12166 = vmatprep.mubr.bf16.mxu0 %v11146_v28  ;;  %v5990_v17 = vsel %vm14063_vm9, %v5985_v1, %v5989_v39  ;;  %v11639_v14 = vpack.c.bf16 %v965_v2, %v965_v2  ;;  %v966_v63 = vmax.f32 %v876_v4, 0.0  ;;  %251 = vst [vmem:[#allocation2 + $0x164] sm:$0x1] %v250_v9  ;;  %v2608_v53 = vshrl.u32 %v2074_v49, 16  ;;  %v5527_v28 = vld [vmem:[#allocation2 + $0xfc] sm:$0xf] }
 0x211   :  { %v6000_v32 = vsel %vm14063_vm9, %v5995_v46, %v5999_v41  ;;  %v11637_v20 = vpack.c.bf16 %v963_v60, %v963_v60  ;;  %v964_v26 = vmax.f32 %v868_v29, 0.0  ;;  %v2611_v11 = vshll.u32 %v2074_v49, 16  ;;  %v2135_v41 = vld [vmem:[#allocation2 + $0x104] sm:$0x1]  ;;  %v5528_v60 = vld [vmem:[#allocation2 + $0x100] sm:$0xf] }
 0x212   :  { %v11337_v19 = vcombine.low %v5990_v17, %v6000_v32  ;;  %v1629_v5 = vshrl.u32 %v11639_v14, 16  ;;  %v1632_v18 = vshll.u32 %v11639_v14, 16  ;;  %v11640_v13 = vpack.c.bf16 %v966_v63, %v966_v63  ;;  %v2076_v9 = vld [vmem:[#allocation2 + $0x108] sm:$0xf] }
 0x213   :  { %v1612_v16 = vshrl.u32 %v11637_v20, 16  ;;  %v1615_v6 = vshll.u32 %v11637_v20, 16  ;;  %v11638_v21 = vpack.c.bf16 %v964_v26, %v964_v26  ;;  %v2610_v7 = vrot.slane %v2608_v53, 4  ;;  %v2001_v25 = vld [vmem:[#allocation2 + $0x168] sm:$0xf]  ;;  %v13432_v20 = vld [vmem:[#allocation3 + $0x28] sm:$0xff]  }
 0x214   :  { %12483 = vmatmul.mubr.bf16.gmra.mrb[28].mxu1 %v11337_v19  ;;  %v1631_v3 = vrot.slane %v1629_v5, 7  ;;  %v1637_v22 = vshrl.u32 %v11640_v13, 16  ;;  %v1640_v30 = vshll.u32 %v11640_v13, 16  ;;  %v2613_v24 = vrot.slane %v2611_v11, 5  ;;  %v1994_v59 = vld [vmem:[#allocation2 + $0x15c] sm:$0xf]  ;;  %12204 = vmatprep.subr.bf16.mxu0 %v13432_v20 }
 0x215   :  { %v1614_v12 = vrot.slane %v1612_v16, 7  ;;  %v1620_v52 = vshrl.u32 %v11638_v21, 16  ;;  %v1623_v37 = vshll.u32 %v11638_v21, 16  ;;  %v2617_v44 = vshll.u32 %v2075_v8, 16  ;;  %v2005_v55 = vld [vmem:[#allocation2 + $0x170] sm:$0x1]  ;;  %12205 = vmatpush3.bf16.msra.mxu0 %v13432_v20 }
 0x216   :  { %v1634_v39 = vor.u32 %v1632_v18, %v1631_v3  ;;  %v1635_v51 = vrot.slane %v1631_v3, 4  ;;  %v1639_v33 = vrot.slane %v1637_v22, 7  ;;  %v2614_v34 = vor.u32 %v2613_v24, %v2610_v7  ;;  %v5529_v53 = vld [vmem:[#allocation2 + $0x104] sm:$0x1]  ;;  %v13431_v32 = vld [vmem:[#allocation3 + $0x178] sm:$0xff]  }
 0x217   :  { %v1617_v40 = vor.u32 %v1615_v6, %v1614_v12  ;;  %v1618_v35 = vrot.slane %v1614_v12, 4  ;;  %v1622_v43 = vrot.slane %v1620_v52, 7  ;;  %v14671_v56 = vrot.slane %v2617_v44, 5  ;;  %v1998_v49 = vld [vmem:[#allocation2 + $0x164] sm:$0x1]  ;;  %12528 = vmatprep.subr.bf16.mxu1 %v13431_v32 }
 0x218   :  { %v2002_v10 = vsel %vm14108_vm12, %v1634_v39, %v2001_v25  ;;  %v1642_v45 = vor.u32 %v1640_v30, %v1639_v33  ;;  %v1644_v58 = vrot.slane %v1639_v33, 4  ;;  %v2615_v23 = vrot.slane %v2614_v34, 4  ;;  %v2077_v6 = vld [vmem:[#allocation2 + $0x10c] sm:$0xf]  ;;  %v5530_v30 = vld [vmem:[#allocation2 + $0x108] sm:$0xf]  ;;  %12529 = vmatpush3.bf16.msra.mxu1 %v13431_v32 }
 0x219   :  { %2003 = vst [vmem:[#allocation2 + $0x168] sm:$0xf] %v2002_v10  ;;  %v1995_v1 = vsel %vm14108_vm12, %v1617_v40, %v1994_v59  ;;  %v1625_v2 = vor.u32 %v1623_v37, %v1622_v43  ;;  %v1627_v4 = vrot.slane %v1622_v43, 4  ;;  %v2621_v46 = vshrl.u32 %v2075_v8, 16  ;;  %v13433_v24 = vld [vmem:[#allocation3 + $0x30] sm:$0xff]  }
 0x21a   :  { %1996 = vst [vmem:[#allocation2 + $0x15c] sm:$0xf] %v1995_v1  ;;  %v1643_v29 = vsel %vm14115_vm13, %v1635_v51, %v1642_v45  ;;  %v2006_v17 = vsel %vm13916_vm4, %v1644_v58, %v2005_v55  ;;  %v2620_v14 = vsel %vm14063_vm9, %v2615_v23, %v14671_v56  ;;  %v2627_v63 = vshll.u32 %v2135_v41, 16  ;;  %v2136_v37 = vld [vmem:[#allocation2 + $0x110] sm:$0x1]  ;;  %12206 = vmatprep.subr.bf16.mxu0 %v13433_v24 }
 0x21b   :  { %2004 = vst [vmem:[#allocation2 + $0x16c] sm:$0xf] %v1643_v29  ;;  %2007 = vst [vmem:[#allocation2 + $0x170] sm:$0x1] %v2006_v17  ;;  %v1626_v26 = vsel %vm14115_vm13, %v1618_v35, %v1625_v2  ;;  %v1999_v11 = vsel %vm13916_vm4, %v1627_v4, %v1998_v49  ;;  %v2623_v19 = vrot.slane %v2621_v46, 4  ;;  %v6002_v5 = vshrl.u32 %v5527_v28, 16  ;;  %12207 = vmatpush3.bf16.msra.mxu0 %v13433_v24 }
 0x21c   :  { %1997 = vst [vmem:[#allocation2 + $0x160] sm:$0xf] %v1626_v26  ;;  %2000 = vst [vmem:[#allocation2 + $0x164] sm:$0x1] %v1999_v11  ;;  %v2629_v18 = vrot.slane %v2627_v63, 5  ;;  %v6005_v13 = vshll.u32 %v5527_v28, 16  ;;  %v881_v24 = vadd.f32 %v14551_v38, %v14490_v61 }
 0x21d   :  { %v6011_v8 = vshll.u32 %v5528_v60, 16  ;;  %v6015_v16 = vshrl.u32 %v5528_v60, 16  ;;  %v2624_v21 = vor.u32 %v2623_v19, %v14671_v56  ;;  %v6004_v7 = vrot.slane %v6002_v5, 4  ;;  %v5531_v10 = vld [vmem:[#allocation2 + $0x10c] sm:$0xf] }
 0x21e   :  { %v6021_v3 = vshll.u32 %v5529_v53, 16  ;;  %v2632_v22 = vshrl.u32 %v2076_v9, 16  ;;  %v6007_v25 = vrot.slane %v6005_v13, 5  ;;  %v2635_v44 = vshll.u32 %v2076_v9, 16  ;;  %v148_v1 = vld [vmem:[#allocation2 + $0x180] sm:$0x1] }
 0x21f   :  { %v6013_v12 = vrot.slane %v6011_v8, 5  ;;  %v6017_v52 = vrot.slane %v6015_v16, 4  ;;  %v2625_v39 = vrot.slane %v2624_v21, 4  ;;  %v2641_v33 = vshll.u32 %v2077_v6, 16  ;;  %v5532_v46 = vld [vmem:[#allocation2 + $0x110] sm:$0x1] }
 0x220   :  { %v6023_v51 = vrot.slane %v6021_v3, 5  ;;  %v2634_v59 = vrot.slane %v2632_v22, 4  ;;  %v6008_v41 = vor.u32 %v6007_v25, %v6004_v7  ;;  %v2637_v40 = vrot.slane %v2635_v44, 5  ;;  %v145_v11 = vld [vmem:[#allocation2 + $0x174] sm:$0x1] }
 0x221   :  { %v6018_v34 = vor.u32 %v6017_v52, %v6013_v12  ;;  %v2645_v35 = vshrl.u32 %v2077_v6, 16  ;;  %v2630_v55 = vsel %vm14063_vm9, %v2625_v39, %v2629_v18  ;;  %v2643_v43 = vrot.slane %v2641_v33, 5  ;;  %v258_v19 = vld [vmem:[#allocation2 + $0x188] sm:$0x1]  ;;  %v255_v3 = vld [vmem:[#allocation2 + $0x17c] sm:$0x1] }
 0x222   :  { %v2651_v56 = vshll.u32 %v2136_v37, 16  ;;  %v6026_v45 = vshrl.u32 %v5530_v30, 16  ;;  %v11147_v58 = vcombine.low %v2620_v14, %v2630_v55  ;;  %v6009_v49 = vrot.slane %v6008_v41, 4  ;;  %v13437_v52 = vld [vmem:[#allocation3 + $0x180] sm:$0xff]  }
 0x223   :  { %v6019_v23 = vrot.slane %v6018_v34, 4  ;;  %v2638_v28 = vor.u32 %v2637_v40, %v2634_v59  ;;  %v2647_v2 = vrot.slane %v2645_v35, 4  ;;  %v6029_v9 = vshll.u32 %v5530_v30, 16  ;;  %12594 = vmatprep.subr.bf16.mxu1 %v13437_v52 }
 0x224   :  { %v2653_v4 = vrot.slane %v2651_v56, 5  ;;  %v6028_v60 = vrot.slane %v6026_v45, 4  ;;  %12167 = vmatmul.mubr.bf16.gmra.mrb[100].mxu0 %v11147_v58  ;;  %v6014_v29 = vsel %vm14063_vm9, %v6009_v49, %v6013_v12  ;;  %v6035_v53 = vshll.u32 %v5531_v10, 16  ;;  %v13434_v12 = vld [vmem:[#allocation3 + $0x38] sm:$0xff]  }
 0x225   :  { %v6024_v17 = vsel %vm14063_vm9, %v6019_v23, %v6023_v51  ;;  %v2639_v63 = vrot.slane %v2638_v28, 4  ;;  %v2648_v14 = vor.u32 %v2647_v2, %v2643_v43  ;;  %v6031_v20 = vrot.slane %v6029_v9, 5  ;;  %12208 = vmatprep.subr.bf16.mxu0 %v13434_v12 }
 0x226   :  { %v11338_v32 = vcombine.low %v6014_v29, %v6024_v17  ;;  %v6039_v26 = vshrl.u32 %v5531_v10, 16  ;;  %v6037_v18 = vrot.slane %v6035_v53, 5  ;;  %v6045_v13 = vshll.u32 %v5532_v46, 16  ;;  %12209 = vmatpush3.bf16.msra.mxu0 %v13434_v12 }
 0x227   :  { %v2644_v5 = vsel %vm14063_vm9, %v2639_v63, %v2643_v43  ;;  %v149_v8 = vsel %vm13916_vm4, 0, %v148_v1  ;;  %v2649_v16 = vrot.slane %v2648_v14, 4  ;;  %v6032_v6 = vor.u32 %v6031_v20, %v6028_v60  ;;  %v2079_v43 = vld [vmem:[#allocation2 + $0x118] sm:$0xf] }
 0x228   :  { %12486 = vmatprep.mubr.bf16.mxu1 %v11338_v32  ;;  %v6041_v21 = vrot.slane %v6039_v26, 4  ;;  %150 = vst [vmem:[#allocation2 + $0x180] sm:$0x1] %v149_v8  ;;  %v889_v7 = vadd.f32 %v14551_v38, %v14482_v31  ;;  %v6047_v22 = vrot.slane %v6045_v13, 5  ;;  %v146_v30 = vsel %vm13916_vm4, 0, %v145_v11 }
 0x229   :  { %v259_v25 = vsel %vm13991_vm6, 0, %v258_v19  ;;  %v2654_v37 = vsel %vm14063_vm9, %v2649_v16, %v2653_v4  ;;  %v6033_v44 = vrot.slane %v6032_v6, 4  ;;  %147 = vst [vmem:[#allocation2 + $0x174] sm:$0x1] %v146_v30  ;;  %v2078_v31 = vld [vmem:[#allocation2 + $0x114] sm:$0xf]  ;;  %v892_v41 = vadd.f32 %v14551_v38, %v14500_v42 }
 0x22a   :  { %v6042_v39 = vor.u32 %v6041_v21, %v6037_v18  ;;  %v969_v51 = vmax.f32 %v889_v7, 0.0  ;;  %260 = vst [vmem:[#allocation2 + $0x188] sm:$0x1] %v259_v25  ;;  %v11148_v59 = vcombine.low %v2644_v5, %v2654_v37  ;;  %v967_v33 = vmax.f32 %v881_v24, 0.0  ;;  %v5533_v5 = vld [vmem:[#allocation2 + $0x114] sm:$0xf] }
 0x22b   :  { %v256_v61 = vsel %vm13991_vm6, 0, %v255_v3  ;;  %v6038_v34 = vsel %vm14063_vm9, %v6033_v44, %v6037_v18  ;;  %v884_v55 = vadd.f32 %v14551_v38, %v14508_v57  ;;  %v970_v10 = vmax.f32 %v892_v41, 0.0  ;;  %v2137_v6 = vld [vmem:[#allocation2 + $0x11c] sm:$0x1]  ;;  %v5534_v25 = vld [vmem:[#allocation2 + $0x118] sm:$0xf] }
 0x22c   :  { %v6043_v40 = vrot.slane %v6042_v39, 4  ;;  %v11643_v35 = vpack.c.bf16 %v969_v51, %v969_v51  ;;  %257 = vst [vmem:[#allocation2 + $0x17c] sm:$0x1] %v256_v61  ;;  %12170 = vmatprep.mubr.bf16.mxu0 %v11148_v59  ;;  %v11641_v56 = vpack.c.bf16 %v967_v33, %v967_v33  ;;  %v2656_v42 = vshrl.u32 %v2078_v31, 16 }
 0x22d   :  { %v2659_v45 = vshll.u32 %v2078_v31, 16  ;;  %v968_v28 = vmax.f32 %v884_v55, 0.0  ;;  %v11644_v46 = vpack.c.bf16 %v970_v10, %v970_v10  ;;  %v2665_v32 = vshll.u32 %v2079_v43, 16 }
 0x22e   :  { %v6048_v58 = vsel %vm14063_vm9, %v6043_v40, %v6047_v22  ;;  %v1663_v49 = vshrl.u32 %v11643_v35, 16  ;;  %v1666_v23 = vshll.u32 %v11643_v35, 16  ;;  %v1646_v2 = vshrl.u32 %v11641_v56, 16  ;;  %v2080_v35 = vld [vmem:[#allocation2 + $0x120] sm:$0xf] }
 0x22f   :  { %v11339_v1 = vcombine.low %v6038_v34, %v6048_v58  ;;  %v1649_v4 = vshll.u32 %v11641_v56, 16  ;;  %v11642_v9 = vpack.c.bf16 %v968_v28, %v968_v28  ;;  %v2658_v57 = vrot.slane %v2656_v42, 4  ;;  %v2015_v29 = vld [vmem:[#allocation2 + $0x180] sm:$0xf]  ;;  %v5535_v34 = vld [vmem:[#allocation2 + $0x11c] sm:$0x1] }
 0x230   :  { %v1665_v60 = vrot.slane %v1663_v49, 7  ;;  %v2661_v38 = vrot.slane %v2659_v45, 5  ;;  %v1648_v17 = vrot.slane %v1646_v2, 7  ;;  %v1671_v63 = vshrl.u32 %v11644_v46, 16  ;;  %v2008_v26 = vld [vmem:[#allocation2 + $0x174] sm:$0xf] }
 0x231   :  { %12487 = vmatmul.mubr.bf16.gmra.mrb[32].mxu1 %v11339_v1  ;;  %v1674_v53 = vshll.u32 %v11644_v46, 16  ;;  %v1654_v11 = vshrl.u32 %v11642_v9, 16  ;;  %v1657_v19 = vshll.u32 %v11642_v9, 16  ;;  %v2019_v16 = vld [vmem:[#allocation2 + $0x188] sm:$0x1]  ;;  %v2667_v30 = vrot.slane %v2665_v32, 5 }
 0x232   :  { %v1668_v14 = vor.u32 %v1666_v23, %v1665_v60  ;;  %v1669_v20 = vrot.slane %v1665_v60, 4  ;;  %v1651_v18 = vor.u32 %v1649_v4, %v1648_v17  ;;  %v1652_v13 = vrot.slane %v1648_v17, 4  ;;  %v2081_v42 = vld [vmem:[#allocation2 + $0x124] sm:$0xf]  ;;  %v2138_v2 = vld [vmem:[#allocation2 + $0x128] sm:$0x1] }
 0x233   :  { %v1673_v8 = vrot.slane %v1671_v63, 7  ;;  %v2662_v21 = vor.u32 %v2661_v38, %v2658_v57  ;;  %v1656_v3 = vrot.slane %v1654_v11, 7  ;;  %v2012_v22 = vld [vmem:[#allocation2 + $0x17c] sm:$0x1]  ;;  %v2669_v24 = vshrl.u32 %v2079_v43, 16 }
 0x234   :  { %v2016_v7 = vsel %vm14108_vm12, %v1668_v14, %v2015_v29  ;;  %v2009_v12 = vsel %vm14108_vm12, %v1651_v18, %v2008_v26  ;;  %v2675_v59 = vshll.u32 %v2137_v6, 16  ;;  %v6050_v40 = vshrl.u32 %v5533_v5, 16  ;;  %v5536_v29 = vld [vmem:[#allocation2 + $0x120] sm:$0xf]  ;;  %v5537_v14 = vld [vmem:[#allocation2 + $0x124] sm:$0xf] }
 0x235   :  { %2017 = vst [vmem:[#allocation2 + $0x180] sm:$0xf] %v2016_v7  ;;  %v1676_v52 = vor.u32 %v1674_v53, %v1673_v8  ;;  %v1678_v37 = vrot.slane %v1673_v8, 4  ;;  %v2663_v44 = vrot.slane %v2662_v21, 4  ;;  %2010 = vst [vmem:[#allocation2 + $0x174] sm:$0xf] %v2009_v12  ;;  %v1659_v39 = vor.u32 %v1657_v19, %v1656_v3 }
 0x236   :  { %v1661_v51 = vrot.slane %v1656_v3, 4  ;;  %v2671_v31 = vrot.slane %v2669_v24, 4  ;;  %v2677_v10 = vrot.slane %v2675_v59, 5  ;;  %v6052_v45 = vrot.slane %v6050_v40, 4  ;;  %v5538_v21 = vld [vmem:[#allocation2 + $0x128] sm:$0x1] }
 0x237   :  { %v1677_v33 = vsel %vm14115_vm13, %v1669_v20, %v1676_v52  ;;  %v2020_v41 = vsel %vm13916_vm4, %v1678_v37, %v2019_v16  ;;  %v2668_v61 = vsel %vm14063_vm9, %v2663_v44, %v2667_v30  ;;  %v1660_v55 = vsel %vm14115_vm13, %v1652_v13, %v1659_v39  ;;  %v154_v12 = vld [vmem:[#allocation2 + $0x198] sm:$0x1] }
 0x238   :  { %2018 = vst [vmem:[#allocation2 + $0x184] sm:$0xf] %v1677_v33  ;;  %2021 = vst [vmem:[#allocation2 + $0x188] sm:$0x1] %v2020_v41  ;;  %v2013_v43 = vsel %vm13916_vm4, %v1661_v51, %v2012_v22  ;;  %v2672_v56 = vor.u32 %v2671_v31, %v2667_v30  ;;  %v6053_v58 = vshll.u32 %v5533_v5, 16  ;;  %v6059_v49 = vshll.u32 %v5534_v25, 16 }
 0x239   :  { %2011 = vst [vmem:[#allocation2 + $0x178] sm:$0xf] %v1660_v55  ;;  %2014 = vst [vmem:[#allocation2 + $0x17c] sm:$0x1] %v2013_v43  ;;  %v6063_v23 = vshrl.u32 %v5534_v25, 16  ;;  %v6069_v1 = vshll.u32 %v5535_v34, 16 }
 0x23a   :  { %v2673_v28 = vrot.slane %v2672_v56, 4  ;;  %v2680_v4 = vshrl.u32 %v2080_v35, 16  ;;  %v2683_v46 = vshll.u32 %v2080_v35, 16  ;;  %v6055_v60 = vrot.slane %v6053_v58, 5  ;;  %v151_v51 = vld [vmem:[#allocation2 + $0x18c] sm:$0x1] }
 0x23b   :  { %v6061_v9 = vrot.slane %v6059_v49, 5  ;;  %v6065_v57 = vrot.slane %v6063_v23, 4  ;;  %v2689_v38 = vshll.u32 %v2081_v42, 16  ;;  %v6071_v63 = vrot.slane %v6069_v1, 5  ;;  %v13574_v55 = vld [vmem:[%s16170_s2] ss:$0 sm:$0xff] }
 0x23c   :  { %v2678_v17 = vsel %vm14063_vm9, %v2673_v28, %v2677_v10  ;;  %v2682_v53 = vrot.slane %v2680_v4, 4  ;;  %v2685_v32 = vrot.slane %v2683_v46, 5  ;;  %v6056_v26 = vor.u32 %v6055_v60, %v6052_v45  ;;  %v261_v58 = vld [vmem:[#allocation2 + $0x194] sm:$0x1] }
 0x23d   :  { %v11149_v20 = vcombine.low %v2668_v61, %v2678_v17  ;;  %v6066_v11 = vor.u32 %v6065_v57, %v6061_v9  ;;  %v2691_v19 = vrot.slane %v2689_v38, 5  ;;  %v2693_v18 = vshrl.u32 %v2081_v42, 16  ;;  %v264_v61 = vld [vmem:[#allocation2 + $0x1a0] sm:$0x1] }
 0x23e   :  { %v2686_v5 = vor.u32 %v2685_v32, %v2682_v53  ;;  %v2699_v13 = vshll.u32 %v2138_v2, 16  ;;  %v6074_v8 = vshrl.u32 %v5536_v29, 16  ;;  %v6057_v16 = vrot.slane %v6056_v26, 4  ;;  %v2082_v2 = vld [vmem:[#allocation2 + $0x12c] sm:$0xf] }
 0x23f   :  { %12171 = vmatmul.mubr.bf16.gmra.mrb[104].mxu0 %v11149_v20  ;;  %v6067_v6 = vrot.slane %v6066_v11, 4  ;;  %v6077_v7 = vshll.u32 %v5536_v29, 16  ;;  %v6083_v3 = vshll.u32 %v5537_v14, 16  ;;  %v2695_v30 = vrot.slane %v2693_v18, 4  ;;  %v2083_v18 = vld [vmem:[#allocation2 + $0x130] sm:$0xf] }
 0x240   :  { %v2687_v22 = vrot.slane %v2686_v5, 4  ;;  %v2701_v24 = vrot.slane %v2699_v13, 5  ;;  %v6076_v25 = vrot.slane %v6074_v8, 4  ;;  %v6062_v52 = vsel %vm14063_vm9, %v6057_v16, %v6061_v9 }
 0x241   :  { %v6072_v37 = vsel %vm14063_vm9, %v6067_v6, %v6071_v63  ;;  %v6079_v44 = vrot.slane %v6077_v7, 5  ;;  %v6085_v39 = vrot.slane %v6083_v3, 5  ;;  %v2696_v33 = vor.u32 %v2695_v30, %v2691_v19 }
 0x242   :  { %v11340_v31 = vcombine.low %v6062_v52, %v6072_v37  ;;  %v2692_v59 = vsel %vm14063_vm9, %v2687_v22, %v2691_v19  ;;  %v6087_v41 = vshrl.u32 %v5537_v14, 16  ;;  %v6093_v40 = vshll.u32 %v5538_v21, 16  ;;  %v5539_v37 = vld [vmem:[#allocation2 + $0x12c] sm:$0xf] }
 0x243   :  { %v6080_v34 = vor.u32 %v6079_v44, %v6076_v25  ;;  %v155_v35 = vsel %vm13916_vm4, 0, %v154_v12  ;;  %v905_v43 = vadd.f32 %v13574_v55, %v14534_v54  ;;  %v2697_v56 = vrot.slane %v2696_v33, 4 }
 0x244   :  { %12490 = vmatprep.mubr.bf16.mxu1 %v11340_v31  ;;  %v6089_v10 = vrot.slane %v6087_v41, 4  ;;  %156 = vst [vmem:[#allocation2 + $0x198] sm:$0x1] %v155_v35  ;;  %v152_v42 = vsel %vm13916_vm4, 0, %v151_v51  ;;  %v897_v45 = vadd.f32 %v13574_v55, %v14538_v62  ;;  %v6095_v23 = vrot.slane %v6093_v40, 5 }
 0x245   :  { %v6081_v49 = vrot.slane %v6080_v34, 4  ;;  %v973_v28 = vmax.f32 %v905_v43, 0.0  ;;  %153 = vst [vmem:[#allocation2 + $0x18c] sm:$0x1] %v152_v42  ;;  %v265_v1 = vsel %vm13991_vm6, 0, %v264_v61  ;;  %v2702_v54 = vsel %vm14063_vm9, %v2697_v56, %v2701_v24 }
 0x246   :  { %v6090_v4 = vor.u32 %v6089_v10, %v6085_v39  ;;  %v971_v46 = vmax.f32 %v897_v45, 0.0  ;;  %266 = vst [vmem:[#allocation2 + $0x1a0] sm:$0x1] %v265_v1  ;;  %v908_v60 = vadd.f32 %v13574_v55, %v14542_v27  ;;  %v11150_v9 = vcombine.low %v2692_v59, %v2702_v54  ;;  %v2139_v31 = vld [vmem:[#allocation2 + $0x134] sm:$0x1] }
 0x247   :  { %v6086_v62 = vsel %vm14063_vm9, %v6081_v49, %v6085_v39  ;;  %v11647_v57 = vpack.c.bf16 %v973_v28, %v973_v28  ;;  %v262_v38 = vsel %vm13991_vm6, 0, %v261_v58  ;;  %v900_v53 = vadd.f32 %v13574_v55, %v14555_v47  ;;  %v5540_v58 = vld [vmem:[#allocation2 + $0x130] sm:$0xf] }
 0x248   :  { %v6091_v29 = vrot.slane %v6090_v4, 4  ;;  %v11645_v17 = vpack.c.bf16 %v971_v46, %v971_v46  ;;  %v974_v63 = vmax.f32 %v908_v60, 0.0  ;;  %263 = vst [vmem:[#allocation2 + $0x194] sm:$0x1] %v262_v38  ;;  %12174 = vmatprep.mubr.bf16.mxu0 %v11150_v9  ;;  %v2704_v20 = vshrl.u32 %v2082_v2, 16 }
 0x249   :  { %v1697_v32 = vshrl.u32 %v11647_v57, 16  ;;  %v1700_v14 = vshll.u32 %v11647_v57, 16  ;;  %v2707_v26 = vshll.u32 %v2082_v2, 16  ;;  %v972_v16 = vmax.f32 %v900_v53, 0.0  ;;  %v5541_v2 = vld [vmem:[#allocation2 + $0x134] sm:$0x1] }
 0x24a   :  { %v6096_v27 = vsel %vm14063_vm9, %v6091_v29, %v6095_v23  ;;  %v1680_v11 = vshrl.u32 %v11645_v17, 16  ;;  %v1683_v19 = vshll.u32 %v11645_v17, 16  ;;  %v11648_v5 = vpack.c.bf16 %v974_v63, %v974_v63  ;;  %v2085_v63 = vld [vmem:[#allocation2 + $0x13c] sm:$0xf] }
 0x24b   :  { %v11341_v13 = vcombine.low %v6086_v62, %v6096_v27  ;;  %v1699_v8 = vrot.slane %v1697_v32, 7  ;;  %v2706_v6 = vrot.slane %v2704_v20, 4  ;;  %v2029_v21 = vld [vmem:[#allocation2 + $0x198] sm:$0xf]  ;;  %v2709_v22 = vrot.slane %v2707_v26, 5 }
 0x24c   :  { %v1682_v7 = vrot.slane %v1680_v11, 7  ;;  %v1705_v3 = vshrl.u32 %v11648_v5, 16  ;;  %v1708_v47 = vshll.u32 %v11648_v5, 16  ;;  %v2022_v25 = vld [vmem:[#allocation2 + $0x18c] sm:$0xf]  ;;  %v11646_v12 = vpack.c.bf16 %v972_v16, %v972_v16 }
 0x24d   :  { %12491 = vmatmul.mubr.bf16.gmra.mrb[36].mxu1 %v11341_v13  ;;  %v1702_v30 = vor.u32 %v1700_v14, %v1699_v8  ;;  %v1703_v24 = vrot.slane %v1699_v8, 4  ;;  %v2713_v52 = vshll.u32 %v2083_v18, 16  ;;  %v2710_v59 = vor.u32 %v2709_v22, %v2706_v6  ;;  %v2033_v41 = vld [vmem:[#allocation2 + $0x1a0] sm:$0x1]  ;;  %v2084_v62 = vld [vmem:[#allocation2 + $0x138] sm:$0xf] }
 0x24e   :  { %v1685_v44 = vor.u32 %v1683_v19, %v1682_v7  ;;  %v1686_v39 = vrot.slane %v1682_v7, 4  ;;  %v1707_v51 = vrot.slane %v1705_v3, 7  ;;  %v1688_v61 = vshrl.u32 %v11646_v12, 16  ;;  %v2140_v19 = vld [vmem:[#allocation2 + $0x140] sm:$0x1] }
 0x24f   :  { %v2030_v33 = vsel %vm14108_vm12, %v1702_v30, %v2029_v21  ;;  %v1691_v34 = vshll.u32 %v11646_v12, 16  ;;  %v2715_v40 = vrot.slane %v2713_v52, 5  ;;  %v2711_v56 = vrot.slane %v2710_v59, 4  ;;  %v2026_v1 = vld [vmem:[#allocation2 + $0x194] sm:$0x1] }
 0x250   :  { %2031 = vst [vmem:[#allocation2 + $0x198] sm:$0xf] %v2030_v33  ;;  %v2023_v35 = vsel %vm14108_vm12, %v1685_v44, %v2022_v25  ;;  %v1710_v55 = vor.u32 %v1708_v47, %v1707_v51  ;;  %v1712_v43 = vrot.slane %v1707_v51, 4  ;;  %v1690_v10 = vrot.slane %v1688_v61, 7  ;;  %v5542_v3 = vld [vmem:[#allocation2 + $0x138] sm:$0xf] }
 0x251   :  { %2024 = vst [vmem:[#allocation2 + $0x18c] sm:$0xf] %v2023_v35  ;;  %v2717_v42 = vshrl.u32 %v2083_v18, 16  ;;  %v2723_v45 = vshll.u32 %v2139_v31, 16  ;;  %v6098_v49 = vshrl.u32 %v5539_v37, 16  ;;  %v2716_v48 = vsel %vm14063_vm9, %v2711_v56, %v2715_v40 }
 0x252   :  { %v1711_v23 = vsel %vm14115_vm13, %v1703_v24, %v1710_v55  ;;  %v2034_v28 = vsel %vm13916_vm4, %v1712_v43, %v2033_v41  ;;  %v6101_v54 = vshll.u32 %v5539_v37, 16  ;;  %v1693_v4 = vor.u32 %v1691_v34, %v1690_v10  ;;  %v5543_v25 = vld [vmem:[#allocation2 + $0x13c] sm:$0xf]  ;;  %v5544_v31 = vld [vmem:[#allocation2 + $0x140] sm:$0x1] }
 0x253   :  { %2032 = vst [vmem:[#allocation2 + $0x19c] sm:$0xf] %v1711_v23  ;;  %2035 = vst [vmem:[#allocation2 + $0x1a0] sm:$0x1] %v2034_v28  ;;  %v1695_v46 = vrot.slane %v1690_v10, 4  ;;  %v2719_v60 = vrot.slane %v2717_v42, 4 }
 0x254   :  { %v2725_v9 = vrot.slane %v2723_v45, 5  ;;  %v6100_v57 = vrot.slane %v6098_v49, 4  ;;  %v6103_v38 = vrot.slane %v6101_v54, 5  ;;  %v6107_v29 = vshll.u32 %v5540_v58, 16  ;;  %v2086_v35 = vld [vmem:[#allocation2 + $0x144] sm:$0xf] }
 0x255   :  { %v6111_v17 = vshrl.u32 %v5540_v58, 16  ;;  %v1694_v53 = vsel %vm14115_vm13, %v1686_v39, %v1693_v4  ;;  %v2027_v32 = vsel %vm13916_vm4, %v1695_v46, %v2026_v1  ;;  %v2720_v14 = vor.u32 %v2719_v60, %v2715_v40  ;;  %v2087_v42 = vld [vmem:[#allocation2 + $0x148] sm:$0xf]  ;;  %v5545_v4 = vld [vmem:[#allocation2 + $0x144] sm:$0xf] }
 0x256   :  { %v6117_v20 = vshll.u32 %v5541_v2, 16  ;;  %2025 = vst [vmem:[#allocation2 + $0x190] sm:$0xf] %v1694_v53  ;;  %2028 = vst [vmem:[#allocation2 + $0x194] sm:$0x1] %v2027_v32  ;;  %v6104_v26 = vor.u32 %v6103_v38, %v6100_v57  ;;  %v6109_v27 = vrot.slane %v6107_v29, 5 }
 0x257   :  { %v6113_v11 = vrot.slane %v6111_v17, 4  ;;  %v2728_v5 = vshrl.u32 %v2084_v62, 16  ;;  %v2721_v18 = vrot.slane %v2720_v14, 4  ;;  %v2731_v8 = vshll.u32 %v2084_v62, 16  ;;  %v5546_v57 = vld [vmem:[#allocation2 + $0x148] sm:$0xf] }
 0x258   :  { %v6119_v13 = vrot.slane %v6117_v20, 5  ;;  %v2737_v16 = vshll.u32 %v2085_v63, 16  ;;  %v6105_v6 = vrot.slane %v6104_v26, 4  ;;  %v2741_v7 = vshrl.u32 %v2085_v63, 16 }
 0x259   :  { %v6114_v21 = vor.u32 %v6113_v11, %v6109_v27  ;;  %v2730_v0 = vrot.slane %v2728_v5, 4  ;;  %v2726_v47 = vsel %vm14063_vm9, %v2721_v18, %v2725_v9  ;;  %v2733_v22 = vrot.slane %v2731_v8, 5  ;;  %v5547_v11 = vld [vmem:[#allocation2 + $0x14c] sm:$0x1] }
 0x25a   :  { %v2739_v30 = vrot.slane %v2737_v16, 5  ;;  %v2747_v24 = vshll.u32 %v2140_v19, 16  ;;  %v11151_v12 = vcombine.low %v2716_v48, %v2726_v47  ;;  %v6110_v52 = vsel %vm14063_vm9, %v6105_v6, %v6109_v27  ;;  %v2141_v48 = vld [vmem:[#allocation2 + $0x14c] sm:$0x1]  ;;  %v2088_v6 = vld [vmem:[#allocation2 + $0x150] sm:$0xf] }
 0x25b   :  { %v6115_v37 = vrot.slane %v6114_v21, 4  ;;  %v2743_v44 = vrot.slane %v2741_v7, 4  ;;  %v2734_v39 = vor.u32 %v2733_v22, %v2730_v0  ;;  %v6122_v59 = vshrl.u32 %v5542_v3, 16  ;;  %v2089_v47 = vld [vmem:[#allocation2 + $0x154] sm:$0xf] }
 0x25c   :  { %v2749_v51 = vrot.slane %v2747_v24, 5  ;;  %v6125_v33 = vshll.u32 %v5542_v3, 16  ;;  %12175 = vmatmul.mubr.bf16.gmra.mrb[108].mxu0 %v11151_v12  ;;  %v6131_v34 = vshll.u32 %v5543_v25, 16  ;;  %v6135_v40 = vshrl.u32 %v5543_v25, 16  ;;  %v2142_v12 = vld [vmem:[#allocation2 + $0x158] sm:$0x1] }
 0x25d   :  { %v6120_v41 = vsel %vm14063_vm9, %v6115_v37, %v6119_v13  ;;  %v2744_v61 = vor.u32 %v2743_v44, %v2739_v30  ;;  %v2735_v43 = vrot.slane %v2734_v39, 4  ;;  %v6124_v56 = vrot.slane %v6122_v59, 4 }
 0x25e   :  { %v11342_v55 = vcombine.low %v6110_v52, %v6120_v41  ;;  %v6127_v10 = vrot.slane %v6125_v33, 5  ;;  %v6133_v58 = vrot.slane %v6131_v34, 5  ;;  %v6137_v49 = vrot.slane %v6135_v40, 4 }
 0x25f   :  { %v2745_v45 = vrot.slane %v2744_v61, 4  ;;  %v6141_v23 = vshll.u32 %v5544_v31, 16  ;;  %v2740_v28 = vsel %vm14063_vm9, %v2735_v43, %v2739_v30  ;;  %v2752_v2 = vshrl.u32 %v2086_v35, 16 }
 0x260   :  { %12494 = vmatprep.mubr.bf16.mxu1 %v11342_v55  ;;  %v6128_v1 = vor.u32 %v6127_v10, %v6124_v56  ;;  %v2755_v54 = vshll.u32 %v2086_v35, 16  ;;  %v6138_v60 = vor.u32 %v6137_v49, %v6133_v58  ;;  %v2761_v62 = vshll.u32 %v2087_v42, 16  ;;  %v14792_v55 = vld [vmem:[#allocation3 + $0x80] sm:$0xff]  }
 0x261   :  { %v2750_v46 = vsel %vm14063_vm9, %v2745_v45, %v2749_v51  ;;  %v6143_v9 = vrot.slane %v6141_v23, 5  ;;  %v2754_v17 = vrot.slane %v2752_v2, 4  ;;  %v2765_v14 = vshrl.u32 %v2087_v42, 16  ;;  %v5548_v51 = vld [vmem:[#allocation2 + $0x150] sm:$0xf]  ;;  %12274 = vmatprep.subr.bf16.mxu0 %v14792_v55 }
 0x262   :  { %v11152_v38 = vcombine.low %v2740_v28, %v2750_v46  ;;  %v6129_v29 = vrot.slane %v6128_v1, 4  ;;  %v2757_v63 = vrot.slane %v2755_v54, 5  ;;  %v6139_v53 = vrot.slane %v6138_v60, 4  ;;  %v5549_v45 = vld [vmem:[#allocation2 + $0x154] sm:$0xf] }
 0x263   :  { %v2763_v32 = vrot.slane %v2761_v62, 5  ;;  %v2771_v20 = vshll.u32 %v2141_v48, 16  ;;  %v6146_v19 = vshrl.u32 %v5545_v4, 16  ;;  %v6149_v5 = vshll.u32 %v5545_v4, 16  ;;  %v5550_v1 = vld [vmem:[#allocation2 + $0x158] sm:$0x1] }
 0x264   :  { %12178 = vmatprep.mubr.bf16.mxu0 %v11152_v38  ;;  %v6134_v26 = vsel %vm14063_vm9, %v6129_v29, %v6133_v58  ;;  %v2758_v27 = vor.u32 %v2757_v63, %v2754_v17  ;;  %v6144_v18 = vsel %vm14063_vm9, %v6139_v53, %v6143_v9  ;;  %v2767_v13 = vrot.slane %v2765_v14, 4  ;;  %v2090_v46 = vld [vmem:[#allocation2 + $0x15c] sm:$0xf]  ;;  %v2091_v53 = vld [vmem:[#allocation2 + $0x160] sm:$0xf] }
 0x265   :  { %v2773_v8 = vrot.slane %v2771_v20, 5  ;;  %v6155_v16 = vshll.u32 %v5546_v57, 16  ;;  %v11343_v21 = vcombine.low %v6134_v26, %v6144_v18  ;;  %v6148_v7 = vrot.slane %v6146_v19, 4 }
 0x266   :  { %v2759_v0 = vrot.slane %v2758_v27, 4  ;;  %v6151_v3 = vrot.slane %v6149_v5, 5  ;;  %v2768_v22 = vor.u32 %v2767_v13, %v2763_v32  ;;  %v6159_v24 = vshrl.u32 %v5546_v57, 16  ;;  %v2143_v5 = vld [vmem:[#allocation2 + $0x164] sm:$0x1] }
 0x267   :  { %v6157_v30 = vrot.slane %v6155_v16, 5  ;;  %v6165_v25 = vshll.u32 %v5547_v11, 16  ;;  %12495 = vmatmul.mubr.bf16.gmra.mrb[40].mxu1 %v11343_v21  ;;  %v2776_v44 = vshrl.u32 %v2088_v6, 16  ;;  %v2779_v39 = vshll.u32 %v2088_v6, 16  ;;  %v5551_v21 = vld [vmem:[#allocation2 + $0x15c] sm:$0xf] }
 0x268   :  { %v2764_v52 = vsel %vm14063_vm9, %v2759_v0, %v2763_v32  ;;  %v6152_v37 = vor.u32 %v6151_v3, %v6148_v7  ;;  %v2769_v31 = vrot.slane %v2768_v22, 4  ;;  %v6161_v59 = vrot.slane %v6159_v24, 4  ;;  %v5552_v22 = vld [vmem:[#allocation2 + $0x160] sm:$0xf] }
 0x269   :  { %v6167_v33 = vrot.slane %v6165_v25, 5  ;;  %v2785_v41 = vshll.u32 %v2089_v47, 16  ;;  %v2778_v34 = vrot.slane %v2776_v44, 4  ;;  %v2781_v40 = vrot.slane %v2779_v39, 5 }
 0x26a   :  { %v6153_v61 = vrot.slane %v6152_v37, 4  ;;  %v2789_v35 = vshrl.u32 %v2089_v47, 16  ;;  %v2774_v43 = vsel %vm14063_vm9, %v2769_v31, %v2773_v8  ;;  %v6162_v56 = vor.u32 %v6161_v59, %v6157_v30 }
 0x26b   :  { %v2787_v10 = vrot.slane %v2785_v41, 5  ;;  %v2795_v42 = vshll.u32 %v2142_v12, 16  ;;  %v11153_v58 = vcombine.low %v2764_v52, %v2774_v43  ;;  %v2782_v23 = vor.u32 %v2781_v40, %v2778_v34 }
 0x26c   :  { %v6158_v49 = vsel %vm14063_vm9, %v6153_v61, %v6157_v30  ;;  %v2791_v28 = vrot.slane %v2789_v35, 4  ;;  %v6163_v48 = vrot.slane %v6162_v56, 4  ;;  %v6170_v54 = vshrl.u32 %v5548_v51, 16  ;;  %v2092_v61 = vld [vmem:[#allocation2 + $0x168] sm:$0xf] }
 0x26d   :  { %v2797_v2 = vrot.slane %v2795_v42, 5  ;;  %v6173_v4 = vshll.u32 %v5548_v51, 16  ;;  %12179 = vmatmul.mubr.bf16.gmra.mrb[112].mxu0 %v11153_v58  ;;  %v2783_v60 = vrot.slane %v2782_v23, 4  ;;  %v6179_v62 = vshll.u32 %v5549_v45, 16  ;;  %v2093_v56 = vld [vmem:[#allocation2 + $0x16c] sm:$0xf] }
 0x26e   :  { %v2792_v9 = vor.u32 %v2791_v28, %v2787_v10  ;;  %v6183_v57 = vshrl.u32 %v5549_v45, 16  ;;  %v6168_v38 = vsel %vm14063_vm9, %v6163_v48, %v6167_v33  ;;  %v6172_v29 = vrot.slane %v6170_v54, 4  ;;  %v5553_v33 = vld [vmem:[#allocation2 + $0x164] sm:$0x1]  ;;  %v2144_v54 = vld [vmem:[#allocation2 + $0x170] sm:$0x1] }
 0x26f   :  { %v6175_v17 = vrot.slane %v6173_v4, 5  ;;  %v6189_v63 = vshll.u32 %v5550_v1, 16  ;;  %v11344_v32 = vcombine.low %v6158_v49, %v6168_v38  ;;  %v2788_v14 = vsel %vm14063_vm9, %v2783_v60, %v2787_v10  ;;  %v5554_v60 = vld [vmem:[#allocation2 + $0x168] sm:$0xf] }
 0x270   :  { %v2793_v20 = vrot.slane %v2792_v9, 4  ;;  %v6181_v26 = vrot.slane %v6179_v62, 5  ;;  %v6185_v11 = vrot.slane %v6183_v57, 4  ;;  %v2800_v18 = vshrl.u32 %v2090_v46, 16 }
 0x271   :  { %v6176_v27 = vor.u32 %v6175_v17, %v6172_v29  ;;  %v6191_v19 = vrot.slane %v6189_v63, 5  ;;  %12498 = vmatprep.mubr.bf16.mxu1 %v11344_v32  ;;  %v2803_v8 = vshll.u32 %v2090_v46, 16  ;;  %v2809_v16 = vshll.u32 %v2091_v53, 16  ;;  %v5555_v29 = vld [vmem:[#allocation2 + $0x16c] sm:$0xf] }
 0x272   :  { %v2798_v13 = vsel %vm14063_vm9, %v2793_v20, %v2797_v2  ;;  %v2813_v6 = vshrl.u32 %v2091_v53, 16  ;;  %v6186_v3 = vor.u32 %v6185_v11, %v6181_v26  ;;  %v2802_v47 = vrot.slane %v2800_v18, 4 }
 0x273   :  { %v11154_v0 = vcombine.low %v2788_v14, %v2798_v13  ;;  %v6177_v7 = vrot.slane %v6176_v27, 4  ;;  %v2805_v30 = vrot.slane %v2803_v8, 5  ;;  %v2811_v24 = vrot.slane %v2809_v16, 5  ;;  %v5556_v27 = vld [vmem:[#allocation2 + $0x170] sm:$0x1] }
 0x274   :  { %v2815_v25 = vrot.slane %v2813_v6, 4  ;;  %v2819_v12 = vshll.u32 %v2143_v5, 16  ;;  %v6187_v37 = vrot.slane %v6186_v3, 4  ;;  %v6194_v44 = vshrl.u32 %v5551_v21, 16  ;;  %v2094_v8 = vld [vmem:[#allocation2 + $0x174] sm:$0xf] }
 0x275   :  { %12182 = vmatprep.mubr.bf16.mxu0 %v11154_v0  ;;  %v6182_v52 = vsel %vm14063_vm9, %v6177_v7, %v6181_v26  ;;  %v6197_v39 = vshll.u32 %v5551_v21, 16  ;;  %v2806_v51 = vor.u32 %v2805_v30, %v2802_v47  ;;  %v6203_v41 = vshll.u32 %v5552_v22, 16  ;;  %v2095_v30 = vld [vmem:[#allocation2 + $0x178] sm:$0xf] }
 0x276   :  { %v2816_v31 = vor.u32 %v2815_v25, %v2811_v24  ;;  %v2821_v59 = vrot.slane %v2819_v12, 5  ;;  %v6192_v34 = vsel %vm14063_vm9, %v6187_v37, %v6191_v19  ;;  %v6196_v40 = vrot.slane %v6194_v44, 4 }
 0x277   :  { %v6199_v35 = vrot.slane %v6197_v39, 5  ;;  %v6207_v43 = vshrl.u32 %v5552_v22, 16  ;;  %v11345_v10 = vcombine.low %v6182_v52, %v6192_v34  ;;  %v2807_v42 = vrot.slane %v2806_v51, 4  ;;  %v2145_v51 = vld [vmem:[#allocation2 + $0x17c] sm:$0x1] }
 0x278   :  { %v2817_v45 = vrot.slane %v2816_v31, 4  ;;  %v6205_v58 = vrot.slane %v6203_v41, 5  ;;  %v6213_v28 = vshll.u32 %v5553_v33, 16  ;;  %v2824_v1 = vshrl.u32 %v2092_v61, 16  ;;  %v5557_v34 = vld [vmem:[#allocation2 + $0x174] sm:$0xf] }
 0x279   :  { %v6200_v49 = vor.u32 %v6199_v35, %v6196_v40  ;;  %v6209_v23 = vrot.slane %v6207_v43, 4  ;;  %12499 = vmatmul.mubr.bf16.gmra.mrb[44].mxu1 %v11345_v10  ;;  %v2812_v48 = vsel %vm14063_vm9, %v2807_v42, %v2811_v24  ;;  %v2827_v4 = vshll.u32 %v2092_v61, 16  ;;  %v14821_v10 = vld [vmem:[#allocation2 + $0x178] sm:$0xf] }
 0x27a   :  { %v2822_v2 = vsel %vm14063_vm9, %v2817_v45, %v2821_v59  ;;  %v2833_v46 = vshll.u32 %v2093_v56, 16  ;;  %v6215_v38 = vrot.slane %v6213_v28, 5  ;;  %v2826_v17 = vrot.slane %v2824_v1, 4 }
 0x27b   :  { %v11155_v9 = vcombine.low %v2812_v48, %v2822_v2  ;;  %v6201_v62 = vrot.slane %v6200_v49, 4  ;;  %v6210_v57 = vor.u32 %v6209_v23, %v6205_v58  ;;  %v2829_v63 = vrot.slane %v2827_v4, 5  ;;  %v14825_v48 = vld [vmem:[#allocation2 + $0x17c] sm:$0x1] }
 0x27c   :  { %v2835_v53 = vrot.slane %v2833_v46, 5  ;;  %v2837_v32 = vshrl.u32 %v2093_v56, 16  ;;  %v2843_v26 = vshll.u32 %v2144_v54, 16  ;;  %v6218_v11 = vshrl.u32 %v5554_v60, 16 }
 0x27d   :  { %12183 = vmatmul.mubr.bf16.gmra.mrb[116].mxu0 %v11155_v9  ;;  %v6206_v14 = vsel %vm14063_vm9, %v6201_v62, %v6205_v58  ;;  %v6211_v20 = vrot.slane %v6210_v57, 4  ;;  %v2830_v19 = vor.u32 %v2829_v63, %v2826_v17  ;;  %v6221_v18 = vshll.u32 %v5554_v60, 16  ;;  %v14830_v9 = vld [vmem:[#allocation2 + $0x180] sm:$0xf]  ;;  %v14832_v17 = vld [vmem:[#allocation2 + $0x184] sm:$0xf] }
 0x27e   :  { %v2839_v5 = vrot.slane %v2837_v32, 4  ;;  %v6227_v13 = vshll.u32 %v5555_v29, 16  ;;  %v2845_v6 = vrot.slane %v2843_v26, 5  ;;  %v6220_v21 = vrot.slane %v6218_v11, 4 }
 0x27f   :  { %v6216_v16 = vsel %vm14063_vm9, %v6211_v20, %v6215_v38  ;;  %v6231_v0 = vshrl.u32 %v5555_v29, 16  ;;  %v2831_v3 = vrot.slane %v2830_v19, 4  ;;  %v6223_v22 = vrot.slane %v6221_v18, 5  ;;  %v5560_v19 = vld [vmem:[#allocation2 + $0x180] sm:$0xf] }
 0x280   :  { %v11346_v7 = vcombine.low %v6206_v14, %v6216_v16  ;;  %v2840_v47 = vor.u32 %v2839_v5, %v2835_v53  ;;  %v6229_v24 = vrot.slane %v6227_v13, 5  ;;  %v6237_v12 = vshll.u32 %v5556_v27, 16 }
 0x281   :  { %v6233_v25 = vrot.slane %v6231_v0, 4  ;;  %v2848_v52 = vshrl.u32 %v2094_v8, 16  ;;  %v2836_v37 = vsel %vm14063_vm9, %v2831_v3, %v2835_v53  ;;  %v6224_v39 = vor.u32 %v6223_v22, %v6220_v21  ;;  %v14844_v3 = vld [vmem:[#allocation2 + $0x184] sm:$0xf] }
 0x282   :  { %12502 = vmatprep.mubr.bf16.mxu1 %v11346_v7  ;;  %v2841_v44 = vrot.slane %v2840_v47, 4  ;;  %v2851_v31 = vshll.u32 %v2094_v8, 16  ;;  %v6239_v33 = vrot.slane %v6237_v12, 5  ;;  %v2857_v61 = vshll.u32 %v2095_v30, 16  ;;  %v2146_v8 = vld [vmem:[#allocation2 + $0x188] sm:$0x1] }
 0x283   :  { %v6234_v59 = vor.u32 %v6233_v25, %v6229_v24  ;;  %v2850_v41 = vrot.slane %v2848_v52, 4  ;;  %v6225_v35 = vrot.slane %v6224_v39, 4  ;;  %v2861_v56 = vshrl.u32 %v2095_v30, 16 }
 0x284   :  { %v2846_v40 = vsel %vm14063_vm9, %v2841_v44, %v2845_v6  ;;  %v2853_v43 = vrot.slane %v2851_v31, 5  ;;  %v2859_v58 = vrot.slane %v2857_v61, 5  ;;  %v2867_v49 = vshll.u32 %v2145_v51, 16  ;;  %v14848_v51 = vld [vmem:[#allocation2 + $0x188] sm:$0x1] }
 0x285   :  { %v11156_v42 = vcombine.low %v2836_v37, %v2846_v40  ;;  %v6235_v45 = vrot.slane %v6234_v59, 4  ;;  %v6230_v23 = vsel %vm14063_vm9, %v6225_v35, %v6229_v24  ;;  %v2863_v1 = vrot.slane %v2861_v56, 4  ;;  %v14851_v40 = vld [vmem:[#allocation2 + $0x18c] sm:$0xf] }
 0x286   :  { %v2854_v28 = vor.u32 %v2853_v43, %v2850_v41  ;;  %v6242_v2 = vshrl.u32 %v5557_v34, 16  ;;  %v2869_v4 = vrot.slane %v2867_v49, 5  ;;  %v6245_v46 = vshll.u32 %v5557_v34, 16 }
 0x287   :  { %12186 = vmatprep.mubr.bf16.mxu0 %v11156_v42  ;;  %v6240_v54 = vsel %vm14063_vm9, %v6235_v45, %v6239_v33  ;;  %v6251_v60 = vshll.u32 %v14821_v10, 16  ;;  %v2864_v38 = vor.u32 %v2863_v1, %v2859_v58  ;;  %v6255_v32 = vshrl.u32 %v14821_v10, 16  ;;  %v14856_v45 = vld [vmem:[#allocation2 + $0x190] sm:$0xf] }
 0x288   :  { %v11347_v62 = vcombine.low %v6230_v23, %v6240_v54  ;;  %v2855_v57 = vrot.slane %v2854_v28, 4  ;;  %v6244_v29 = vrot.slane %v6242_v2, 4  ;;  %v6247_v63 = vrot.slane %v6245_v46, 5  ;;  %v2147_v54 = vld [vmem:[#allocation2 + $0x194] sm:$0x1] }
 0x289   :  { %v6253_v53 = vrot.slane %v6251_v60, 5  ;;  %v6261_v14 = vshll.u32 %v14825_v48, 16  ;;  %v2865_v26 = vrot.slane %v2864_v38, 4  ;;  %v2872_v27 = vshrl.u32 %v14830_v9, 16 }
 0x28a   :  { %12503 = vmatmul.mubr.bf16.gmra.mrb[48].mxu1 %v11347_v62  ;;  %v2860_v20 = vsel %vm14063_vm9, %v2855_v57, %v2859_v58  ;;  %v2875_v11 = vshll.u32 %v14830_v9, 16  ;;  %v6248_v5 = vor.u32 %v6247_v63, %v6244_v29  ;;  %v6257_v18 = vrot.slane %v6255_v32, 4  ;;  %v5563_v29 = vld [vmem:[#allocation2 + $0x18c] sm:$0xf] }
 0x28b   :  { %v6263_v13 = vrot.slane %v6261_v14, 5  ;;  %v2881_v16 = vshll.u32 %v14832_v17, 16  ;;  %v2870_v6 = vsel %vm14063_vm9, %v2865_v26, %v2869_v4  ;;  %v2874_v21 = vrot.slane %v2872_v27, 4 }
 0x28c   :  { %v2877_v0 = vrot.slane %v2875_v11, 5  ;;  %v2885_v7 = vshrl.u32 %v14832_v17, 16  ;;  %v11157_v47 = vcombine.low %v2860_v20, %v2870_v6  ;;  %v6249_v22 = vrot.slane %v6248_v5, 4  ;;  %v14867_v20 = vld [vmem:[#allocation2 + $0x190] sm:$0xf] }
 0x28d   :  { %v6258_v30 = vor.u32 %v6257_v18, %v6253_v53  ;;  %v2883_v24 = vrot.slane %v2881_v16, 5  ;;  %v2891_v52 = vshll.u32 %v2146_v8, 16  ;;  %v6266_v37 = vshrl.u32 %v5560_v19, 16 }
 0x28e   :  { %v2878_v25 = vor.u32 %v2877_v0, %v2874_v21  ;;  %v2887_v12 = vrot.slane %v2885_v7, 4  ;;  %12187 = vmatmul.mubr.bf16.gmra.mrb[120].mxu0 %v11157_v47  ;;  %v6254_v44 = vsel %vm14063_vm9, %v6249_v22, %v6253_v53  ;;  %v6269_v31 = vshll.u32 %v5560_v19, 16  ;;  %v14871_v0 = vld [vmem:[#allocation2 + $0x194] sm:$0x1]  ;;  %v5566_v47 = vld [vmem:[#allocation2 + $0x198] sm:$0xf] }
 0x28f   :  { %v6259_v39 = vrot.slane %v6258_v30, 4  ;;  %v6275_v59 = vshll.u32 %v14844_v3, 16  ;;  %v2893_v61 = vrot.slane %v2891_v52, 5  ;;  %v6268_v34 = vrot.slane %v6266_v37, 4 }
 0x290   :  { %v2879_v33 = vrot.slane %v2878_v25, 4  ;;  %v2888_v41 = vor.u32 %v2887_v12, %v2883_v24  ;;  %v6271_v43 = vrot.slane %v6269_v31, 5  ;;  %v6279_v42 = vshrl.u32 %v14844_v3, 16  ;;  %v14877_v12 = vld [vmem:[#allocation2 + $0x19c] sm:$0xf] }
 0x291   :  { %v6264_v35 = vsel %vm14063_vm9, %v6259_v39, %v6263_v13  ;;  %v6277_v56 = vrot.slane %v6275_v59, 5  ;;  %v6285_v28 = vshll.u32 %v14848_v51, 16  ;;  %v2896_v4 = vshrl.u32 %v14851_v40, 16 }
 0x292   :  { %v11348_v58 = vcombine.low %v6254_v44, %v6264_v35  ;;  %v2884_v49 = vsel %vm14063_vm9, %v2879_v33, %v2883_v24  ;;  %v2889_v23 = vrot.slane %v2888_v41, 4  ;;  %v6272_v1 = vor.u32 %v6271_v43, %v6268_v34 }
 0x293   :  { %v6281_v2 = vrot.slane %v6279_v42, 4  ;;  %v2899_v46 = vshll.u32 %v14851_v40, 16  ;;  %v6287_v62 = vrot.slane %v6285_v28, 5  ;;  %v2905_v57 = vshll.u32 %v14856_v45, 16 }
 0x294   :  { %12506 = vmatprep.mubr.bf16.mxu1 %v11348_v58  ;;  %v2894_v60 = vsel %vm14063_vm9, %v2889_v23, %v2893_v61  ;;  %v2909_v38 = vshrl.u32 %v14856_v45, 16  ;;  %v6273_v53 = vrot.slane %v6272_v1, 4  ;;  %v2898_v14 = vrot.slane %v2896_v4, 4 }
 0x295   :  { %v11158_v63 = vcombine.low %v2884_v49, %v2894_v60  ;;  %v6282_v32 = vor.u32 %v6281_v2, %v6277_v56  ;;  %v2901_v26 = vrot.slane %v2899_v46, 5  ;;  %v2907_v27 = vrot.slane %v2905_v57, 5  ;;  %v14885_v49 = vld [vmem:[#allocation2 + $0x1a0] sm:$0x1] }
 0x296   :  { %v2911_v11 = vrot.slane %v2909_v38, 4  ;;  %v2915_v19 = vshll.u32 %v2147_v54, 16  ;;  %v6278_v5 = vsel %vm14063_vm9, %v6273_v53, %v6277_v56  ;;  %v6290_v13 = vshrl.u32 %v5563_v29, 16  ;;  %v5474_v54 = vld [vmem:[#allocation2 + $0x10] sm:$0xf] }
 0x297   :  { %12190 = vmatprep.mubr.bf16.mxu0 %v11158_v63  ;;  %v6283_v18 = vrot.slane %v6282_v32, 4  ;;  %v6293_v8 = vshll.u32 %v5563_v29, 16  ;;  %v2902_v16 = vor.u32 %v2901_v26, %v2898_v14  ;;  %v6299_v7 = vshll.u32 %v14867_v20, 16  ;;  %v5475_v29 = vld [vmem:[#allocation2 + $0x14] sm:$0x1] }
 0x298   :  { %v2912_v6 = vor.u32 %v2911_v11, %v2907_v27  ;;  %v2917_v21 = vrot.slane %v2915_v19, 5  ;;  %v6292_v30 = vrot.slane %v6290_v13, 4  ;;  %v6303_v25 = vshrl.u32 %v14867_v20, 16  ;;  %v14893_v32 = vld [vmem:[#allocation2 + $0x1c] sm:$0xf] }
 0x299   :  { %v6288_v22 = vsel %vm14063_vm9, %v6283_v18, %v6287_v62  ;;  %v6295_v24 = vrot.slane %v6293_v8, 5  ;;  %v2903_v37 = vrot.slane %v2902_v16, 4  ;;  %v6301_v39 = vrot.slane %v6299_v7, 5  ;;  %v6883_v11 = vld [vmem:[#allocation2 + $0xc] sm:$0xe] }
 0x29a   :  { %v11349_v52 = vcombine.low %v6278_v5, %v6288_v22  ;;  %v2913_v44 = vrot.slane %v2912_v6, 4  ;;  %v6305_v59 = vrot.slane %v6303_v25, 4  ;;  %v6309_v33 = vshll.u32 %v14871_v0, 16  ;;  %v13575_v19 = vld [vmem:[#allocation2] sm:$0xf] }
 0x29b   :  { %v6296_v31 = vor.u32 %v6295_v24, %v6292_v30  ;;  %v6314_v41 = vshrl.u32 %v5566_v47, 16  ;;  %v2908_v61 = vsel %vm14063_vm9, %v2903_v37, %v2907_v27  ;;  %v6317_v35 = vshll.u32 %v5566_v47, 16  ;;  %v14895_v5 = vld [vmem:[#allocation2 + $0x4] sm:$0xf]  ;;  %v13577_v30 = vld [vmem:[#allocation2 + $0xc] sm:$0xf] }
 0x29c   :  { %12507 = vmatmul.mubr.bf16.gmra.mrb[52].mxu1 %v11349_v52  ;;  %v2918_v34 = vsel %vm14063_vm9, %v2913_v44, %v2917_v21  ;;  %v6323_v43 = vshll.u32 %v14877_v12, 16  ;;  %v6306_v58 = vor.u32 %v6305_v59, %v6301_v39  ;;  %v6327_v2 = vshrl.u32 %v14877_v12, 16  ;;  %v14907_v24 = vld [vmem:[#allocation2 + $0x10] sm:$0xf]  ;;  %v13579_v52 = vld [vmem:[#allocation2 + $0x28] sm:$0xf] }
 0x29d   :  { %v11159_v56 = vcombine.low %v2908_v61, %v2918_v34  ;;  %v6297_v42 = vrot.slane %v6296_v31, 4  ;;  %v6316_v23 = vrot.slane %v6314_v41, 4  ;;  %v6319_v28 = vrot.slane %v6317_v35, 5  ;;  %v13463_v44 = vld [vmem:[#allocation3 + $0x88] sm:$0xff]   ;;  %v5478_v35 = vld [vmem:[#allocation2 + $0x20] sm:$0x1] }
 0x29e   :  { %v6325_v1 = vrot.slane %v6323_v43, 5  ;;  %v6307_v4 = vrot.slane %v6306_v58, 4  ;;  %v6311_v46 = vrot.slane %v6309_v33, 5  ;;  %v6329_v57 = vrot.slane %v6327_v2, 4  ;;  %v13580_v59 = vld [vmem:[#allocation2 + $0x18] sm:$0xf] }
 0x29f   :  { %12191 = vmatmul.mubr.bf16.gmra.mrb[124].mxu0 %v11159_v56  ;;  %v6302_v60 = vsel %vm14063_vm9, %v6297_v42, %v6301_v39  ;;  %v6320_v62 = vor.u32 %v6319_v28, %v6316_v23  ;;  %v6333_v38 = vshll.u32 %v14885_v49, 16  ;;  %v7013_v53 = vrot.slane %v5474_v54, 5  ;;  %v14914_v33 = vld [vmem:[#allocation2 + $0x1c] sm:$0xf]  ;;  %v6884_v42 = vld [vmem:[#allocation2 + $0x18] sm:$0xe] }
 0x2a0   :  { %v6312_v63 = vsel %vm14063_vm9, %v6307_v4, %v6311_v46  ;;  %v6330_v27 = vor.u32 %v6329_v57, %v6325_v1  ;;  %v11168_v18 = vcombine.low %v13575_v19, %v14895_v5  ;;  %v7016_v8 = vrot.slane %v5475_v29, 5  ;;  %v13469_v23 = vld [vmem:[#allocation3 + $0x90] sm:$0xff]   ;;  %v13582_v2 = vld [vmem:[#allocation2 + $0x2c] sm:$0x1]  ;;  %v14924_v29 = vld [vmem:[#allocation2 + $0x28] sm:$0xf] }
 0x2a1   :  { %v11350_v14 = vcombine.low %v6302_v60, %v6312_v63  ;;  %v6321_v26 = vrot.slane %v6320_v62, 4  ;;  %v7015_v13 = vrot.slane %v7013_v53, 4  ;;  %v6335_v6 = vrot.slane %v6333_v38, 5  ;;  %v13583_v60 = vld [vmem:[#allocation2 + $0x34] sm:$0xf] }
 0x2a2   :  { %v6331_v16 = vrot.slane %v6330_v27, 4  ;;  %12210 = vmatprep.mubr.bf16.mxu0 %v11168_v18  ;;  %v7020_v7 = vrot.slane %v14893_v32, 5  ;;  %v11360_v47 = vrot.slane %v6883_v11, 9  ;;  %v11169_v25 = vcombine.low %v13577_v30, %v14907_v24  ;;  %v13584_v38 = vld [vmem:[#allocation2 + $0x24] sm:$0xf]  ;;  %v13589_v30 = vld [vmem:[#allocation3 + $0x180] sm:$0xff]  }
 0x2a3   :  { %12510 = vmatprep.mubr.bf16.mxu1 %v11350_v14  ;;  %v7017_v22 = vsel %vm14900_vm0, %v7015_v13, %v7016_v8  ;;  %v7027_v37 = vrot.slane %v13579_v52, 5  ;;  %v6326_v39 = vsel %vm14063_vm9, %v6321_v26, %v6325_v1  ;;  %v11170_v41 = vcombine.low %v13580_v59, %v14914_v33  ;;  %v6885_v1 = vld [vmem:[#allocation2 + $0x24] sm:$0xe]  ;;  %v13474_v14 = vld [vmem:[#allocation3 + $0x98] sm:$0xff]   ;;  %v13587_v27 = vld [vmem:[#allocation2 + $0x30] sm:$0xf] }
 0x2a4   :  { %v6336_v31 = vsel %vm14063_vm9, %v6331_v16, %v6335_v6  ;;  %v7014_v34 = vsel %vm14900_vm0, %v11360_v47, %v7013_v53  ;;  %v7022_v56 = vrot.slane %v7020_v7, 4  ;;  %v7023_v28 = vrot.slane %v5478_v35, 5  ;;  %v13586_v53 = vld [vmem:[#allocation2 + $0x40] sm:$0xf]  ;;  %v14929_v11 = vld [vmem:[#allocation2 + $0x34] sm:$0xf] }
 0x2a5   :  { %v11351_v61 = vcombine.low %v6326_v39, %v6336_v31  ;;  %v11392_v43 = vcombine.low %v7014_v34, %v7017_v22  ;;  %v7029_v58 = vrot.slane %v7027_v37, 4  ;;  %v7030_v54 = vrot.slane %v13582_v2, 5  ;;  %v13442_v8 = vld [vmem:[#allocation3 + $0x188] sm:$0xff]   ;;  %v6886_v47 = vld [vmem:[#allocation2 + $0x30] sm:$0xe] }
 0x2a6   :  { %v11361_v4 = vrot.slane %v6884_v42, 9  ;;  %v7024_v46 = vsel %vm14900_vm0, %v7022_v56, %v7023_v28  ;;  %v7034_v62 = vrot.slane %v13583_v60, 5  ;;  %v11362_v57 = vrot.slane %v6885_v1, 9  ;;  %v13591_v39 = vld [vmem:[#allocation2 + $0x44] sm:$0x1]  ;;  %v13479_v1 = vld [vmem:[#allocation3 + $0xa8] sm:$0xff]  }
 0x2a7   :  { %12211 = vmatmul.mubr.bf16.vlgmr.msra.gmra.mrb[64].mxu0 %v11169_v25  ;;  %12511 = vmatmul.mubr.bf16.gmra.mrb[56].mxu1 %v11351_v61  ;;  %v11171_v63 = vcombine.low %v13584_v38, %v14924_v29  ;;  %v7041_v32 = vrot.slane %v13586_v53, 5  ;;  %v11172_v19 = vcombine.low %v13587_v27, %v14929_v11  ;;  %v13590_v25 = vld [vmem:[#allocation2 + $0x38] sm:$0x1]  ;;  %v7044_v31 = vrot.slane %v13591_v39, 5  ;;  %v13592_v61 = vld [vmem:[#allocation2 + $0x4c] sm:$0xf] }
 0x2a8   :  { %12214 = vmatprep.mubr.bf16.mxu0 %v11170_v41  ;;  %12275 = vmatpush3.bf16.msra.mxu0 %v14792_v55  ;;  %v7031_v55 = vsel %vm14900_vm0, %v7029_v58, %v7030_v54  ;;  %v7021_v26 = vsel %vm14900_vm0, %v11361_v4, %v7020_v7  ;;  %v7028_v13 = vsel %vm14900_vm0, %v11362_v57, %v7027_v37  ;;  %v7036_v6 = vrot.slane %v7034_v62, 4  ;;  %v13476_v7 = vld [vmem:[#allocation3 + $0xa0] sm:$0xff]   ;;  %v13447_v37 = vld [vmem:[#allocation3 + $0x190] sm:$0xff]   ;;  %v13593_v56 = vld [vmem:[#allocation2 + $0x3c] sm:$0xf] }
 0x2a9   :  { %12276 = vmatprep.subr.bf16.mxu0 %v13463_v44  ;;  %12530 = vmatprep.mubr.bf16.mxu1 %v11392_v43  ;;  %v11393_v18 = vcombine.low %v7021_v26, %v7024_v46  ;;  %v11394_v16 = vcombine.low %v7028_v13, %v7031_v55  ;;  %v7043_v22 = vrot.slane %v7041_v32, 4  ;;  %v7037_v52 = vrot.slane %v13590_v25, 5  ;;  %v14938_v42 = vld [vmem:[#allocation2 + $0x40] sm:$0xf]  ;;  %v13596_v54 = vld [vmem:[#allocation2 + $0x48] sm:$0xf] }
 0x2aa   :  { %v11363_v59 = vrot.slane %v6886_v47, 9  ;;  %v7048_v34 = vrot.slane %v13592_v61, 5  ;;  %v11173_v58 = vcombine.low %v13593_v56, %v14938_v42  ;;  %v14943_v4 = vld [vmem:[#allocation2 + $0x4c] sm:$0xf]  ;;  %v6888_v53 = vld [vmem:[#allocation2 + $0x48] sm:$0xe] }
 0x2ab   :  { %v7038_v41 = vsel %vm14900_vm0, %v7036_v6, %v7037_v52  ;;  %v7045_v43 = vsel %vm14900_vm0, %v7043_v22, %v7044_v31  ;;  %v11174_v46 = vcombine.low %v13596_v54, %v14943_v4  ;;  %v13452_v55 = vld [vmem:[#allocation3 + $0x198] sm:$0xff]   ;;  %v13598_v26 = vld [vmem:[#allocation2 + $0x50] sm:$0x1]  ;;  %v13600_v6 = vld [vmem:[#allocation2 + $0x64] sm:$0xf] }
 0x2ac   :  { %12277 = vmatpush3.bf16.msra.mxu0 %v13463_v44  ;;  %v6887_v44 = vld [vmem:[#allocation2 + $0x3c] sm:$0xe]  ;;  %v7035_v2 = vsel %vm14900_vm0, %v11363_v59, %v7034_v62  ;;  %v7051_v27 = vrot.slane %v13598_v26, 5  ;;  %v7062_v47 = vrot.slane %v13600_v6, 5  ;;  %v14952_v25 = vld [vmem:[#allocation2 + $0x58] sm:$0xf] }
 0x2ad   :  { %12278 = vmatprep.subr.bf16.mxu0 %v13469_v23  ;;  %v11364_v35 = vrot.slane %v6887_v44, 9  ;;  %v11395_v60 = vcombine.low %v7035_v2, %v7038_v41  ;;  %v13603_v44 = vld [vmem:[#allocation2 + $0x70] sm:$0xf]  ;;  %v13483_v31 = vld [vmem:[#allocation3 + $0xb8] sm:$0xff]   ;;  %v13604_v59 = vld [vmem:[#allocation2 + $0x60] sm:$0xf] }
 0x2ae   :  { %v7069_v39 = vrot.slane %v13603_v44, 5  ;;  %v14957_v41 = vld [vmem:[#allocation2 + $0x64] sm:$0xf]  ;;  %v13464_v56 = vld [vmem:[#allocation3 + $0x1a8] sm:$0xff]   ;;  %v13606_v2 = vld [vmem:[#allocation2 + $0x68] sm:$0x1] }
 0x2af   :  { %12215 = vmatmul.mubr.bf16.gmra.mrb[68].mxu0 %v11171_v63  ;;  %12531 = vmatmul.mubr.bf16.vlgmr.msra.gmra.mrb[60].mxu1 %v11393_v18  ;;  %v7042_v57 = vsel %vm14900_vm0, %v11364_v35, %v7041_v32  ;;  %v7050_v63 = vrot.slane %v7048_v34, 4  ;;  %v13599_v18 = vld [vmem:[#allocation2 + $0x5c] sm:$0x1]  ;;  %v13458_v32 = vld [vmem:[#allocation3 + $0x1a0] sm:$0xff]   ;;  %v11176_v61 = vcombine.low %v13604_v59, %v14957_v41  ;;  %v7065_v54 = vrot.slane %v13606_v2, 5 }
 0x2b0   :  { %12218 = vmatprep.mubr.bf16.mxu0 %v11172_v19  ;;  %12279 = vmatpush3.bf16.msra.mxu0 %v13469_v23  ;;  %v13595_v23 = vld [vmem:[#allocation2 + $0x58] sm:$0xf]  ;;  %v11396_v38 = vcombine.low %v7042_v57, %v7045_v43  ;;  %v6889_v19 = vld [vmem:[#allocation2 + $0x54] sm:$0xe]  ;;  %v7058_v13 = vrot.slane %v13599_v18, 5 }
 0x2b1   :  { %12280 = vmatprep.subr.bf16.mxu0 %v13474_v14  ;;  %12595 = vmatpush3.bf16.msra.mxu1 %v13589_v30  ;;  %v7055_v28 = vrot.slane %v13595_v23, 5  ;;  %v11366_v22 = vrot.slane %v6889_v19, 9  ;;  %v13601_v30 = vld [vmem:[#allocation2 + $0x54] sm:$0xf]  ;;  %v7064_v23 = vrot.slane %v7062_v47, 4 }
 0x2b2   :  { %12534 = vmatprep.mubr.bf16.mxu1 %v11394_v16  ;;  %12596 = vmatprep.subr.bf16.mxu1 %v13442_v8  ;;  %v7052_v16 = vsel %vm14900_vm0, %v7050_v63, %v7051_v27  ;;  %v11175_v52 = vcombine.low %v13601_v30, %v14952_v25  ;;  %v13608_v63 = vld [vmem:[#allocation2 + $0x7c] sm:$0xf]  ;;  %v13609_v26 = vld [vmem:[#allocation2 + $0x6c] sm:$0xf]  ;;  %v14966_v27 = vld [vmem:[#allocation2 + $0x70] sm:$0xf] }
 0x2b3   :  { %v7057_v62 = vrot.slane %v7055_v28, 4  ;;  %v7056_v43 = vsel %vm14900_vm0, %v11366_v22, %v7055_v28  ;;  %v13470_v28 = vld [vmem:[#allocation3 + $0x1b0] sm:$0xff]   ;;  %v11177_v19 = vcombine.low %v13609_v26, %v14966_v27  ;;  %v13611_v18 = vld [vmem:[#allocation2 + $0x88] sm:$0xf] }
 0x2b4   :  { %12281 = vmatpush3.bf16.msra.mxu0 %v13474_v14  ;;  %v13481_v14 = vld [vmem:[#allocation3 + $0xb0] sm:$0xff]   ;;  %v13477_v30 = vld [vmem:[#allocation3 + $0x1b8] sm:$0xff]  }
 0x2b5   :  { %12282 = vmatprep.subr.bf16.mxu0 %v13476_v7  ;;  %12597 = vmatpush3.bf16.msra.mxu1 %v13442_v8  ;;  %v11365_v8 = vrot.slane %v6888_v53, 9  ;;  %v7076_v53 = vrot.slane %v13608_v63, 5  ;;  %v14987_v63 = vld [vmem:[#allocation2 + $0x94] sm:$0xf] }
 0x2b6   :  { %12598 = vmatprep.subr.bf16.mxu1 %v13447_v37 }
 0x2b7   :  { %12219 = vmatmul.mubr.bf16.gmra.mrb[72].mxu0 %v11173_v58  ;;  %12535 = vmatmul.mubr.bf16.gmra.mrb[0].mxu1 %v11395_v60  ;;  %v13607_v60 = vld [vmem:[#allocation2 + $0x74] sm:$0x1]  ;;  %v7078_v44 = vrot.slane %v7076_v53, 4 }
 0x2b8   :  { %12222 = vmatprep.mubr.bf16.mxu0 %v11174_v46  ;;  %12283 = vmatpush3.bf16.msra.mxu0 %v13476_v7  ;;  %v7059_v7 = vsel %vm14900_vm0, %v7057_v62, %v7058_v13  ;;  %v6891_v46 = vld [vmem:[#allocation2 + $0x6c] sm:$0xe]  ;;  %v7072_v57 = vrot.slane %v13607_v60, 5  ;;  %v7083_v13 = vrot.slane %v13611_v18, 5 }
 0x2b9   :  { %12284 = vmatprep.subr.bf16.mxu0 %v13479_v1  ;;  %12538 = vmatprep.mubr.bf16.mxu1 %v11396_v38  ;;  %v11398_v58 = vcombine.low %v7056_v43, %v7059_v7  ;;  %v7066_v38 = vsel %vm14900_vm0, %v7064_v23, %v7065_v54  ;;  %v11368_v62 = vrot.slane %v6891_v46, 9  ;;  %v13616_v23 = vld [vmem:[#allocation2 + $0x94] sm:$0xf]  ;;  %v13617_v54 = vld [vmem:[#allocation2 + $0x84] sm:$0xf] }
 0x2ba   :  { %12599 = vmatpush3.bf16.msra.mxu1 %v13447_v37  ;;  %v7049_v37 = vsel %vm14900_vm0, %v11365_v8, %v7048_v34  ;;  %v7071_v34 = vrot.slane %v7069_v39, 4  ;;  %v13612_v8 = vld [vmem:[#allocation2 + $0x78] sm:$0xf]  ;;  %v14982_v46 = vld [vmem:[#allocation2 + $0x88] sm:$0xf] }
 0x2bb   :  { %12600 = vmatprep.subr.bf16.mxu1 %v13452_v55  ;;  %v11397_v35 = vcombine.low %v7049_v37, %v7052_v16  ;;  %v14971_v16 = vld [vmem:[#allocation2 + $0x7c] sm:$0xf]  ;;  %v7070_v7 = vsel %vm14900_vm0, %v11368_v62, %v7069_v39  ;;  %v7085_v37 = vrot.slane %v7083_v13, 4  ;;  %v11179_v60 = vcombine.low %v13617_v54, %v14982_v46 }
 0x2bc   :  { %12285 = vmatpush3.bf16.msra.mxu0 %v13479_v1  ;;  %v6890_v1 = vld [vmem:[#allocation2 + $0x60] sm:$0xe]  ;;  %v11178_v6 = vcombine.low %v13612_v8, %v14971_v16 }
 0x2bd   :  { %12286 = vmatprep.subr.bf16.mxu0 %v13481_v14 }
 0x2be   :  { %12601 = vmatpush3.bf16.msra.mxu1 %v13452_v55  ;;  %v11367_v55 = vrot.slane %v6890_v1, 9  ;;  %v7090_v1 = vrot.slane %v13616_v23, 5  ;;  %v13628_v23 = vld [vmem:[#allocation2 + $0xa8] sm:$0xf] }
 0x2bf   :  { %12223 = vmatmul.mubr.bf16.gmra.mrb[76].mxu0 %v11175_v52  ;;  %12602 = vmatprep.subr.bf16.mxu1 %v13458_v32 }
 0x2c0   :  { %12226 = vmatprep.mubr.bf16.mxu0 %v11176_v61  ;;  %12287 = vmatpush3.bf16.msra.mxu0 %v13481_v14  ;;  %v7073_v14 = vsel %vm14900_vm0, %v7071_v34, %v7072_v57  ;;  %v6893_v61 = vld [vmem:[#allocation2 + $0x84] sm:$0xe]  ;;  %v13619_v57 = vld [vmem:[#allocation2 + $0xa0] sm:$0xf]  ;;  %v7092_v18 = vrot.slane %v7090_v1, 4 }
 0x2c1   :  { %12539 = vmatmul.mubr.bf16.gmra.mrb[4].mxu1 %v11397_v35  ;;  %12288 = vmatprep.subr.bf16.mxu0 %v13483_v31  ;;  %v11400_v52 = vcombine.low %v7070_v7, %v7073_v14  ;;  %v13615_v35 = vld [vmem:[#allocation2 + $0x8c] sm:$0x1]  ;;  %v11370_v34 = vrot.slane %v6893_v61, 9  ;;  %v13623_v7 = vld [vmem:[#allocation2 + $0xa4] sm:$0x1] }
 0x2c2   :  { %12542 = vmatprep.mubr.bf16.mxu1 %v11398_v58  ;;  %12603 = vmatpush3.bf16.msra.mxu1 %v13458_v32  ;;  %v7063_v32 = vsel %vm14900_vm0, %v11367_v55, %v7062_v47  ;;  %v13614_v47 = vld [vmem:[#allocation2 + $0x80] sm:$0x1]  ;;  %v7086_v43 = vrot.slane %v13615_v35, 5 }
 0x2c3   :  { %12604 = vmatprep.subr.bf16.mxu1 %v13464_v56  ;;  %v11399_v22 = vcombine.low %v7063_v32, %v7066_v38  ;;  %v7079_v59 = vrot.slane %v13614_v47, 5  ;;  %v13620_v38 = vld [vmem:[#allocation2 + $0x90] sm:$0xf]  ;;  %v7084_v26 = vsel %vm14900_vm0, %v11370_v34, %v7083_v13  ;;  %v13624_v13 = vld [vmem:[#allocation2 + $0xac] sm:$0xf] }
 0x2c4   :  { %12289 = vmatpush3.bf16.msra.mxu0 %v13483_v31  ;;  %v6892_v31 = vld [vmem:[#allocation2 + $0x78] sm:$0xe]  ;;  %v7087_v2 = vsel %vm14900_vm0, %v7085_v37, %v7086_v43  ;;  %v11180_v62 = vcombine.low %v13620_v38, %v14987_v63  ;;  %v6894_v32 = vld [vmem:[#allocation2 + $0x90] sm:$0xe]  ;;  %v14997_v61 = vld [vmem:[#allocation2 + $0xa0] sm:$0xf] }
 0x2c5   :  { %v11369_v39 = vrot.slane %v6892_v31, 9  ;;  %v7080_v58 = vsel %vm14900_vm0, %v7078_v44, %v7079_v59  ;;  %v7104_v31 = vrot.slane %v13624_v13, 5  ;;  %v13625_v59 = vld [vmem:[#allocation2 + $0x9c] sm:$0xf]  ;;  %v13627_v43 = vld [vmem:[#allocation2 + $0xb8] sm:$0xf] }
 0x2c6   :  { %12605 = vmatpush3.bf16.msra.mxu1 %v13464_v56  ;;  %v14976_v56 = vld [vmem:[#allocation3 + $0x1c0] sm:$0xff]   ;;  %v11181_v35 = vcombine.low %v13625_v59, %v14997_v61  ;;  %v15002_v34 = vld [vmem:[#allocation2 + $0xac] sm:$0xf]  ;;  %v6896_v38 = vld [vmem:[#allocation2 + $0xa8] sm:$0xe] }
 0x2c7   :  { %12227 = vmatmul.mubr.bf16.gmra.mrb[80].mxu0 %v11177_v19  ;;  %12606 = vmatprep.subr.bf16.mxu1 %v13470_v28  ;;  %v7077_v55 = vsel %vm14900_vm0, %v11369_v39, %v7076_v53  ;;  %v11402_v19 = vcombine.low %v7084_v26, %v7087_v2  ;;  %v13622_v53 = vld [vmem:[#allocation2 + $0x98] sm:$0x1]  ;;  %v7111_v39 = vrot.slane %v13627_v43, 5  ;;  %v11182_v2 = vcombine.low %v13628_v23, %v15002_v34 }
 0x2c8   :  { %12230 = vmatprep.mubr.bf16.mxu0 %v11178_v6  ;;  %v11401_v14 = vcombine.low %v7077_v55, %v7080_v58  ;;  %v7093_v6 = vrot.slane %v13622_v53, 5  ;;  %v7106_v55 = vrot.slane %v7104_v31, 4  ;;  %v13632_v53 = vld [vmem:[#allocation2 + $0xc4] sm:$0xf]  ;;  %v15014_v13 = vld [vmem:[#allocation2 + $0xb8] sm:$0xf] }
 0x2c9   :  { %12543 = vmatmul.mubr.bf16.gmra.mrb[8].mxu1 %v11399_v22  ;;  %v6895_v22 = vld [vmem:[#allocation2 + $0x9c] sm:$0xe] }
 0x2ca   :  { %12546 = vmatprep.mubr.bf16.mxu1 %v11400_v52  ;;  %12607 = vmatpush3.bf16.msra.mxu1 %v13470_v28  ;;  %v7097_v28 = vrot.slane %v13619_v57, 5  ;;  %v7100_v52 = vrot.slane %v13623_v7, 5  ;;  %v7094_v44 = vsel %vm14900_vm0, %v7092_v18, %v7093_v6  ;;  %v11372_v37 = vrot.slane %v6895_v22, 9  ;;  %v13634_v22 = vld [vmem:[#allocation2 + $0xd8] sm:$0xf] }
 0x2cb   :  { %12608 = vmatprep.subr.bf16.mxu1 %v13477_v30  ;;  %v7118_v6 = vrot.slane %v13632_v53, 5 }
 0x2cc   :  { %v7099_v8 = vrot.slane %v7097_v28, 4 }
 0x2ce   :  { %12609 = vmatpush3.bf16.msra.mxu1 %v13477_v30  ;;  %v11371_v30 = vrot.slane %v6894_v32, 9  ;;  %v7101_v47 = vsel %vm14900_vm0, %v7099_v8, %v7100_v52  ;;  %v11373_v32 = vrot.slane %v6896_v38, 9  ;;  %v6899_v38 = vld [vmem:[#allocation2 + $0xe4] sm:$0xe] }
 0x2cf   :  { %12231 = vmatmul.mubr.bf16.gmra.mrb[84].mxu0 %v11179_v60  ;;  %12674 = vmatprep.subr.bf16.mxu1 %v14976_v56  ;;  %v7098_v60 = vsel %vm14900_vm0, %v11372_v37, %v7097_v28  ;;  %v15009_v28 = vld [vmem:[#allocation2 + $0xdc] sm:$0xf] }
 0x2d0   :  { %12234 = vmatprep.mubr.bf16.mxu0 %v11180_v62  ;;  %v7091_v58 = vsel %vm14900_vm0, %v11371_v30, %v7090_v1  ;;  %v11404_v57 = vcombine.low %v7098_v60, %v7101_v47  ;;  %v7113_v62 = vrot.slane %v7111_v39, 4  ;;  %v6897_v1 = vld [vmem:[#allocation2 + $0xb4] sm:$0xe]  ;;  %v11184_v7 = vcombine.low %v13634_v22, %v15009_v28  ;;  %v13637_v47 = vld [vmem:[#allocation2 + $0xe8] sm:$0xf] }
 0x2d1   :  { %12547 = vmatmul.mubr.bf16.gmra.mrb[12].mxu1 %v11401_v14  ;;  %v11403_v54 = vcombine.low %v7091_v58, %v7094_v44  ;;  %v13630_v14 = vld [vmem:[#allocation2 + $0xb0] sm:$0x1]  ;;  %v11374_v52 = vrot.slane %v6897_v1, 9  ;;  %v13635_v44 = vld [vmem:[#allocation2 + $0xb4] sm:$0xf]  ;;  %v7125_v59 = vrot.slane %v13637_v47, 5 }
 0x2d2   :  { %12550 = vmatprep.mubr.bf16.mxu1 %v11402_v19  ;;  %v7107_v26 = vrot.slane %v13630_v14, 5  ;;  %v13631_v19 = vld [vmem:[#allocation2 + $0xbc] sm:$0x1]  ;;  %v11183_v37 = vcombine.low %v13635_v44, %v15014_v13  ;;  %v13640_v1 = vld [vmem:[#allocation2 + $0xf4] sm:$0xf] }
 0x2d3   :  { %v7114_v18 = vrot.slane %v13631_v19, 5  ;;  %v7112_v58 = vsel %vm14900_vm0, %v11374_v52, %v7111_v39  ;;  %v7127_v60 = vrot.slane %v7125_v59, 4  ;;  %v7132_v19 = vrot.slane %v13640_v1, 5  ;;  %v13643_v22 = vld [vmem:[#allocation2 + $0x100] sm:$0xf] }
 0x2d4   :  { %v7108_v8 = vsel %vm14900_vm0, %v7106_v55, %v7107_v26  ;;  %v11376_v39 = vrot.slane %v6899_v38, 9  ;;  %v15030_v44 = vld [vmem:[#allocation2 + $0xf4] sm:$0xf] }
 0x2d5   :  { %v7115_v30 = vsel %vm14900_vm0, %v7113_v62, %v7114_v18  ;;  %v13639_v62 = vld [vmem:[#allocation2 + $0xec] sm:$0x1] }
 0x2d6   :  { %v11406_v23 = vcombine.low %v7112_v58, %v7115_v30  ;;  %v7128_v14 = vrot.slane %v13639_v62, 5  ;;  %v13644_v30 = vld [vmem:[#allocation2 + $0xf0] sm:$0xf]  ;;  %v7134_v58 = vrot.slane %v7132_v19, 4 }
 0x2d7   :  { %12235 = vmatmul.mubr.bf16.gmra.mrb[88].mxu0 %v11181_v35  ;;  %v7105_v35 = vsel %vm14900_vm0, %v11373_v32, %v7104_v31  ;;  %v13641_v32 = vld [vmem:[#allocation2 + $0xe4] sm:$0xf] }
 0x2d8   :  { %12238 = vmatprep.mubr.bf16.mxu0 %v11182_v2  ;;  %v11405_v43 = vcombine.low %v7105_v35, %v7108_v8  ;;  %v7120_v2 = vrot.slane %v7118_v6, 4  ;;  %v7129_v18 = vsel %vm14900_vm0, %v7127_v60, %v7128_v14  ;;  %v15025_v8 = vld [vmem:[#allocation2 + $0xe8] sm:$0xf]  ;;  %v7126_v35 = vsel %vm14900_vm0, %v11376_v39, %v7125_v59  ;;  %v13648_v59 = vld [vmem:[#allocation2 + $0x10c] sm:$0xf] }
 0x2d9   :  { %12551 = vmatmul.mubr.bf16.gmra.mrb[16].mxu1 %v11403_v54  ;;  %v6898_v54 = vld [vmem:[#allocation2 + $0xc0] sm:$0xe]  ;;  %v11185_v53 = vcombine.low %v13641_v32, %v15025_v8  ;;  %v13649_v39 = vld [vmem:[#allocation2 + $0xfc] sm:$0xf] }
 0x2da   :  { %12554 = vmatprep.mubr.bf16.mxu1 %v11404_v57  ;;  %v13638_v57 = vld [vmem:[#allocation2 + $0xc8] sm:$0x1]  ;;  %v11375_v26 = vrot.slane %v6898_v54, 9  ;;  %v13646_v54 = vld [vmem:[#allocation2 + $0xf8] sm:$0x1] }
 0x2db   :  { %v7121_v55 = vrot.slane %v13638_v57, 5  ;;  %v7135_v60 = vrot.slane %v13646_v54, 5  ;;  %v15035_v57 = vld [vmem:[#allocation3 + $0xc0] sm:$0xff]  }
 0x2dc   :  { %v7119_v52 = vsel %vm14900_vm0, %v11375_v26, %v7118_v6  ;;  %v6901_v6 = vld [vmem:[#allocation2 + $0xfc] sm:$0xe]  ;;  %v7146_v26 = vrot.slane %v13648_v59, 5  ;;  %12354 = vmatprep.subr.bf16.mxu0 %v15035_v57  ;;  %v13656_v59 = vld [vmem:[#allocation2 + $0x124] sm:$0xf] }
 0x2dd   :  { %v7122_v31 = vsel %vm14900_vm0, %v7120_v2, %v7121_v55  ;;  %v13647_v55 = vld [vmem:[#allocation2 + $0x104] sm:$0x1]  ;;  %v7136_v14 = vsel %vm14900_vm0, %v7134_v58, %v7135_v60  ;;  %v13654_v60 = vld [vmem:[#allocation2 + $0x110] sm:$0x1] }
 0x2de   :  { %v11407_v47 = vcombine.low %v7119_v52, %v7122_v31  ;;  %v7142_v38 = vrot.slane %v13647_v55, 5  ;;  %v11378_v31 = vrot.slane %v6901_v6, 9  ;;  %v7149_v6 = vrot.slane %v13654_v60, 5  ;;  %v13655_v55 = vld [vmem:[#allocation2 + $0x11c] sm:$0x1] }
 0x2df   :  { %12239 = vmatmul.mubr.bf16.gmra.mrb[92].mxu0 %v11183_v37  ;;  %v11186_v37 = vcombine.low %v13644_v30, %v15030_v44  ;;  %v13652_v30 = vld [vmem:[#allocation2 + $0x108] sm:$0xf] }
 0x2e0   :  { %12242 = vmatprep.mubr.bf16.mxu0 %v11184_v7  ;;  %v7139_v7 = vrot.slane %v13643_v22, 5 }
 0x2e1   :  { %12555 = vmatmul.mubr.bf16.gmra.mrb[20].mxu1 %v11405_v43  ;;  %v11408_v43 = vcombine.low %v7126_v35, %v7129_v18  ;;  %v15042_v18 = vld [vmem:[#allocation2 + $0x100] sm:$0xf] }
 0x2e2   :  { %12558 = vmatprep.mubr.bf16.mxu1 %v11406_v23  ;;  %v6900_v23 = vld [vmem:[#allocation2 + $0xf0] sm:$0xe]  ;;  %v7141_v2 = vrot.slane %v7139_v7, 4  ;;  %v11187_v32 = vcombine.low %v13649_v39, %v15042_v18  ;;  %v7160_v39 = vrot.slane %v13656_v59, 5  ;;  %v13663_v59 = vld [vmem:[#allocation2 + $0x134] sm:$0x1] }
 0x2e3   :  { %v11377_v62 = vrot.slane %v6900_v23, 9  ;;  %v7148_v23 = vrot.slane %v7146_v26, 4 }
 0x2e4   :  { %v7143_v1 = vsel %vm14900_vm0, %v7141_v2, %v7142_v38  ;;  %v6902_v2 = vld [vmem:[#allocation2 + $0x108] sm:$0xe]  ;;  %v7156_v38 = vrot.slane %v13655_v55, 5  ;;  %v7162_v60 = vrot.slane %v7160_v39, 4 }
 0x2e5   :  { %v7133_v52 = vsel %vm14900_vm0, %v11377_v62, %v7132_v19  ;;  %v6903_v19 = vld [vmem:[#allocation2 + $0x114] sm:$0xe]  ;;  %v11379_v62 = vrot.slane %v6902_v2, 9 }
 0x2e6   :  { %v11409_v35 = vcombine.low %v7133_v52, %v7136_v14  ;;  %v7150_v14 = vsel %vm14900_vm0, %v7148_v23, %v7149_v6  ;;  %v13659_v52 = vld [vmem:[#allocation2 + $0x130] sm:$0xf]  ;;  %v6904_v6 = vld [vmem:[#allocation2 + $0x120] sm:$0xe] }
 0x2e7   :  { %12243 = vmatmul.mubr.bf16.gmra.mrb[96].mxu0 %v11185_v53  ;;  %v13651_v53 = vld [vmem:[#allocation2 + $0x118] sm:$0xf] }
 0x2e8   :  { %12246 = vmatprep.mubr.bf16.mxu0 %v11186_v37  ;;  %v7153_v22 = vrot.slane %v13651_v53, 5  ;;  %v15047_v37 = vld [vmem:[#allocation2 + $0x10c] sm:$0xf] }
 0x2e9   :  { %12559 = vmatmul.mubr.bf16.gmra.mrb[24].mxu1 %v11407_v47  ;;  %v11188_v47 = vcombine.low %v13652_v30, %v15047_v37  ;;  %v7167_v30 = vrot.slane %v13659_v52, 5  ;;  %v11381_v52 = vrot.slane %v6904_v6, 9 }
 0x2ea   :  { %12562 = vmatprep.mubr.bf16.mxu1 %v11408_v43  ;;  %v7140_v43 = vsel %vm14900_vm0, %v11378_v31, %v7139_v7  ;;  %v7155_v54 = vrot.slane %v7153_v22, 4  ;;  %v11380_v7 = vrot.slane %v6903_v19, 9  ;;  %v6905_v19 = vld [vmem:[#allocation2 + $0x12c] sm:$0xe] }
 0x2eb   :  { %v11410_v58 = vcombine.low %v7140_v43, %v7143_v1  ;;  %v13657_v1 = vld [vmem:[#allocation2 + $0x114] sm:$0xf]  ;;  %v15061_v43 = vld [vmem:[#allocation2 + $0x124] sm:$0xf]  ;;  %v7169_v55 = vrot.slane %v7167_v30, 4  ;;  %v7161_v6 = vsel %vm14900_vm0, %v11381_v52, %v7160_v39 }
 0x2ec   :  { %v7157_v31 = vsel %vm14900_vm0, %v7155_v54, %v7156_v38  ;;  %v7154_v2 = vsel %vm14900_vm0, %v11380_v7, %v7153_v22  ;;  %v13662_v38 = vld [vmem:[#allocation2 + $0x128] sm:$0x1]  ;;  %v13664_v22 = vld [vmem:[#allocation2 + $0x13c] sm:$0xf]  ;;  %v6907_v52 = vld [vmem:[#allocation2 + $0x144] sm:$0xe] }
 0x2ed   :  { %v11412_v54 = vcombine.low %v7154_v2, %v7157_v31  ;;  %v7174_v7 = vrot.slane %v13664_v22, 5  ;;  %v6906_v22 = vld [vmem:[#allocation2 + $0x138] sm:$0xe] }
 0x2ef   :  { %12247 = vmatmul.mubr.bf16.gmra.mrb[100].mxu0 %v11187_v32  ;;  %v15056_v32 = vld [vmem:[#allocation2 + $0x118] sm:$0xf] }
 0x2f0   :  { %12250 = vmatprep.mubr.bf16.mxu0 %v11188_v47  ;;  %v11189_v53 = vcombine.low %v13657_v1, %v15056_v32  ;;  %v7147_v47 = vsel %vm14900_vm0, %v11379_v62, %v7146_v26  ;;  %v7163_v26 = vrot.slane %v13662_v38, 5  ;;  %v103_v62 = vld [vmem:[#allocation2 + $0xcc] sm:$0x1]  ;;  %v7170_v1 = vrot.slane %v13663_v59, 5 }
 0x2f1   :  { %12563 = vmatmul.mubr.bf16.gmra.mrb[28].mxu1 %v11409_v35  ;;  %v13660_v35 = vld [vmem:[#allocation2 + $0x120] sm:$0xf]  ;;  %v11411_v23 = vcombine.low %v7147_v47, %v7150_v14  ;;  %v11382_v47 = vrot.slane %v6905_v19, 9  ;;  %v15077_v19 = vld [vmem:[#allocation2 + $0x13c] sm:$0xf] }
 0x2f2   :  { %12566 = vmatprep.mubr.bf16.mxu1 %v11410_v58  ;;  %v11190_v58 = vcombine.low %v13660_v35, %v15061_v43  ;;  %v7164_v14 = vsel %vm14900_vm0, %v7162_v60, %v7163_v26  ;;  %v7171_v31 = vsel %vm14900_vm0, %v7169_v55, %v7170_v1  ;;  %v15070_v35 = vld [vmem:[#allocation2 + $0x130] sm:$0xf]  ;;  %v13668_v60 = vld [vmem:[#allocation2 + $0x138] sm:$0xf]  ;;  %v7176_v1 = vrot.slane %v7174_v7, 4 }
 0x2f3   :  { %16191 = vst [vmem:[#allocation10_spill] sm:$0xff] %v15070_v35  ;;  %v11192_v38 = vcombine.low %v13668_v60, %v15077_v19  ;;  %v11413_v55 = vcombine.low %v7161_v6, %v7164_v14  ;;  %v7168_v26 = vsel %vm14900_vm0, %v11382_v47, %v7167_v30  ;;  %v11384_v30 = vrot.slane %v6907_v52, 9  ;;  %v6908_v52 = vld [vmem:[#allocation2 + $0x150] sm:$0xe] }
 0x2f4   :  { %v11414_v59 = vcombine.low %v7168_v26, %v7171_v31  ;;  %v13673_v31 = vld [vmem:[#allocation2 + $0x144] sm:$0xf] }
 0x2f7   :  { %12251 = vmatmul.mubr.bf16.gmra.mrb[104].mxu0 %v11189_v53  ;;  %v13665_v53 = vld [vmem:[#allocation2 + $0x12c] sm:$0xf] }
 0x2f8   :  { %12254 = vmatprep.mubr.bf16.mxu0 %v11190_v58  ;;  %v11191_v58 = vcombine.low %v13665_v53, %v15070_v35  ;;  %v13670_v53 = vld [vmem:[#allocation2 + $0x140] sm:$0x1]  ;;  %v11383_v35 = vrot.slane %v6906_v22, 9  ;;  %v15091_v22 = vld [vmem:[#allocation2 + $0x154] sm:$0xf] }
 0x2f9   :  { %12567 = vmatmul.mubr.bf16.gmra.mrb[32].mxu1 %v11411_v23  ;;  %v13667_v23 = vld [vmem:[#allocation2 + $0x148] sm:$0xf]  ;;  %v7177_v39 = vrot.slane %v13670_v53, 5 }
 0x2fa   :  { %12570 = vmatprep.mubr.bf16.mxu1 %v11412_v54  ;;  %v7181_v2 = vrot.slane %v13667_v23, 5  ;;  %v104_v54 = vsel %vm13916_vm4, 0, %v103_v62  ;;  %v13671_v23 = vld [vmem:[#allocation2 + $0x14c] sm:$0x1]  ;;  %v7175_v26 = vsel %vm14900_vm0, %v11383_v35, %v7174_v7  ;;  %v6909_v7 = vld [vmem:[#allocation2 + $0x15c] sm:$0xe] }
 0x2fb   :  { %105 = vst [vmem:[#allocation2 + $0xcc] sm:$0x1] %v104_v54  ;;  %v7184_v50 = vrot.slane %v13671_v23, 5  ;;  %v7178_v14 = vsel %vm14900_vm0, %v7176_v1, %v7177_v39  ;;  %v13672_v54 = vld [vmem:[#allocation2 + $0x154] sm:$0xf] }
 0x2fc   :  { %v7183_v62 = vrot.slane %v7181_v2, 4  ;;  %v7188_v6 = vrot.slane %v13672_v54, 5  ;;  %v11415_v53 = vcombine.low %v7175_v26, %v7178_v14  ;;  %v7182_v39 = vsel %vm14900_vm0, %v11384_v30, %v7181_v2  ;;  %v13678_v54 = vld [vmem:[#allocation2 + $0x158] sm:$0x1]  ;;  %v13679_v35 = vld [vmem:[#allocation2 + $0x164] sm:$0x1] }
 0x2fd   :  { %v13680_v26 = vld [vmem:[#allocation2 + $0x16c] sm:$0xf]  ;;  %v7209_v2 = vrot.slane %v14821_v10, 5  ;;  %v11386_v30 = vrot.slane %v6909_v7, 9 }
 0x2fe   :  { %v7185_v47 = vsel %vm14900_vm0, %v7183_v62, %v7184_v50  ;;  %v7190_v62 = vrot.slane %v7188_v6, 4 }
 0x2ff   :  { %12255 = vmatmul.mubr.bf16.gmra.mrb[108].mxu0 %v11191_v58  ;;  %v15086_v58 = vld [vmem:[#allocation2 + $0x148] sm:$0xf]  ;;  %v11416_v50 = vcombine.low %v7182_v39, %v7185_v47 }
 0x300   :  { %12258 = vmatprep.mubr.bf16.mxu0 %v11192_v38  ;;  %16192 = vst [vmem:[#allocation11_spill] sm:$0xff] %v15086_v58  ;;  %v11193_v60 = vcombine.low %v13673_v31, %v15086_v58  ;;  %v13675_v38 = vld [vmem:[#allocation2 + $0x160] sm:$0xf]  ;;  %v7191_v31 = vrot.slane %v13678_v54, 5  ;;  %v11385_v58 = vrot.slane %v6908_v52, 9 }
 0x301   :  { %12571 = vmatmul.mubr.bf16.gmra.mrb[36].mxu1 %v11413_v55  ;;  %v7195_v55 = vrot.slane %v13675_v38, 5  ;;  %v7198_v38 = vrot.slane %v13679_v35, 5  ;;  %v15106_v52 = vld [vmem:[#allocation2 + $0x16c] sm:$0xf]  ;;  %v6911_v35 = vld [vmem:[#allocation2 + $0x174] sm:$0xe] }
 0x302   :  { %12574 = vmatprep.mubr.bf16.mxu1 %v11414_v59  ;;  %v13676_v59 = vld [vmem:[#allocation2 + $0x150] sm:$0xf]  ;;  %v7192_v14 = vsel %vm14900_vm0, %v7190_v62, %v7191_v31  ;;  %v7189_v39 = vsel %vm14900_vm0, %v11385_v58, %v7188_v6 }
 0x303   :  { %v11194_v1 = vcombine.low %v13676_v59, %v15091_v22  ;;  %v7197_v23 = vrot.slane %v7195_v55, 4  ;;  %v7202_v59 = vrot.slane %v13680_v26, 5  ;;  %v11417_v54 = vcombine.low %v7189_v39, %v7192_v14  ;;  %v13685_v6 = vld [vmem:[#allocation2 + $0x170] sm:$0x1] }
 0x304   :  { %v7196_v10 = vsel %vm14900_vm0, %v11386_v30, %v7195_v55  ;;  %v4031_v26 = vrot.slane %v14895_v5, 5  ;;  %v7205_v58 = vrot.slane %v13685_v6, 5  ;;  %v11388_v39 = vrot.slane %v6911_v35, 9 }
 0x305   :  { %v7199_v47 = vsel %vm14900_vm0, %v7197_v23, %v7198_v38  ;;  %v6910_v23 = vld [vmem:[#allocation2 + $0x168] sm:$0xe]  ;;  %v7204_v7 = vrot.slane %v7202_v59, 4  ;;  %v7211_v38 = vrot.slane %v7209_v2, 4  ;;  %v7216_v5 = vrot.slane %v14844_v3, 5 }
 0x306   :  { %v11418_v31 = vcombine.low %v7196_v10, %v7199_v47  ;;  %v11387_v14 = vrot.slane %v6910_v23, 9  ;;  %v13686_v47 = vld [vmem:[#allocation2 + $0x174] sm:$0xf]  ;;  %v7210_v6 = vsel %vm14900_vm0, %v11388_v39, %v7209_v2  ;;  %v7226_v2 = vrot.slane %v14871_v0, 5 }
 0x307   :  { %12259 = vmatmul.mubr.bf16.gmra.mrb[112].mxu0 %v11193_v60  ;;  %v13681_v60 = vld [vmem:[#allocation2 + $0x15c] sm:$0xf]  ;;  %v7206_v55 = vsel %vm14900_vm0, %v7204_v7, %v7205_v58  ;;  %v11198_v7 = vcombine.low %v14830_v9, %v14832_v17  ;;  %v7218_v3 = vrot.slane %v7216_v5, 4  ;;  %v7219_v9 = vrot.slane %v14848_v51, 5  ;;  %v6913_v17 = vld [vmem:[#allocation2 + $0x18c] sm:$0xe] }
 0x308   :  { %12262 = vmatprep.mubr.bf16.mxu0 %v11194_v1  ;;  %v15101_v1 = vld [vmem:[#allocation2 + $0x160] sm:$0xf]  ;;  %v7203_v35 = vsel %vm14900_vm0, %v11387_v14, %v7202_v59  ;;  %v4038_v14 = vrot.slane %v14907_v24, 5  ;;  %v4045_v39 = vrot.slane %v14914_v33, 5  ;;  %v11199_v51 = vcombine.low %v14851_v40, %v14856_v45 }
 0x309   :  { %12575 = vmatmul.mubr.bf16.gmra.mrb[40].mxu1 %v11415_v53  ;;  %v11195_v53 = vcombine.low %v13681_v60, %v15101_v1  ;;  %v7212_v60 = vrot.slane %v14825_v48, 5  ;;  %v4033_v48 = vrot.slane %v4031_v26, 4  ;;  %v13690_v40 = vld [vmem:[#allocation2 + $0x20] sm:$0x1] }
 0x30a   :  { %12578 = vmatprep.mubr.bf16.mxu1 %v11416_v50  ;;  %v13683_v50 = vld [vmem:[#allocation2 + $0x168] sm:$0xf]  ;;  %v4040_v0 = vrot.slane %v4038_v14, 4  ;;  %v4048_v45 = vrot.slane %v13690_v40, 5 }
 0x30b   :  { %v11196_v62 = vcombine.low %v13683_v50, %v15106_v52  ;;  %v3930_v50 = vld [vmem:[#allocation2] sm:$0xe]  ;;  %v7213_v30 = vsel %vm14900_vm0, %v7211_v38, %v7212_v60  ;;  %v11419_v38 = vcombine.low %v7203_v35, %v7206_v55 }
 0x30c   :  { %v11208_v10 = vrot.slane %v3930_v50, 9  ;;  %v11420_v58 = vcombine.low %v7210_v6, %v7213_v30  ;;  %v7220_v30 = vsel %vm14900_vm0, %v7218_v3, %v7219_v9  ;;  %v3932_v6 = vld [vmem:[#allocation2 + $0x18] sm:$0xe]  ;;  %v4059_v9 = vrot.slane %v14929_v11, 5 }
 0x30e   :  { %v4032_v50 = vsel %vm14900_vm0, %v11208_v10, %v4031_v26 }
 0x30f   :  { %12263 = vmatmul.mubr.bf16.gmra.mrb[116].mxu0 %v11195_v53  ;;  %v15117_v53 = vld [vmem:[#allocation2 + $0x178] sm:$0xf] }
 0x310   :  { %12266 = vmatprep.mubr.bf16.mxu0 %v11196_v62  ;;  %v11197_v62 = vcombine.low %v13686_v47, %v15117_v53  ;;  %v7230_v47 = vrot.slane %v14877_v12, 5 }
 0x311   :  { %12579 = vmatmul.mubr.bf16.gmra.mrb[44].mxu1 %v11417_v54  ;;  %v7223_v54 = vrot.slane %v14867_v20, 5  ;;  %v6912_v20 = vld [vmem:[#allocation2 + $0x180] sm:$0xe] }
 0x312   :  { %12582 = vmatprep.mubr.bf16.mxu1 %v11418_v31  ;;  %v13688_v31 = vld [vmem:[#allocation2 + $0x8] sm:$0x1]  ;;  %v11389_v55 = vrot.slane %v6912_v20, 9  ;;  %v7232_v35 = vrot.slane %v7230_v47, 4  ;;  %v4052_v20 = vrot.slane %v14924_v29, 5 }
 0x313   :  { %v4034_v23 = vrot.slane %v13688_v31, 5  ;;  %v7225_v60 = vrot.slane %v7223_v54, 4  ;;  %v3931_v31 = vld [vmem:[#allocation2 + $0xc] sm:$0xe] }
 0x314   :  { %v7217_v24 = vsel %vm14900_vm0, %v11389_v55, %v7216_v5  ;;  %v7233_v5 = vrot.slane %v14885_v49, 5  ;;  %v11209_v3 = vrot.slane %v3931_v31, 9  ;;  %v13692_v31 = vld [vmem:[#allocation2 + $0x38] sm:$0x1] }
 0x315   :  { %v4035_v59 = vsel %vm14900_vm0, %v4033_v48, %v4034_v23  ;;  %v7227_v10 = vsel %vm14900_vm0, %v7225_v60, %v7226_v2  ;;  %v11421_v48 = vcombine.low %v7217_v24, %v7220_v30  ;;  %v4047_v23 = vrot.slane %v4045_v39, 4  ;;  %v157_v60 = vld [vmem:[#allocation2 + $0x1a4] sm:$0x1] }
 0x316   :  { %v11240_v26 = vcombine.low %v4032_v50, %v4035_v59  ;;  %v11210_v50 = vrot.slane %v3932_v6, 9  ;;  %v7234_v49 = vsel %vm14900_vm0, %v7232_v35, %v7233_v5  ;;  %v4039_v55 = vsel %vm14900_vm0, %v11209_v3, %v4038_v14  ;;  %v3934_v14 = vld [vmem:[#allocation2 + $0x30] sm:$0xe] }
 0x317   :  { %12267 = vmatmul.mubr.bf16.gmra.mrb[120].mxu0 %v11197_v62  ;;  %v11390_v62 = vrot.slane %v6913_v17, 9  ;;  %v4049_v59 = vsel %vm14900_vm0, %v4047_v23, %v4048_v45  ;;  %v158_v17 = vsel %vm13916_vm4, 0, %v157_v60  ;;  %v4061_v24 = vrot.slane %v4059_v9, 4  ;;  %v13516_v23 = vld [vmem:[#allocation3 + $0xd0] sm:$0xff]   ;;  %v13522_v45 = vld [vmem:[#allocation3 + $0xd8] sm:$0xff]   ;;  %v13489_v60 = vld [vmem:[#allocation3 + $0x1c8] sm:$0xff]  }
 0x318   :  { %12270 = vmatprep.mubr.bf16.mxu0 %v11198_v7  ;;  %v13689_v7 = vld [vmem:[#allocation2 + $0x14] sm:$0x1]  ;;  %159 = vst [vmem:[#allocation2 + $0x1a4] sm:$0x1] %v158_v17  ;;  %v4046_v29 = vsel %vm14900_vm0, %v11210_v50, %v4045_v39  ;;  %v4062_v39 = vrot.slane %v13692_v31, 5  ;;  %v4066_v35 = vrot.slane %v14938_v42, 5 }
 0x319   :  { %12583 = vmatmul.mubr.bf16.gmra.mrb[48].mxu1 %v11419_v38  ;;  %v7224_v33 = vsel %vm14900_vm0, %v11390_v62, %v7223_v54  ;;  %v4041_v38 = vrot.slane %v13689_v7, 5  ;;  %v11242_v11 = vcombine.low %v4046_v29, %v4049_v59  ;;  %v11212_v7 = vrot.slane %v3934_v14, 9  ;;  %v3935_v42 = vld [vmem:[#allocation2 + $0x3c] sm:$0xe]  ;;  %v13486_v59 = vld [vmem:[#allocation2 + $0x30] sm:$0xff]   ;;  %v13488_v31 = vld [vmem:[#allocation2 + $0x48] sm:$0xff]  }
 0x31a   :  { %12586 = vmatprep.mubr.bf16.mxu1 %v11420_v58  ;;  %v11422_v12 = vcombine.low %v7224_v33, %v7227_v10  ;;  %v6914_v58 = vld [vmem:[#allocation2 + $0x198] sm:$0xe]  ;;  %v4054_v10 = vrot.slane %v4052_v20, 4  ;;  %v4073_v6 = vrot.slane %v14943_v4, 5  ;;  %v4068_v3 = vrot.slane %v4066_v35, 4 }
 0x31b   :  { %v4042_v54 = vsel %vm14900_vm0, %v4040_v0, %v4041_v38  ;;  %v11391_v2 = vrot.slane %v6914_v58, 9  ;;  %v13482_v0 = vld [vmem:[#allocation2 + $0x18] sm:$0xff]   ;;  %v4063_v38 = vsel %vm14900_vm0, %v4061_v24, %v4062_v39  ;;  %v4060_v40 = vsel %vm14900_vm0, %v11212_v7, %v4059_v9  ;;  %v13693_v4 = vld [vmem:[#allocation2 + $0x44] sm:$0x1]  ;;  %v13523_v9 = vld [vmem:[#allocation3 + $0xe0] sm:$0xff]  }
 0x31c   :  { %v11241_v30 = vcombine.low %v4039_v55, %v4042_v54  ;;  %v11244_v5 = vcombine.low %v4060_v40, %v4063_v38  ;;  %v13485_v54 = vld [vmem:[#allocation2 + $0x24] sm:$0xff]   ;;  %v4075_v50 = vrot.slane %v4073_v6, 4  ;;  %v4069_v17 = vrot.slane %v13693_v4, 5  ;;  %v13527_v24 = vld [vmem:[#allocation3 + $0xe8] sm:$0xff]   ;;  %v3939_v4 = vld [vmem:[#allocation2 + $0x6c] sm:$0xe] }
 0x31d   :  { %v7231_v62 = vsel %vm14900_vm0, %v11391_v2, %v7230_v47  ;;  %v3936_v2 = vld [vmem:[#allocation2 + $0x48] sm:$0xe]  ;;  %v11213_v55 = vrot.slane %v3935_v42, 9  ;;  %v4080_v29 = vrot.slane %v14952_v25, 5  ;;  %v13695_v39 = vld [vmem:[#allocation2 + $0x5c] sm:$0x1] }
 0x31e   :  { %v11423_v15 = vcombine.low %v7231_v62, %v7234_v49  ;;  %v13528_v7 = vld [vmem:[#allocation3 + $0xf0] sm:$0xff]  }
 0x31f   :  { %12271 = vmatmul.mubr.bf16.gmra.mrb[124].mxu0 %v11199_v51  ;;  %v3933_v51 = vld [vmem:[#allocation2 + $0x24] sm:$0xe]  ;;  %v4082_v25 = vrot.slane %v4080_v29, 4 }
 0x320   :  { %12290 = vmatprep.mubr.bf16.mxu0 %v11240_v26  ;;  %v13510_v26 = vld [vmem:[#allocation3 + $0xc8] sm:$0xff]   ;;  %v11211_v47 = vrot.slane %v3933_v51, 9 }
 0x321   :  { %12587 = vmatmul.mubr.bf16.gmra.mrb[52].mxu1 %v11421_v48  ;;  %v13691_v48 = vld [vmem:[#allocation2 + $0x2c] sm:$0x1] }
 0x322   :  { %12590 = vmatprep.mubr.bf16.mxu1 %v11422_v12  ;;  %v4055_v33 = vrot.slane %v13691_v48, 5  ;;  %v13487_v48 = vld [vmem:[#allocation2 + $0x3c] sm:$0xff]  }
 0x324   :  { %v4056_v12 = vsel %vm14900_vm0, %v4054_v10, %v4055_v33  ;;  %v13494_v10 = vld [vmem:[#allocation3 + $0x1d0] sm:$0xff]   ;;  %v3937_v33 = vld [vmem:[#allocation2 + $0x54] sm:$0xe] }
 0x325   :  { %v11215_v38 = vrot.slane %v3937_v33, 9  ;;  %v13492_v33 = vld [vmem:[#allocation2 + $0x6c] sm:$0xff]  }
 0x327   :  { %12291 = vmatmul.mubr.bf16.vlgmr.msra.gmra.mrb[64].mxu0 %v11241_v30  ;;  %v4070_v30 = vsel %vm14900_vm0, %v4068_v3, %v4069_v17  ;;  %v4081_v3 = vsel %vm14900_vm0, %v11215_v38, %v4080_v29  ;;  %v11217_v29 = vrot.slane %v3939_v4, 9  ;;  %v13702_v4 = vld [vmem:[#allocation2 + $0xa4] sm:$0x1] }
 0x328   :  { %12294 = vmatprep.mubr.bf16.mxu0 %v11242_v11  ;;  %12355 = vmatpush3.bf16.msra.mxu0 %v15035_v57  ;;  %v4053_v57 = vsel %vm14900_vm0, %v11211_v47, %v4052_v20  ;;  %v13694_v20 = vld [vmem:[#allocation2 + $0x50] sm:$0x1]  ;;  %v4087_v11 = vrot.slane %v14957_v41, 5  ;;  %v13499_v41 = vld [vmem:[#allocation3 + $0x1d8] sm:$0xff]   ;;  %v3938_v47 = vld [vmem:[#allocation2 + $0x60] sm:$0xe] }
 0x329   :  { %12591 = vmatmul.mubr.bf16.gmra.mrb[56].mxu1 %v11423_v15  ;;  %12356 = vmatprep.subr.bf16.mxu0 %v13510_v26  ;;  %v11243_v58 = vcombine.low %v4053_v57, %v4056_v12  ;;  %v4076_v49 = vrot.slane %v13694_v20, 5  ;;  %v4067_v15 = vsel %vm14900_vm0, %v11213_v55, %v4066_v35  ;;  %v13696_v12 = vld [vmem:[#allocation2 + $0x68] sm:$0x1]  ;;  %v4094_v57 = vrot.slane %v14966_v27, 5  ;;  %v13697_v20 = vld [vmem:[#allocation2 + $0x74] sm:$0x1] }
 0x32a   :  { %12610 = vmatprep.mubr.bf16.mxu1 %v13482_v0  ;;  %v4089_v14 = vrot.slane %v4087_v11, 4  ;;  %v4090_v35 = vrot.slane %v13696_v12, 5  ;;  %v13698_v55 = vld [vmem:[#allocation2 + $0x80] sm:$0x1]  ;;  %v13701_v12 = vld [vmem:[#allocation2 + $0x98] sm:$0x1] }
 0x32b   :  { %v4077_v62 = vsel %vm14900_vm0, %v4075_v50, %v4076_v49  ;;  %v4096_v50 = vrot.slane %v4094_v57, 4  ;;  %v4097_v49 = vrot.slane %v13697_v20, 5  ;;  %v4143_v20 = vrot.slane %v15009_v28, 5 }
 0x32c   :  { %12357 = vmatpush3.bf16.msra.mxu0 %v13510_v26  ;;  %v11214_v26 = vrot.slane %v3936_v2, 9  ;;  %v4091_v40 = vsel %vm14900_vm0, %v4089_v14, %v4090_v35  ;;  %v13491_v2 = vld [vmem:[#allocation2 + $0x60] sm:$0xff]   ;;  %v4118_v35 = vrot.slane %v13701_v12, 5 }
 0x32d   :  { %12358 = vmatprep.subr.bf16.mxu0 %v13516_v23 }
 0x32e   :  { %v4074_v51 = vsel %vm14900_vm0, %v11214_v26, %v4073_v6  ;;  %v4098_v26 = vsel %vm14900_vm0, %v4096_v50, %v4097_v49  ;;  %v3944_v50 = vld [vmem:[#allocation2 + $0xa8] sm:$0xe] }
 0x32f   :  { %12295 = vmatmul.mubr.bf16.gmra.mrb[68].mxu0 %v11243_v58  ;;  %v11246_v0 = vcombine.low %v4074_v51, %v4077_v62  ;;  %v11216_v58 = vrot.slane %v3938_v47, 9  ;;  %v4108_v62 = vrot.slane %v14982_v46, 5  ;;  %v4095_v51 = vsel %vm14900_vm0, %v11217_v29, %v4094_v57  ;;  %v3942_v47 = vld [vmem:[#allocation2 + $0x90] sm:$0xe]  ;;  %v3946_v29 = vld [vmem:[#allocation2 + $0xd8] sm:$0xe] }
 0x330   :  { %12298 = vmatprep.mubr.bf16.mxu0 %v11244_v5  ;;  %12359 = vmatpush3.bf16.msra.mxu0 %v13516_v23  ;;  %v4083_v23 = vrot.slane %v13695_v39, 5  ;;  %v13505_v5 = vld [vmem:[#allocation3 + $0x1e0] sm:$0xff]   ;;  %v13700_v39 = vld [vmem:[#allocation2 + $0x8c] sm:$0x1]  ;;  %v11220_v57 = vrot.slane %v3942_v47, 9  ;;  %v11224_v28 = vrot.slane %v3946_v29, 9 }
 0x331   :  { %12611 = vmatmul.mubr.bf16.vlgmr.msra.gmra.mrb[60].mxu1 %v13485_v54  ;;  %12360 = vmatprep.subr.bf16.mxu0 %v13522_v45  ;;  %v4088_v42 = vsel %vm14900_vm0, %v11216_v58, %v4087_v11  ;;  %v4157_v47 = vrot.slane %v15030_v44, 5 }
 0x332   :  { %12675 = vmatpush3.bf16.msra.mxu1 %v14976_v56  ;;  %12614 = vmatprep.mubr.bf16.mxu1 %v13486_v59  ;;  %v11245_v56 = vcombine.low %v4067_v15, %v4070_v30  ;;  %v4084_v6 = vsel %vm14900_vm0, %v4082_v25, %v4083_v23  ;;  %v11248_v27 = vcombine.low %v4088_v42, %v4091_v40  ;;  %v13490_v59 = vld [vmem:[#allocation2 + $0x54] sm:$0xff]   ;;  %v4104_v30 = vrot.slane %v13698_v55, 5 }
 0x333   :  { %12676 = vmatprep.subr.bf16.mxu1 %v13489_v60  ;;  %v11247_v54 = vcombine.low %v4081_v3, %v4084_v6  ;;  %v4115_v15 = vrot.slane %v14987_v63, 5  ;;  %v15206_v25 = vld [vmem:[#allocation3 + $0x100] sm:$0xff]   ;;  %v3941_v63 = vld [vmem:[#allocation2 + $0x84] sm:$0xe]  ;;  %v4111_v23 = vrot.slane %v13700_v39, 5  ;;  %v4122_v6 = vrot.slane %v14997_v61, 5 }
 0x334   :  { %12361 = vmatpush3.bf16.msra.mxu0 %v13522_v45  ;;  %v4101_v45 = vrot.slane %v14971_v16, 5  ;;  %v13511_v16 = vld [vmem:[#allocation3 + $0x1e8] sm:$0xff]   ;;  %v4129_v40 = vrot.slane %v15002_v34, 5  ;;  %v13495_v61 = vld [vmem:[#allocation2 + $0x84] sm:$0xff]   ;;  %v13496_v34 = vld [vmem:[#allocation2 + $0x90] sm:$0xff]   ;;  %v11222_v55 = vrot.slane %v3944_v50, 9 }
 0x335   :  { %12362 = vmatprep.subr.bf16.mxu0 %v13523_v9  ;;  %v4117_v14 = vrot.slane %v4115_v15, 4 }
 0x336   :  { %12677 = vmatpush3.bf16.msra.mxu1 %v13489_v60  ;;  %v13531_v60 = vld [vmem:[#allocation3 + $0xf8] sm:$0xff]   ;;  %v4103_v17 = vrot.slane %v4101_v45, 4 }
 0x337   :  { %12299 = vmatmul.mubr.bf16.gmra.mrb[72].mxu0 %v11245_v56  ;;  %12678 = vmatprep.subr.bf16.mxu1 %v13494_v10  ;;  %v13517_v56 = vld [vmem:[#allocation3 + $0x1f0] sm:$0xff]   ;;  %v4119_v58 = vsel %vm14900_vm0, %v4117_v14, %v4118_v35  ;;  %v4144_v14 = vsel %vm14900_vm0, %v11224_v28, %v4143_v20 }
 0x338   :  { %12302 = vmatprep.mubr.bf16.mxu0 %v11246_v0  ;;  %12363 = vmatpush3.bf16.msra.mxu0 %v13523_v9  ;;  %v3940_v9 = vld [vmem:[#allocation2 + $0x78] sm:$0xe] }
 0x339   :  { %12615 = vmatmul.mubr.bf16.gmra.mrb[0].mxu1 %v13487_v48  ;;  %12364 = vmatprep.subr.bf16.mxu0 %v13527_v24  ;;  %v11218_v11 = vrot.slane %v3940_v9, 9  ;;  %v4110_v48 = vrot.slane %v4108_v62, 4 }
 0x33a   :  { %12618 = vmatprep.mubr.bf16.mxu1 %v13488_v31  ;;  %12679 = vmatpush3.bf16.msra.mxu1 %v13494_v10  ;;  %v4105_v10 = vsel %vm14900_vm0, %v4103_v17, %v4104_v30  ;;  %v13493_v31 = vld [vmem:[#allocation2 + $0x78] sm:$0xff]   ;;  %v4125_v17 = vrot.slane %v13702_v4, 5  ;;  %v4136_v30 = vrot.slane %v15014_v13, 5  ;;  %v3945_v13 = vld [vmem:[#allocation2 + $0xb4] sm:$0xe] }
 0x33b   :  { %12680 = vmatprep.subr.bf16.mxu1 %v13499_v41  ;;  %v4102_v0 = vsel %vm14900_vm0, %v11218_v11, %v4101_v45  ;;  %v4112_v38 = vsel %vm14900_vm0, %v4110_v48, %v4111_v23  ;;  %v15215_v45 = vld [vmem:[#allocation3 + $0x200] sm:$0xff]   ;;  %v4130_v11 = vsel %vm14900_vm0, %v11222_v55, %v4129_v40  ;;  %v13498_v48 = vld [vmem:[#allocation2 + $0xa8] sm:$0xff]   ;;  %v4150_v23 = vrot.slane %v15025_v8, 5 }
 0x33c   :  { %12365 = vmatpush3.bf16.msra.mxu0 %v13527_v24  ;;  %v11249_v24 = vcombine.low %v4095_v51, %v4098_v26  ;;  %v11250_v46 = vcombine.low %v4102_v0, %v4105_v10  ;;  %v4138_v0 = vrot.slane %v4136_v30, 4 }
 0x33d   :  { %12366 = vmatprep.subr.bf16.mxu0 %v13528_v7 }
 0x33e   :  { %12681 = vmatpush3.bf16.msra.mxu1 %v13499_v41  ;;  %v13524_v41 = vld [vmem:[#allocation3 + $0x1f8] sm:$0xff]  }
 0x33f   :  { %12303 = vmatmul.mubr.bf16.gmra.mrb[76].mxu0 %v11247_v54  ;;  %12682 = vmatprep.subr.bf16.mxu1 %v13505_v5  ;;  %v4116_v54 = vsel %vm14900_vm0, %v11220_v57, %v4115_v15  ;;  %v4145_v15 = vrot.slane %v4143_v20, 4  ;;  %v3947_v57 = vld [vmem:[#allocation2 + $0xe4] sm:$0xe] }
 0x340   :  { %12306 = vmatprep.mubr.bf16.mxu0 %v11248_v27  ;;  %12367 = vmatpush3.bf16.msra.mxu0 %v13528_v7  ;;  %v11219_v7 = vrot.slane %v3941_v63, 9  ;;  %v11252_v42 = vcombine.low %v4116_v54, %v4119_v58  ;;  %v3943_v27 = vld [vmem:[#allocation2 + $0x9c] sm:$0xe]  ;;  %v4159_v58 = vrot.slane %v4157_v47, 4  ;;  %v3948_v54 = vld [vmem:[#allocation2 + $0xf0] sm:$0xe] }
 0x341   :  { %12619 = vmatmul.mubr.bf16.gmra.mrb[4].mxu1 %v13490_v59  ;;  %12368 = vmatprep.subr.bf16.mxu0 %v13531_v60  ;;  %v4131_v59 = vrot.slane %v4129_v40, 4  ;;  %v11221_v49 = vrot.slane %v3943_v27, 9  ;;  %v13501_v40 = vld [vmem:[#allocation2 + $0xc0] sm:$0xff]   ;;  %v11225_v44 = vrot.slane %v3947_v57, 9  ;;  %v213_v27 = vld [vmem:[#allocation2 + $0xd4] sm:$0x1] }
 0x342   :  { %12622 = vmatprep.mubr.bf16.mxu1 %v13491_v2  ;;  %12683 = vmatpush3.bf16.msra.mxu1 %v13505_v5  ;;  %v4109_v5 = vsel %vm14900_vm0, %v11219_v7, %v4108_v62  ;;  %v11226_v50 = vrot.slane %v3948_v54, 9  ;;  %v214_v4 = vsel %vm13991_vm6, 0, %v213_v27  ;;  %v13712_v27 = vld [vmem:[#allocation2 + $0x134] sm:$0x1] }
 0x343   :  { %12684 = vmatprep.subr.bf16.mxu1 %v13511_v16  ;;  %v11251_v3 = vcombine.low %v4109_v5, %v4112_v38  ;;  %v4123_v62 = vsel %vm14900_vm0, %v11221_v49, %v4122_v6  ;;  %v4152_v38 = vrot.slane %v4150_v23, 4  ;;  %v13706_v5 = vld [vmem:[#allocation2 + $0xec] sm:$0x1]  ;;  %215 = vst [vmem:[#allocation2 + $0xd4] sm:$0x1] %v214_v4 }
 0x344   :  { %12369 = vmatpush3.bf16.msra.mxu0 %v13531_v60  ;;  %v4124_v60 = vrot.slane %v4122_v6, 4  ;;  %v13500_v6 = vld [vmem:[#allocation2 + $0xb4] sm:$0xff]   ;;  %v4158_v20 = vsel %vm14900_vm0, %v11226_v50, %v4157_v47  ;;  %v4195_v50 = vrot.slane %v13712_v27, 5  ;;  %v8459_v27 = vld [vmem:[#allocation2 + $0x24] sm:$0xf] }
 0x345   :  { %12434 = vmatprep.subr.bf16.mxu0 %v15206_v25 }
 0x346   :  { %12685 = vmatpush3.bf16.msra.mxu1 %v13511_v16  ;;  %v13703_v16 = vld [vmem:[#allocation2 + $0xb0] sm:$0x1]  ;;  %v4126_v9 = vsel %vm14900_vm0, %v4124_v60, %v4125_v17  ;;  %v4151_v17 = vsel %vm14900_vm0, %v11225_v44, %v4150_v23  ;;  %v3952_v23 = vld [vmem:[#allocation2 + $0x120] sm:$0xe]  ;;  %v3953_v44 = vld [vmem:[#allocation2 + $0x12c] sm:$0xe] }
 0x347   :  { %12307 = vmatmul.mubr.bf16.gmra.mrb[80].mxu0 %v11249_v24  ;;  %12686 = vmatprep.subr.bf16.mxu1 %v13517_v56  ;;  %v4132_v2 = vrot.slane %v13703_v16, 5  ;;  %v11253_v10 = vcombine.low %v4123_v62, %v4126_v9  ;;  %v13502_v16 = vld [vmem:[#allocation2 + $0xcc] sm:$0xff]   ;;  %v3949_v9 = vld [vmem:[#allocation2 + $0xfc] sm:$0xe]  ;;  %v11231_v4 = vrot.slane %v3953_v44, 9 }
 0x348   :  { %12310 = vmatprep.mubr.bf16.mxu0 %v11250_v46  ;;  %v13497_v46 = vld [vmem:[#allocation2 + $0x9c] sm:$0xff]   ;;  %v13709_v62 = vld [vmem:[#allocation2 + $0x110] sm:$0x1] }
 0x349   :  { %12623 = vmatmul.mubr.bf16.gmra.mrb[8].mxu1 %v13492_v33  ;;  %v4133_v26 = vsel %vm14900_vm0, %v4131_v59, %v4132_v2  ;;  %v13705_v33 = vld [vmem:[#allocation2 + $0xbc] sm:$0x1] }
 0x34a   :  { %12626 = vmatprep.mubr.bf16.mxu1 %v13493_v31  ;;  %12687 = vmatpush3.bf16.msra.mxu1 %v13517_v56  ;;  %v13704_v56 = vld [vmem:[#allocation2 + $0xe0] sm:$0x1]  ;;  %v11254_v24 = vcombine.low %v4130_v11, %v4133_v26  ;;  %v4139_v63 = vrot.slane %v13705_v33, 5  ;;  %v11223_v31 = vrot.slane %v3945_v13, 9  ;;  %v3950_v26 = vld [vmem:[#allocation2 + $0x108] sm:$0xe] }
 0x34b   :  { %12688 = vmatprep.subr.bf16.mxu1 %v13524_v41  ;;  %v4146_v51 = vrot.slane %v13704_v56, 5  ;;  %v4174_v11 = vrot.slane %v13709_v62, 5  ;;  %v11228_v56 = vrot.slane %v3950_v26, 9  ;;  %v13512_v26 = vld [vmem:[#allocation2 + $0x12c] sm:$0xff]   ;;  %v3955_v62 = vld [vmem:[#allocation2 + $0x144] sm:$0xe] }
 0x34c   :  { %v4140_v39 = vsel %vm14900_vm0, %v4138_v0, %v4139_v63  ;;  %v4137_v12 = vsel %vm14900_vm0, %v11223_v31, %v4136_v30  ;;  %v13503_v30 = vld [vmem:[#allocation2 + $0xf0] sm:$0xff]   ;;  %v13506_v63 = vld [vmem:[#allocation2 + $0xfc] sm:$0xff]  }
 0x34d   :  { %v11255_v7 = vcombine.low %v4137_v12, %v4140_v39  ;;  %v13710_v31 = vld [vmem:[#allocation2 + $0x11c] sm:$0x1] }
 0x34e   :  { %12689 = vmatpush3.bf16.msra.mxu1 %v13524_v41  ;;  %v4147_v41 = vsel %vm14900_vm0, %v4145_v15, %v4146_v51  ;;  %v4178_v15 = vrot.slane %v15056_v32, 5  ;;  %v13507_v32 = vld [vmem:[#allocation2 + $0x108] sm:$0xff]   ;;  %v4181_v39 = vrot.slane %v13710_v31, 5  ;;  %v13716_v31 = vld [vmem:[#allocation2 + $0x164] sm:$0x1] }
 0x34f   :  { %12311 = vmatmul.mubr.bf16.gmra.mrb[84].mxu0 %v11251_v3  ;;  %12754 = vmatprep.subr.bf16.mxu1 %v15215_v45  ;;  %v11256_v35 = vcombine.low %v4144_v14, %v4147_v41  ;;  %v4153_v3 = vrot.slane %v13706_v5, 5  ;;  %v3951_v14 = vld [vmem:[#allocation2 + $0x114] sm:$0xe] }
 0x350   :  { %12314 = vmatprep.mubr.bf16.mxu0 %v11252_v42  ;;  %v13707_v42 = vld [vmem:[#allocation2 + $0xf8] sm:$0x1]  ;;  %v4180_v33 = vrot.slane %v4178_v15, 4  ;;  %v11229_v12 = vrot.slane %v3951_v14, 9  ;;  %v3957_v14 = vld [vmem:[#allocation2 + $0x15c] sm:$0xe] }
 0x351   :  { %12627 = vmatmul.mubr.bf16.gmra.mrb[12].mxu1 %v13495_v61  ;;  %v4160_v8 = vrot.slane %v13707_v42, 5  ;;  %v4154_v60 = vsel %vm14900_vm0, %v4152_v38, %v4153_v3  ;;  %v4164_v61 = vrot.slane %v15042_v18, 5 }
 0x352   :  { %12630 = vmatprep.mubr.bf16.mxu1 %v13496_v34  ;;  %v4171_v34 = vrot.slane %v15047_v37, 5  ;;  %v11257_v2 = vcombine.low %v4151_v17, %v4154_v60  ;;  %v13708_v37 = vld [vmem:[#allocation2 + $0x104] sm:$0x1] }
 0x353   :  { %v4161_v59 = vsel %vm14900_vm0, %v4159_v58, %v4160_v8  ;;  %v4166_v49 = vrot.slane %v4164_v61, 4  ;;  %v4167_v29 = vrot.slane %v13708_v37, 5  ;;  %v4199_v58 = vrot.slane %v15077_v19, 5  ;;  %v13508_v8 = vld [vmem:[#allocation2 + $0x114] sm:$0xff]   ;;  %v13713_v19 = vld [vmem:[#allocation2 + $0x140] sm:$0x1] }
 0x354   :  { %v11258_v18 = vcombine.low %v4158_v20, %v4161_v59  ;;  %v4173_v55 = vrot.slane %v4171_v34, 4  ;;  %v4172_v13 = vsel %vm14900_vm0, %v11228_v56, %v4171_v34  ;;  %v3954_v59 = vld [vmem:[#allocation2 + $0x138] sm:$0xe]  ;;  %v4202_v34 = vrot.slane %v13713_v19, 5 }
 0x355   :  { %v4168_v28 = vsel %vm14900_vm0, %v4166_v49, %v4167_v29  ;;  %v4201_v60 = vrot.slane %v4199_v58, 4  ;;  %v11232_v20 = vrot.slane %v3954_v59, 9  ;;  %v4213_v49 = vrot.slane %v15091_v22, 5  ;;  %v3956_v22 = vld [vmem:[#allocation2 + $0x150] sm:$0xe] }
 0x356   :  { %v4175_v51 = vsel %vm14900_vm0, %v4173_v55, %v4174_v11 }
 0x357   :  { %12315 = vmatmul.mubr.bf16.gmra.mrb[88].mxu0 %v11253_v10  ;;  %v11227_v10 = vrot.slane %v3949_v9, 9  ;;  %v4215_v11 = vrot.slane %v4213_v49, 4 }
 0x358   :  { %12318 = vmatprep.mubr.bf16.mxu0 %v11254_v24  ;;  %v4185_v24 = vrot.slane %v15061_v43, 5  ;;  %v13711_v43 = vld [vmem:[#allocation2 + $0x128] sm:$0x1] }
 0x359   :  { %12631 = vmatmul.mubr.bf16.gmra.mrb[16].mxu1 %v13497_v46  ;;  %v4165_v0 = vsel %vm14900_vm0, %v11227_v10, %v4164_v61  ;;  %v4188_v47 = vrot.slane %v13711_v43, 5  ;;  %v13509_v61 = vld [vmem:[#allocation2 + $0x120] sm:$0xff]   ;;  %v4220_v10 = vrot.slane %v15101_v1, 5  ;;  %v4227_v1 = vrot.slane %v15106_v52, 5  ;;  %v3959_v52 = vld [vmem:[#allocation2 + $0x174] sm:$0xe] }
 0x35a   :  { %12634 = vmatprep.mubr.bf16.mxu1 %v13498_v48  ;;  %v11259_v46 = vcombine.low %v4165_v0, %v4168_v28  ;;  %v11260_v48 = vcombine.low %v4172_v13, %v4175_v51  ;;  %v4187_v41 = vrot.slane %v4185_v24, 4  ;;  %v13513_v28 = vld [vmem:[#allocation2 + $0x138] sm:$0xff]   ;;  %v11233_v0 = vrot.slane %v3955_v62, 9 }
 0x35b   :  { %v13715_v51 = vld [vmem:[#allocation2 + $0x158] sm:$0x1]  ;;  %v11234_v13 = vrot.slane %v3956_v22, 9 }
 0x35c   :  { %v4189_v57 = vsel %vm14900_vm0, %v4187_v41, %v4188_v47  ;;  %v13514_v47 = vld [vmem:[#allocation2 + $0x144] sm:$0xff]  }
 0x35f   :  { %12319 = vmatmul.mubr.bf16.gmra.mrb[92].mxu0 %v11255_v7  ;;  %v16193_v7 = vld [vmem:[#allocation10_spill] sm:$0xff] }
 0x360   :  { %12322 = vmatprep.mubr.bf16.mxu0 %v11256_v35  ;;  %v4182_v35 = vsel %vm14900_vm0, %v4180_v33, %v4181_v39  ;;  %v4192_v38 = vrot.slane %v16193_v7, 5  ;;  %v4222_v33 = vrot.slane %v4220_v10, 4  ;;  %v4223_v39 = vrot.slane %v13716_v31, 5 }
 0x361   :  { %12635 = vmatmul.mubr.bf16.gmra.mrb[20].mxu1 %v13500_v6  ;;  %v11230_v6 = vrot.slane %v3952_v23, 9  ;;  %v3958_v23 = vld [vmem:[#allocation2 + $0x168] sm:$0xe]  ;;  %v4229_v7 = vrot.slane %v4227_v1, 4 }
 0x362   :  { %12638 = vmatprep.mubr.bf16.mxu1 %v13501_v40  ;;  %v4179_v40 = vsel %vm14900_vm0, %v11229_v12, %v4178_v15  ;;  %v4194_v42 = vrot.slane %v4192_v38, 4  ;;  %v4193_v9 = vsel %vm14900_vm0, %v11231_v4, %v4192_v38  ;;  %v13714_v15 = vld [vmem:[#allocation2 + $0x14c] sm:$0x1]  ;;  %v11235_v12 = vrot.slane %v3957_v14, 9 }
 0x363   :  { %v11261_v5 = vcombine.low %v4179_v40, %v4182_v35  ;;  %v4186_v3 = vsel %vm14900_vm0, %v11230_v6, %v4185_v24  ;;  %v4209_v56 = vrot.slane %v13714_v15, 5  ;;  %v4216_v24 = vrot.slane %v13715_v51, 5  ;;  %v13515_v6 = vld [vmem:[#allocation2 + $0x150] sm:$0xff]   ;;  %v13518_v15 = vld [vmem:[#allocation2 + $0x15c] sm:$0xff]  }
 0x364   :  { %v11262_v54 = vcombine.low %v4186_v3, %v4189_v57  ;;  %v4196_v17 = vsel %vm14900_vm0, %v4194_v42, %v4195_v50  ;;  %v4224_v35 = vsel %vm14900_vm0, %v4222_v33, %v4223_v39  ;;  %v4234_v38 = vrot.slane %v15117_v53, 5  ;;  %v8457_v42 = vld [vmem:[#allocation2 + $0x1c] sm:$0xf]  ;;  %v8460_v50 = vld [vmem:[#allocation2 + $0x28] sm:$0xf] }
 0x365   :  { %v11263_v55 = vcombine.low %v4193_v9, %v4196_v17  ;;  %v11236_v57 = vrot.slane %v3958_v23, 9  ;;  %v4221_v40 = vsel %vm14900_vm0, %v11235_v12, %v4220_v10  ;;  %v8577_v9 = vshrl.u32 %v8459_v27, 16 }
 0x366   :  { %v4236_v19 = vrot.slane %v4234_v38, 4 }
 0x367   :  { %12323 = vmatmul.mubr.bf16.gmra.mrb[96].mxu0 %v11257_v2  ;;  %v4228_v44 = vsel %vm14900_vm0, %v11236_v57, %v4227_v1 }
 0x368   :  { %12326 = vmatprep.mubr.bf16.mxu0 %v11258_v18  ;;  %v4203_v18 = vsel %vm14900_vm0, %v4201_v60, %v4202_v34  ;;  %v11237_v60 = vrot.slane %v3959_v52, 9  ;;  %v13719_v34 = vld [vmem:[#allocation2 + $0x17c] sm:$0x1] }
 0x369   :  { %12639 = vmatmul.mubr.bf16.gmra.mrb[24].mxu1 %v13502_v16  ;;  %v16194_v16 = vld [vmem:[#allocation11_spill] sm:$0xff]  ;;  %v4237_v4 = vrot.slane %v13719_v34, 5 }
 0x36a   :  { %12642 = vmatprep.mubr.bf16.mxu1 %v13503_v30  ;;  %v4206_v2 = vrot.slane %v16194_v16, 5  ;;  %v4200_v30 = vsel %vm14900_vm0, %v11232_v20, %v4199_v58  ;;  %v3960_v58 = vld [vmem:[#allocation2 + $0x180] sm:$0xe]  ;;  %v3961_v16 = vld [vmem:[#allocation2 + $0x18c] sm:$0xe] }
 0x36b   :  { %v11264_v37 = vcombine.low %v4200_v30, %v4203_v18  ;;  %v11238_v17 = vrot.slane %v3960_v58, 9  ;;  %v8562_v18 = vshll.u32 %v8457_v42, 16  ;;  %v8586_v30 = vshll.u32 %v8460_v50, 16  ;;  %v8465_v58 = vld [vmem:[#allocation2 + $0x3c] sm:$0xf] }
 0x36c   :  { %v4208_v29 = vrot.slane %v4206_v2, 4  ;;  %v11239_v51 = vrot.slane %v3961_v16, 9  ;;  %v8468_v34 = vld [vmem:[#allocation2 + $0x48] sm:$0xf] }
 0x36d   :  { %v15311_v39 = vrot.slane %v8586_v30, 5 }
 0x36f   :  { %12327 = vmatmul.mubr.bf16.gmra.mrb[100].mxu0 %v11259_v46  ;;  %v4210_v46 = vsel %vm14900_vm0, %v4208_v29, %v4209_v56  ;;  %v4238_v56 = vsel %vm14900_vm0, %v4236_v19, %v4237_v4  ;;  %v8628_v19 = vshll.u32 %v8465_v58, 16  ;;  %v13520_v4 = vld [vmem:[#allocation2 + $0x174] sm:$0xff]  }
 0x370   :  { %12330 = vmatprep.mubr.bf16.mxu0 %v11260_v48  ;;  %v4217_v48 = vsel %vm14900_vm0, %v4215_v11, %v4216_v24  ;;  %v13720_v11 = vld [vmem:[#allocation2 + $0x188] sm:$0x1]  ;;  %v13721_v24 = vld [vmem:[#allocation2 + $0x190] sm:$0xf] }
 0x371   :  { %12643 = vmatmul.mubr.bf16.gmra.mrb[28].mxu1 %v13506_v63  ;;  %v4207_v63 = vsel %vm14900_vm0, %v11233_v0, %v4206_v2  ;;  %v4244_v10 = vrot.slane %v13720_v11, 5  ;;  %v4248_v0 = vrot.slane %v13721_v24, 5 }
 0x372   :  { %12646 = vmatprep.mubr.bf16.mxu1 %v13507_v32  ;;  %v11265_v41 = vcombine.low %v4207_v63, %v4210_v46  ;;  %v4214_v32 = vsel %vm14900_vm0, %v11234_v13, %v4213_v49  ;;  %v8566_v49 = vshrl.u32 %v8457_v42, 16  ;;  %v8462_v46 = vld [vmem:[#allocation2 + $0x30] sm:$0xf]  ;;  %v8463_v13 = vld [vmem:[#allocation2 + $0x34] sm:$0xf]  ;;  %v15309_v63 = vrot.slane %v8562_v18, 5 }
 0x373   :  { %v11266_v43 = vcombine.low %v4214_v32, %v4217_v48  ;;  %v13519_v48 = vld [vmem:[#allocation2 + $0x168] sm:$0xff]   ;;  %v8579_v32 = vrot.slane %v8577_v9, 4  ;;  %v8610_v12 = vshll.u32 %v8463_v13, 16  ;;  %v4250_v52 = vrot.slane %v4248_v0, 4  ;;  %v8466_v42 = vld [vmem:[#allocation2 + $0x40] sm:$0xf] }
 0x374   :  { %v8568_v14 = vrot.slane %v8566_v49, 4  ;;  %v8469_v18 = vld [vmem:[#allocation2 + $0x4c] sm:$0xf]  ;;  %v13521_v49 = vld [vmem:[#allocation2 + $0x180] sm:$0xff]  }
 0x377   :  { %12331 = vmatmul.mubr.bf16.gmra.mrb[104].mxu0 %v11261_v5  ;;  %v13717_v5 = vld [vmem:[#allocation2 + $0x170] sm:$0x1] }
 0x378   :  { %12334 = vmatprep.mubr.bf16.mxu0 %v11262_v54  ;;  %v4230_v3 = vrot.slane %v13717_v5, 5  ;;  %v8456_v54 = vld [vmem:[#allocation2 + $0x18] sm:$0xf]  ;;  %v8569_v5 = vor.u32 %v8568_v14, %v15309_v63  ;;  %v8662_v14 = vshrl.u32 %v8469_v18, 16 }
 0x379   :  { %12647 = vmatmul.mubr.bf16.gmra.mrb[32].mxu1 %v13508_v8  ;;  %v11267_v8 = vcombine.low %v4221_v40, %v4224_v35  ;;  %v8553_v2 = vshrl.u32 %v8456_v54, 16  ;;  %v8556_v20 = vshll.u32 %v8456_v54, 16  ;;  %v8614_v35 = vshrl.u32 %v8463_v13, 16 }
 0x37a   :  { %12650 = vmatprep.mubr.bf16.mxu1 %v13509_v61  ;;  %v13718_v61 = vld [vmem:[#allocation2 + $0x184] sm:$0xf]  ;;  %v4231_v59 = vsel %vm14900_vm0, %v4229_v7, %v4230_v3  ;;  %v15317_v7 = vsel %vm14900_vm0, %v11239_v51, %v4248_v0  ;;  %v8601_v54 = vshrl.u32 %v8462_v46, 16  ;;  %v8652_v0 = vshll.u32 %v8468_v34, 16 }
 0x37b   :  { %v4241_v53 = vrot.slane %v13718_v61, 5  ;;  %v11268_v29 = vcombine.low %v4228_v44, %v4231_v59  ;;  %v8555_v33 = vrot.slane %v8553_v2, 4  ;;  %v8558_v1 = vrot.slane %v8556_v20, 5  ;;  %v8464_v61 = vld [vmem:[#allocation2 + $0x38] sm:$0x1] }
 0x37c   :  { %v8625_v59 = vshrl.u32 %v8465_v58, 16  ;;  %v8634_v2 = vshll.u32 %v8466_v42, 16  ;;  %v8638_v20 = vshrl.u32 %v8466_v42, 16  ;;  %v8620_v11 = vshll.u32 %v8464_v61, 16  ;;  %v8470_v61 = vld [vmem:[#allocation2 + $0x50] sm:$0x1] }
 0x37d   :  { %v4243_v62 = vrot.slane %v4241_v53, 4  ;;  %v4242_v22 = vsel %vm14900_vm0, %v11238_v17, %v4241_v53  ;;  %v8559_v40 = vor.u32 %v8558_v1, %v8555_v33  ;;  %v8604_v53 = vshll.u32 %v8462_v46, 16 }
 0x37e   :  { %v15326_v51 = vrot.slane %v8634_v2, 5  ;;  %v8640_v24 = vrot.slane %v8638_v20, 4  ;;  %v8658_v46 = vshll.u32 %v8469_v18, 16  ;;  %v8654_v58 = vrot.slane %v8652_v0, 5  ;;  %v8478_v0 = vld [vmem:[#allocation2 + $0x70] sm:$0xf] }
 0x37f   :  { %12335 = vmatmul.mubr.bf16.gmra.mrb[108].mxu0 %v11263_v55  ;;  %v8580_v55 = vshll.u32 %v8459_v27, 16  ;;  %v15321_v27 = vrot.slane %v8610_v12, 5  ;;  %v8560_v9 = vrot.slane %v8559_v40, 4  ;;  %v13529_v12 = vld [vmem:[#allocation2 + $0xc] sm:$0xff]  }
 0x380   :  { %12338 = vmatprep.mubr.bf16.mxu0 %v11264_v37  ;;  %v8590_v37 = vshrl.u32 %v8460_v50, 16  ;;  %v8616_v50 = vrot.slane %v8614_v35, 4  ;;  %v15340_v40 = vrot.slane %v8658_v46, 5 }
 0x381   :  { %12651 = vmatmul.mubr.bf16.gmra.mrb[36].mxu1 %v13512_v26  ;;  %v4235_v26 = vsel %vm14900_vm0, %v11237_v60, %v4234_v38  ;;  %v8582_v31 = vrot.slane %v8580_v55, 5  ;;  %v13722_v38 = vld [vmem:[#allocation2 + $0x194] sm:$0x1]  ;;  %v8570_v55 = vrot.slane %v8569_v5, 4  ;;  %v8565_v33 = vsel %vm14063_vm9, %v8560_v9, %v15309_v63  ;;  %v13526_v5 = vld [vmem:[#allocation2 + $0x198] sm:$0xff]  }
 0x382   :  { %12654 = vmatprep.mubr.bf16.mxu1 %v13513_v28  ;;  %v8458_v28 = vld [vmem:[#allocation2 + $0x20] sm:$0x1]  ;;  %v8592_v23 = vrot.slane %v8590_v37, 4  ;;  %v8603_v37 = vrot.slane %v8601_v54, 4 }
 0x383   :  { %v8572_v57 = vshll.u32 %v8458_v28, 16  ;;  %v8583_v44 = vor.u32 %v8582_v31, %v8579_v32  ;;  %v8627_v28 = vrot.slane %v8625_v59, 4 }
 0x384   :  { %v8593_v60 = vor.u32 %v8592_v23, %v15311_v39 }
 0x385   :  { %v8574_v16 = vrot.slane %v8572_v57, 5  ;;  %v8641_v57 = vor.u32 %v8640_v24, %v15326_v51  ;;  %v8668_v24 = vshll.u32 %v8470_v61, 16 }
 0x387   :  { %12339 = vmatmul.mubr.bf16.gmra.mrb[112].mxu0 %v11265_v41  ;;  %v8461_v41 = vld [vmem:[#allocation2 + $0x2c] sm:$0x1]  ;;  %v8575_v1 = vsel %vm14063_vm9, %v8570_v55, %v8574_v16  ;;  %v8642_v2 = vrot.slane %v8641_v57, 4  ;;  %v8734_v57 = vshrl.u32 %v8478_v0, 16 }
 0x388   :  { %12342 = vmatprep.mubr.bf16.mxu0 %v11266_v43  ;;  %v11269_v43 = vcombine.low %v4235_v26, %v4238_v56  ;;  %v8596_v3 = vshll.u32 %v8461_v41, 16  ;;  %v8594_v26 = vrot.slane %v8593_v60, 4  ;;  %v8649_v56 = vshrl.u32 %v8468_v34, 16  ;;  %v8471_v41 = vld [vmem:[#allocation2 + $0x54] sm:$0xf] }
 0x389   :  { %12655 = vmatmul.mubr.bf16.gmra.mrb[40].mxu1 %v13514_v47  ;;  %v4245_v47 = vsel %vm14900_vm0, %v4243_v62, %v4244_v10  ;;  %v8606_v62 = vrot.slane %v8604_v53, 5  ;;  %v8617_v10 = vor.u32 %v8616_v50, %v15321_v27  ;;  %v8676_v54 = vshll.u32 %v8471_v41, 16  ;;  %v8474_v53 = vld [vmem:[#allocation2 + $0x60] sm:$0xf]  ;;  %v267_v16 = vld [vmem:[#allocation2 + $0x1ac] sm:$0x1] }
 0x38a   :  { %12658 = vmatprep.mubr.bf16.mxu1 %v13515_v6  ;;  %v4251_v6 = vrot.slane %v13722_v38, 5  ;;  %v8598_v30 = vrot.slane %v8596_v3, 5  ;;  %v8651_v63 = vrot.slane %v8649_v56, 4  ;;  %v8475_v38 = vld [vmem:[#allocation2 + $0x64] sm:$0xf]  ;;  %v8664_v3 = vrot.slane %v8662_v14, 4 }
 0x38b   :  { %v8607_v23 = vor.u32 %v8606_v62, %v8603_v37  ;;  %v8618_v35 = vrot.slane %v8617_v10, 4  ;;  %v8706_v50 = vshll.u32 %v8475_v38, 16  ;;  %v8710_v59 = vshrl.u32 %v8475_v38, 16  ;;  %v13530_v62 = vld [vmem:[#allocation2 + $0x1a4] sm:$0xff]  }
 0x38c   :  { %v4252_v17 = vsel %vm14900_vm0, %v4250_v52, %v4251_v6  ;;  %v8599_v31 = vsel %vm14063_vm9, %v8594_v26, %v8598_v30  ;;  %v13525_v6 = vld [vmem:[#allocation2 + $0x18c] sm:$0xff]   ;;  %v8655_v20 = vor.u32 %v8654_v58, %v8651_v63  ;;  %v268_v9 = vsel %vm13991_vm6, 0, %v267_v16  ;;  %v8473_v30 = vld [vmem:[#allocation2 + $0x5c] sm:$0x1]  ;;  %v8479_v16 = vld [vmem:[#allocation2 + $0x74] sm:$0x1] }
 0x38d   :  { %v11271_v13 = vcombine.low %v15317_v7, %v4252_v17  ;;  %v8665_v55 = vor.u32 %v8664_v3, %v15340_v40  ;;  %v8678_v37 = vrot.slane %v8676_v54, 5  ;;  %269 = vst [vmem:[#allocation2 + $0x1ac] sm:$0x1] %v268_v9  ;;  %v8697_v10 = vshrl.u32 %v8474_v53, 16  ;;  %v13538_v9 = vld [vmem:[#allocation3 + $0x208] sm:$0xff]  }
 0x38e   :  { %v8712_v56 = vrot.slane %v8710_v59, 4  ;;  %v8670_v63 = vrot.slane %v8668_v24, 5  ;;  %v8740_v24 = vshll.u32 %v8479_v16, 16 }
 0x38f   :  { %12343 = vmatmul.mubr.bf16.gmra.mrb[116].mxu0 %v11267_v8  ;;  %v11270_v8 = vcombine.low %v4242_v22, %v4245_v47  ;;  %v8467_v22 = vld [vmem:[#allocation2 + $0x44] sm:$0x1]  ;;  %v8472_v47 = vld [vmem:[#allocation2 + $0x58] sm:$0xf] }
 0x390   :  { %12346 = vmatprep.mubr.bf16.mxu0 %v11268_v29  ;;  %v8584_v29 = vrot.slane %v8583_v44, 4  ;;  %v8644_v52 = vshll.u32 %v8467_v22, 16  ;;  %v8682_v42 = vshll.u32 %v8472_v47, 16  ;;  %v11472_v44 = vcombine.low %v8565_v33, %v8575_v1  ;;  %v13534_v22 = vld [vmem:[#allocation2 + $0x24] sm:$0xff]  }
 0x391   :  { %12659 = vmatmul.mubr.bf16.gmra.mrb[44].mxu1 %v13518_v15  ;;  %v8630_v15 = vrot.slane %v8628_v19, 5  ;;  %v8608_v19 = vrot.slane %v8607_v23, 4  ;;  %v8692_v23 = vshll.u32 %v8473_v30, 16 }
 0x392   :  { %12662 = vmatprep.mubr.bf16.mxu1 %v13519_v48  ;;  %v8589_v32 = vsel %vm14063_vm9, %v8584_v29, %v15311_v39  ;;  %v8673_v39 = vshrl.u32 %v8471_v41, 16  ;;  %v8646_v17 = vrot.slane %v8644_v52, 5  ;;  %v15349_v29 = vrot.slane %v8682_v42, 5  ;;  %v13723_v52 = vld [vmem:[#allocation3 + $0x108] sm:$0xff]   ;;  %v13738_v48 = vld [vmem:[#allocation2 + $0x2c] sm:$0x1] }
 0x393   :  { %v8631_v7 = vor.u32 %v8630_v15, %v8627_v28  ;;  %v15342_v60 = vcombine.low %v8589_v32, %v8599_v31  ;;  %v8700_v28 = vshll.u32 %v8474_v53, 16  ;;  %v15351_v15 = vrot.slane %v8706_v50, 5  ;;  %v13535_v53 = vld [vmem:[#allocation2 + $0x30] sm:$0xff]  }
 0x394   :  { %v8675_v18 = vrot.slane %v8673_v39, 4  ;;  %v8613_v36 = vsel %vm14063_vm9, %v8608_v19, %v15321_v27  ;;  %v8647_v14 = vsel %vm14063_vm9, %v8642_v2, %v8646_v17  ;;  %v8656_v41 = vrot.slane %v8655_v20, 4  ;;  %v8480_v39 = vld [vmem:[#allocation2 + $0x78] sm:$0xf]  ;;  %v13724_v17 = vld [vmem:[#allocation3 + $0x110] sm:$0xff]  }
 0x395   :  { %v8666_v32 = vrot.slane %v8665_v55, 4  ;;  %v8736_v20 = vrot.slane %v8734_v57, 4  ;;  %v13539_v57 = vld [vmem:[#allocation2 + $0x54] sm:$0xff]  }
 0x396   :  { %v8679_v31 = vor.u32 %v8678_v37, %v8675_v18  ;;  %v8745_v18 = vshrl.u32 %v8480_v39, 16 }
 0x397   :  { %12347 = vmatmul.mubr.bf16.gmra.mrb[120].mxu0 %v11269_v43  ;;  %v8622_v43 = vrot.slane %v8620_v11, 5  ;;  %v13532_v11 = vld [vmem:[#allocation2 + $0x18] sm:$0xff]   ;;  %v8671_v54 = vsel %vm14063_vm9, %v8666_v32, %v8670_v63 }
 0x398   :  { %12350 = vmatprep.mubr.bf16.mxu0 %v11270_v8  ;;  %v8686_v8 = vshrl.u32 %v8472_v47, 16  ;;  %v8476_v47 = vld [vmem:[#allocation2 + $0x68] sm:$0x1]  ;;  %v8680_v42 = vrot.slane %v8679_v31, 4 }
 0x399   :  { %12663 = vmatmul.mubr.bf16.gmra.mrb[48].mxu1 %v13520_v4  ;;  %v8623_v34 = vsel %vm14063_vm9, %v8618_v35, %v8622_v43  ;;  %v8632_v4 = vrot.slane %v8631_v7, 4  ;;  %v8481_v43 = vld [vmem:[#allocation2 + $0x7c] sm:$0xf]  ;;  %v8702_v35 = vrot.slane %v8700_v28, 5  ;;  %v8713_v7 = vor.u32 %v8712_v56, %v15351_v15 }
 0x39a   :  { %12666 = vmatprep.mubr.bf16.mxu1 %v13521_v49  ;;  %v8477_v49 = vld [vmem:[#allocation2 + $0x6c] sm:$0xf]  ;;  %v8688_v26 = vrot.slane %v8686_v8, 4  ;;  %v15356_v33 = vcombine.low %v8613_v36, %v8623_v34  ;;  %v8758_v3 = vshrl.u32 %v8481_v43, 16  ;;  %v8694_v8 = vrot.slane %v8692_v23, 5 }
 0x39b   :  { %v8721_v46 = vshrl.u32 %v8477_v49, 16  ;;  %v8637_v1 = vsel %vm14063_vm9, %v8632_v4, %v15326_v51  ;;  %v8730_v51 = vshll.u32 %v8478_v0, 16  ;;  %v8716_v61 = vshll.u32 %v8476_v47, 16  ;;  %v8484_v4 = vld [vmem:[#allocation2 + $0x88] sm:$0xf] }
 0x39c   :  { %v8689_v27 = vor.u32 %v8688_v26, %v15349_v29  ;;  %v15366_v58 = vcombine.low %v8637_v1, %v8647_v14  ;;  %v8714_v19 = vrot.slane %v8713_v7, 4  ;;  %v8760_v30 = vrot.slane %v8758_v3, 4  ;;  %v8486_v0 = vld [vmem:[#allocation2 + $0x90] sm:$0xf]  ;;  %v8487_v14 = vld [vmem:[#allocation2 + $0x94] sm:$0xf] }
 0x39d   :  { %v8723_v38 = vrot.slane %v8721_v46, 4  ;;  %v15373_v34 = vrot.slane %v8730_v51, 5  ;;  %v8782_v28 = vshrl.u32 %v8484_v4, 16  ;;  %v8685_v56 = vsel %vm14063_vm9, %v8680_v42, %v15349_v29  ;;  %v13725_v46 = vld [vmem:[#allocation3 + $0x118] sm:$0xff]  }
 0x39e   :  { %v8690_v50 = vrot.slane %v8689_v27, 4  ;;  %v8747_v29 = vrot.slane %v8745_v18, 4  ;;  %v13543_v27 = vld [vmem:[#allocation3 + $0x210] sm:$0xff]   ;;  %v13537_v7 = vld [vmem:[#allocation2 + $0x48] sm:$0xff]   ;;  %v8802_v63 = vshll.u32 %v8487_v14, 16  ;;  %v13727_v18 = vld [vmem:[#allocation3 + $0x128] sm:$0xff]  }
 0x39f   :  { %12351 = vmatmul.mubr.bf16.gmra.mrb[124].mxu0 %v11271_v13  ;;  %v8724_v13 = vshll.u32 %v8477_v49, 16  ;;  %v8748_v49 = vshll.u32 %v8480_v39, 16  ;;  %v8737_v1 = vor.u32 %v8736_v20, %v15373_v34 }
 0x3a0   :  { %12370 = vmatprep.mubr.bf16.mxu0 %v13529_v12  ;;  %v8699_v12 = vrot.slane %v8697_v10, 4  ;;  %v8778_v10 = vshll.u32 %v8484_v4, 16  ;;  %v15408_v16 = vrot.slane %v8802_v63, 5 }
 0x3a1   :  { %12667 = vmatmul.mubr.bf16.gmra.mrb[52].mxu1 %v13525_v6  ;;  %v8726_v6 = vrot.slane %v8724_v13, 5  ;;  %v8750_v32 = vrot.slane %v8748_v49, 5  ;;  %v8738_v39 = vrot.slane %v8737_v1, 4 }
 0x3a2   :  { %12670 = vmatprep.mubr.bf16.mxu1 %v13526_v5  ;;  %v8754_v5 = vshll.u32 %v8481_v43, 16  ;;  %v8703_v59 = vor.u32 %v8702_v35, %v8699_v12  ;;  %v15393_v47 = vrot.slane %v8778_v10, 5  ;;  %v8793_v12 = vshrl.u32 %v8486_v0, 16 }
 0x3a3   :  { %v8727_v2 = vor.u32 %v8726_v6, %v8723_v38  ;;  %v8796_v35 = vshll.u32 %v8486_v0, 16  ;;  %v8806_v38 = vshrl.u32 %v8487_v14, 16  ;;  %v13726_v6 = vld [vmem:[#allocation3 + $0x120] sm:$0xff]   ;;  %v13540_v0 = vld [vmem:[#allocation2 + $0x60] sm:$0xff]  }
 0x3a4   :  { %v15375_v55 = vrot.slane %v8754_v5, 5  ;;  %v8704_v36 = vrot.slane %v8703_v59, 4  ;;  %v8742_v5 = vrot.slane %v8740_v24, 5  ;;  %v13728_v14 = vld [vmem:[#allocation3 + $0x130] sm:$0xff]  }
 0x3a5   :  { %v8798_v4 = vrot.slane %v8796_v35, 5  ;;  %v13558_v35 = vld [vmem:[#allocation3 + $0x228] sm:$0xff]  }
 0x3a6   :  { %v8761_v31 = vor.u32 %v8760_v30, %v15375_v55  ;;  %v8743_v49 = vsel %vm14063_vm9, %v8738_v39, %v8742_v5 }
 0x3a7   :  { %12371 = vmatmul.mubr.bf16.vlgmr.msra.gmra.mrb[64].mxu0 %v13532_v11  ;;  %v8718_v11 = vrot.slane %v8716_v61, 5 }
 0x3a8   :  { %12374 = vmatprep.mubr.bf16.mxu0 %v13534_v22  ;;  %12435 = vmatpush3.bf16.msra.mxu0 %v15206_v25  ;;  %v8661_v25 = vsel %vm14063_vm9, %v8656_v41, %v15340_v40  ;;  %v13536_v40 = vld [vmem:[#allocation2 + $0x3c] sm:$0xff]   ;;  %v8695_v22 = vsel %vm14063_vm9, %v8690_v50, %v8694_v8  ;;  %v8751_v8 = vor.u32 %v8750_v32, %v8747_v29  ;;  %v8762_v50 = vrot.slane %v8761_v31, 4 }
 0x3a9   :  { %12671 = vmatmul.mubr.bf16.gmra.mrb[56].mxu1 %v13530_v62  ;;  %12436 = vmatprep.subr.bf16.mxu0 %v13723_v52  ;;  %v15377_v62 = vcombine.low %v8661_v25, %v8671_v54  ;;  %v8719_v13 = vsel %vm14063_vm9, %v8714_v19, %v8718_v11  ;;  %v8482_v41 = vld [vmem:[#allocation2 + $0x80] sm:$0x1]  ;;  %v15395_v51 = vcombine.low %v8685_v56, %v8695_v22  ;;  %v8489_v54 = vld [vmem:[#allocation2 + $0x9c] sm:$0xf]  ;;  %v8795_v19 = vrot.slane %v8793_v12, 4  ;;  %v13553_v56 = vld [vmem:[#allocation3 + $0x220] sm:$0xff]  }
 0x3aa   :  { %12690 = vmatprep.mubr.bf16.mxu1 %v11472_v44  ;;  %v8483_v44 = vld [vmem:[#allocation2 + $0x84] sm:$0xf]  ;;  %v8764_v3 = vshll.u32 %v8482_v41, 16  ;;  %v8820_v20 = vshll.u32 %v8489_v54, 16  ;;  %v8752_v11 = vrot.slane %v8751_v8, 4 }
 0x3ab   :  { %v8769_v37 = vshrl.u32 %v8483_v44, 16  ;;  %v8772_v26 = vshll.u32 %v8483_v44, 16  ;;  %v8490_v44 = vld [vmem:[#allocation2 + $0xa0] sm:$0xf]  ;;  %v8491_v41 = vld [vmem:[#allocation2 + $0xa4] sm:$0x1] }
 0x3ac   :  { %12437 = vmatpush3.bf16.msra.mxu0 %v13723_v52  ;;  %v8709_v52 = vsel %vm14063_vm9, %v8704_v36, %v15351_v15  ;;  %v8826_v30 = vshll.u32 %v8490_v44, 16  ;;  %v8822_v29 = vrot.slane %v8820_v20, 5  ;;  %v8836_v5 = vshll.u32 %v8491_v41, 16 }
 0x3ad   :  { %12438 = vmatprep.subr.bf16.mxu0 %v13724_v17  ;;  %v8771_v23 = vrot.slane %v8769_v37, 4  ;;  %v8774_v43 = vrot.slane %v8772_v26, 5  ;;  %v15400_v25 = vcombine.low %v8709_v52, %v8719_v13  ;;  %v8830_v37 = vshrl.u32 %v8490_v44, 16  ;;  %v8493_v26 = vld [vmem:[#allocation2 + $0xac] sm:$0xf] }
 0x3ae   :  { %v8799_v13 = vor.u32 %v8798_v4, %v8795_v19  ;;  %v15416_v32 = vrot.slane %v8826_v30, 5  ;;  %v13563_v19 = vld [vmem:[#allocation3 + $0x230] sm:$0xff]   ;;  %v8494_v4 = vld [vmem:[#allocation2 + $0xb0] sm:$0x1] }
 0x3af   :  { %12375 = vmatmul.mubr.bf16.gmra.mrb[68].mxu0 %v13535_v53  ;;  %v8775_v15 = vor.u32 %v8774_v43, %v8771_v23  ;;  %v13548_v53 = vld [vmem:[#allocation3 + $0x218] sm:$0xff]   ;;  %v8832_v31 = vrot.slane %v8830_v37, 4  ;;  %v8854_v23 = vshrl.u32 %v8493_v26, 16 }
 0x3b0   :  { %12378 = vmatprep.mubr.bf16.mxu0 %v13536_v40  ;;  %12439 = vmatpush3.bf16.msra.mxu0 %v13724_v17  ;;  %v8492_v17 = vld [vmem:[#allocation2 + $0xa8] sm:$0xf]  ;;  %v8488_v40 = vld [vmem:[#allocation2 + $0x98] sm:$0x1] }
 0x3b1   :  { %12691 = vmatmul.mubr.bf16.vlgmr.msra.gmra.mrb[60].mxu1 %v15342_v60  ;;  %12440 = vmatprep.subr.bf16.mxu0 %v13725_v46  ;;  %v15389_v60 = vrot.slane %v8727_v2, 4  ;;  %v8817_v2 = vshrl.u32 %v8489_v54, 16  ;;  %v8841_v10 = vshrl.u32 %v8492_v17, 16  ;;  %v13729_v54 = vld [vmem:[#allocation3 + $0x138] sm:$0xff]  }
 0x3b2   :  { %12755 = vmatpush3.bf16.msra.mxu1 %v15215_v45  ;;  %12694 = vmatprep.mubr.bf16.mxu1 %v15356_v33  ;;  %v8485_v45 = vld [vmem:[#allocation2 + $0x8c] sm:$0x1]  ;;  %v8784_v33 = vrot.slane %v8782_v28, 4  ;;  %v8844_v28 = vshll.u32 %v8492_v17, 16 }
 0x3b3   :  { %12756 = vmatprep.subr.bf16.mxu1 %v13538_v9  ;;  %v8733_v42 = vsel %vm14063_vm9, %v15389_v60, %v15373_v34  ;;  %v8788_v61 = vshll.u32 %v8485_v45, 16  ;;  %v8808_v34 = vrot.slane %v8806_v38, 4  ;;  %v8819_v1 = vrot.slane %v8817_v2, 4  ;;  %v8495_v38 = vld [vmem:[#allocation2 + $0xb4] sm:$0xf]  ;;  %v13544_v2 = vld [vmem:[#allocation2 + $0x84] sm:$0xff]  }
 0x3b4   :  { %12441 = vmatpush3.bf16.msra.mxu0 %v13725_v46  ;;  %v8785_v59 = vor.u32 %v8784_v33, %v15393_v47  ;;  %v13541_v46 = vld [vmem:[#allocation2 + $0x6c] sm:$0xff]   ;;  %v15418_v43 = vcombine.low %v8733_v42, %v8743_v49  ;;  %v8757_v45 = vsel %vm14063_vm9, %v8752_v11, %v15375_v55  ;;  %v8843_v33 = vrot.slane %v8841_v10, 4  ;;  %v8497_v49 = vld [vmem:[#allocation2 + $0xbc] sm:$0x1] }
 0x3b5   :  { %12442 = vmatprep.subr.bf16.mxu0 %v13726_v6  ;;  %v8790_v24 = vrot.slane %v8788_v61, 5  ;;  %v8809_v60 = vor.u32 %v8808_v34, %v15408_v16  ;;  %v8846_v12 = vrot.slane %v8844_v28, 5  ;;  %v15431_v55 = vrot.slane %v8799_v13, 4  ;;  %v8499_v61 = vld [vmem:[#allocation2 + $0xc4] sm:$0xf] }
 0x3b6   :  { %12757 = vmatpush3.bf16.msra.mxu1 %v13538_v9  ;;  %v8766_v9 = vrot.slane %v8764_v3, 5  ;;  %v8786_v36 = vrot.slane %v8785_v59, 4  ;;  %v8496_v3 = vld [vmem:[#allocation2 + $0xb8] sm:$0xf]  ;;  %v8833_v42 = vor.u32 %v8832_v31, %v15416_v32  ;;  %v8868_v59 = vshll.u32 %v8495_v38, 16 }
 0x3b7   :  { %12379 = vmatmul.mubr.bf16.gmra.mrb[72].mxu0 %v13537_v7  ;;  %12758 = vmatprep.subr.bf16.mxu1 %v13543_v27  ;;  %v8874_v17 = vshll.u32 %v8496_v3, 16  ;;  %v8805_v20 = vsel %vm14063_vm9, %v15431_v55, %v15408_v16  ;;  %v8902_v30 = vshrl.u32 %v8499_v61, 16  ;;  %v8504_v10 = vld [vmem:[#allocation2 + $0xf0] sm:$0xf]  ;;  %v8505_v28 = vld [vmem:[#allocation2 + $0xf4] sm:$0xf] }
 0x3b8   :  { %12382 = vmatprep.mubr.bf16.mxu0 %v13539_v57  ;;  %12443 = vmatpush3.bf16.msra.mxu0 %v13726_v6  ;;  %v8767_v22 = vsel %vm14063_vm9, %v8762_v50, %v8766_v9  ;;  %v8791_v63 = vsel %vm14063_vm9, %v8786_v36, %v8790_v24  ;;  %v8498_v6 = vld [vmem:[#allocation2 + $0xc0] sm:$0xf]  ;;  %v15433_v57 = vrot.slane %v8809_v60, 4  ;;  %v8865_v50 = vshrl.u32 %v8495_v38, 16  ;;  %v13568_v24 = vld [vmem:[#allocation3 + $0x238] sm:$0xff]  }
 0x3b9   :  { %12695 = vmatmul.mubr.bf16.gmra.mrb[0].mxu1 %v15366_v58  ;;  %12444 = vmatprep.subr.bf16.mxu0 %v13727_v18  ;;  %v8776_v58 = vrot.slane %v8775_v15, 4  ;;  %v15423_v7 = vcombine.low %v8757_v45, %v8767_v22  ;;  %v8856_v15 = vrot.slane %v8854_v23, 4  ;;  %v8892_v34 = vshll.u32 %v8498_v6, 16  ;;  %v8500_v60 = vld [vmem:[#allocation2 + $0xc8] sm:$0x1] }
 0x3ba   :  { %12698 = vmatprep.mubr.bf16.mxu1 %v15377_v62  ;;  %12759 = vmatpush3.bf16.msra.mxu1 %v13543_v27  ;;  %v8812_v62 = vshll.u32 %v8488_v40, 16  ;;  %v8850_v27 = vshll.u32 %v8493_v26, 16  ;;  %v8878_v40 = vshrl.u32 %v8496_v3, 16  ;;  %v8898_v9 = vshll.u32 %v8499_v61, 16  ;;  %v8508_v55 = vld [vmem:[#allocation2 + $0x100] sm:$0xf] }
 0x3bb   :  { %12760 = vmatprep.subr.bf16.mxu1 %v13548_v53  ;;  %v8781_v52 = vsel %vm14063_vm9, %v8776_v58, %v15393_v47  ;;  %v8823_v47 = vor.u32 %v8822_v29, %v8819_v1  ;;  %v15455_v11 = vrot.slane %v8833_v42, 4  ;;  %v8867_v22 = vrot.slane %v8865_v50, 4  ;;  %v8501_v61 = vld [vmem:[#allocation2 + $0xcc] sm:$0xf]  ;;  %v8502_v50 = vld [vmem:[#allocation2 + $0xd0] sm:$0xf] }
 0x3bc   :  { %12445 = vmatpush3.bf16.msra.mxu0 %v13727_v18  ;;  %v15435_v39 = vrot.slane %v8812_v62, 5  ;;  %v15439_v8 = vrot.slane %v8850_v27, 5  ;;  %v15441_v44 = vcombine.low %v8781_v52, %v8791_v63  ;;  %v15447_v18 = vrot.slane %v8836_v5, 5  ;;  %v8506_v5 = vld [vmem:[#allocation2 + $0xf8] sm:$0x1] }
 0x3bd   :  { %12446 = vmatprep.subr.bf16.mxu0 %v13728_v14  ;;  %v15453_v26 = vrot.slane %v8823_v47, 4  ;;  %v8870_v36 = vrot.slane %v8868_v59, 5  ;;  %v15460_v62 = vrot.slane %v8874_v17, 5  ;;  %v8894_v13 = vrot.slane %v8892_v34, 5  ;;  %v13546_v47 = vld [vmem:[#allocation2 + $0x9c] sm:$0xff]  }
 0x3be   :  { %12761 = vmatpush3.bf16.msra.mxu1 %v13548_v53  ;;  %v8847_v53 = vor.u32 %v8846_v12, %v8843_v33  ;;  %v8815_v37 = vsel %vm14063_vm9, %v15433_v57, %v15435_v39  ;;  %v8857_v58 = vor.u32 %v8856_v15, %v15439_v8  ;;  %v15463_v1 = vrot.slane %v8898_v9, 5  ;;  %v13545_v57 = vld [vmem:[#allocation2 + $0x90] sm:$0xff]  }
 0x3bf   :  { %12383 = vmatmul.mubr.bf16.gmra.mrb[76].mxu0 %v13540_v0  ;;  %12762 = vmatprep.subr.bf16.mxu1 %v13553_v56  ;;  %v8880_v0 = vrot.slane %v8878_v40, 4  ;;  %v8904_v29 = vrot.slane %v8902_v30, 4  ;;  %v8950_v41 = vshrl.u32 %v8505_v28, 16  ;;  %v8884_v27 = vshll.u32 %v8497_v49, 16 }
 0x3c0   :  { %12386 = vmatprep.mubr.bf16.mxu0 %v13541_v46  ;;  %12447 = vmatpush3.bf16.msra.mxu0 %v13728_v14  ;;  %v15458_v16 = vrot.slane %v8847_v53, 4  ;;  %v8946_v14 = vshll.u32 %v8505_v28, 16  ;;  %v8858_v31 = vrot.slane %v8857_v58, 4  ;;  %v8937_v23 = vshrl.u32 %v8504_v10, 16 }
 0x3c1   :  { %12699 = vmatmul.mubr.bf16.gmra.mrb[4].mxu1 %v15395_v51  ;;  %12448 = vmatprep.subr.bf16.mxu0 %v13729_v54  ;;  %v13542_v51 = vld [vmem:[#allocation2 + $0x78] sm:$0xff]   ;;  %v8940_v45 = vshll.u32 %v8504_v10, 16  ;;  %v11482_v33 = vcombine.low %v8805_v20, %v8815_v37  ;;  %v8829_v12 = vsel %vm14063_vm9, %v15453_v26, %v15416_v32  ;;  %v8871_v52 = vor.u32 %v8870_v36, %v8867_v22  ;;  %v8509_v36 = vld [vmem:[#allocation2 + $0x104] sm:$0x1] }
 0x3c2   :  { %12702 = vmatprep.mubr.bf16.mxu1 %v15400_v25  ;;  %12763 = vmatpush3.bf16.msra.mxu1 %v13553_v56  ;;  %v8889_v25 = vshrl.u32 %v8498_v6, 16  ;;  %v8860_v56 = vshll.u32 %v8494_v4, 16  ;;  %v8908_v38 = vshll.u32 %v8500_v60, 16  ;;  %v8507_v6 = vld [vmem:[#allocation2 + $0xfc] sm:$0xf]  ;;  %v8853_v32 = vsel %vm14063_vm9, %v15458_v16, %v15439_v8 }
 0x3c3   :  { %12764 = vmatprep.subr.bf16.mxu1 %v13558_v35  ;;  %v8905_v39 = vor.u32 %v8904_v29, %v15463_v1  ;;  %v15480_v3 = vrot.slane %v8946_v14, 5  ;;  %v8886_v15 = vrot.slane %v8884_v27, 5  ;;  %v8942_v53 = vrot.slane %v8940_v45, 5  ;;  %v8510_v29 = vld [vmem:[#allocation2 + $0x108] sm:$0xf]  ;;  %v13549_v14 = vld [vmem:[#allocation2 + $0xb4] sm:$0xff]  }
 0x3c4   :  { %12449 = vmatpush3.bf16.msra.mxu0 %v13729_v54  ;;  %v8891_v46 = vrot.slane %v8889_v25, 4  ;;  %v8952_v54 = vrot.slane %v8950_v41, 4  ;;  %v8961_v59 = vshrl.u32 %v8507_v6, 16  ;;  %v8970_v8 = vshll.u32 %v8508_v55, 16  ;;  %v8503_v45 = vld [vmem:[#allocation2 + $0xd4] sm:$0x1] }
 0x3c5   :  { %v8974_v4 = vshrl.u32 %v8508_v55, 16  ;;  %v8872_v17 = vrot.slane %v8871_v52, 4  ;;  %v8910_v34 = vrot.slane %v8908_v38, 5  ;;  %v8913_v20 = vshrl.u32 %v8501_v61, 16  ;;  %v8514_v52 = vld [vmem:[#allocation2 + $0x118] sm:$0xf] }
 0x3c6   :  { %12765 = vmatpush3.bf16.msra.mxu1 %v13558_v35  ;;  %v8862_v35 = vrot.slane %v8860_v56, 5  ;;  %v8895_v63 = vor.u32 %v8894_v13, %v8891_v46  ;;  %v8953_v49 = vor.u32 %v8952_v54, %v15480_v3  ;;  %v8922_v9 = vshll.u32 %v8502_v50, 16 }
 0x3c7   :  { %12387 = vmatmul.mubr.bf16.gmra.mrb[80].mxu0 %v13542_v51  ;;  %12766 = vmatprep.subr.bf16.mxu1 %v13563_v19  ;;  %v8939_v51 = vrot.slane %v8937_v23, 4  ;;  %v8926_v30 = vshrl.u32 %v8502_v50, 16  ;;  %v8956_v26 = vshll.u32 %v8506_v5, 16  ;;  %v15486_v10 = vrot.slane %v8970_v8, 5  ;;  %v8511_v23 = vld [vmem:[#allocation2 + $0x10c] sm:$0xf] }
 0x3c8   :  { %12390 = vmatprep.mubr.bf16.mxu0 %v13544_v2  ;;  %v8863_v42 = vsel %vm14063_vm9, %v8858_v31, %v8862_v35  ;;  %v8896_v25 = vrot.slane %v8895_v63, 4  ;;  %v8906_v2 = vrot.slane %v8905_v39, 4  ;;  %v8976_v28 = vrot.slane %v8974_v4, 4  ;;  %v8513_v39 = vld [vmem:[#allocation2 + $0x114] sm:$0xf] }
 0x3c9   :  { %12703 = vmatmul.mubr.bf16.gmra.mrb[8].mxu1 %v15418_v43  ;;  %v8839_v43 = vsel %vm14063_vm9, %v15455_v11, %v15447_v18  ;;  %v8916_v18 = vshll.u32 %v8501_v61, 16  ;;  %v8943_v37 = vor.u32 %v8942_v53, %v8939_v51  ;;  %v8963_v11 = vrot.slane %v8961_v59, 4  ;;  %v15513_v50 = vld [vmem:[#allocation2 + $0x110] sm:$0x1]  ;;  %v13550_v59 = vld [vmem:[#allocation2 + $0xc0] sm:$0xff]  }
 0x3ca   :  { %12706 = vmatprep.mubr.bf16.mxu1 %v15423_v7  ;;  %12767 = vmatpush3.bf16.msra.mxu1 %v13563_v19  ;;  %v8881_v7 = vor.u32 %v8880_v0, %v15460_v62  ;;  %v8964_v19 = vshll.u32 %v8507_v6, 16  ;;  %v11483_v16 = vcombine.low %v8829_v12, %v8839_v43  ;;  %v11484_v56 = vcombine.low %v8853_v32, %v8863_v42 }
 0x3cb   :  { %12768 = vmatprep.subr.bf16.mxu1 %v13568_v24  ;;  %v8911_v0 = vsel %vm14063_vm9, %v8906_v2, %v8910_v34  ;;  %v8915_v46 = vrot.slane %v8913_v20, 4  ;;  %v8918_v13 = vrot.slane %v8916_v18, 5  ;;  %v8954_v60 = vrot.slane %v8953_v49, 4  ;;  %v8520_v20 = vld [vmem:[#allocation2 + $0x130] sm:$0xf]  ;;  %v13551_v18 = vld [vmem:[#allocation2 + $0xe4] sm:$0xff]  }
 0x3cc   :  { %v8882_v40 = vrot.slane %v8881_v7, 4  ;;  %v8966_v58 = vrot.slane %v8964_v19, 5  ;;  %v8901_v41 = vsel %vm14063_vm9, %v8896_v25, %v15463_v1  ;;  %v15498_v31 = vrot.slane %v8922_v9, 5 }
 0x3cd   :  { %v8958_v27 = vrot.slane %v8956_v26, 5  ;;  %v8977_v43 = vor.u32 %v8976_v28, %v15486_v10  ;;  %v8980_v35 = vshll.u32 %v8509_v36, 16  ;;  %v11486_v63 = vcombine.low %v8901_v41, %v8911_v0 }
 0x3ce   :  { %12769 = vmatpush3.bf16.msra.mxu1 %v13568_v24  ;;  %v8887_v22 = vsel %vm14063_vm9, %v8882_v40, %v8886_v15  ;;  %v13547_v24 = vld [vmem:[#allocation2 + $0xa8] sm:$0xff]   ;;  %v8967_v12 = vor.u32 %v8966_v58, %v8963_v11  ;;  %v8985_v38 = vshrl.u32 %v8510_v29, 16  ;;  %v8988_v6 = vshll.u32 %v8510_v29, 16  ;;  %v8517_v40 = vld [vmem:[#allocation2 + $0x124] sm:$0xf] }
 0x3cf   :  { %12391 = vmatmul.mubr.bf16.gmra.mrb[84].mxu0 %v13545_v57  ;;  %v8919_v1 = vor.u32 %v8918_v13, %v8915_v46  ;;  %v8959_v55 = vsel %vm14063_vm9, %v8954_v60, %v8958_v27  ;;  %v8994_v57 = vshll.u32 %v8511_v23, 16  ;;  %v8998_v32 = vshrl.u32 %v8511_v23, 16  ;;  %v8516_v58 = vld [vmem:[#allocation2 + $0x120] sm:$0xf]  ;;  %v8522_v60 = vld [vmem:[#allocation2 + $0x138] sm:$0xf] }
 0x3d0   :  { %12394 = vmatprep.mubr.bf16.mxu0 %v13546_v47  ;;  %v8932_v54 = vshll.u32 %v8503_v45, 16  ;;  %v9018_v47 = vshll.u32 %v8514_v52, 16  ;;  %v9022_v42 = vshrl.u32 %v8514_v52, 16  ;;  %v15507_v61 = vrot.slane %v8967_v12, 4  ;;  %v8523_v23 = vld [vmem:[#allocation2 + $0x13c] sm:$0xf] }
 0x3d1   :  { %12707 = vmatmul.mubr.bf16.gmra.mrb[12].mxu1 %v15441_v44  ;;  %v8877_v44 = vsel %vm14063_vm9, %v8872_v17, %v15460_v62  ;;  %v8928_v62 = vrot.slane %v8926_v30, 4  ;;  %v15509_v51 = vrot.slane %v8977_v43, 4  ;;  %v15511_v53 = vrot.slane %v8980_v35, 5 }
 0x3d2   :  { %12710 = vmatprep.mubr.bf16.mxu1 %v11482_v33  ;;  %v8944_v33 = vrot.slane %v8943_v37, 4  ;;  %v11485_v7 = vcombine.low %v8877_v44, %v8887_v22  ;;  %v8987_v8 = vrot.slane %v8985_v38, 4  ;;  %v8990_v4 = vrot.slane %v8988_v6, 5  ;;  %v8519_v22 = vld [vmem:[#allocation2 + $0x12c] sm:$0xf]  ;;  %v13552_v38 = vld [vmem:[#allocation2 + $0xf0] sm:$0xff]  }
 0x3d3   :  { %v8929_v5 = vor.u32 %v8928_v62, %v15498_v31  ;;  %v9009_v17 = vshrl.u32 %v8513_v39, 16  ;;  %v8920_v25 = vrot.slane %v8919_v1, 4  ;;  %v15517_v34 = vrot.slane %v8994_v57, 5  ;;  %v13554_v57 = vld [vmem:[#allocation2 + $0xfc] sm:$0xff]  }
 0x3d4   :  { %v8949_v15 = vsel %vm14063_vm9, %v8944_v33, %v15480_v3  ;;  %v9000_v2 = vrot.slane %v8998_v32, 4  ;;  %v9012_v3 = vshll.u32 %v8513_v39, 16  ;;  %v8934_v9 = vrot.slane %v8932_v54, 5  ;;  %v15544_v54 = vld [vmem:[#allocation2 + $0x128] sm:$0x1] }
 0x3d5   :  { %v15515_v19 = vcombine.low %v8949_v15, %v8959_v55  ;;  %v8930_v49 = vrot.slane %v8929_v5, 4  ;;  %v15519_v30 = vrot.slane %v9018_v47, 5  ;;  %v9024_v37 = vrot.slane %v9022_v42, 4 }
 0x3d6   :  { %v8973_v26 = vsel %vm14063_vm9, %v15507_v61, %v15486_v10  ;;  %v8983_v11 = vsel %vm14063_vm9, %v15509_v51, %v15511_v53  ;;  %v9042_v28 = vshll.u32 %v8517_v40, 16  ;;  %v9004_v44 = vshll.u32 %v15513_v50, 16  ;;  %v15547_v51 = vld [vmem:[#allocation2 + $0x134] sm:$0x1] }
 0x3d7   :  { %12395 = vmatmul.mubr.bf16.gmra.mrb[88].mxu0 %v13547_v24  ;;  %v9066_v36 = vshll.u32 %v8520_v20, 16  ;;  %v9070_v24 = vshrl.u32 %v8520_v20, 16  ;;  %v8925_v10 = vsel %vm14063_vm9, %v8920_v25, %v15498_v31  ;;  %v9001_v0 = vor.u32 %v9000_v2, %v15517_v34 }
 0x3d8   :  { %12398 = vmatprep.mubr.bf16.mxu0 %v13549_v14  ;;  %v9011_v46 = vrot.slane %v9009_v17, 4  ;;  %v9014_v13 = vrot.slane %v9012_v3, 5  ;;  %v8935_v29 = vsel %vm14063_vm9, %v8930_v49, %v8934_v9  ;;  %v15536_v14 = vld [vmem:[#allocation2 + $0x11c] sm:$0x1]  ;;  %v9025_v41 = vor.u32 %v9024_v37, %v15519_v30  ;;  %v8525_v3 = vld [vmem:[#allocation2 + $0x144] sm:$0xf] }
 0x3d9   :  { %12711 = vmatmul.mubr.bf16.gmra.mrb[16].mxu1 %v11483_v16  ;;  %v9046_v16 = vshrl.u32 %v8517_v40, 16  ;;  %v9033_v62 = vshrl.u32 %v8516_v58, 16  ;;  %v9036_v27 = vshll.u32 %v8516_v58, 16  ;;  %v15539_v45 = vrot.slane %v9042_v28, 5  ;;  %v15555_v37 = vld [vmem:[#allocation2 + $0x148] sm:$0xf] }
 0x3da   :  { %12714 = vmatprep.mubr.bf16.mxu1 %v11484_v56  ;;  %v8991_v56 = vor.u32 %v8990_v4, %v8987_v8  ;;  %v9057_v31 = vshrl.u32 %v8519_v22, 16  ;;  %v9060_v12 = vshll.u32 %v8519_v22, 16  ;;  %v15541_v43 = vrot.slane %v9066_v36, 5  ;;  %v13555_v36 = vld [vmem:[#allocation2 + $0x108] sm:$0xff]  }
 0x3db   :  { %v9048_v33 = vrot.slane %v9046_v16, 4  ;;  %v9072_v35 = vrot.slane %v9070_v24, 4  ;;  %v9081_v52 = vshrl.u32 %v8522_v60, 16  ;;  %v9028_v6 = vshll.u32 %v15536_v14, 16 }
 0x3dc   :  { %v9090_v1 = vshll.u32 %v8523_v23, 16  ;;  %v9094_v55 = vshrl.u32 %v8523_v23, 16  ;;  %v8992_v32 = vrot.slane %v8991_v56, 4  ;;  %v9002_v39 = vrot.slane %v9001_v0, 4 }
 0x3dd   :  { %v9015_v5 = vor.u32 %v9014_v13, %v9011_v46  ;;  %v9035_v47 = vrot.slane %v9033_v62, 4  ;;  %v9026_v42 = vrot.slane %v9025_v41, 4  ;;  %v9038_v15 = vrot.slane %v9036_v27, 5  ;;  %v13556_v46 = vld [vmem:[#allocation2 + $0x114] sm:$0xff]  }
 0x3de   :  { %v9049_v61 = vor.u32 %v9048_v33, %v15539_v45  ;;  %v9059_v53 = vrot.slane %v9057_v31, 4  ;;  %v9062_v50 = vrot.slane %v9060_v12, 5  ;;  %v9083_v8 = vrot.slane %v9081_v52, 4  ;;  %v15573_v31 = vld [vmem:[#allocation2 + $0x14c] sm:$0x1] }
 0x3df   :  { %12399 = vmatmul.mubr.bf16.gmra.mrb[92].mxu0 %v13550_v59  ;;  %v9073_v59 = vor.u32 %v9072_v35, %v15541_v43  ;;  %v9006_v17 = vrot.slane %v9004_v44, 5  ;;  %v9030_v40 = vrot.slane %v9028_v6, 5  ;;  %v15550_v25 = vrot.slane %v9090_v1, 5  ;;  %v15564_v44 = vld [vmem:[#allocation2 + $0x140] sm:$0x1] }
 0x3e0   :  { %12402 = vmatprep.mubr.bf16.mxu0 %v13551_v18  ;;  %v9096_v2 = vrot.slane %v9094_v55, 4  ;;  %v11489_v20 = vcombine.low %v8973_v26, %v8983_v11  ;;  %v9016_v18 = vrot.slane %v9015_v5, 4  ;;  %v9052_v49 = vshll.u32 %v15544_v54, 16  ;;  %v8528_v12 = vld [vmem:[#allocation2 + $0x150] sm:$0xf] }
 0x3e1   :  { %12715 = vmatmul.mubr.bf16.gmra.mrb[20].mxu1 %v11485_v7  ;;  %v9084_v7 = vshll.u32 %v8522_v60, 16  ;;  %v9076_v9 = vshll.u32 %v15547_v51, 16  ;;  %v8997_v58 = vsel %vm14063_vm9, %v8992_v32, %v15517_v34  ;;  %v9007_v28 = vsel %vm14063_vm9, %v9002_v39, %v9006_v17 }
 0x3e2   :  { %12718 = vmatprep.mubr.bf16.mxu1 %v11486_v63  ;;  %v11487_v63 = vcombine.low %v8925_v10, %v8935_v29  ;;  %v9031_v16 = vsel %vm14063_vm9, %v9026_v42, %v9030_v40  ;;  %v9039_v56 = vor.u32 %v9038_v15, %v9035_v47  ;;  %v9063_v26 = vor.u32 %v9062_v50, %v9059_v53  ;;  %v13557_v40 = vld [vmem:[#allocation2 + $0x120] sm:$0xff]  }
 0x3e3   :  { %v9086_v4 = vrot.slane %v9084_v7, 5  ;;  %v9074_v11 = vrot.slane %v9073_v59, 4  ;;  %v9097_v24 = vor.u32 %v9096_v2, %v15550_v25  ;;  %v9105_v10 = vshrl.u32 %v8525_v3, 16 }
 0x3e4   :  { %v9108_v0 = vshll.u32 %v8525_v3, 16  ;;  %v9114_v34 = vshll.u32 %v15555_v37, 16  ;;  %v9021_v13 = vsel %vm14063_vm9, %v9016_v18, %v15519_v30  ;;  %v9054_v60 = vrot.slane %v9052_v49, 5  ;;  %v8534_v18 = vld [vmem:[#allocation2 + $0x168] sm:$0xf] }
 0x3e5   :  { %v9087_v22 = vor.u32 %v9086_v4, %v9083_v8  ;;  %v9078_v29 = vrot.slane %v9076_v9, 5  ;;  %v9118_v41 = vshrl.u32 %v15555_v37, 16  ;;  %v11490_v62 = vcombine.low %v8997_v58, %v9007_v28  ;;  %v8531_v8 = vld [vmem:[#allocation2 + $0x15c] sm:$0xf]  ;;  %v15603_v49 = vld [vmem:[#allocation2 + $0x16c] sm:$0xf] }
 0x3e6   :  { %v11491_v27 = vcombine.low %v9021_v13, %v9031_v16  ;;  %v9040_v23 = vrot.slane %v9039_v56, 4  ;;  %v9100_v33 = vshll.u32 %v15564_v44, 16  ;;  %v9064_v52 = vrot.slane %v9063_v26, 4  ;;  %v15608_v56 = vld [vmem:[#allocation2 + $0x178] sm:$0xf] }
 0x3e7   :  { %12403 = vmatmul.mubr.bf16.gmra.mrb[96].mxu0 %v13552_v38  ;;  %v9079_v30 = vsel %vm14063_vm9, %v9074_v11, %v9078_v29  ;;  %v9088_v7 = vrot.slane %v9087_v22, 4  ;;  %v9098_v38 = vrot.slane %v9097_v24, 4  ;;  %v9107_v6 = vrot.slane %v9105_v10, 4 }
 0x3e8   :  { %12406 = vmatprep.mubr.bf16.mxu0 %v13554_v57  ;;  %v9110_v1 = vrot.slane %v9108_v0, 5  ;;  %v15581_v55 = vrot.slane %v9114_v34, 5  ;;  %v15583_v57 = vld [vmem:[#allocation2 + $0x160] sm:$0xf]  ;;  %v9120_v32 = vrot.slane %v9118_v41, 4  ;;  %v9124_v39 = vshll.u32 %v15573_v31, 16 }
 0x3e9   :  { %12719 = vmatmul.mubr.bf16.gmra.mrb[24].mxu1 %v11487_v63  ;;  %v15579_v63 = vld [vmem:[#allocation2 + $0x154] sm:$0xf]  ;;  %v9129_v5 = vshrl.u32 %v8528_v12, 16  ;;  %v9132_v47 = vshll.u32 %v8528_v12, 16  ;;  %v9045_v42 = vsel %vm14063_vm9, %v9040_v23, %v15539_v45  ;;  %v9102_v15 = vrot.slane %v9100_v33, 5 }
 0x3ea   :  { %12722 = vmatprep.mubr.bf16.mxu1 %v15515_v19  ;;  %v9050_v19 = vrot.slane %v9049_v61, 4  ;;  %v9138_v61 = vshll.u32 %v15579_v63, 16  ;;  %v9142_v53 = vshrl.u32 %v15579_v63, 16  ;;  %v9069_v59 = vsel %vm14063_vm9, %v9064_v52, %v15541_v43  ;;  %v13559_v43 = vld [vmem:[#allocation2 + $0x12c] sm:$0xff]   ;;  %v8537_v0 = vld [vmem:[#allocation2 + $0x174] sm:$0xf] }
 0x3eb   :  { %v9162_v4 = vshll.u32 %v15583_v57, 16  ;;  %v9166_v17 = vshrl.u32 %v15583_v57, 16  ;;  %v15596_v2 = vcombine.low %v9069_v59, %v9079_v30  ;;  %v9093_v45 = vsel %vm14063_vm9, %v9088_v7, %v15550_v25  ;;  %v15618_v23 = vld [vmem:[#allocation2 + $0x158] sm:$0x1]  ;;  %v8540_v7 = vld [vmem:[#allocation2 + $0x180] sm:$0xf] }
 0x3ec   :  { %v9055_v35 = vsel %vm14063_vm9, %v9050_v19, %v9054_v60  ;;  %v9103_v3 = vsel %vm14063_vm9, %v9098_v38, %v9102_v15  ;;  %v9121_v9 = vor.u32 %v9120_v32, %v15581_v55  ;;  %v15606_v58 = vrot.slane %v9124_v39, 5  ;;  %v15621_v38 = vld [vmem:[#allocation2 + $0x164] sm:$0x1]  ;;  %v13560_v39 = vld [vmem:[#allocation2 + $0x138] sm:$0xff]   ;;  %v15632_v59 = vld [vmem:[#allocation2 + $0x170] sm:$0x1] }
 0x3ed   :  { %v11492_v50 = vcombine.low %v9045_v42, %v9055_v35  ;;  %v9131_v28 = vrot.slane %v9129_v5, 4  ;;  %v9134_v16 = vrot.slane %v9132_v47, 5  ;;  %v15610_v19 = vrot.slane %v9138_v61, 5  ;;  %v13561_v61 = vld [vmem:[#allocation2 + $0x144] sm:$0xff]  }
 0x3ee   :  { %v9144_v25 = vrot.slane %v9142_v53, 4  ;;  %v9153_v26 = vshrl.u32 %v8531_v8, 16  ;;  %v9156_v11 = vshll.u32 %v8531_v8, 16  ;;  %v15612_v22 = vrot.slane %v9162_v4, 5 }
 0x3ef   :  { %12407 = vmatmul.mubr.bf16.gmra.mrb[100].mxu0 %v13555_v36  ;;  %v9168_v36 = vrot.slane %v9166_v17, 4  ;;  %v9186_v24 = vshll.u32 %v15603_v49, 16  ;;  %v9190_v10 = vshrl.u32 %v15603_v49, 16  ;;  %v9177_v34 = vshrl.u32 %v8534_v18, 16 }
 0x3f0   :  { %12410 = vmatprep.mubr.bf16.mxu0 %v13556_v46  ;;  %v9180_v46 = vshll.u32 %v8534_v18, 16  ;;  %v9210_v13 = vshll.u32 %v15608_v56, 16  ;;  %v9214_v60 = vshrl.u32 %v15608_v56, 16  ;;  %v11494_v29 = vcombine.low %v9093_v45, %v9103_v3 }
 0x3f1   :  { %12723 = vmatmul.mubr.bf16.gmra.mrb[28].mxu1 %v11489_v20  ;;  %v9111_v20 = vor.u32 %v9110_v1, %v9107_v6  ;;  %v9135_v33 = vor.u32 %v9134_v16, %v9131_v28  ;;  %v9155_v12 = vrot.slane %v9153_v26, 4  ;;  %v9158_v35 = vrot.slane %v9156_v11, 5  ;;  %v15643_v26 = vld [vmem:[#allocation2 + $0x17c] sm:$0x1] }
 0x3f2   :  { %12726 = vmatprep.mubr.bf16.mxu1 %v11490_v62  ;;  %v9122_v62 = vrot.slane %v9121_v9, 4  ;;  %v9201_v52 = vshrl.u32 %v8537_v0, 16  ;;  %v9204_v30 = vshll.u32 %v8537_v0, 16  ;;  %v9169_v6 = vor.u32 %v9168_v36, %v15612_v22 }
 0x3f3   :  { %v9112_v41 = vrot.slane %v9111_v20, 4  ;;  %v15624_v1 = vrot.slane %v9186_v24, 5  ;;  %v9192_v32 = vrot.slane %v9190_v10, 4  ;;  %v9179_v5 = vrot.slane %v9177_v34, 4  ;;  %v15635_v20 = vld [vmem:[#allocation2 + $0x184] sm:$0xf] }
 0x3f4   :  { %v9182_v47 = vrot.slane %v9180_v46, 5  ;;  %v15626_v42 = vrot.slane %v9210_v13, 5  ;;  %v9216_v15 = vrot.slane %v9214_v60, 4  ;;  %v9225_v8 = vshrl.u32 %v8540_v7, 16 }
 0x3f5   :  { %v9117_v53 = vsel %vm14063_vm9, %v9112_v41, %v15581_v55  ;;  %v9228_v4 = vshll.u32 %v8540_v7, 16  ;;  %v9159_v17 = vor.u32 %v9158_v35, %v9155_v12  ;;  %v9203_v45 = vrot.slane %v9201_v52, 4  ;;  %v13562_v12 = vld [vmem:[#allocation2 + $0x150] sm:$0xff]   ;;  %v13564_v7 = vld [vmem:[#allocation2 + $0x15c] sm:$0xff]  }
 0x3f6   :  { %v9206_v3 = vrot.slane %v9204_v30, 5  ;;  %v9127_v18 = vsel %vm14063_vm9, %v9122_v62, %v15606_v58  ;;  %v9136_v55 = vrot.slane %v9135_v33, 4  ;;  %v9193_v9 = vor.u32 %v9192_v32, %v15624_v1  ;;  %v8543_v33 = vld [vmem:[#allocation2 + $0x18c] sm:$0xf] }
 0x3f7   :  { %12411 = vmatmul.mubr.bf16.gmra.mrb[104].mxu0 %v13557_v40  ;;  %v9172_v40 = vshll.u32 %v15621_v38, 16  ;;  %v9170_v28 = vrot.slane %v9169_v6, 4  ;;  %v9183_v16 = vor.u32 %v9182_v47, %v9179_v5  ;;  %v9217_v11 = vor.u32 %v9216_v15, %v15626_v42  ;;  %v15656_v6 = vld [vmem:[#allocation2 + $0x188] sm:$0x1]  ;;  %v15663_v15 = vld [vmem:[#allocation2 + $0x190] sm:$0xf] }
 0x3f8   :  { %12414 = vmatprep.mubr.bf16.mxu0 %v13559_v43  ;;  %v9227_v36 = vrot.slane %v9225_v8, 4  ;;  %v9230_v24 = vrot.slane %v9228_v4, 5  ;;  %v9234_v10 = vshll.u32 %v15635_v20, 16  ;;  %v9238_v58 = vshrl.u32 %v15635_v20, 16 }
 0x3f9   :  { %12727 = vmatmul.mubr.bf16.gmra.mrb[32].mxu1 %v11491_v27  ;;  %v9145_v27 = vor.u32 %v9144_v25, %v15610_v19  ;;  %v9196_v25 = vshll.u32 %v15632_v59, 16  ;;  %v9160_v34 = vrot.slane %v9159_v17, 4  ;;  %v9174_v46 = vrot.slane %v9172_v40, 5  ;;  %v5473_v40 = vld [vmem:[#allocation2 + $0xc] sm:$0xf] }
 0x3fa   :  { %12730 = vmatprep.mubr.bf16.mxu1 %v11492_v50  ;;  %v9148_v50 = vshll.u32 %v15618_v23, 16  ;;  %v9207_v13 = vor.u32 %v9206_v3, %v9203_v45  ;;  %v9141_v60 = vsel %vm14063_vm9, %v9136_v55, %v15610_v19  ;;  %v9194_v41 = vrot.slane %v9193_v9, 4  ;;  %v15671_v3 = vld [vmem:[#allocation2 + $0x19c] sm:$0xf] }
 0x3fb   :  { %v9146_v43 = vrot.slane %v9145_v27, 4  ;;  %v9220_v62 = vshll.u32 %v15643_v26, 16  ;;  %v9175_v35 = vsel %vm14063_vm9, %v9170_v28, %v9174_v46  ;;  %v9184_v52 = vrot.slane %v9183_v16, 4 }
 0x3fc   :  { %v9150_v0 = vrot.slane %v9148_v50, 5  ;;  %v9198_v30 = vrot.slane %v9196_v25, 5  ;;  %v9218_v27 = vrot.slane %v9217_v11, 4  ;;  %v9231_v32 = vor.u32 %v9230_v24, %v9227_v36 }
 0x3fd   :  { %v9240_v19 = vrot.slane %v9238_v58, 4  ;;  %v9165_v5 = vsel %vm14063_vm9, %v9160_v34, %v15612_v22  ;;  %v9208_v47 = vrot.slane %v9207_v13, 4  ;;  %v9222_v17 = vrot.slane %v9220_v62, 5  ;;  %v15686_v58 = vld [vmem:[#allocation2 + $0x194] sm:$0x1] }
 0x3fe   :  { %v11497_v8 = vcombine.low %v9165_v5, %v9175_v35  ;;  %v9199_v4 = vsel %vm14063_vm9, %v9194_v41, %v9198_v30  ;;  %v9189_v45 = vsel %vm14063_vm9, %v9184_v52, %v15624_v1  ;;  %v9244_v22 = vshll.u32 %v15656_v6, 16  ;;  %v8549_v30 = vld [vmem:[#allocation2 + $0x1a4] sm:$0xf]  ;;  %v15704_v5 = vld [vmem:[#allocation2 + $0x1a8] sm:$0xf] }
 0x3ff   :  { %12415 = vmatmul.mubr.bf16.gmra.mrb[108].mxu0 %v13560_v39  ;;  %v15658_v39 = vrot.slane %v9234_v10, 5  ;;  %v9223_v9 = vsel %vm14063_vm9, %v9218_v27, %v9222_v17  ;;  %v15675_v28 = vrot.slane %v9231_v32, 4  ;;  %v9258_v25 = vshll.u32 %v15663_v15, 16  ;;  %v8546_v10 = vld [vmem:[#allocation2 + $0x198] sm:$0xf] }
 0x400   :  { %12418 = vmatprep.mubr.bf16.mxu0 %v13561_v61  ;;  %v9249_v61 = vshrl.u32 %v8543_v33, 16  ;;  %v11498_v11 = vcombine.low %v9189_v45, %v9199_v4  ;;  %v9213_v1 = vsel %vm14063_vm9, %v9208_v47, %v15626_v42  ;;  %v9282_v34 = vshll.u32 %v15671_v3, 16  ;;  %v5476_v45 = vld [vmem:[#allocation2 + $0x18] sm:$0xf] }
 0x401   :  { %12731 = vmatmul.mubr.bf16.gmra.mrb[36].mxu1 %v15596_v2  ;;  %v11495_v2 = vcombine.low %v9117_v53, %v9127_v18  ;;  %v9252_v53 = vshll.u32 %v8543_v33, 16  ;;  %v13730_v18 = vld [vmem:[#allocation2 + $0x10] sm:$0xf]  ;;  %v9241_v16 = vor.u32 %v9240_v19, %v15658_v39  ;;  %v5570_v46 = vshrl.u32 %v5473_v40, 16  ;;  %v13566_v33 = vld [vmem:[#allocation2 + $0x174] sm:$0xff]  }
 0x402   :  { %12734 = vmatprep.mubr.bf16.mxu1 %v11494_v29  ;;  %v9151_v29 = vsel %vm14063_vm9, %v9146_v43, %v9150_v0  ;;  %v5579_v55 = vshll.u32 %v13730_v18, 16  ;;  %v5583_v43 = vshrl.u32 %v13730_v18, 16  ;;  %v15682_v36 = vrot.slane %v9249_v61, 4 }
 0x403   :  { %v11496_v50 = vcombine.low %v9141_v60, %v9151_v29  ;;  %v15684_v24 = vrot.slane %v9252_v53, 5  ;;  %v9262_v0 = vshrl.u32 %v15663_v15, 16  ;;  %v5573_v13 = vshll.u32 %v5473_v40, 16 }
 0x404   :  { %v15690_v60 = vcombine.low %v9213_v1, %v9223_v9  ;;  %v9286_v41 = vshrl.u32 %v15671_v3, 16  ;;  %v15693_v62 = vrot.slane %v5579_v55, 5  ;;  %v5585_v42 = vrot.slane %v5583_v43, 4  ;;  %v13731_v55 = vld [vmem:[#allocation2 + $0x1c] sm:$0xf] }
 0x405   :  { %v9237_v29 = vsel %vm14063_vm9, %v15675_v28, %v15658_v39  ;;  %v9246_v35 = vrot.slane %v9244_v22, 5  ;;  %v15699_v52 = vrot.slane %v9258_v25, 5  ;;  %v9268_v27 = vshll.u32 %v15686_v58, 16 }
 0x406   :  { %v9273_v32 = vshrl.u32 %v8546_v10, 16  ;;  %v9276_v19 = vshll.u32 %v8546_v10, 16  ;;  %v9264_v47 = vrot.slane %v9262_v0, 4  ;;  %v15706_v61 = vrot.slane %v9282_v34, 5  ;;  %v13567_v34 = vld [vmem:[#allocation2 + $0x180] sm:$0xff]  }
 0x407   :  { %12419 = vmatmul.mubr.bf16.gmra.mrb[112].mxu0 %v13562_v12  ;;  %v9242_v12 = vrot.slane %v9241_v16, 4  ;;  %v5572_v39 = vrot.slane %v5570_v46, 4  ;;  %v5575_v53 = vrot.slane %v5573_v13, 5  ;;  %v5586_v4 = vor.u32 %v5585_v42, %v15693_v62  ;;  %v13569_v42 = vld [vmem:[#allocation2 + $0x18c] sm:$0xff]  }
 0x408   :  { %12422 = vmatprep.mubr.bf16.mxu0 %v13564_v7  ;;  %v9255_v7 = vor.u32 %v15684_v24, %v15682_v36  ;;  %v9297_v17 = vshrl.u32 %v8549_v30, 16  ;;  %v9300_v40 = vshll.u32 %v8549_v30, 16  ;;  %v9306_v22 = vshll.u32 %v15704_v5, 16  ;;  %v15714_v24 = vld [vmem:[#allocation2 + $0x1a0] sm:$0x1] }
 0x409   :  { %12735 = vmatmul.mubr.bf16.gmra.mrb[40].mxu1 %v11495_v2  ;;  %v13565_v2 = vld [vmem:[#allocation2 + $0x168] sm:$0xff]   ;;  %v9310_v18 = vshrl.u32 %v15704_v5, 16  ;;  %v5603_v43 = vshll.u32 %v13731_v55, 16  ;;  %v5607_v9 = vshrl.u32 %v13731_v55, 16  ;;  %v9247_v28 = vsel %vm14063_vm9, %v9242_v12, %v9246_v35 }
 0x40a   :  { %12738 = vmatprep.mubr.bf16.mxu1 %v11496_v50  ;;  %v9288_v50 = vrot.slane %v9286_v41, 4  ;;  %v9275_v16 = vrot.slane %v9273_v32, 4  ;;  %v9278_v25 = vrot.slane %v9276_v19, 5  ;;  %v9265_v36 = vor.u32 %v9264_v47, %v15699_v52 }
 0x40b   :  { %v5576_v10 = vor.u32 %v5575_v53, %v5572_v39  ;;  %v5597_v0 = vshll.u32 %v5476_v45, 16  ;;  %v5587_v13 = vrot.slane %v5586_v4, 4  ;;  %v9302_v41 = vrot.slane %v9300_v40, 5  ;;  %v15722_v53 = vld [vmem:[#allocation2 + $0x1ac] sm:$0x1] }
 0x40c   :  { %v9289_v46 = vor.u32 %v9288_v50, %v15706_v61  ;;  %v9312_v12 = vrot.slane %v9310_v18, 4  ;;  %v15719_v35 = vrot.slane %v5603_v43, 5  ;;  %v5609_v30 = vrot.slane %v5607_v9, 4 }
 0x40d   :  { %v11500_v32 = vcombine.low %v9237_v29, %v9247_v28  ;;  %v9279_v19 = vor.u32 %v9278_v25, %v9275_v16  ;;  %v9292_v47 = vshll.u32 %v15714_v24, 16  ;;  %v9266_v50 = vrot.slane %v9265_v36, 4 }
 0x40e   :  { %v5577_v4 = vrot.slane %v5576_v10, 4  ;;  %v5599_v40 = vrot.slane %v5597_v0, 5  ;;  %v9290_v18 = vrot.slane %v9289_v46, 4  ;;  %v9316_v9 = vshll.u32 %v15722_v53, 16 }
 0x40f   :  { %12423 = vmatmul.mubr.bf16.gmra.mrb[116].mxu0 %v13565_v2  ;;  %v9299_v2 = vrot.slane %v9297_v17, 4  ;;  %v5610_v28 = vor.u32 %v5609_v30, %v15719_v35  ;;  %v9280_v16 = vrot.slane %v9279_v19, 4  ;;  %v9294_v25 = vrot.slane %v9292_v47, 5  ;;  %v9866_v19 = vld [vmem:[#allocation2 + $0x18] sm:$0xe] }
 0x410   :  { %12426 = vmatprep.mubr.bf16.mxu0 %v13566_v33  ;;  %v15717_v33 = vrot.slane %v9306_v22, 5  ;;  %v9270_v22 = vrot.slane %v9268_v27, 5  ;;  %v13733_v27 = vld [vmem:[#allocation2 + $0x20] sm:$0x1] }
 0x411   :  { %12739 = vmatmul.mubr.bf16.gmra.mrb[44].mxu1 %v11497_v8  ;;  %v13732_v8 = vld [vmem:[#allocation2 + $0x14] sm:$0x1]  ;;  %v9303_v55 = vor.u32 %v9302_v41, %v9299_v2  ;;  %v9295_v10 = vsel %vm14063_vm9, %v9290_v18, %v9294_v25  ;;  %v9318_v41 = vrot.slane %v9316_v9, 5 }
 0x412   :  { %12742 = vmatprep.mubr.bf16.mxu1 %v11498_v11  ;;  %v5589_v1 = vshll.u32 %v13732_v8, 16  ;;  %v5594_v11 = vshrl.u32 %v5476_v45, 16  ;;  %v9256_v45 = vrot.slane %v9255_v7, 4  ;;  %v9313_v43 = vor.u32 %v9312_v12, %v15717_v33 }
 0x413   :  { %v9271_v8 = vsel %vm14063_vm9, %v9266_v50, %v9270_v22  ;;  %v13736_v22 = vld [vmem:[#allocation2 + $0x28] sm:$0xf] }
 0x414   :  { %v5591_v39 = vrot.slane %v5589_v1, 5  ;;  %v5596_v17 = vrot.slane %v5594_v11, 4  ;;  %v5613_v1 = vshll.u32 %v13733_v27, 16  ;;  %v9261_v36 = vsel %vm14063_vm9, %v9256_v45, %v15699_v52  ;;  %v13570_v11 = vld [vmem:[#allocation2 + $0x198] sm:$0xff]  }
 0x415   :  { %v9314_v2 = vrot.slane %v9313_v43, 4  ;;  %v11501_v12 = vcombine.low %v9261_v36, %v9271_v8  ;;  %v10003_v18 = vrot.slane %v13736_v22, 5  ;;  %v13737_v43 = vld [vmem:[#allocation2 + $0x34] sm:$0xf]  ;;  %v9867_v8 = vld [vmem:[#allocation2 + $0x24] sm:$0xe] }
 0x416   :  { %v5592_v29 = vsel %vm14063_vm9, %v5587_v13, %v5591_v39  ;;  %v5600_v7 = vor.u32 %v5599_v40, %v5596_v17  ;;  %v9304_v13 = vrot.slane %v9303_v55, 4  ;;  %v11512_v40 = vrot.slane %v9866_v19, 9  ;;  %v13739_v27 = vld [vmem:[#allocation2 + $0x38] sm:$0x1]  ;;  %v13742_v19 = vld [vmem:[#allocation2 + $0x44] sm:$0x1] }
 0x417   :  { %12427 = vmatmul.mubr.bf16.gmra.mrb[120].mxu0 %v13567_v34  ;;  %v13734_v34 = vld [vmem:[#allocation2 + $0x1c] sm:$0xf]  ;;  %v9319_v50 = vsel %vm14063_vm9, %v9314_v2, %v9318_v41  ;;  %v10010_v9 = vrot.slane %v13737_v43, 5  ;;  %v10005_v25 = vrot.slane %v10003_v18, 4  ;;  %v11513_v36 = vrot.slane %v9867_v8, 9 }
 0x418   :  { %12430 = vmatprep.mubr.bf16.mxu0 %v13569_v42  ;;  %v9996_v46 = vrot.slane %v13734_v34, 5  ;;  %v5611_v42 = vrot.slane %v5610_v28, 4  ;;  %v5601_v52 = vrot.slane %v5600_v7, 4  ;;  %v9309_v39 = vsel %vm14063_vm9, %v9304_v13, %v15717_v33  ;;  %v9868_v7 = vld [vmem:[#allocation2 + $0x30] sm:$0xe] }
 0x419   :  { %12743 = vmatmul.mubr.bf16.gmra.mrb[48].mxu1 %v15690_v60  ;;  %v5582_v60 = vsel %vm14063_vm9, %v5577_v4, %v15693_v62  ;;  %v9285_v62 = vsel %vm14063_vm9, %v9280_v16, %v15706_v61  ;;  %v13735_v61 = vld [vmem:[#allocation2 + $0x20] sm:$0x1]  ;;  %v11514_v34 = vrot.slane %v9868_v7, 9  ;;  %v13741_v13 = vld [vmem:[#allocation2 + $0x4c] sm:$0xf]  ;;  %v10004_v41 = vsel %vm14900_vm0, %v11513_v36, %v10003_v18 }
 0x41a   :  { %12746 = vmatprep.mubr.bf16.mxu1 %v11500_v32  ;;  %v11320_v0 = vcombine.low %v5582_v60, %v5592_v29  ;;  %v11502_v30 = vcombine.low %v9285_v62, %v9295_v10  ;;  %v5615_v32 = vrot.slane %v5613_v1, 5  ;;  %v9998_v47 = vrot.slane %v9996_v46, 4  ;;  %v13747_v7 = vld [vmem:[#allocation2 + $0x68] sm:$0x1] }
 0x41b   :  { %v9999_v17 = vrot.slane %v13735_v61, 5  ;;  %v5606_v45 = vsel %vm14063_vm9, %v5601_v52, %v15719_v35  ;;  %v11503_v29 = vcombine.low %v9309_v39, %v9319_v50  ;;  %v9997_v28 = vsel %vm14900_vm0, %v11512_v40, %v9996_v46  ;;  %v9869_v52 = vld [vmem:[#allocation2 + $0x3c] sm:$0xe]  ;;  %v9870_v39 = vld [vmem:[#allocation2 + $0x48] sm:$0xe] }
 0x41c   :  { %v5616_v4 = vsel %vm14063_vm9, %v5611_v42, %v5615_v32  ;;  %v10012_v60 = vrot.slane %v10010_v9, 4  ;;  %v10006_v35 = vrot.slane %v13738_v48, 5  ;;  %v10013_v1 = vrot.slane %v13739_v27, 5  ;;  %v13743_v50 = vld [vmem:[#allocation2 + $0x50] sm:$0x1] }
 0x41d   :  { %v10000_v55 = vsel %vm14900_vm0, %v9998_v47, %v9999_v17  ;;  %v11321_v33 = vcombine.low %v5606_v45, %v5616_v4  ;;  %v10024_v2 = vrot.slane %v13741_v13, 5  ;;  %v10020_v47 = vrot.slane %v13742_v19, 5  ;;  %v13744_v40 = vld [vmem:[#allocation2 + $0x58] sm:$0xf] }
 0x41e   :  { %v11544_v16 = vcombine.low %v9997_v28, %v10000_v55  ;;  %v10007_v10 = vsel %vm14900_vm0, %v10005_v25, %v10006_v35  ;;  %v10014_v46 = vsel %vm14900_vm0, %v10012_v60, %v10013_v1  ;;  %v10027_v4 = vrot.slane %v13743_v50, 5  ;;  %v9871_v25 = vld [vmem:[#allocation2 + $0x54] sm:$0xe]  ;;  %v13746_v60 = vld [vmem:[#allocation2 + $0x5c] sm:$0x1] }
 0x41f   :  { %12431 = vmatmul.mubr.bf16.gmra.mrb[124].mxu0 %v13570_v11  ;;  %v13740_v11 = vld [vmem:[#allocation2 + $0x40] sm:$0xf]  ;;  %v11545_v42 = vcombine.low %v10004_v41, %v10007_v10  ;;  %v10026_v32 = vrot.slane %v10024_v2, 4  ;;  %v11515_v61 = vrot.slane %v9869_v52, 9  ;;  %v10031_v45 = vrot.slane %v13744_v40, 5 }
 0x420   :  { %12450 = vmatprep.mubr.bf16.mxu0 %v11320_v0  ;;  %v10017_v0 = vrot.slane %v13740_v11, 5  ;;  %v11516_v22 = vrot.slane %v9870_v39, 9  ;;  %v10034_v48 = vrot.slane %v13746_v60, 5  ;;  %v9872_v35 = vld [vmem:[#allocation2 + $0x60] sm:$0xe]  ;;  %v10041_v27 = vrot.slane %v13747_v7, 5 }
 0x421   :  { %12747 = vmatmul.mubr.bf16.gmra.mrb[52].mxu1 %v11501_v12  ;;  %v10011_v12 = vsel %vm14900_vm0, %v11514_v34, %v10010_v9  ;;  %v10028_v18 = vsel %vm14900_vm0, %v10026_v32, %v10027_v4  ;;  %v11517_v1 = vrot.slane %v9871_v25, 9  ;;  %v13748_v10 = vld [vmem:[#allocation2 + $0x70] sm:$0xf]  ;;  %v13750_v32 = vld [vmem:[#allocation2 + $0x74] sm:$0x1] }
 0x422   :  { %12750 = vmatprep.mubr.bf16.mxu1 %v11502_v30  ;;  %v11546_v62 = vcombine.low %v10011_v12, %v10014_v46  ;;  %v10019_v30 = vrot.slane %v10017_v0, 4  ;;  %v10025_v9 = vsel %vm14900_vm0, %v11516_v22, %v10024_v2  ;;  %v10045_v11 = vrot.slane %v13748_v10, 5  ;;  %v13749_v46 = vld [vmem:[#allocation2 + $0x7c] sm:$0xf]  ;;  %v13751_v39 = vld [vmem:[#allocation2 + $0x80] sm:$0x1] }
 0x423   :  { %v11548_v28 = vcombine.low %v10025_v9, %v10028_v18  ;;  %v10052_v13 = vrot.slane %v13749_v46, 5  ;;  %v10032_v2 = vsel %vm14900_vm0, %v11517_v1, %v10031_v45  ;;  %v10048_v19 = vrot.slane %v13750_v32, 5  ;;  %v13753_v18 = vld [vmem:[#allocation2 + $0x94] sm:$0xf] }
 0x424   :  { %v10021_v17 = vsel %vm14900_vm0, %v10019_v30, %v10020_v47  ;;  %v9873_v30 = vld [vmem:[#allocation2 + $0x6c] sm:$0xe]  ;;  %v9874_v47 = vld [vmem:[#allocation2 + $0x78] sm:$0xe]  ;;  %v10055_v50 = vrot.slane %v13751_v39, 5 }
 0x425   :  { %v10054_v52 = vrot.slane %v10052_v13, 4  ;;  %v11519_v4 = vrot.slane %v9873_v30, 9 }
 0x427   :  { %12451 = vmatmul.mubr.bf16.vlgmr.msra.gmra.mrb[64].mxu0 %v11321_v33  ;;  %v10018_v33 = vsel %vm14900_vm0, %v11515_v61, %v10017_v0  ;;  %v11518_v0 = vrot.slane %v9872_v35, 9  ;;  %v10056_v22 = vsel %vm14900_vm0, %v10054_v52, %v10055_v50  ;;  %v13755_v35 = vld [vmem:[#allocation2 + $0x98] sm:$0x1]  ;;  %v13758_v52 = vld [vmem:[#allocation2 + $0xa4] sm:$0x1] }
 0x428   :  { %v11547_v43 = vcombine.low %v10018_v33, %v10021_v17  ;;  %v13752_v17 = vld [vmem:[#allocation2 + $0x88] sm:$0xf]  ;;  %v10069_v7 = vrot.slane %v13755_v35, 5  ;;  %v10076_v32 = vrot.slane %v13758_v52, 5 }
 0x429   :  { %12751 = vmatmul.mubr.bf16.gmra.mrb[56].mxu1 %v11503_v29  ;;  %v13745_v29 = vld [vmem:[#allocation2 + $0x64] sm:$0xf]  ;;  %v10059_v40 = vrot.slane %v13752_v17, 5 }
 0x42a   :  { %12770 = vmatprep.mubr.bf16.mxu1 %v11544_v16  ;;  %v10038_v55 = vrot.slane %v13745_v29, 5  ;;  %v10033_v16 = vrot.slane %v10031_v45, 4  ;;  %v11520_v45 = vrot.slane %v9874_v47, 9  ;;  %v10066_v29 = vrot.slane %v13753_v18, 5  ;;  %v13759_v47 = vld [vmem:[#allocation2 + $0xb0] sm:$0x1] }
 0x42b   :  { %v10083_v39 = vrot.slane %v13759_v47, 5 }
 0x42c   :  { %v10040_v8 = vrot.slane %v10038_v55, 4  ;;  %v10035_v36 = vsel %vm14900_vm0, %v10033_v16, %v10034_v48  ;;  %v9875_v16 = vld [vmem:[#allocation2 + $0x84] sm:$0xe]  ;;  %v10068_v25 = vrot.slane %v10066_v29, 4  ;;  %v9876_v48 = vld [vmem:[#allocation2 + $0x90] sm:$0xe] }
 0x42d   :  { %v11549_v41 = vcombine.low %v10032_v2, %v10035_v36  ;;  %v13756_v36 = vld [vmem:[#allocation2 + $0xa0] sm:$0xf] }
 0x42e   :  { %v10042_v34 = vsel %vm14900_vm0, %v10040_v8, %v10041_v27  ;;  %v13754_v8 = vld [vmem:[#allocation2 + $0x8c] sm:$0x1]  ;;  %v11521_v27 = vrot.slane %v9875_v16, 9  ;;  %v10073_v10 = vrot.slane %v13756_v36, 5 }
 0x42f   :  { %v10062_v60 = vrot.slane %v13754_v8, 5 }
 0x431   :  { %12771 = vmatmul.mubr.bf16.vlgmr.msra.gmra.mrb[60].mxu1 %v11545_v42  ;;  %v10039_v42 = vsel %vm14900_vm0, %v11518_v0, %v10038_v55  ;;  %v10046_v55 = vsel %vm14900_vm0, %v11519_v4, %v10045_v11  ;;  %v10070_v0 = vsel %vm14900_vm0, %v10068_v25, %v10069_v7  ;;  %v13762_v25 = vld [vmem:[#allocation2 + $0xbc] sm:$0x1]  ;;  %v13764_v7 = vld [vmem:[#allocation2 + $0xc8] sm:$0x1] }
 0x432   :  { %12774 = vmatprep.mubr.bf16.mxu1 %v11546_v62  ;;  %v11550_v12 = vcombine.low %v10039_v42, %v10042_v34  ;;  %v10047_v62 = vrot.slane %v10045_v11, 4  ;;  %v11522_v11 = vrot.slane %v9876_v48, 9  ;;  %v13757_v34 = vld [vmem:[#allocation2 + $0xac] sm:$0xf]  ;;  %v10090_v8 = vrot.slane %v13762_v25, 5 }
 0x433   :  { %v10080_v46 = vrot.slane %v13757_v34, 5  ;;  %v13763_v48 = vld [vmem:[#allocation2 + $0xd0] sm:$0xf]  ;;  %v13765_v34 = vld [vmem:[#allocation2 + $0xf4] sm:$0xf] }
 0x434   :  { %v10049_v61 = vsel %vm14900_vm0, %v10047_v62, %v10048_v19  ;;  %v9877_v62 = vld [vmem:[#allocation2 + $0x9c] sm:$0xe]  ;;  %v9878_v19 = vld [vmem:[#allocation2 + $0xa8] sm:$0xe]  ;;  %v10101_v35 = vrot.slane %v13763_v48, 5 }
 0x435   :  { %v11551_v33 = vcombine.low %v10046_v55, %v10049_v61  ;;  %v10082_v30 = vrot.slane %v10080_v46, 4  ;;  %v11523_v50 = vrot.slane %v9877_v62, 9  ;;  %v13760_v61 = vld [vmem:[#allocation2 + $0xb8] sm:$0xf] }
 0x436   :  { %v10087_v17 = vrot.slane %v13760_v61, 5  ;;  %v13768_v61 = vld [vmem:[#allocation2 + $0x100] sm:$0xf] }
 0x439   :  { %12775 = vmatmul.mubr.bf16.gmra.mrb[0].mxu1 %v11547_v43  ;;  %v10053_v43 = vsel %vm14900_vm0, %v11520_v45, %v10052_v13  ;;  %v10060_v13 = vsel %vm14900_vm0, %v11521_v27, %v10059_v40  ;;  %v10084_v45 = vsel %vm14900_vm0, %v10082_v30, %v10083_v39  ;;  %v10097_v27 = vrot.slane %v13764_v7, 5  ;;  %v9882_v39 = vld [vmem:[#allocation2 + $0xf0] sm:$0xe] }
 0x43a   :  { %12778 = vmatprep.mubr.bf16.mxu1 %v11548_v28  ;;  %v11552_v9 = vcombine.low %v10053_v43, %v10056_v22  ;;  %v10061_v28 = vrot.slane %v10059_v40, 4  ;;  %v11524_v40 = vrot.slane %v9878_v19, 9  ;;  %v13761_v22 = vld [vmem:[#allocation2 + $0xc4] sm:$0xf] }
 0x43b   :  { %v10094_v18 = vrot.slane %v13761_v22, 5 }
 0x43c   :  { %v10063_v1 = vsel %vm14900_vm0, %v10061_v28, %v10062_v60  ;;  %v9879_v28 = vld [vmem:[#allocation2 + $0xb4] sm:$0xe]  ;;  %v9880_v60 = vld [vmem:[#allocation2 + $0xc0] sm:$0xe] }
 0x43d   :  { %v11553_v2 = vcombine.low %v10060_v13, %v10063_v1  ;;  %v10096_v16 = vrot.slane %v10094_v18, 4  ;;  %v9881_v1 = vld [vmem:[#allocation2 + $0xcc] sm:$0xe]  ;;  %v11525_v36 = vrot.slane %v9879_v28, 9 }
 0x43f   :  { %v10088_v13 = vsel %vm14900_vm0, %v11525_v36, %v10087_v17 }
 0x441   :  { %12779 = vmatmul.mubr.bf16.gmra.mrb[4].mxu1 %v11549_v41  ;;  %v10067_v41 = vsel %vm14900_vm0, %v11522_v11, %v10066_v29  ;;  %v10074_v29 = vsel %vm14900_vm0, %v11523_v50, %v10073_v10  ;;  %v11526_v11 = vrot.slane %v9880_v60, 9  ;;  %v13767_v50 = vld [vmem:[#allocation2 + $0xf8] sm:$0x1]  ;;  %v13771_v60 = vld [vmem:[#allocation2 + $0x110] sm:$0x1] }
 0x442   :  { %12782 = vmatprep.mubr.bf16.mxu1 %v11550_v12  ;;  %v11554_v42 = vcombine.low %v10067_v41, %v10070_v0  ;;  %v10075_v12 = vrot.slane %v10073_v10, 4  ;;  %v10098_v0 = vsel %vm14900_vm0, %v10096_v16, %v10097_v27  ;;  %v10103_v41 = vrot.slane %v10101_v35, 4  ;;  %v13770_v16 = vld [vmem:[#allocation2 + $0x104] sm:$0x1]  ;;  %v13772_v27 = vld [vmem:[#allocation2 + $0x118] sm:$0xf] }
 0x443   :  { %v10095_v30 = vsel %vm14900_vm0, %v11526_v11, %v10094_v18  ;;  %v13769_v18 = vld [vmem:[#allocation2 + $0x10c] sm:$0xf]  ;;  %v10118_v25 = vrot.slane %v13770_v16, 5  ;;  %v10125_v48 = vrot.slane %v13771_v60, 5  ;;  %v13773_v11 = vld [vmem:[#allocation2 + $0x124] sm:$0xf] }
 0x444   :  { %v10077_v4 = vsel %vm14900_vm0, %v10075_v12, %v10076_v32  ;;  %v11558_v52 = vcombine.low %v10095_v30, %v10098_v0  ;;  %v10136_v0 = vrot.slane %v13773_v11, 5  ;;  %v9886_v30 = vld [vmem:[#allocation2 + $0x120] sm:$0xe]  ;;  %v10157_v16 = vrot.slane %v15555_v37, 5 }
 0x445   :  { %v11555_v55 = vcombine.low %v10074_v29, %v10077_v4  ;;  %v10111_v4 = vrot.slane %v13767_v50, 5  ;;  %v10122_v29 = vrot.slane %v13769_v18, 5  ;;  %v11532_v50 = vrot.slane %v9886_v30, 9  ;;  %v9887_v18 = vld [vmem:[#allocation2 + $0x12c] sm:$0xe] }
 0x446   :  { %v10164_v60 = vrot.slane %v15579_v63, 5  ;;  %v10160_v37 = vrot.slane %v15573_v31, 5  ;;  %v10167_v63 = vrot.slane %v15618_v23, 5 }
 0x447   :  { %v10124_v28 = vrot.slane %v10122_v29, 4 }
 0x449   :  { %12783 = vmatmul.mubr.bf16.gmra.mrb[8].mxu1 %v11551_v33  ;;  %v10081_v33 = vsel %vm14900_vm0, %v11524_v40, %v10080_v46  ;;  %v10108_v46 = vrot.slane %v13765_v34, 5 }
 0x44a   :  { %12786 = vmatprep.mubr.bf16.mxu1 %v11552_v9  ;;  %v11556_v43 = vcombine.low %v10081_v33, %v10084_v45  ;;  %v10089_v9 = vrot.slane %v10087_v17, 4  ;;  %v10115_v17 = vrot.slane %v13768_v61, 5  ;;  %v11528_v45 = vrot.slane %v9882_v39, 9  ;;  %v13775_v61 = vld [vmem:[#allocation2 + $0x13c] sm:$0xf] }
 0x44b   :  { %v10110_v32 = vrot.slane %v10108_v46, 4 }
 0x44c   :  { %v10091_v10 = vsel %vm14900_vm0, %v10089_v9, %v10090_v8  ;;  %v9883_v9 = vld [vmem:[#allocation2 + $0xfc] sm:$0xe]  ;;  %v9884_v8 = vld [vmem:[#allocation2 + $0x108] sm:$0xe] }
 0x44d   :  { %v11557_v62 = vcombine.low %v10088_v13, %v10091_v10  ;;  %v10112_v22 = vsel %vm14900_vm0, %v10110_v32, %v10111_v4  ;;  %v11530_v36 = vrot.slane %v9884_v8, 9  ;;  %v10126_v10 = vsel %vm14900_vm0, %v10124_v28, %v10125_v48 }
 0x44f   :  { %v10123_v13 = vsel %vm14900_vm0, %v11530_v36, %v10122_v29  ;;  %v9890_v36 = vld [vmem:[#allocation2 + $0x150] sm:$0xe] }
 0x451   :  { %12787 = vmatmul.mubr.bf16.gmra.mrb[12].mxu1 %v11553_v2  ;;  %v11527_v2 = vrot.slane %v9881_v1, 9  ;;  %v10129_v1 = vrot.slane %v13772_v27, 5  ;;  %v9889_v27 = vld [vmem:[#allocation2 + $0x144] sm:$0xe] }
 0x452   :  { %12790 = vmatprep.mubr.bf16.mxu1 %v11554_v42  ;;  %v13766_v42 = vld [vmem:[#allocation2 + $0xd4] sm:$0x1] }
 0x453   :  { %v10104_v12 = vrot.slane %v13766_v42, 5  ;;  %v10102_v19 = vsel %vm14900_vm0, %v11527_v2, %v10101_v35  ;;  %v11529_v35 = vrot.slane %v9883_v9, 9  ;;  %v11562_v2 = vcombine.low %v10123_v13, %v10126_v10  ;;  %v9885_v42 = vld [vmem:[#allocation2 + $0x114] sm:$0xe] }
 0x454   :  { %v11531_v32 = vrot.slane %v9885_v42, 9  ;;  %v11533_v9 = vrot.slane %v9887_v18, 9  ;;  %v10171_v13 = vrot.slane %v15583_v57, 5  ;;  %v10178_v42 = vrot.slane %v15603_v49, 5 }
 0x455   :  { %v10105_v47 = vsel %vm14900_vm0, %v10103_v41, %v10104_v12  ;;  %v10116_v34 = vsel %vm14900_vm0, %v11529_v35, %v10115_v17  ;;  %v10131_v41 = vrot.slane %v10129_v1, 4  ;;  %v10138_v12 = vrot.slane %v10136_v0, 4 }
 0x456   :  { %v11559_v40 = vcombine.low %v10102_v19, %v10105_v47  ;;  %v13774_v47 = vld [vmem:[#allocation2 + $0x130] sm:$0xf]  ;;  %v10180_v57 = vrot.slane %v10178_v42, 4  ;;  %v10181_v49 = vrot.slane %v15632_v59, 5 }
 0x457   :  { %v10143_v39 = vrot.slane %v13774_v47, 5  ;;  %v9892_v47 = vld [vmem:[#allocation2 + $0x168] sm:$0xe] }
 0x459   :  { %12791 = vmatmul.mubr.bf16.gmra.mrb[16].mxu1 %v11555_v55  ;;  %v10109_v55 = vsel %vm14900_vm0, %v11528_v45, %v10108_v46  ;;  %v10144_v48 = vsel %vm14900_vm0, %v11533_v9, %v10143_v39  ;;  %v9894_v9 = vld [vmem:[#allocation2 + $0x180] sm:$0xe] }
 0x45a   :  { %12794 = vmatprep.mubr.bf16.mxu1 %v11556_v43  ;;  %v11560_v33 = vcombine.low %v10109_v55, %v10112_v22  ;;  %v10117_v43 = vrot.slane %v10115_v17, 4  ;;  %v10150_v17 = vrot.slane %v13775_v61, 5  ;;  %v10145_v22 = vrot.slane %v10143_v39, 4 }
 0x45b   :  { %v10146_v55 = vrot.slane %v15547_v51, 5 }
 0x45c   :  { %v10119_v7 = vsel %vm14900_vm0, %v10117_v43, %v10118_v25  ;;  %v10152_v29 = vrot.slane %v10150_v17, 4  ;;  %v10153_v43 = vrot.slane %v15564_v44, 5 }
 0x45d   :  { %v11561_v46 = vcombine.low %v10116_v34, %v10119_v7  ;;  %v10147_v28 = vsel %vm14900_vm0, %v10145_v22, %v10146_v55  ;;  %v10159_v7 = vrot.slane %v10157_v16, 4 }
 0x45e   :  { %v10154_v8 = vsel %vm14900_vm0, %v10152_v29, %v10153_v43  ;;  %v11565_v35 = vcombine.low %v10144_v48, %v10147_v28  ;;  %v10188_v43 = vrot.slane %v15643_v26, 5  ;;  %v10199_v48 = vrot.slane %v15663_v15, 5 }
 0x45f   :  { %v10161_v34 = vsel %vm14900_vm0, %v10159_v7, %v10160_v37 }
 0x460   :  { %v10201_v37 = vrot.slane %v10199_v48, 4 }
 0x461   :  { %12795 = vmatmul.mubr.bf16.gmra.mrb[20].mxu1 %v11557_v62  ;;  %v10132_v62 = vrot.slane %v15536_v14, 5  ;;  %v10137_v14 = vsel %vm14900_vm0, %v11532_v50, %v10136_v0  ;;  %v11535_v0 = vrot.slane %v9889_v27, 9 }
 0x462   :  { %12798 = vmatprep.mubr.bf16.mxu1 %v11558_v52  ;;  %v10139_v52 = vrot.slane %v15544_v54, 5 }
 0x463   :  { %v10133_v19 = vsel %vm14900_vm0, %v10131_v41, %v10132_v62  ;;  %v10158_v23 = vsel %vm14900_vm0, %v11535_v0, %v10157_v16  ;;  %v9896_v0 = vld [vmem:[#allocation2 + $0x198] sm:$0xe] }
 0x464   :  { %v10140_v4 = vsel %vm14900_vm0, %v10138_v12, %v10139_v52  ;;  %v11567_v12 = vcombine.low %v10158_v23, %v10161_v34  ;;  %v10173_v52 = vrot.slane %v10171_v13, 4 }
 0x465   :  { %v11564_v54 = vcombine.low %v10137_v14, %v10140_v4  ;;  %v10182_v14 = vsel %vm14900_vm0, %v10180_v57, %v10181_v49 }
 0x469   :  { %12799 = vmatmul.mubr.bf16.gmra.mrb[24].mxu1 %v11559_v40  ;;  %v10130_v40 = vsel %vm14900_vm0, %v11531_v32, %v10129_v1  ;;  %v10166_v1 = vrot.slane %v10164_v60, 4  ;;  %v9891_v32 = vld [vmem:[#allocation2 + $0x15c] sm:$0xe] }
 0x46a   :  { %12802 = vmatprep.mubr.bf16.mxu1 %v11560_v33  ;;  %v11563_v45 = vcombine.low %v10130_v40, %v10133_v19  ;;  %v9888_v33 = vld [vmem:[#allocation2 + $0x138] sm:$0xe]  ;;  %v10174_v19 = vrot.slane %v15621_v38, 5  ;;  %v11537_v4 = vrot.slane %v9891_v32, 9  ;;  %v10185_v40 = vrot.slane %v15608_v56, 5 }
 0x46b   :  { %v11534_v25 = vrot.slane %v9888_v33, 9  ;;  %v10168_v41 = vsel %vm14900_vm0, %v10166_v1, %v10167_v63  ;;  %v9893_v33 = vld [vmem:[#allocation2 + $0x174] sm:$0xe]  ;;  %v10202_v63 = vrot.slane %v15686_v58, 5  ;;  %v10216_v32 = vrot.slane %v15722_v53, 5 }
 0x46c   :  { %v10175_v61 = vsel %vm14900_vm0, %v10173_v52, %v10174_v19  ;;  %v10172_v59 = vsel %vm14900_vm0, %v11537_v4, %v10171_v13  ;;  %v10187_v55 = vrot.slane %v10185_v40, 4  ;;  %v10209_v13 = vrot.slane %v15714_v24, 5 }
 0x46d   :  { %v10151_v51 = vsel %vm14900_vm0, %v11534_v25, %v10150_v17  ;;  %v11569_v22 = vcombine.low %v10172_v59, %v10175_v61  ;;  %v11539_v25 = vrot.slane %v9893_v33, 9  ;;  %v10203_v23 = vsel %vm14900_vm0, %v10201_v37, %v10202_v63 }
 0x46e   :  { %v11566_v44 = vcombine.low %v10151_v51, %v10154_v8  ;;  %v10189_v8 = vsel %vm14900_vm0, %v10187_v55, %v10188_v43 }
 0x471   :  { %12803 = vmatmul.mubr.bf16.gmra.mrb[28].mxu1 %v11561_v46 }
 0x472   :  { %12806 = vmatprep.mubr.bf16.mxu1 %v11562_v2  ;;  %v11536_v2 = vrot.slane %v9890_v36, 9  ;;  %v9895_v36 = vld [vmem:[#allocation2 + $0x18c] sm:$0xe] }
 0x474   :  { %v10165_v62 = vsel %vm14900_vm0, %v11536_v2, %v10164_v60 }
 0x475   :  { %v11568_v30 = vcombine.low %v10165_v62, %v10168_v41  ;;  %v9897_v41 = vld [vmem:[#allocation2 + $0x1a4] sm:$0xe]  ;;  %v11542_v62 = vrot.slane %v9896_v0, 9 }
 0x476   :  { %v11543_v52 = vrot.slane %v9897_v41, 9 }
 0x479   :  { %12807 = vmatmul.mubr.bf16.gmra.mrb[32].mxu1 %v11563_v45  ;;  %v11538_v45 = vrot.slane %v9892_v47, 9 }
 0x47a   :  { %12810 = vmatprep.mubr.bf16.mxu1 %v11564_v54  ;;  %v10192_v54 = vrot.slane %v15635_v20, 5  ;;  %v10195_v20 = vrot.slane %v15656_v6, 5  ;;  %v10186_v6 = vsel %vm14900_vm0, %v11539_v25, %v10185_v40 }
 0x47b   :  { %v10179_v18 = vsel %vm14900_vm0, %v11538_v45, %v10178_v42  ;;  %v11571_v7 = vcombine.low %v10186_v6, %v10189_v8  ;;  %v11541_v42 = vrot.slane %v9895_v36, 9 }
 0x47c   :  { %v11570_v29 = vcombine.low %v10179_v18, %v10182_v14  ;;  %v10194_v56 = vrot.slane %v10192_v54, 4 }
 0x47e   :  { %v10196_v51 = vsel %vm14900_vm0, %v10194_v56, %v10195_v20 }
 0x481   :  { %12811 = vmatmul.mubr.bf16.gmra.mrb[36].mxu1 %v11565_v35  ;;  %v11540_v35 = vrot.slane %v9894_v9, 9 }
 0x482   :  { %12814 = vmatprep.mubr.bf16.mxu1 %v11566_v44  ;;  %v15852_v10 = vpop.f32.mrb[68].mxu0  ;;  %v10206_v44 = vrot.slane %v15671_v3, 5  ;;  %v10213_v3 = vrot.slane %v15704_v5, 5  ;;  %v10200_v5 = vsel %vm14900_vm0, %v11541_v42, %v10199_v48 }
 0x483   :  { %v15855_v11 = vpop.f32.mrb[69].mxu0  ;;  %v10193_v27 = vsel %vm14900_vm0, %v11540_v35, %v10192_v54  ;;  %v11573_v57 = vcombine.low %v10200_v5, %v10203_v23 }
 0x484   :  { %v15859_v46 = vpop.f32.mrb[70].mxu0  ;;  %v11572_v1 = vcombine.low %v10193_v27, %v10196_v51  ;;  %v10208_v15 = vrot.slane %v10206_v44, 4  ;;  %v10215_v24 = vrot.slane %v10213_v3, 4  ;;  %v10207_v19 = vsel %vm14900_vm0, %v11542_v62, %v10206_v44 }
 0x485   :  { %v15864_v31 = vpop.f32.mrb[71].mxu0  ;;  %v10214_v49 = vsel %vm14900_vm0, %v11543_v52, %v10213_v3 }
 0x486   :  { %v10210_v58 = vsel %vm14900_vm0, %v10208_v15, %v10209_v13  ;;  %v10217_v4 = vsel %vm14900_vm0, %v10215_v24, %v10216_v32 }
 0x487   :  { %v11574_v47 = vcombine.low %v10207_v19, %v10210_v58  ;;  %v11575_v53 = vcombine.low %v10214_v49, %v10217_v4 }
 0x489   :  { %12815 = vmatmul.mubr.bf16.gmra.mrb[40].mxu1 %v11567_v12 }
 0x48a   :  { %12818 = vmatprep.mubr.bf16.mxu1 %v11568_v30  ;;  %v15872_v39 = vpop.f32.mrb[72].mxu0 }
 0x48b   :  { %v15875_v50 = vpop.f32.mrb[73].mxu0 }
 0x48c   :  { %v15879_v17 = vpop.f32.mrb[74].mxu0 }
 0x48d   :  { %v15884_v38 = vpop.f32.mrb[75].mxu0 }
 0x491   :  { %12819 = vmatmul.mubr.bf16.gmra.mrb[44].mxu1 %v11569_v22 }
 0x492   :  { %12822 = vmatprep.mubr.bf16.mxu1 %v11570_v29  ;;  %v15892_v28 = vpop.f32.mrb[76].mxu0 }
 0x493   :  { %v15895_v16 = vpop.f32.mrb[77].mxu0 }
 0x494   :  { %v15899_v60 = vpop.f32.mrb[78].mxu0 }
 0x495   :  { %v15904_v26 = vpop.f32.mrb[79].mxu0 }
 0x499   :  { %12823 = vmatmul.mubr.bf16.gmra.mrb[48].mxu1 %v11571_v7 }
 0x49a   :  { %12826 = vmatprep.mubr.bf16.mxu1 %v11572_v1  ;;  %v15912_v34 = vpop.f32.mrb[80].mxu0 }
 0x49b   :  { %v15916_v2 = vpop.f32.mrb[81].mxu0 }
 0x49c   :  { %v15920_v12 = vpop.f32.mrb[82].mxu0 }
 0x49d   :  { %v15924_v30 = vpop.f32.mrb[83].mxu0 }
 0x4a1   :  { %12827 = vmatmul.mubr.bf16.gmra.mrb[52].mxu1 %v11573_v57 }
 0x4a2   :  { %12830 = vmatprep.mubr.bf16.mxu1 %v11574_v47  ;;  %v15935_v61 = vpop.f32.mrb[84].mxu0 }
 0x4a3   :  { %v15937_v40 = vpop.f32.mrb[85].mxu0 }
 0x4a4   :  { %v15939_v45 = vpop.f32.mrb[86].mxu0 }
 0x4a5   :  { %v15941_v14 = vpop.f32.mrb[87].mxu0 }
 0x4a9   :  { %12831 = vmatmul.mubr.bf16.gmra.mrb[56].mxu1 %v11575_v53 }
 0x4aa   :  { %v15943_v54 = vpop.f32.mrb[88].mxu0 }
 0x4ab   :  { %v15945_v59 = vpop.f32.mrb[89].mxu0 }
 0x4ac   :  { %v15947_v22 = vpop.f32.mrb[90].mxu0 }
 0x4ad   :  { %v15949_v18 = vpop.f32.mrb[91].mxu0 }
 0x4b2   :  { %v15951_v21 = vpop.f32.mrb[92].mxu0 }
 0x4b3   :  { %v15953_v29 = vpop.f32.mrb[93].mxu0 }
 0x4b4   :  { %v15955_v55 = vpop.f32.mrb[94].mxu0 }
 0x4b5   :  { %v15957_v33 = vpop.f32.mrb[95].mxu0 }
 0x4ba   :  { %v15959_v56 = vpop.f32.mrb[96].mxu0 }
 0x4bb   :  { %v15961_v43 = vpop.f32.mrb[97].mxu0 }
 0x4bc   :  { %v15963_v9 = vpop.f32.mrb[98].mxu0 }
 0x4bd   :  { %v15965_v20 = vpop.f32.mrb[99].mxu0 }
 0x4c2   :  { %v15967_v25 = vpop.f32.mrb[100].mxu0 }
 0x4c3   :  { %v15969_v8 = vpop.f32.mrb[101].mxu0 }
 0x4c4   :  { %v15971_v48 = vpop.f32.mrb[102].mxu0 }
 0x4c5   :  { %v15973_v35 = vpop.f32.mrb[103].mxu0 }
 0x4ca   :  { %v15975_v51 = vpop.f32.mrb[104].mxu0 }
 0x4cb   :  { %v15977_v44 = vpop.f32.mrb[105].mxu0 }
 0x4cc   :  { %v15979_v6 = vpop.f32.mrb[106].mxu0 }
 0x4cd   :  { %v15981_v7 = vpop.f32.mrb[107].mxu0 }
 0x4d2   :  { %v15983_v27 = vpop.f32.mrb[108].mxu0 }
 0x4d3   :  { %v15985_v1 = vpop.f32.mrb[109].mxu0 }
 0x4d4   :  { %v15987_v37 = vpop.f32.mrb[110].mxu0 }
 0x4d5   :  { %v15989_v36 = vpop.f32.mrb[111].mxu0 }
 0x4d6   :  { %16196 = vst [vmem:[#allocation10_spill] sm:$0xff] %v15989_v36 }
 0x4da   :  { %v15991_v15 = vpop.f32.mrb[112].mxu0 }
 0x4db   :  { %16197 = vst [vmem:[#allocation11_spill] sm:$0xff] %v15991_v15  ;;  %v15993_v63 = vpop.f32.mrb[113].mxu0 }
 0x4dc   :  { %16198 = vst [vmem:[#allocation9_spill] sm:$0xff] %v15993_v63  ;;  %v15995_v0 = vpop.f32.mrb[114].mxu0 }
 0x4dd   :  { %16199 = vst [vmem:[#allocation12_spill] sm:$0xff] %v15995_v0  ;;  %v15997_v3 = vpop.f32.mrb[115].mxu0 }
 0x4de   :  { %16200 = vst [vmem:[#allocation13_spill] sm:$0xff] %v15997_v3 }
 0x4e2   :  { %v15999_v13 = vpop.f32.mrb[116].mxu0 }
 0x4e3   :  { %16201 = vst [vmem:[#allocation14_spill] sm:$0xff] %v15999_v13  ;;  %v16001_v41 = vpop.f32.mrb[117].mxu0 }
 0x4e4   :  { %16202 = vst [vmem:[#allocation15_spill] sm:$0xff] %v16001_v41  ;;  %v16003_v42 = vpop.f32.mrb[118].mxu0 }
 0x4e5   :  { %16203 = vst [vmem:[#allocation16_spill] sm:$0xff] %v16003_v42  ;;  %v16005_v23 = vpop.f32.mrb[119].mxu0 }
 0x4e6   :  { %16204 = vst [vmem:[#allocation17_spill] sm:$0xff] %v16005_v23 }
 0x4ea   :  { %v16007_v62 = vpop.f32.mrb[120].mxu0 }
 0x4eb   :  { %16205 = vst [vmem:[#allocation18_spill] sm:$0xff] %v16007_v62  ;;  %v16009_v58 = vpop.f32.mrb[121].mxu0 }
 0x4ec   :  { %16206 = vst [vmem:[#allocation19_spill] sm:$0xff] %v16009_v58  ;;  %v16011_v5 = vpop.f32.mrb[122].mxu0 }
 0x4ed   :  { %16207 = vst [vmem:[#allocation20_spill] sm:$0xff] %v16011_v5  ;;  %v16013_v52 = vpop.f32.mrb[123].mxu0  ;;  %v16026_v5 = vld [vmem:[%s16172_s4] ss:$0 sm:$0xff]  ;;  %s13828_s4 = smov [#allocation6]  }
 0x4ee   :  { %16208 = vst [vmem:[#allocation21_spill] sm:$0xff] %v16013_v52  ;;  %s10987_s29 = sshll.u32 %s13828_s4, 4  ;;  %s10988_s29 = int_to_ptr.vmem [resolvable:$true] %s10987_s29 }
 0x4ef   :  { %s13798_s30 = scalar_lea.vmem %s10988_s29, 32  ;;  %p13803_p9 = scmp.lt.s32.totalorder %s10988_s29, %s10988_s29 }
 0x4f0   :  { %p13799_p8 = scmp.ne.s32.totalorder %s10988_s29, %s13798_s30  ;;  %p13804_p10 = scmp.lt.s32.totalorder %s13798_s30, %s13798_s30 }
 0x4f2   :  { %v16015_v24 = vpop.f32.mrb[124].mxu0  ;;  %p13805_p11 = por %p13804_p10, %p13803_p9 }
 0x4f3   :  { %16209 = vst [vmem:[#allocation22_spill] sm:$0xff] %v16015_v24  ;;  %v16017_v32 = vpop.f32.mrb[125].mxu0 }
 0x4f4   :  { %16210 = vst [vmem:[#allocation23_spill] sm:$0xff] %v16017_v32  ;;  %v16019_v57 = vpop.f32.mrb[126].mxu0  ;;  %p13806_p12 = pnand %p13805_p11, %p13799_p8 }
 0x4f5   :  { %16211 = vst [vmem:[#allocation24_spill] sm:$0xff] %v16019_v57  ;;  %v16021_v19 = vpop.f32.mrb[127].mxu0 }
 0x4f6   :  { %16212 = vst [vmem:[#allocation25_spill] sm:$0xff] %v16021_v19 }
 0x4fa   :  { %v12452_v47 = vpop.f32.mrb[64].mxu0 }
 0x4fb   :  { %v6564_v49 = vpop.f32.mrb[65].mxu0 }
 0x4fc   :  { %v12453_v4 = vpop.f32.mrb[66].mxu0 }
 0x4fd   :  { %v6567_v53 = vpop.f32.mrb[67].mxu0 }
 0x504   :  { %v12772_v23 = vpop.f32.mrb[60].mxu1 }
 0x505   :  { %v12850_v62 = vadd.f32 %v12772_v23, %v12452_v47  ;;  %v10445_v52 = vpop.f32.mrb[61].mxu1 }
 0x506   :  { %v12851_v58 = vadd.f32 %v10445_v52, %v6564_v49  ;;  %v12773_v24 = vpop.f32.mrb[62].mxu1 }
 0x507   :  { %v12852_v42 = vadd.f32 %v12773_v24, %v12453_v4  ;;  %v10448_v32 = vpop.f32.mrb[63].mxu1  ;;  %v10773_v19 = vadd.f32 %v12850_v62, %v16026_v5 }
 0x508   :  { %v10771_v57 = vadd.f32 %v12851_v58, %v16026_v5  ;;  %v12853_v41 = vadd.f32 %v10448_v32, %v6567_v53 }
 0x509   :  { %v10774_v23 = vadd.f32 %v12852_v42, %v16026_v5  ;;  %v10837_v36 = vmax.f32 %v10773_v19, 0.0 }
 0x50a   :  { %v10772_v13 = vadd.f32 %v12853_v41, %v16026_v5  ;;  %v10835_v3 = vmax.f32 %v10771_v57, 0.0 }
 0x50b   :  { %v10838_v4 = vmax.f32 %v10774_v23, 0.0 }
 0x50c   :  { %v10836_v47 = vmax.f32 %v10772_v13, 0.0  ;;  %v12776_v0 = vpop.f32.mrb[0].mxu1 }
 0x50d   :  { %v12854_v63 = vadd.f32 %v12776_v0, %v15852_v10  ;;  %v10461_v15 = vpop.f32.mrb[1].mxu1 }
 0x50e   :  { %v10899_v52 = vadd.f32 %v10836_v47, %v10835_v3  ;;  %v12855_v24 = vadd.f32 %v10461_v15, %v15855_v11  ;;  %v12777_v49 = vpop.f32.mrb[2].mxu1 }
 0x50f   :  { %v12856_v58 = vadd.f32 %v12777_v49, %v15859_v46  ;;  %v10464_v32 = vpop.f32.mrb[3].mxu1  ;;  %v10777_v13 = vadd.f32 %v12854_v63, %v16026_v5 }
 0x510   :  { %v10900_v62 = vadd.f32 %v10899_v52, %v10837_v36  ;;  %v10775_v41 = vadd.f32 %v12855_v24, %v16026_v5  ;;  %v12857_v57 = vadd.f32 %v10464_v32, %v15864_v31 }
 0x511   :  { %v10778_v3 = vadd.f32 %v12856_v58, %v16026_v5  ;;  %v10841_v23 = vmax.f32 %v10777_v13, 0.0 }
 0x512   :  { %v10839_v42 = vmax.f32 %v10775_v41, 0.0  ;;  %v10901_v53 = vadd.f32 %v10900_v62, %v10838_v4  ;;  %v10776_v10 = vadd.f32 %v12857_v57, %v16026_v5 }
 0x513   :  { %v10842_v24 = vmax.f32 %v10778_v3, 0.0 }
 0x514   :  { %v10902_v0 = vadd.f32 %v10901_v53, %v10839_v42  ;;  %v10840_v11 = vmax.f32 %v10776_v10, 0.0  ;;  %v12780_v15 = vpop.f32.mrb[4].mxu1 }
 0x515   :  { %v12858_v46 = vadd.f32 %v12780_v15, %v15872_v39  ;;  %v10477_v19 = vpop.f32.mrb[5].mxu1 }
 0x516   :  { %v10903_v36 = vadd.f32 %v10902_v0, %v10840_v11  ;;  %v12859_v47 = vadd.f32 %v10477_v19, %v15875_v50  ;;  %v12781_v52 = vpop.f32.mrb[6].mxu1 }
 0x517   :  { %v12860_v31 = vadd.f32 %v12781_v52, %v15879_v17  ;;  %v10480_v63 = vpop.f32.mrb[7].mxu1  ;;  %v10781_v58 = vadd.f32 %v12858_v46, %v16026_v5 }
 0x518   :  { %v10904_v49 = vadd.f32 %v10903_v36, %v10841_v23  ;;  %v10779_v32 = vadd.f32 %v12859_v47, %v16026_v5  ;;  %v12861_v4 = vadd.f32 %v10480_v63, %v15884_v38 }
 0x519   :  { %v10782_v13 = vadd.f32 %v12860_v31, %v16026_v5  ;;  %v10845_v10 = vmax.f32 %v10781_v58, 0.0 }
 0x51a   :  { %v10843_v62 = vmax.f32 %v10779_v32, 0.0  ;;  %v10905_v41 = vadd.f32 %v10904_v49, %v10842_v24  ;;  %v10780_v39 = vadd.f32 %v12861_v4, %v16026_v5 }
 0x51b   :  { %v10846_v46 = vmax.f32 %v10782_v13, 0.0 }
 0x51c   :  { %v10906_v57 = vadd.f32 %v10905_v41, %v10843_v62  ;;  %v10844_v50 = vmax.f32 %v10780_v39, 0.0  ;;  %v12784_v42 = vpop.f32.mrb[8].mxu1 }
 0x51d   :  { %v12862_v17 = vadd.f32 %v12784_v42, %v15892_v28  ;;  %v10493_v53 = vpop.f32.mrb[9].mxu1 }
 0x51e   :  { %v10907_v0 = vadd.f32 %v10906_v57, %v10844_v50  ;;  %v12863_v3 = vadd.f32 %v10493_v53, %v15895_v16  ;;  %v12785_v11 = vpop.f32.mrb[10].mxu1 }
 0x51f   :  { %v12864_v38 = vadd.f32 %v12785_v11, %v15899_v60  ;;  %v10496_v15 = vpop.f32.mrb[11].mxu1  ;;  %v10785_v47 = vadd.f32 %v12862_v17, %v16026_v5 }
 0x520   :  { %v10908_v19 = vadd.f32 %v10907_v0, %v10845_v10  ;;  %v10783_v23 = vadd.f32 %v12863_v3, %v16026_v5  ;;  %v12865_v36 = vadd.f32 %v10496_v15, %v15904_v26 }
 0x521   :  { %v10786_v24 = vadd.f32 %v12864_v38, %v16026_v5  ;;  %v10849_v4 = vmax.f32 %v10785_v47, 0.0 }
 0x522   :  { %v10847_v52 = vmax.f32 %v10783_v23, 0.0  ;;  %v10909_v31 = vadd.f32 %v10908_v19, %v10846_v46  ;;  %v10784_v28 = vadd.f32 %v12865_v36, %v16026_v5 }
 0x523   :  { %v10850_v57 = vmax.f32 %v10786_v24, 0.0 }
 0x524   :  { %v10910_v63 = vadd.f32 %v10909_v31, %v10847_v52  ;;  %v10848_v16 = vmax.f32 %v10784_v28, 0.0  ;;  %v12788_v49 = vpop.f32.mrb[12].mxu1 }
 0x525   :  { %v12866_v60 = vadd.f32 %v12788_v49, %v15912_v34  ;;  %v10509_v32 = vpop.f32.mrb[13].mxu1 }
 0x526   :  { %v10911_v58 = vadd.f32 %v10910_v63, %v10848_v16  ;;  %v12867_v62 = vadd.f32 %v10509_v32, %v15916_v2  ;;  %v12789_v41 = vpop.f32.mrb[14].mxu1 }
 0x527   :  { %v12868_v26 = vadd.f32 %v12789_v41, %v15920_v12  ;;  %v10512_v39 = vpop.f32.mrb[15].mxu1  ;;  %v10789_v17 = vadd.f32 %v12866_v60, %v16026_v5 }
 0x528   :  { %v10912_v13 = vadd.f32 %v10911_v58, %v10849_v4  ;;  %v10787_v50 = vadd.f32 %v12867_v62, %v16026_v5  ;;  %v12869_v42 = vadd.f32 %v10512_v39, %v15924_v30 }
 0x529   :  { %v10790_v3 = vadd.f32 %v12868_v26, %v16026_v5  ;;  %v10853_v15 = vmax.f32 %v10789_v17, 0.0 }
 0x52a   :  { %v10851_v53 = vmax.f32 %v10787_v50, 0.0  ;;  %v10913_v10 = vadd.f32 %v10912_v13, %v10850_v57  ;;  %v10788_v34 = vadd.f32 %v12869_v42, %v16026_v5 }
 0x52b   :  { %v10854_v47 = vmax.f32 %v10790_v3, 0.0 }
 0x52c   :  { %v10914_v0 = vadd.f32 %v10913_v10, %v10851_v53  ;;  %v10852_v2 = vmax.f32 %v10788_v34, 0.0  ;;  %v12792_v11 = vpop.f32.mrb[16].mxu1 }
 0x52d   :  { %v12870_v12 = vadd.f32 %v12792_v11, %v15935_v61  ;;  %v10525_v38 = vpop.f32.mrb[17].mxu1 }
 0x52e   :  { %v10915_v46 = vadd.f32 %v10914_v0, %v10852_v2  ;;  %v12871_v19 = vadd.f32 %v10525_v38, %v15937_v40  ;;  %v12793_v23 = vpop.f32.mrb[18].mxu1 }
 0x52f   :  { %v12872_v30 = vadd.f32 %v12793_v23, %v15939_v45  ;;  %v10528_v36 = vpop.f32.mrb[19].mxu1  ;;  %v10793_v63 = vadd.f32 %v12870_v12, %v16026_v5 }
 0x530   :  { %v10916_v52 = vadd.f32 %v10915_v46, %v10853_v15  ;;  %v10791_v31 = vadd.f32 %v12871_v19, %v16026_v5  ;;  %v12873_v28 = vadd.f32 %v10528_v36, %v15941_v14 }
 0x531   :  { %v10794_v60 = vadd.f32 %v12872_v30, %v16026_v5  ;;  %v10857_v58 = vmax.f32 %v10793_v63, 0.0 }
 0x532   :  { %v10855_v24 = vmax.f32 %v10791_v31, 0.0  ;;  %v10917_v16 = vadd.f32 %v10916_v52, %v10854_v47  ;;  %v10792_v61 = vadd.f32 %v12873_v28, %v16026_v5 }
 0x533   :  { %v10858_v57 = vmax.f32 %v10794_v60, 0.0 }
 0x534   :  { %v10918_v49 = vadd.f32 %v10917_v16, %v10855_v24  ;;  %v10856_v40 = vmax.f32 %v10792_v61, 0.0  ;;  %v12796_v32 = vpop.f32.mrb[20].mxu1 }
 0x535   :  { %v12874_v45 = vadd.f32 %v12796_v32, %v15943_v54  ;;  %v10541_v4 = vpop.f32.mrb[21].mxu1 }
 0x536   :  { %v10919_v62 = vadd.f32 %v10918_v49, %v10856_v40  ;;  %v12875_v41 = vadd.f32 %v10541_v4, %v15945_v59  ;;  %v12797_v26 = vpop.f32.mrb[22].mxu1 }
 0x537   :  { %v12876_v14 = vadd.f32 %v12797_v26, %v15947_v22  ;;  %v10544_v39 = vpop.f32.mrb[23].mxu1  ;;  %v10797_v17 = vadd.f32 %v12874_v45, %v16026_v5 }
 0x538   :  { %v10920_v13 = vadd.f32 %v10919_v62, %v10857_v58  ;;  %v10795_v50 = vadd.f32 %v12875_v41, %v16026_v5  ;;  %v12877_v42 = vadd.f32 %v10544_v39, %v15949_v18 }
 0x539   :  { %v10798_v0 = vadd.f32 %v12876_v14, %v16026_v5  ;;  %v10861_v11 = vmax.f32 %v10797_v17, 0.0 }
 0x53a   :  { %v10859_v53 = vmax.f32 %v10795_v50, 0.0  ;;  %v10921_v10 = vadd.f32 %v10920_v13, %v10858_v57  ;;  %v10796_v54 = vadd.f32 %v12877_v42, %v16026_v5 }
 0x53b   :  { %v10862_v19 = vmax.f32 %v10798_v0, 0.0 }
 0x53c   :  { %v10922_v34 = vadd.f32 %v10921_v10, %v10859_v53  ;;  %v10860_v59 = vmax.f32 %v10796_v54, 0.0  ;;  %v12800_v3 = vpop.f32.mrb[24].mxu1 }
 0x53d   :  { %v12878_v22 = vadd.f32 %v12800_v3, %v15951_v21  ;;  %v10557_v2 = vpop.f32.mrb[25].mxu1 }
 0x53e   :  { %v10923_v12 = vadd.f32 %v10922_v34, %v10860_v59  ;;  %v12879_v38 = vadd.f32 %v10557_v2, %v15953_v29  ;;  %v12801_v15 = vpop.f32.mrb[26].mxu1 }
 0x53f   :  { %v12880_v18 = vadd.f32 %v12801_v15, %v15955_v55  ;;  %v10560_v46 = vpop.f32.mrb[27].mxu1  ;;  %v10801_v47 = vadd.f32 %v12878_v22, %v16026_v5 }
 0x540   :  { %v10924_v23 = vadd.f32 %v10923_v12, %v10861_v11  ;;  %v10799_v30 = vadd.f32 %v12879_v38, %v16026_v5  ;;  %v12881_v36 = vadd.f32 %v10560_v46, %v15957_v33 }
 0x541   :  { %v10802_v63 = vadd.f32 %v12880_v18, %v16026_v5  ;;  %v10865_v61 = vmax.f32 %v10801_v47, 0.0 }
 0x542   :  { %v10863_v52 = vmax.f32 %v10799_v30, 0.0  ;;  %v10925_v31 = vadd.f32 %v10924_v23, %v10862_v19  ;;  %v10800_v21 = vadd.f32 %v12881_v36, %v16026_v5 }
 0x543   :  { %v10866_v45 = vmax.f32 %v10802_v63, 0.0 }
 0x544   :  { %v10926_v28 = vadd.f32 %v10925_v31, %v10863_v52  ;;  %v10864_v29 = vmax.f32 %v10800_v21, 0.0  ;;  %v12804_v24 = vpop.f32.mrb[28].mxu1 }
 0x545   :  { %v12882_v55 = vadd.f32 %v12804_v24, %v15959_v56  ;;  %v10573_v16 = vpop.f32.mrb[29].mxu1 }
 0x546   :  { %v10927_v49 = vadd.f32 %v10926_v28, %v10864_v29  ;;  %v12883_v60 = vadd.f32 %v10573_v16, %v15961_v43  ;;  %v12805_v40 = vpop.f32.mrb[30].mxu1 }
 0x547   :  { %v12884_v33 = vadd.f32 %v12805_v40, %v15963_v9  ;;  %v10576_v32 = vpop.f32.mrb[31].mxu1  ;;  %v10805_v26 = vadd.f32 %v12882_v55, %v16026_v5 }
 0x548   :  { %v10928_v4 = vadd.f32 %v10927_v49, %v10865_v61  ;;  %v10803_v58 = vadd.f32 %v12883_v60, %v16026_v5  ;;  %v12885_v62 = vadd.f32 %v10576_v32, %v15965_v20 }
 0x549   :  { %v10806_v39 = vadd.f32 %v12884_v33, %v16026_v5  ;;  %v10869_v50 = vmax.f32 %v10805_v26, 0.0 }
 0x54a   :  { %v16093_v41 = vadd.f32 %v10928_v4, %v10866_v45  ;;  %v10804_v56 = vadd.f32 %v12885_v62, %v16026_v5  ;;  %v10867_v14 = vmax.f32 %v10803_v58, 0.0  ;;  %v16213_v58 = vld [vmem:[#allocation10_spill] sm:$0xff] }
 0x54b   :  { %v10870_v54 = vmax.f32 %v10806_v39, 0.0 }
 0x54c   :  { %v10868_v43 = vmax.f32 %v10804_v56, 0.0  ;;  %v12808_v57 = vpop.f32.mrb[32].mxu1 }
 0x54d   :  { %v12886_v9 = vadd.f32 %v12808_v57, %v15967_v25  ;;  %v10589_v13 = vpop.f32.mrb[33].mxu1 }
 0x54e   :  { %v10936_v42 = vadd.f32 %v10868_v43, %v10867_v14  ;;  %v12887_v17 = vadd.f32 %v10589_v13, %v15969_v8  ;;  %v12809_v53 = vpop.f32.mrb[34].mxu1 }
 0x54f   :  { %v12888_v20 = vadd.f32 %v12809_v53, %v15971_v48  ;;  %v10592_v10 = vpop.f32.mrb[35].mxu1  ;;  %v10809_v3 = vadd.f32 %v12886_v9, %v16026_v5  ;;  %v16214_v9 = vld [vmem:[#allocation11_spill] sm:$0xff] }
 0x550   :  { %v10937_v34 = vadd.f32 %v10936_v42, %v10869_v50  ;;  %v10807_v0 = vadd.f32 %v12887_v17, %v16026_v5  ;;  %v12889_v59 = vadd.f32 %v10592_v10, %v15973_v35  ;;  %v16215_v17 = vld [vmem:[#allocation9_spill] sm:$0xff]  ;;  %v16216_v10 = vld [vmem:[#allocation12_spill] sm:$0xff] }
 0x551   :  { %v10810_v12 = vadd.f32 %v12888_v20, %v16026_v5  ;;  %v10873_v18 = vmax.f32 %v10809_v3, 0.0 }
 0x552   :  { %v10871_v22 = vmax.f32 %v10807_v0, 0.0  ;;  %v10938_v2 = vadd.f32 %v10937_v34, %v10870_v54  ;;  %v10808_v25 = vadd.f32 %v12889_v59, %v16026_v5 }
 0x553   :  { %v10874_v36 = vmax.f32 %v10810_v12, 0.0 }
 0x554   :  { %v10939_v11 = vadd.f32 %v10938_v2, %v10871_v22  ;;  %v10872_v8 = vmax.f32 %v10808_v25, 0.0  ;;  %v12812_v38 = vpop.f32.mrb[36].mxu1  ;;  %v16217_v22 = vld [vmem:[#allocation13_spill] sm:$0xff] }
 0x555   :  { %v12890_v48 = vadd.f32 %v12812_v38, %v15975_v51  ;;  %v10605_v15 = vpop.f32.mrb[37].mxu1 }
 0x556   :  { %v10940_v46 = vadd.f32 %v10939_v11, %v10872_v8  ;;  %v12891_v19 = vadd.f32 %v10605_v15, %v15977_v44  ;;  %v12813_v23 = vpop.f32.mrb[38].mxu1 }
 0x557   :  { %v12892_v35 = vadd.f32 %v12813_v23, %v15979_v6  ;;  %v10608_v30 = vpop.f32.mrb[39].mxu1  ;;  %v10813_v21 = vadd.f32 %v12890_v48, %v16026_v5 }
 0x558   :  { %v10941_v47 = vadd.f32 %v10940_v46, %v10873_v18  ;;  %v10811_v52 = vadd.f32 %v12891_v19, %v16026_v5  ;;  %v12893_v31 = vadd.f32 %v10608_v30, %v15981_v7  ;;  %v16218_v46 = vld [vmem:[#allocation14_spill] sm:$0xff] }
 0x559   :  { %v10814_v24 = vadd.f32 %v12892_v35, %v16026_v5  ;;  %v10877_v61 = vmax.f32 %v10813_v21, 0.0 }
 0x55a   :  { %v10875_v28 = vmax.f32 %v10811_v52, 0.0  ;;  %v10942_v63 = vadd.f32 %v10941_v47, %v10874_v36  ;;  %v10812_v51 = vadd.f32 %v12893_v31, %v16026_v5  ;;  %v16219_v36 = vld [vmem:[#allocation15_spill] sm:$0xff]  ;;  %v16220_v31 = vld [vmem:[#allocation16_spill] sm:$0xff] }
 0x55b   :  { %v10878_v32 = vmax.f32 %v10814_v24, 0.0  ;;  %v16221_v24 = vld [vmem:[#allocation17_spill] sm:$0xff] }
 0x55c   :  { %v10943_v29 = vadd.f32 %v10942_v63, %v10875_v28  ;;  %v10876_v44 = vmax.f32 %v10812_v51, 0.0  ;;  %v12816_v55 = vpop.f32.mrb[40].mxu1 }
 0x55d   :  { %v12894_v6 = vadd.f32 %v12816_v55, %v15983_v27  ;;  %v10621_v16 = vpop.f32.mrb[41].mxu1 }
 0x55e   :  { %v10944_v49 = vadd.f32 %v10943_v29, %v10876_v44  ;;  %v12895_v60 = vadd.f32 %v10621_v16, %v15985_v1  ;;  %v12817_v40 = vpop.f32.mrb[42].mxu1 }
 0x55f   :  { %v12896_v7 = vadd.f32 %v12817_v40, %v15987_v37  ;;  %v10624_v33 = vpop.f32.mrb[43].mxu1  ;;  %v10817_v26 = vadd.f32 %v12894_v6, %v16026_v5 }
 0x560   :  { %v10945_v45 = vadd.f32 %v10944_v49, %v10877_v61  ;;  %v10815_v4 = vadd.f32 %v12895_v60, %v16026_v5  ;;  %v12897_v62 = vadd.f32 %v10624_v33, %v16213_v58  ;;  %v16222_v33 = vld [vmem:[#allocation18_spill] sm:$0xff] }
 0x561   :  { %v10818_v43 = vadd.f32 %v12896_v7, %v16026_v5  ;;  %v10881_v50 = vmax.f32 %v10817_v26, 0.0 }
 0x562   :  { %v10879_v56 = vmax.f32 %v10815_v4, 0.0  ;;  %v10946_v14 = vadd.f32 %v10945_v45, %v10878_v32  ;;  %v10816_v27 = vadd.f32 %v12897_v62, %v16026_v5  ;;  %v16223_v62 = vld [vmem:[#allocation19_spill] sm:$0xff] }
 0x563   :  { %v10882_v0 = vmax.f32 %v10818_v43, 0.0 }
 0x564   :  { %v10947_v39 = vadd.f32 %v10946_v14, %v10879_v56  ;;  %v10880_v1 = vmax.f32 %v10816_v27, 0.0  ;;  %v12820_v57 = vpop.f32.mrb[44].mxu1  ;;  %v16224_v14 = vld [vmem:[#allocation20_spill] sm:$0xff] }
 0x565   :  { %v12898_v37 = vadd.f32 %v12820_v57, %v16214_v9  ;;  %v10637_v13 = vpop.f32.mrb[45].mxu1  ;;  %v16225_v9 = vld [vmem:[#allocation21_spill] sm:$0xff] }
 0x566   :  { %v10948_v42 = vadd.f32 %v10947_v39, %v10880_v1  ;;  %v12899_v53 = vadd.f32 %v10637_v13, %v16215_v17  ;;  %v12821_v20 = vpop.f32.mrb[46].mxu1 }
 0x567   :  { %v12900_v54 = vadd.f32 %v12821_v20, %v16216_v10  ;;  %v10640_v34 = vpop.f32.mrb[47].mxu1  ;;  %v10821_v25 = vadd.f32 %v12898_v37, %v16026_v5 }
 0x568   :  { %v10949_v59 = vadd.f32 %v10948_v42, %v10881_v50  ;;  %v10819_v3 = vadd.f32 %v12899_v53, %v16026_v5  ;;  %v12901_v2 = vadd.f32 %v10640_v34, %v16217_v22  ;;  %v16226_v34 = vld [vmem:[#allocation22_spill] sm:$0xff] }
 0x569   :  { %v10822_v48 = vadd.f32 %v12900_v54, %v16026_v5  ;;  %v10885_v35 = vmax.f32 %v10821_v25, 0.0 }
 0x56a   :  { %v10883_v11 = vmax.f32 %v10819_v3, 0.0  ;;  %v10950_v12 = vadd.f32 %v10949_v59, %v10882_v0  ;;  %v10820_v8 = vadd.f32 %v12901_v2, %v16026_v5  ;;  %v16227_v2 = vld [vmem:[#allocation23_spill] sm:$0xff] }
 0x56b   :  { %v10886_v63 = vmax.f32 %v10822_v48, 0.0 }
 0x56c   :  { %v10951_v38 = vadd.f32 %v10950_v12, %v10883_v11  ;;  %v10884_v15 = vmax.f32 %v10820_v8, 0.0  ;;  %v12824_v18 = vpop.f32.mrb[48].mxu1  ;;  %v10930_v12 = vrot.slane %v16093_v41, 4  ;;  %v16228_v8 = vld [vmem:[#allocation24_spill] sm:$0xff] }
 0x56d   :  { %v12902_v19 = vadd.f32 %v12824_v18, %v16218_v46  ;;  %v10653_v23 = vpop.f32.mrb[49].mxu1 }
 0x56e   :  { %v10952_v30 = vadd.f32 %v10951_v38, %v10884_v15  ;;  %v12903_v47 = vadd.f32 %v10653_v23, %v16219_v36  ;;  %v12825_v52 = vpop.f32.mrb[50].mxu1 }
 0x56f   :  { %v12904_v21 = vadd.f32 %v12825_v52, %v16220_v31  ;;  %v10656_v28 = vpop.f32.mrb[51].mxu1  ;;  %v10825_v55 = vadd.f32 %v12902_v19, %v16026_v5  ;;  %v16229_v19 = vld [vmem:[#allocation25_spill] sm:$0xff]  ;;  %v10931_v52 = vadd.f32 %v10930_v12, %v16093_v41 }
 0x570   :  { %v10953_v51 = vadd.f32 %v10952_v30, %v10885_v35  ;;  %v10823_v29 = vadd.f32 %v12903_v47, %v16026_v5  ;;  %v12905_v44 = vadd.f32 %v10656_v28, %v16221_v24 }
 0x571   :  { %v10826_v60 = vadd.f32 %v12904_v21, %v16026_v5  ;;  %v10889_v4 = vmax.f32 %v10825_v55, 0.0 }
 0x572   :  { %v10887_v6 = vmax.f32 %v10823_v29, 0.0  ;;  %v10954_v16 = vadd.f32 %v10953_v51, %v10886_v63  ;;  %v10824_v61 = vadd.f32 %v12905_v44, %v16026_v5  ;;  %v10932_v44 = vrot.slane %v10931_v52, 2 }
 0x573   :  { %v10890_v43 = vmax.f32 %v10826_v60, 0.0 }
 0x574   :  { %v10955_v49 = vadd.f32 %v10954_v16, %v10887_v6  ;;  %v10888_v40 = vmax.f32 %v10824_v61, 0.0  ;;  %v12828_v7 = vpop.f32.mrb[52].mxu1  ;;  %v10933_v16 = vadd.f32 %v10932_v44, %v10931_v52 }
 0x575   :  { %v12906_v32 = vadd.f32 %v12828_v7, %v16222_v33  ;;  %v10669_v45 = vpop.f32.mrb[53].mxu1 }
 0x576   :  { %v10956_v58 = vadd.f32 %v10955_v49, %v10888_v40  ;;  %v12907_v26 = vadd.f32 %v10669_v45, %v16223_v62  ;;  %v12829_v56 = vpop.f32.mrb[54].mxu1  ;;  %v10934_v49 = vrot.slane %v10933_v16, 1 }
 0x577   :  { %v12908_v27 = vadd.f32 %v12829_v56, %v16224_v14  ;;  %v10672_v39 = vpop.f32.mrb[55].mxu1  ;;  %v10829_v13 = vadd.f32 %v12906_v32, %v16026_v5 }
 0x578   :  { %v10957_v1 = vadd.f32 %v10956_v58, %v10889_v4  ;;  %v10827_v57 = vadd.f32 %v12907_v26, %v16026_v5  ;;  %v12909_v37 = vadd.f32 %v10672_v39, %v16225_v9  ;;  %v10935_v7 = vadd.f32 %v10934_v49, %v10933_v16 }
 0x579   :  { %v10830_v20 = vadd.f32 %v12908_v27, %v16026_v5  ;;  %v10893_v3 = vmax.f32 %v10829_v13, 0.0 }
 0x57a   :  { %v10891_v50 = vmax.f32 %v10827_v57, 0.0  ;;  %v10958_v42 = vadd.f32 %v10957_v1, %v10890_v43  ;;  %v10828_v17 = vadd.f32 %v12909_v37, %v16026_v5 }
 0x57b   :  { %v10894_v15 = vmax.f32 %v10830_v20, 0.0 }
 0x57c   :  { %v10959_v53 = vadd.f32 %v10958_v42, %v10891_v50  ;;  %v10892_v10 = vmax.f32 %v10828_v17, 0.0  ;;  %v12832_v54 = vpop.f32.mrb[56].mxu1 }
 0x57d   :  { %v12910_v0 = vadd.f32 %v12832_v54, %v16226_v34  ;;  %v10685_v59 = vpop.f32.mrb[57].mxu1 }
 0x57e   :  { %v10960_v22 = vadd.f32 %v10959_v53, %v10892_v10  ;;  %v12911_v25 = vadd.f32 %v10685_v59, %v16227_v2  ;;  %v12833_v11 = vpop.f32.mrb[58].mxu1 }
 0x57f   :  { %v12912_v38 = vadd.f32 %v12833_v11, %v16228_v8  ;;  %v10688_v48 = vpop.f32.mrb[59].mxu1  ;;  %v10833_v35 = vadd.f32 %v12910_v0, %v16026_v5 }
 0x580   :  { %v10961_v18 = vadd.f32 %v10960_v22, %v10893_v3  ;;  %v10831_v46 = vadd.f32 %v12911_v25, %v16026_v5  ;;  %v12913_v23 = vadd.f32 %v10688_v48, %v16229_v19 }
 0x581   :  { %v10834_v21 = vadd.f32 %v12912_v38, %v16026_v5  ;;  %v10897_v63 = vmax.f32 %v10833_v35, 0.0 }
 0x582   :  { %v10895_v30 = vmax.f32 %v10831_v46, 0.0  ;;  %v10962_v36 = vadd.f32 %v10961_v18, %v10894_v15  ;;  %v10832_v47 = vadd.f32 %v12913_v23, %v16026_v5  ;;  %v10973_v5 = vmul.f32 0.00390625, %v10935_v7 }
 0x583   :  { %v10898_v29 = vmax.f32 %v10834_v21, 0.0 }
 0x584   :  { %v10963_v31 = vadd.f32 %v10962_v36, %v10895_v30  ;;  %v10896_v28 = vmax.f32 %v10832_v47, 0.0 }
 0x586   :  { %v10964_v51 = vadd.f32 %v10963_v31, %v10896_v28 }
 0x588   :  { %v10965_v24 = vadd.f32 %v10964_v51, %v10897_v63 }
 0x58a   :  { %v10966_v55 = vadd.f32 %v10965_v24, %v10898_v29 }
 0x58c   :  { %v10967_v6 = vrot.slane %v10966_v55, 4 }
 0x58e   :  { %v10968_v61 = vadd.f32 %v10967_v6, %v10966_v55 }
 0x590   :  { %v10969_v60 = vrot.slane %v10968_v61, 2 }
 0x592   :  { %v10970_v40 = vadd.f32 %v10969_v60, %v10968_v61 }
 0x594   :  { %v10971_v33 = vrot.slane %v10970_v40, 1 }
 0x596   :  { %v10972_v32 = vadd.f32 %v10971_v33, %v10970_v40 }
 0x598   :  { %v10974_v41 = vmul.f32 0.00390625, %v10972_v32 }
 0x59a   :  { %v10978_v45 = vsel %vm10977_vm1, %v10974_v41, %v10973_v5 }
 0x59b   :  { %10980 = vst [vmem:[#allocation6] sm:$0x3] %v10978_v45 }
 0x59c   :  { %13809 = shalt.err (!%p13806_p12)
}
 0x59d   :  { %s13810_s8 = scalar_lea.hbm %s16173_s5, 32 }
 0x59e   :  { %p13811_p13 = scmp.ne.s32.totalorder %s16173_s5, %s13810_s8  ;;  %p13814_p0 = scmp.lt.u32.totalorder %s13810_s8, %s16173_s5 }
 0x5a0   :  { %p13816_p1 = pnand %p13814_p0, %p13811_p13 }
 0x5a2   :  { %13819 = shalt.err (!%p13816_p1)
}
 0x5a3   :  { %10990 = dma.vmem_to_hbm [thread:$0]  %s10988_s29, 32, %s16173_s5, [#allocation5]  }
 0x5a4   :  { %13822 = dma.done.wait [#allocation5], 32  }
 0x5a5   :  { %13823 = vsyncadd [#allocation5], 4294967264 }
 0x5a6   :  { %10994 = vsyncpa [#allocation4], 1 }
 0x5a7   :  { %10995 = vsyncpa [#allocation5], 1 }

</bundles_post_ra>
